<compile_context>
chip_gen: v6e
topology: v6e:2x2x1
jax: 0.10.0
libtpu: 0.0.40
codegen_flags: <defaults>
</compile_context>

<pallas_src>
import functools
import math

import jax
import jax.numpy as jnp
from jax import lax
from jax.experimental import pallas as pl
from jax.experimental.pallas import tpu as pltpu

# ----------------------------- configuration -------------------------------
HIDDEN = 32          # transformer.d_model
NHEAD = 4
DH = HIDDEN // NHEAD
DIM_FF = 64
NUM_ENC = 1
NUM_DEC = 2
BACKBONE_CH = 8      # backbone.num_channels
STRIDE = 4           # backbone spatial downsampling
HALF_W = 16          # scaled-down analogue of the hard-coded 256-pixel split


# --------------------------- in-kernel helpers ------------------------------
def _mm(a, b):
    """Matmul with bf16 operands and f32 accumulation (MXU)."""
    return jnp.dot(a.astype(jnp.bfloat16), b.astype(jnp.bfloat16),
                   preferred_element_type=jnp.float32)


def _ln(x, g, b):
    """LayerNorm over the last dim (PyTorch eps=1e-5); g,b are (1, D)."""
    mu = jnp.mean(x, axis=-1, keepdims=True)
    var = jnp.mean((x - mu) ** 2, axis=-1, keepdims=True)
    return (x - mu) * lax.rsqrt(var + 1e-5) * g + b


def _mha_core(q, k, v, wo, bo):
    """All heads of softmax attention + output projection, fully VMEM-resident.

    q:(Lq,D), k,v:(Lk,D), wo:(D,D), bo:(1,D).  Heads run in a static python loop;
    the output projection is folded per head (concat(o_h) @ Wo == sum_h o_h @
    Wo[h*Dh:(h+1)*Dh]) so no in-kernel concatenate is needed.
    """
    scale = 1.0 / math.sqrt(DH)
    acc = None
    for h in range(NHEAD):
        sl = slice(h * DH, (h + 1) * DH)
        qh, kh, vh = q[:, sl], k[:, sl], v[:, sl]
        s = jnp.dot(qh, kh.T, preferred_element_type=jnp.float32) * scale
        s = s - jnp.max(s, axis=-1, keepdims=True)
        p = jnp.exp(s)
        p = p * pl.reciprocal(jnp.sum(p, axis=-1, keepdims=True), approx=True)
        oh = jnp.dot(p, vh, preferred_element_type=jnp.float32)
        contrib = _mm(oh, wo[sl, :])
        acc = contrib if acc is None else acc + contrib
    return acc + bo


# ------------------------------ Pallas kernel -------------------------------
def _cotr_kernel(*refs):
    """Whole COTR forward for one batch element (grid axis = batch)."""
    (x_ref, pos_ref, qe_ref,
     bw_ref, bb_ref, pw_ref, pb_ref,
     e_wqk, e_bqk, e_wv, e_bv, e_wo, e_bo,
     e_fw1, e_fb1, e_fw2, e_fb2,
     e_n1g, e_n1b, e_n2g, e_n2b,
     d_sa_wqk, d_sa_bqk, d_sa_wv, d_sa_bv, d_sa_wo, d_sa_bo,
     d_ca_wq, d_ca_bq, d_ca_wk, d_ca_bk, d_ca_wv, d_ca_bv, d_ca_wo, d_ca_bo,
     d_fw1, d_fb1, d_fw2, d_fb2,
     d_n1g, d_n1b, d_n2g, d_n2b, d_n3g, d_n3b,
     dng_ref, dnb_ref,
     cw0, cb0, cw1, cb1, cw2, cb2,
     corr_ref) = refs

    x = x_ref[0]            # (S, 3)   pooled patch pixels (query | key token order)
    pos = pos_ref[0]        # (S, D)   sine position embedding
    qe = qe_ref[0]          # (Q, D)   NeRF-encoded query embedding

    # ---- fused stem: backbone 1x1 conv (3->8) + ReLU + input_proj (8->D) ----
    h = jnp.dot(x, bw_ref[...], preferred_element_type=jnp.float32) + bb_ref[...]
    h = jnp.maximum(h, 0.0)
    mem = jnp.dot(h, pw_ref[...], preferred_element_type=jnp.float32) + pb_ref[...]

    # ---------------------------- encoder layers ----------------------------
    for l in range(NUM_ENC):
        xp = mem + pos
        qk = _mm(xp, e_wqk[l]) + e_bqk[l]            # fused Q/K projection
        q, k = qk[:, :HIDDEN], qk[:, HIDDEN:]
        v = _mm(mem, e_wv[l]) + e_bv[l]
        a = _mha_core(q, k, v, e_wo[l], e_bo[l])
        mem = _ln(mem + a, e_n1g[l], e_n1b[l])
        f = _mm(jnp.maximum(_mm(mem, e_fw1[l]) + e_fb1[l], 0.0), e_fw2[l]) + e_fb2[l]
        mem = _ln(mem + f, e_n2g[l], e_n2b[l])

    mem_pos = mem + pos                               # hoisted out of decoder loop
    dng = dng_ref[...]
    dnb = dnb_ref[...]

    # ------------- decoder layers with intermediate corr-MLP head -----------
    t = jnp.zeros_like(qe)                            # DETR: tgt = zeros
    for l in range(NUM_DEC):
        # self attention (q = k = tgt + query_pos, v = tgt), fused QK projection
        tq = t + qe
        qk = _mm(tq, d_sa_wqk[l]) + d_sa_bqk[l]
        q, k = qk[:, :HIDDEN], qk[:, HIDDEN:]
        v = _mm(t, d_sa_wv[l]) + d_sa_bv[l]
        a = _mha_core(q, k, v, d_sa_wo[l], d_sa_bo[l])
        t = _ln(t + a, d_n1g[l], d_n1b[l])

        # cross attention (q = tgt + query_pos, k = memory + pos, v = memory)
        q = _mm(t + qe, d_ca_wq[l]) + d_ca_bq[l]
        k = _mm(mem_pos, d_ca_wk[l]) + d_ca_bk[l]
        v = _mm(mem, d_ca_wv[l]) + d_ca_bv[l]
        a = _mha_core(q, k, v, d_ca_wo[l], d_ca_bo[l])
        t = _ln(t + a, d_n2g[l], d_n2b[l])

        # FFN
        f = _mm(jnp.maximum(_mm(t, d_fw1[l]) + d_fb1[l], 0.0), d_fw2[l]) + d_fb2[l]
        t = _ln(t + f, d_n3g[l], d_n3b[l])

        # shared decoder norm + corr-embed MLP head on this intermediate output
        hn = _ln(t, dng, dnb)
        c = jnp.maximum(_mm(hn, cw0[...]) + cb0[...], 0.0)
        c = jnp.maximum(_mm(c, cw1[...]) + cb1[...], 0.0)
        c = jnp.dot(c, cw2[...], preferred_element_type=jnp.float32) + cb2[...]
        corr_ref[l, 0] = c


# --------------------------- pallas_call wrapper -----------------------------
_ENC_KEYS = ("wqk", "bqk", "wv", "bv", "wo", "bo",
             "fw1", "fb1", "fw2", "fb2",
             "n1g", "n1b", "n2g", "n2b")

_DEC_KEYS = ("sa_wqk", "sa_bqk", "sa_wv", "sa_bv", "sa_wo", "sa_bo",
             "ca_wq", "ca_bq", "ca_wk", "ca_bk", "ca_wv", "ca_bv", "ca_wo", "ca_bo",
             "fw1", "fb1", "fw2", "fb2",
             "n1g", "n1b", "n2g", "n2b", "n3g", "n3b")


def cotr_fused(params, x_cat, pos_cat, qenc):
    """Single pallas_call for the whole network, gridded over batch."""
    B, S, _ = x_cat.shape
    Q = qenc.shape[1]
    tp = params["transformer"]
    weights = ([params["backbone"]["w"], params["backbone"]["b"],
                params["input_proj"]["w"], params["input_proj"]["b"]]
               + [tp["enc"][k] for k in _ENC_KEYS]
               + [tp["dec"][k] for k in _DEC_KEYS]
               + [tp["dec_norm_g"], tp["dec_norm_b"]]
               + [params["corr"][k] for k in ("w0", "b0", "w1", "b1", "w2", "b2")])

    data_specs = [
        pl.BlockSpec((1, S, 3), lambda b: (b, 0, 0)),
        pl.BlockSpec((1, S, HIDDEN), lambda b: (b, 0, 0)),
        pl.BlockSpec((1, Q, HIDDEN), lambda b: (b, 0, 0)),
    ]
    # every weight / bias / norm param: whole-array block, fetched once per grid step
    w_specs = [pl.BlockSpec(w.shape, lambda b, nd=w.ndim: (0,) * nd) for w in weights]

    return pl.pallas_call(
        _cotr_kernel,
        out_shape=jax.ShapeDtypeStruct((NUM_DEC, B, Q, 2), jnp.float32),
        grid=(B,),
        in_specs=data_specs + w_specs,
        out_specs=pl.BlockSpec((NUM_DEC, 1, Q, 2), lambda b: (0, b, 0, 0)),
        compiler_params=pltpu.CompilerParams(dimension_semantics=("parallel",)),
    )(x_cat, pos_cat, qenc, *weights)


# ------------------------------- JAX glue ------------------------------------
def pos_embed_sine(mask, num_pos_feats, temperature=10000.0):
    """DETR-style sine position embedding, NHWC output (B, H, W, 2*num_pos_feats)."""
    not_mask = jnp.logical_not(mask).astype(jnp.float32)      # (B,H,W)
    y_embed = jnp.cumsum(not_mask, axis=1)
    x_embed = jnp.cumsum(not_mask, axis=2)
    eps = 1e-6
    scale = 2.0 * math.pi
    y_embed = y_embed / (y_embed[:, -1:, :] + eps) * scale
    x_embed = x_embed / (x_embed[:, :, -1:] + eps) * scale
    dim_t = jnp.arange(num_pos_feats, dtype=jnp.float32)
    dim_t = temperature ** (2.0 * jnp.floor(dim_t / 2.0) / num_pos_feats)
    B, H, W = mask.shape
    px = x_embed[..., None] / dim_t
    py = y_embed[..., None] / dim_t
    px = jnp.stack([jnp.sin(px[..., 0::2]), jnp.cos(px[..., 1::2])], axis=4).reshape(B, H, W, -1)
    py = jnp.stack([jnp.sin(py[..., 0::2]), jnp.cos(py[..., 1::2])], axis=4).reshape(B, H, W, -1)
    return jnp.concatenate([py, px], axis=3)


def nerf_pos_encoding(x, depth):
    """NerfPositionalEncoding, 'lin_sine': bases = 1..depth. x:(N,2) -> (N,4*depth)."""
    bases = jnp.arange(1, depth + 1, dtype=jnp.float32)
    ang = x[:, None, :] * (bases[None, :, None] * math.pi)     # (N, depth, 2)
    n = x.shape[0]
    return jnp.concatenate([jnp.sin(ang).reshape(n, -1), jnp.cos(ang).reshape(n, -1)], axis=-1)


# ------------------------------- COTR forward -------------------------------
def cotr_forward(params, images, masks, queries, mode="normal"):
    """images: (B,3,H,2*HALF_W) NCHW; masks: (B,H,2*HALF_W) bool; queries: (B,Q,2)."""
    B, _, H, _ = images.shape
    Hf, Wf = H // STRIDE, HALF_W // STRIDE

    # NCHW -> NHWC once (kept NHWC throughout), then split into query / key halves.
    img = images.transpose(0, 2, 3, 1)
    q_img, k_img = img[:, :, :HALF_W, :], img[:, :, HALF_W:, :]
    q_mask, k_mask = masks[:, :, :HALF_W], masks[:, :, HALF_W:]

    def patch_avg(x):   # synthetic strided backbone pooling, NHWC
        return x.reshape(B, Hf, STRIDE, Wf, STRIDE, 3).mean(axis=(2, 4))

    q_pix, k_pix = patch_avg(q_img), patch_avg(k_img)          # (B,Hf,Wf,3)
    q_pos = pos_embed_sine(q_mask[:, ::STRIDE, ::STRIDE], HIDDEN // 2)
    k_pos = pos_embed_sine(k_mask[:, ::STRIDE, ::STRIDE], HIDDEN // 2)

    # NeRF positional encoding of the query points -> decoder query embedding
    _, Q, _ = queries.shape
    qenc = nerf_pos_encoding(queries.reshape(-1, 2), HIDDEN // 4).reshape(B, Q, HIDDEN)

    if mode == "normal":
        pix_a, pix_b, pos_a, pos_b = q_pix, k_pix, q_pos, k_pos
    else:
        pix_a, pix_b, pos_a, pos_b = k_pix, q_pix, k_pos, q_pos
    # TODO(synk): key_padding_mask from the backbone is not applied inside attention
    #             (inputs are all-valid in this synthetic setup).

    # concat the two images along W (token order: b, h, [query cols | key cols]).
    # The stem is a per-token 1x1 conv, so it is applied *inside* the fused kernel
    # after this reordering (commutes with the reorder).
    x_cat = jnp.concatenate([pix_a, pix_b], axis=2).reshape(B, -1, 3)        # (B,S,3)
    pos_cat = jnp.concatenate([pos_a, pos_b], axis=2).reshape(B, -1, HIDDEN)  # (B,S,D)

    corrs = cotr_fused(params, x_cat, pos_cat, qenc)            # (num_dec, B, Q, 2)
    return {"pred_corrs": corrs}


# --------------------------- deterministic params ----------------------------
def init_params(key):
    keys = iter(jax.random.split(key, 512))

    def w(din, dout):
        lim = math.sqrt(6.0 / (din + dout))
        return jax.random.uniform(next(keys), (din, dout), jnp.float32, -lim, lim)

    def zeros(*shape):
        return jnp.zeros(shape, jnp.float32)

    def ones(*shape):
        return jnp.ones(shape, jnp.float32)

    def enc_layer():
        return dict(
            wqk=jnp.concatenate([w(HIDDEN, HIDDEN), w(HIDDEN, HIDDEN)], axis=1),
            bqk=zeros(1, 2 * HIDDEN),
            wv=w(HIDDEN, HIDDEN), bv=zeros(1, HIDDEN),
            wo=w(HIDDEN, HIDDEN), bo=zeros(1, HIDDEN),
            fw1=w(HIDDEN, DIM_FF), fb1=zeros(1, DIM_FF),
            fw2=w(DIM_FF, HIDDEN), fb2=zeros(1, HIDDEN),
            n1g=ones(1, HIDDEN), n1b=zeros(1, HIDDEN),
            n2g=ones(1, HIDDEN), n2b=zeros(1, HIDDEN),
        )

    def dec_layer():
        return dict(
            sa_wqk=jnp.concatenate([w(HIDDEN, HIDDEN), w(HIDDEN, HIDDEN)], axis=1),
            sa_bqk=zeros(1, 2 * HIDDEN),
            sa_wv=w(HIDDEN, HIDDEN), sa_bv=zeros(1, HIDDEN),
            sa_wo=w(HIDDEN, HIDDEN), sa_bo=zeros(1, HIDDEN),
            ca_wq=w(HIDDEN, HIDDEN), ca_bq=zeros(1, HIDDEN),
            ca_wk=w(HIDDEN, HIDDEN), ca_bk=zeros(1, HIDDEN),
            ca_wv=w(HIDDEN, HIDDEN), ca_bv=zeros(1, HIDDEN),
            ca_wo=w(HIDDEN, HIDDEN), ca_bo=zeros(1, HIDDEN),
            fw1=w(HIDDEN, DIM_FF), fb1=zeros(1, DIM_FF),
            fw2=w(DIM_FF, HIDDEN), fb2=zeros(1, HIDDEN),
            n1g=ones(1, HIDDEN), n1b=zeros(1, HIDDEN),
            n2g=ones(1, HIDDEN), n2b=zeros(1, HIDDEN),
            n3g=ones(1, HIDDEN), n3b=zeros(1, HIDDEN),
        )

    def stack(layers):  # stack per-layer params on a leading layer axis
        return {k: jnp.stack([lp[k] for lp in layers], axis=0) for k in layers[0]}

    return dict(
        backbone=dict(w=w(3, BACKBONE_CH), b=zeros(1, BACKBONE_CH)),
        input_proj=dict(w=w(BACKBONE_CH, HIDDEN), b=zeros(1, HIDDEN)),
        transformer=dict(
            enc=stack([enc_layer() for _ in range(NUM_ENC)]),
            dec=stack([dec_layer() for _ in range(NUM_DEC)]),
            dec_norm_g=ones(1, HIDDEN),
            dec_norm_b=zeros(1, HIDDEN),
        ),
        corr=dict(w0=w(HIDDEN, HIDDEN), b0=zeros(1, HIDDEN),
                  w1=w(HIDDEN, HIDDEN), b1=zeros(1, HIDDEN),
                  w2=w(HIDDEN, 2), b2=zeros(1, 2)),
    )


# ------------------------------------ main -----------------------------------
if __name__ == "__main__":
    key = jax.random.PRNGKey(0)
    kp, ki, kq = jax.random.split(key, 3)
    params = init_params(kp)

    B, Q, H = 2, 8, 16
    images = jax.random.normal(ki, (B, 3, H, 2 * HALF_W), jnp.float32)   # two images side-by-side
    masks = jnp.zeros((B, H, 2 * HALF_W), dtype=jnp.bool_)               # all-valid padding mask
    queries = jax.random.uniform(kq, (B, Q, 2), jnp.float32)

    fwd = jax.jit(functools.partial(cotr_forward, mode="normal"))
    out = fwd(params, images, masks, queries)
    jax.block_until_ready(out)

    assert out["pred_corrs"].shape == (NUM_DEC, B, Q, 2)
    assert bool(jnp.all(jnp.isfinite(out["pred_corrs"])))
    print("KERNEL_OK")
</pallas_src>

<mosaic_0001>
module attributes {stable_mosaic.version = 11 : i64} {
  func.func @_cotr_kernel(%arg0: i32, %arg1: memref<1x32x3xf32, #tpu.memory_space<vmem>>, %arg2: memref<1x32x32xf32, #tpu.memory_space<vmem>>, %arg3: memref<1x8x32xf32, #tpu.memory_space<vmem>>, %arg4: memref<3x8xf32, #tpu.memory_space<vmem>>, %arg5: memref<1x8xf32, #tpu.memory_space<vmem>>, %arg6: memref<8x32xf32, #tpu.memory_space<vmem>>, %arg7: memref<1x32xf32, #tpu.memory_space<vmem>>, %arg8: memref<1x32x64xf32, #tpu.memory_space<vmem>>, %arg9: memref<1x1x64xf32, #tpu.memory_space<vmem>>, %arg10: memref<1x32x32xf32, #tpu.memory_space<vmem>>, %arg11: memref<1x1x32xf32, #tpu.memory_space<vmem>>, %arg12: memref<1x32x32xf32, #tpu.memory_space<vmem>>, %arg13: memref<1x1x32xf32, #tpu.memory_space<vmem>>, %arg14: memref<1x32x64xf32, #tpu.memory_space<vmem>>, %arg15: memref<1x1x64xf32, #tpu.memory_space<vmem>>, %arg16: memref<1x64x32xf32, #tpu.memory_space<vmem>>, %arg17: memref<1x1x32xf32, #tpu.memory_space<vmem>>, %arg18: memref<1x1x32xf32, #tpu.memory_space<vmem>>, %arg19: memref<1x1x32xf32, #tpu.memory_space<vmem>>, %arg20: memref<1x1x32xf32, #tpu.memory_space<vmem>>, %arg21: memref<1x1x32xf32, #tpu.memory_space<vmem>>, %arg22: memref<2x32x64xf32, #tpu.memory_space<vmem>>, %arg23: memref<2x1x64xf32, #tpu.memory_space<vmem>>, %arg24: memref<2x32x32xf32, #tpu.memory_space<vmem>>, %arg25: memref<2x1x32xf32, #tpu.memory_space<vmem>>, %arg26: memref<2x32x32xf32, #tpu.memory_space<vmem>>, %arg27: memref<2x1x32xf32, #tpu.memory_space<vmem>>, %arg28: memref<2x32x32xf32, #tpu.memory_space<vmem>>, %arg29: memref<2x1x32xf32, #tpu.memory_space<vmem>>, %arg30: memref<2x32x32xf32, #tpu.memory_space<vmem>>, %arg31: memref<2x1x32xf32, #tpu.memory_space<vmem>>, %arg32: memref<2x32x32xf32, #tpu.memory_space<vmem>>, %arg33: memref<2x1x32xf32, #tpu.memory_space<vmem>>, %arg34: memref<2x32x32xf32, #tpu.memory_space<vmem>>, %arg35: memref<2x1x32xf32, #tpu.memory_space<vmem>>, %arg36: memref<2x32x64xf32, #tpu.memory_space<vmem>>, %arg37: memref<2x1x64xf32, #tpu.memory_space<vmem>>, %arg38: memref<2x64x32xf32, #tpu.memory_space<vmem>>, %arg39: memref<2x1x32xf32, #tpu.memory_space<vmem>>, %arg40: memref<2x1x32xf32, #tpu.memory_space<vmem>>, %arg41: memref<2x1x32xf32, #tpu.memory_space<vmem>>, %arg42: memref<2x1x32xf32, #tpu.memory_space<vmem>>, %arg43: memref<2x1x32xf32, #tpu.memory_space<vmem>>, %arg44: memref<2x1x32xf32, #tpu.memory_space<vmem>>, %arg45: memref<2x1x32xf32, #tpu.memory_space<vmem>>, %arg46: memref<1x32xf32, #tpu.memory_space<vmem>>, %arg47: memref<1x32xf32, #tpu.memory_space<vmem>>, %arg48: memref<32x32xf32, #tpu.memory_space<vmem>>, %arg49: memref<1x32xf32, #tpu.memory_space<vmem>>, %arg50: memref<32x32xf32, #tpu.memory_space<vmem>>, %arg51: memref<1x32xf32, #tpu.memory_space<vmem>>, %arg52: memref<32x2xf32, #tpu.memory_space<vmem>>, %arg53: memref<1x2xf32, #tpu.memory_space<vmem>>, %arg54: memref<2x1x8x2xf32, #tpu.memory_space<vmem>>) attributes {dimension_semantics = [#tpu.dimension_semantics<parallel>], iteration_bounds = array<i64: 2>, scalar_prefetch = 0 : i64, scratch_operands = 0 : i64, tpu.core_type = #tpu.core_type<tc>, window_params = [{transform_indices = @transform_0, window_bounds = array<i64: 1, 32, 3>}, {transform_indices = @transform_1, window_bounds = array<i64: 1, 32, 32>}, {transform_indices = @transform_2, window_bounds = array<i64: 1, 8, 32>}, {pipeline_mode = #tpu.pipeline_mode<synchronous>, transform_indices = @transform_3, window_bounds = array<i64: 3, 8>}, {pipeline_mode = #tpu.pipeline_mode<synchronous>, transform_indices = @transform_4, window_bounds = array<i64: 1, 8>}, {pipeline_mode = #tpu.pipeline_mode<synchronous>, transform_indices = @transform_5, window_bounds = array<i64: 8, 32>}, {pipeline_mode = #tpu.pipeline_mode<synchronous>, transform_indices = @transform_6, window_bounds = array<i64: 1, 32>}, {pipeline_mode = #tpu.pipeline_mode<synchronous>, transform_indices = @transform_7, window_bounds = array<i64: 1, 32, 64>}, {pipeline_mode = #tpu.pipeline_mode<synchronous>, transform_indices = @transform_8, window_bounds = array<i64: 1, 1, 64>}, {pipeline_mode = #tpu.pipeline_mode<synchronous>, transform_indices = @transform_9, window_bounds = array<i64: 1, 32, 32>}, {pipeline_mode = #tpu.pipeline_mode<synchronous>, transform_indices = @transform_10, window_bounds = array<i64: 1, 1, 32>}, {pipeline_mode = #tpu.pipeline_mode<synchronous>, transform_indices = @transform_11, window_bounds = array<i64: 1, 32, 32>}, {pipeline_mode = #tpu.pipeline_mode<synchronous>, transform_indices = @transform_12, window_bounds = array<i64: 1, 1, 32>}, {pipeline_mode = #tpu.pipeline_mode<synchronous>, transform_indices = @transform_13, window_bounds = array<i64: 1, 32, 64>}, {pipeline_mode = #tpu.pipeline_mode<synchronous>, transform_indices = @transform_14, window_bounds = array<i64: 1, 1, 64>}, {pipeline_mode = #tpu.pipeline_mode<synchronous>, transform_indices = @transform_15, window_bounds = array<i64: 1, 64, 32>}, {pipeline_mode = #tpu.pipeline_mode<synchronous>, transform_indices = @transform_16, window_bounds = array<i64: 1, 1, 32>}, {pipeline_mode = #tpu.pipeline_mode<synchronous>, transform_indices = @transform_17, window_bounds = array<i64: 1, 1, 32>}, {pipeline_mode = #tpu.pipeline_mode<synchronous>, transform_indices = @transform_18, window_bounds = array<i64: 1, 1, 32>}, {pipeline_mode = #tpu.pipeline_mode<synchronous>, transform_indices = @transform_19, window_bounds = array<i64: 1, 1, 32>}, {pipeline_mode = #tpu.pipeline_mode<synchronous>, transform_indices = @transform_20, window_bounds = array<i64: 1, 1, 32>}, {pipeline_mode = #tpu.pipeline_mode<synchronous>, transform_indices = @transform_21, window_bounds = array<i64: 2, 32, 64>}, {pipeline_mode = #tpu.pipeline_mode<synchronous>, transform_indices = @transform_22, window_bounds = array<i64: 2, 1, 64>}, {pipeline_mode = #tpu.pipeline_mode<synchronous>, transform_indices = @transform_23, window_bounds = array<i64: 2, 32, 32>}, {pipeline_mode = #tpu.pipeline_mode<synchronous>, transform_indices = @transform_24, window_bounds = array<i64: 2, 1, 32>}, {pipeline_mode = #tpu.pipeline_mode<synchronous>, transform_indices = @transform_25, window_bounds = array<i64: 2, 32, 32>}, {pipeline_mode = #tpu.pipeline_mode<synchronous>, transform_indices = @transform_26, window_bounds = array<i64: 2, 1, 32>}, {pipeline_mode = #tpu.pipeline_mode<synchronous>, transform_indices = @transform_27, window_bounds = array<i64: 2, 32, 32>}, {pipeline_mode = #tpu.pipeline_mode<synchronous>, transform_indices = @transform_28, window_bounds = array<i64: 2, 1, 32>}, {pipeline_mode = #tpu.pipeline_mode<synchronous>, transform_indices = @transform_29, window_bounds = array<i64: 2, 32, 32>}, {pipeline_mode = #tpu.pipeline_mode<synchronous>, transform_indices = @transform_30, window_bounds = array<i64: 2, 1, 32>}, {pipeline_mode = #tpu.pipeline_mode<synchronous>, transform_indices = @transform_31, window_bounds = array<i64: 2, 32, 32>}, {pipeline_mode = #tpu.pipeline_mode<synchronous>, transform_indices = @transform_32, window_bounds = array<i64: 2, 1, 32>}, {pipeline_mode = #tpu.pipeline_mode<synchronous>, transform_indices = @transform_33, window_bounds = array<i64: 2, 32, 32>}, {pipeline_mode = #tpu.pipeline_mode<synchronous>, transform_indices = @transform_34, window_bounds = array<i64: 2, 1, 32>}, {pipeline_mode = #tpu.pipeline_mode<synchronous>, transform_indices = @transform_35, window_bounds = array<i64: 2, 32, 64>}, {pipeline_mode = #tpu.pipeline_mode<synchronous>, transform_indices = @transform_36, window_bounds = array<i64: 2, 1, 64>}, {pipeline_mode = #tpu.pipeline_mode<synchronous>, transform_indices = @transform_37, window_bounds = array<i64: 2, 64, 32>}, {pipeline_mode = #tpu.pipeline_mode<synchronous>, transform_indices = @transform_38, window_bounds = array<i64: 2, 1, 32>}, {pipeline_mode = #tpu.pipeline_mode<synchronous>, transform_indices = @transform_39, window_bounds = array<i64: 2, 1, 32>}, {pipeline_mode = #tpu.pipeline_mode<synchronous>, transform_indices = @transform_40, window_bounds = array<i64: 2, 1, 32>}, {pipeline_mode = #tpu.pipeline_mode<synchronous>, transform_indices = @transform_41, window_bounds = array<i64: 2, 1, 32>}, {pipeline_mode = #tpu.pipeline_mode<synchronous>, transform_indices = @transform_42, window_bounds = array<i64: 2, 1, 32>}, {pipeline_mode = #tpu.pipeline_mode<synchronous>, transform_indices = @transform_43, window_bounds = array<i64: 2, 1, 32>}, {pipeline_mode = #tpu.pipeline_mode<synchronous>, transform_indices = @transform_44, window_bounds = array<i64: 2, 1, 32>}, {pipeline_mode = #tpu.pipeline_mode<synchronous>, transform_indices = @transform_45, window_bounds = array<i64: 1, 32>}, {pipeline_mode = #tpu.pipeline_mode<synchronous>, transform_indices = @transform_46, window_bounds = array<i64: 1, 32>}, {pipeline_mode = #tpu.pipeline_mode<synchronous>, transform_indices = @transform_47, window_bounds = array<i64: 32, 32>}, {pipeline_mode = #tpu.pipeline_mode<synchronous>, transform_indices = @transform_48, window_bounds = array<i64: 1, 32>}, {pipeline_mode = #tpu.pipeline_mode<synchronous>, transform_indices = @transform_49, window_bounds = array<i64: 32, 32>}, {pipeline_mode = #tpu.pipeline_mode<synchronous>, transform_indices = @transform_50, window_bounds = array<i64: 1, 32>}, {pipeline_mode = #tpu.pipeline_mode<synchronous>, transform_indices = @transform_51, window_bounds = array<i64: 32, 2>}, {pipeline_mode = #tpu.pipeline_mode<synchronous>, transform_indices = @transform_52, window_bounds = array<i64: 1, 2>}, {transform_indices = @transform_53, window_bounds = array<i64: 2, 1, 8, 2>}]} {
    %c0 = arith.constant 0 : index
    %c0_0 = arith.constant 0 : index
    %c0_1 = arith.constant 0 : index
    %0 = vector.load %arg1[%c0, %c0_0, %c0_1] : memref<1x32x3xf32, #tpu.memory_space<vmem>>, vector<1x32x3xf32>
    %1 = vector.shape_cast %0 : vector<1x32x3xf32> to vector<32x3xf32>
    %c0_2 = arith.constant 0 : index
    %c0_3 = arith.constant 0 : index
    %c0_4 = arith.constant 0 : index
    %2 = vector.load %arg2[%c0_2, %c0_3, %c0_4] : memref<1x32x32xf32, #tpu.memory_space<vmem>>, vector<1x32x32xf32>
    %3 = vector.shape_cast %2 : vector<1x32x32xf32> to vector<32x32xf32>
    %c0_5 = arith.constant 0 : index
    %c0_6 = arith.constant 0 : index
    %c0_7 = arith.constant 0 : index
    %4 = vector.load %arg3[%c0_5, %c0_6, %c0_7] : memref<1x8x32xf32, #tpu.memory_space<vmem>>, vector<1x8x32xf32>
    %5 = vector.shape_cast %4 : vector<1x8x32xf32> to vector<8x32xf32>
    %c0_8 = arith.constant 0 : index
    %c0_9 = arith.constant 0 : index
    %6 = vector.load %arg4[%c0_8, %c0_9] : memref<3x8xf32, #tpu.memory_space<vmem>>, vector<3x8xf32>
    %cst = arith.constant dense<0.000000e+00> : vector<32x8xf32>
    %7 = tpu.matmul %1, %6, %cst {dimension_numbers = #tpu.dot_dimension_numbers<[1], [0], [0], [1], [0, 0, 1, 1], [], []>} : vector<32x3xf32>, vector<3x8xf32>, vector<32x8xf32> -> vector<32x8xf32>
    %c0_10 = arith.constant 0 : index
    %c0_11 = arith.constant 0 : index
    %8 = vector.load %arg5[%c0_10, %c0_11] : memref<1x8xf32, #tpu.memory_space<vmem>>, vector<1x8xf32>
    %9 = vector.broadcast %8 : vector<1x8xf32> to vector<32x8xf32>
    %10 = arith.addf %7, %9 : vector<32x8xf32>
    %cst_12 = arith.constant 0.000000e+00 : f32
    %11 = vector.broadcast %cst_12 : f32 to vector<32x8xf32>
    %12 = arith.maximumf %10, %11 : vector<32x8xf32>
    %c0_13 = arith.constant 0 : index
    %c0_14 = arith.constant 0 : index
    %13 = vector.load %arg6[%c0_13, %c0_14] : memref<8x32xf32, #tpu.memory_space<vmem>>, vector<8x32xf32>
    %cst_15 = arith.constant dense<0.000000e+00> : vector<32x32xf32>
    %14 = tpu.matmul %12, %13, %cst_15 {dimension_numbers = #tpu.dot_dimension_numbers<[1], [0], [0], [1], [0, 0, 1, 1], [], []>} : vector<32x8xf32>, vector<8x32xf32>, vector<32x32xf32> -> vector<32x32xf32>
    %c0_16 = arith.constant 0 : index
    %c0_17 = arith.constant 0 : index
    %15 = vector.load %arg7[%c0_16, %c0_17] : memref<1x32xf32, #tpu.memory_space<vmem>>, vector<1x32xf32>
    %16 = vector.broadcast %15 : vector<1x32xf32> to vector<32x32xf32>
    %17 = arith.addf %14, %16 : vector<32x32xf32>
    %18 = arith.addf %17, %3 : vector<32x32xf32>
    %c0_18 = arith.constant 0 : index
    %c0_19 = arith.constant 0 : index
    %c0_20 = arith.constant 0 : index
    %19 = vector.load %arg8[%c0_18, %c0_19, %c0_20] : memref<1x32x64xf32, #tpu.memory_space<vmem>>, vector<1x32x64xf32>
    %20 = vector.shape_cast %19 : vector<1x32x64xf32> to vector<32x64xf32>
    %21 = arith.truncf %18 : vector<32x32xf32> to vector<32x32xbf16>
    %22 = arith.truncf %20 : vector<32x64xf32> to vector<32x64xbf16>
    %cst_21 = arith.constant dense<0.000000e+00> : vector<32x64xf32>
    %23 = tpu.matmul %21, %22, %cst_21 {dimension_numbers = #tpu.dot_dimension_numbers<[1], [0], [0], [1], [0, 0, 1, 1], [], []>} : vector<32x32xbf16>, vector<32x64xbf16>, vector<32x64xf32> -> vector<32x64xf32>
    %c0_22 = arith.constant 0 : index
    %c0_23 = arith.constant 0 : index
    %c0_24 = arith.constant 0 : index
    %24 = vector.load %arg9[%c0_22, %c0_23, %c0_24] : memref<1x1x64xf32, #tpu.memory_space<vmem>>, vector<1x1x64xf32>
    %25 = vector.shape_cast %24 : vector<1x1x64xf32> to vector<1x64xf32>
    %26 = vector.broadcast %25 : vector<1x64xf32> to vector<32x64xf32>
    %27 = arith.addf %23, %26 : vector<32x64xf32>
    %28 = vector.extract_strided_slice %27 {offsets = [0, 0], sizes = [32, 32], strides = [1, 1]} : vector<32x64xf32> to vector<32x32xf32>
    %29 = vector.extract_strided_slice %27 {offsets = [0, 32], sizes = [32, 32], strides = [1, 1]} : vector<32x64xf32> to vector<32x32xf32>
    %c0_25 = arith.constant 0 : index
    %c0_26 = arith.constant 0 : index
    %c0_27 = arith.constant 0 : index
    %30 = vector.load %arg10[%c0_25, %c0_26, %c0_27] : memref<1x32x32xf32, #tpu.memory_space<vmem>>, vector<1x32x32xf32>
    %31 = vector.shape_cast %30 : vector<1x32x32xf32> to vector<32x32xf32>
    %32 = arith.truncf %17 : vector<32x32xf32> to vector<32x32xbf16>
    %33 = arith.truncf %31 : vector<32x32xf32> to vector<32x32xbf16>
    %cst_28 = arith.constant dense<0.000000e+00> : vector<32x32xf32>
    %34 = tpu.matmul %32, %33, %cst_28 {dimension_numbers = #tpu.dot_dimension_numbers<[1], [0], [0], [1], [0, 0, 1, 1], [], []>} : vector<32x32xbf16>, vector<32x32xbf16>, vector<32x32xf32> -> vector<32x32xf32>
    %c0_29 = arith.constant 0 : index
    %c0_30 = arith.constant 0 : index
    %c0_31 = arith.constant 0 : index
    %35 = vector.load %arg11[%c0_29, %c0_30, %c0_31] : memref<1x1x32xf32, #tpu.memory_space<vmem>>, vector<1x1x32xf32>
    %36 = vector.shape_cast %35 : vector<1x1x32xf32> to vector<1x32xf32>
    %37 = vector.broadcast %36 : vector<1x32xf32> to vector<32x32xf32>
    %38 = arith.addf %34, %37 : vector<32x32xf32>
    %c0_32 = arith.constant 0 : index
    %c0_33 = arith.constant 0 : index
    %c0_34 = arith.constant 0 : index
    %39 = vector.load %arg12[%c0_32, %c0_33, %c0_34] : memref<1x32x32xf32, #tpu.memory_space<vmem>>, vector<1x32x32xf32>
    %40 = vector.shape_cast %39 : vector<1x32x32xf32> to vector<32x32xf32>
    %c0_35 = arith.constant 0 : index
    %c0_36 = arith.constant 0 : index
    %c0_37 = arith.constant 0 : index
    %41 = vector.load %arg13[%c0_35, %c0_36, %c0_37] : memref<1x1x32xf32, #tpu.memory_space<vmem>>, vector<1x1x32xf32>
    %42 = vector.shape_cast %41 : vector<1x1x32xf32> to vector<1x32xf32>
    %43 = vector.extract_strided_slice %28 {offsets = [0, 0], sizes = [32, 8], strides = [1, 1]} : vector<32x32xf32> to vector<32x8xf32>
    %44 = vector.extract_strided_slice %29 {offsets = [0, 0], sizes = [32, 8], strides = [1, 1]} : vector<32x32xf32> to vector<32x8xf32>
    %45 = vector.extract_strided_slice %38 {offsets = [0, 0], sizes = [32, 8], strides = [1, 1]} : vector<32x32xf32> to vector<32x8xf32>
    %46 = tpu.transpose %44, [1, 0] : vector<32x8xf32> -> vector<8x32xf32>
    %cst_38 = arith.constant dense<0.000000e+00> : vector<32x32xf32>
    %47 = tpu.matmul %43, %46, %cst_38 {dimension_numbers = #tpu.dot_dimension_numbers<[1], [0], [0], [1], [0, 0, 1, 1], [], []>} : vector<32x8xf32>, vector<8x32xf32>, vector<32x32xf32> -> vector<32x32xf32>
    %cst_39 = arith.constant 0.353553385 : f32
    %48 = vector.broadcast %cst_39 : f32 to vector<32x32xf32>
    %49 = arith.mulf %47, %48 : vector<32x32xf32>
    %cst_40 = arith.constant dense<0xFF800000> : vector<32xf32>
    %50 = vector.multi_reduction <maximumf>, %49, %cst_40 [1] : vector<32x32xf32> to vector<32xf32>
    %51 = vector.shape_cast %50 : vector<32xf32> to vector<32x1xf32>
    %52 = vector.broadcast %51 : vector<32x1xf32> to vector<32x32xf32>
    %53 = arith.subf %49, %52 : vector<32x32xf32>
    %54 = math.exp %53 : vector<32x32xf32>
    %cst_41 = arith.constant dense<0.000000e+00> : vector<32xf32>
    %55 = vector.multi_reduction <add>, %54, %cst_41 [1] : vector<32x32xf32> to vector<32xf32>
    %56 = vector.shape_cast %55 : vector<32xf32> to vector<32x1xf32>
    %57 = tpu.reciprocal %56 {approx = true} : vector<32x1xf32> -> vector<32x1xf32>
    %58 = vector.broadcast %57 : vector<32x1xf32> to vector<32x32xf32>
    %59 = arith.mulf %54, %58 : vector<32x32xf32>
    %cst_42 = arith.constant dense<0.000000e+00> : vector<32x8xf32>
    %60 = tpu.matmul %59, %45, %cst_42 {dimension_numbers = #tpu.dot_dimension_numbers<[1], [0], [0], [1], [0, 0, 1, 1], [], []>} : vector<32x32xf32>, vector<32x8xf32>, vector<32x8xf32> -> vector<32x8xf32>
    %61 = vector.extract_strided_slice %40 {offsets = [0, 0], sizes = [8, 32], strides = [1, 1]} : vector<32x32xf32> to vector<8x32xf32>
    %62 = arith.truncf %60 : vector<32x8xf32> to vector<32x8xbf16>
    %63 = arith.truncf %61 : vector<8x32xf32> to vector<8x32xbf16>
    %cst_43 = arith.constant dense<0.000000e+00> : vector<32x32xf32>
    %64 = tpu.matmul %62, %63, %cst_43 {dimension_numbers = #tpu.dot_dimension_numbers<[1], [0], [0], [1], [0, 0, 1, 1], [], []>} : vector<32x8xbf16>, vector<8x32xbf16>, vector<32x32xf32> -> vector<32x32xf32>
    %65 = vector.extract_strided_slice %28 {offsets = [0, 8], sizes = [32, 8], strides = [1, 1]} : vector<32x32xf32> to vector<32x8xf32>
    %66 = vector.extract_strided_slice %29 {offsets = [0, 8], sizes = [32, 8], strides = [1, 1]} : vector<32x32xf32> to vector<32x8xf32>
    %67 = vector.extract_strided_slice %38 {offsets = [0, 8], sizes = [32, 8], strides = [1, 1]} : vector<32x32xf32> to vector<32x8xf32>
    %68 = tpu.transpose %66, [1, 0] : vector<32x8xf32> -> vector<8x32xf32>
    %cst_44 = arith.constant dense<0.000000e+00> : vector<32x32xf32>
    %69 = tpu.matmul %65, %68, %cst_44 {dimension_numbers = #tpu.dot_dimension_numbers<[1], [0], [0], [1], [0, 0, 1, 1], [], []>} : vector<32x8xf32>, vector<8x32xf32>, vector<32x32xf32> -> vector<32x32xf32>
    %cst_45 = arith.constant 0.353553385 : f32
    %70 = vector.broadcast %cst_45 : f32 to vector<32x32xf32>
    %71 = arith.mulf %69, %70 : vector<32x32xf32>
    %cst_46 = arith.constant dense<0xFF800000> : vector<32xf32>
    %72 = vector.multi_reduction <maximumf>, %71, %cst_46 [1] : vector<32x32xf32> to vector<32xf32>
    %73 = vector.shape_cast %72 : vector<32xf32> to vector<32x1xf32>
    %74 = vector.broadcast %73 : vector<32x1xf32> to vector<32x32xf32>
    %75 = arith.subf %71, %74 : vector<32x32xf32>
    %76 = math.exp %75 : vector<32x32xf32>
    %cst_47 = arith.constant dense<0.000000e+00> : vector<32xf32>
    %77 = vector.multi_reduction <add>, %76, %cst_47 [1] : vector<32x32xf32> to vector<32xf32>
    %78 = vector.shape_cast %77 : vector<32xf32> to vector<32x1xf32>
    %79 = tpu.reciprocal %78 {approx = true} : vector<32x1xf32> -> vector<32x1xf32>
    %80 = vector.broadcast %79 : vector<32x1xf32> to vector<32x32xf32>
    %81 = arith.mulf %76, %80 : vector<32x32xf32>
    %cst_48 = arith.constant dense<0.000000e+00> : vector<32x8xf32>
    %82 = tpu.matmul %81, %67, %cst_48 {dimension_numbers = #tpu.dot_dimension_numbers<[1], [0], [0], [1], [0, 0, 1, 1], [], []>} : vector<32x32xf32>, vector<32x8xf32>, vector<32x8xf32> -> vector<32x8xf32>
    %83 = vector.extract_strided_slice %40 {offsets = [8, 0], sizes = [8, 32], strides = [1, 1]} : vector<32x32xf32> to vector<8x32xf32>
    %84 = arith.truncf %82 : vector<32x8xf32> to vector<32x8xbf16>
    %85 = arith.truncf %83 : vector<8x32xf32> to vector<8x32xbf16>
    %cst_49 = arith.constant dense<0.000000e+00> : vector<32x32xf32>
    %86 = tpu.matmul %84, %85, %cst_49 {dimension_numbers = #tpu.dot_dimension_numbers<[1], [0], [0], [1], [0, 0, 1, 1], [], []>} : vector<32x8xbf16>, vector<8x32xbf16>, vector<32x32xf32> -> vector<32x32xf32>
    %87 = arith.addf %64, %86 : vector<32x32xf32>
    %88 = vector.extract_strided_slice %28 {offsets = [0, 16], sizes = [32, 8], strides = [1, 1]} : vector<32x32xf32> to vector<32x8xf32>
    %89 = vector.extract_strided_slice %29 {offsets = [0, 16], sizes = [32, 8], strides = [1, 1]} : vector<32x32xf32> to vector<32x8xf32>
    %90 = vector.extract_strided_slice %38 {offsets = [0, 16], sizes = [32, 8], strides = [1, 1]} : vector<32x32xf32> to vector<32x8xf32>
    %91 = tpu.transpose %89, [1, 0] : vector<32x8xf32> -> vector<8x32xf32>
    %cst_50 = arith.constant dense<0.000000e+00> : vector<32x32xf32>
    %92 = tpu.matmul %88, %91, %cst_50 {dimension_numbers = #tpu.dot_dimension_numbers<[1], [0], [0], [1], [0, 0, 1, 1], [], []>} : vector<32x8xf32>, vector<8x32xf32>, vector<32x32xf32> -> vector<32x32xf32>
    %cst_51 = arith.constant 0.353553385 : f32
    %93 = vector.broadcast %cst_51 : f32 to vector<32x32xf32>
    %94 = arith.mulf %92, %93 : vector<32x32xf32>
    %cst_52 = arith.constant dense<0xFF800000> : vector<32xf32>
    %95 = vector.multi_reduction <maximumf>, %94, %cst_52 [1] : vector<32x32xf32> to vector<32xf32>
    %96 = vector.shape_cast %95 : vector<32xf32> to vector<32x1xf32>
    %97 = vector.broadcast %96 : vector<32x1xf32> to vector<32x32xf32>
    %98 = arith.subf %94, %97 : vector<32x32xf32>
    %99 = math.exp %98 : vector<32x32xf32>
    %cst_53 = arith.constant dense<0.000000e+00> : vector<32xf32>
    %100 = vector.multi_reduction <add>, %99, %cst_53 [1] : vector<32x32xf32> to vector<32xf32>
    %101 = vector.shape_cast %100 : vector<32xf32> to vector<32x1xf32>
    %102 = tpu.reciprocal %101 {approx = true} : vector<32x1xf32> -> vector<32x1xf32>
    %103 = vector.broadcast %102 : vector<32x1xf32> to vector<32x32xf32>
    %104 = arith.mulf %99, %103 : vector<32x32xf32>
    %cst_54 = arith.constant dense<0.000000e+00> : vector<32x8xf32>
    %105 = tpu.matmul %104, %90, %cst_54 {dimension_numbers = #tpu.dot_dimension_numbers<[1], [0], [0], [1], [0, 0, 1, 1], [], []>} : vector<32x32xf32>, vector<32x8xf32>, vector<32x8xf32> -> vector<32x8xf32>
    %106 = vector.extract_strided_slice %40 {offsets = [16, 0], sizes = [8, 32], strides = [1, 1]} : vector<32x32xf32> to vector<8x32xf32>
    %107 = arith.truncf %105 : vector<32x8xf32> to vector<32x8xbf16>
    %108 = arith.truncf %106 : vector<8x32xf32> to vector<8x32xbf16>
    %cst_55 = arith.constant dense<0.000000e+00> : vector<32x32xf32>
    %109 = tpu.matmul %107, %108, %cst_55 {dimension_numbers = #tpu.dot_dimension_numbers<[1], [0], [0], [1], [0, 0, 1, 1], [], []>} : vector<32x8xbf16>, vector<8x32xbf16>, vector<32x32xf32> -> vector<32x32xf32>
    %110 = arith.addf %87, %109 : vector<32x32xf32>
    %111 = vector.extract_strided_slice %28 {offsets = [0, 24], sizes = [32, 8], strides = [1, 1]} : vector<32x32xf32> to vector<32x8xf32>
    %112 = vector.extract_strided_slice %29 {offsets = [0, 24], sizes = [32, 8], strides = [1, 1]} : vector<32x32xf32> to vector<32x8xf32>
    %113 = vector.extract_strided_slice %38 {offsets = [0, 24], sizes = [32, 8], strides = [1, 1]} : vector<32x32xf32> to vector<32x8xf32>
    %114 = tpu.transpose %112, [1, 0] : vector<32x8xf32> -> vector<8x32xf32>
    %cst_56 = arith.constant dense<0.000000e+00> : vector<32x32xf32>
    %115 = tpu.matmul %111, %114, %cst_56 {dimension_numbers = #tpu.dot_dimension_numbers<[1], [0], [0], [1], [0, 0, 1, 1], [], []>} : vector<32x8xf32>, vector<8x32xf32>, vector<32x32xf32> -> vector<32x32xf32>
    %cst_57 = arith.constant 0.353553385 : f32
    %116 = vector.broadcast %cst_57 : f32 to vector<32x32xf32>
    %117 = arith.mulf %115, %116 : vector<32x32xf32>
    %cst_58 = arith.constant dense<0xFF800000> : vector<32xf32>
    %118 = vector.multi_reduction <maximumf>, %117, %cst_58 [1] : vector<32x32xf32> to vector<32xf32>
    %119 = vector.shape_cast %118 : vector<32xf32> to vector<32x1xf32>
    %120 = vector.broadcast %119 : vector<32x1xf32> to vector<32x32xf32>
    %121 = arith.subf %117, %120 : vector<32x32xf32>
    %122 = math.exp %121 : vector<32x32xf32>
    %cst_59 = arith.constant dense<0.000000e+00> : vector<32xf32>
    %123 = vector.multi_reduction <add>, %122, %cst_59 [1] : vector<32x32xf32> to vector<32xf32>
    %124 = vector.shape_cast %123 : vector<32xf32> to vector<32x1xf32>
    %125 = tpu.reciprocal %124 {approx = true} : vector<32x1xf32> -> vector<32x1xf32>
    %126 = vector.broadcast %125 : vector<32x1xf32> to vector<32x32xf32>
    %127 = arith.mulf %122, %126 : vector<32x32xf32>
    %cst_60 = arith.constant dense<0.000000e+00> : vector<32x8xf32>
    %128 = tpu.matmul %127, %113, %cst_60 {dimension_numbers = #tpu.dot_dimension_numbers<[1], [0], [0], [1], [0, 0, 1, 1], [], []>} : vector<32x32xf32>, vector<32x8xf32>, vector<32x8xf32> -> vector<32x8xf32>
    %129 = vector.extract_strided_slice %40 {offsets = [24, 0], sizes = [8, 32], strides = [1, 1]} : vector<32x32xf32> to vector<8x32xf32>
    %130 = arith.truncf %128 : vector<32x8xf32> to vector<32x8xbf16>
    %131 = arith.truncf %129 : vector<8x32xf32> to vector<8x32xbf16>
    %cst_61 = arith.constant dense<0.000000e+00> : vector<32x32xf32>
    %132 = tpu.matmul %130, %131, %cst_61 {dimension_numbers = #tpu.dot_dimension_numbers<[1], [0], [0], [1], [0, 0, 1, 1], [], []>} : vector<32x8xbf16>, vector<8x32xbf16>, vector<32x32xf32> -> vector<32x32xf32>
    %133 = arith.addf %110, %132 : vector<32x32xf32>
    %134 = vector.broadcast %42 : vector<1x32xf32> to vector<32x32xf32>
    %135 = arith.addf %133, %134 : vector<32x32xf32>
    %136 = arith.addf %17, %135 : vector<32x32xf32>
    %c0_62 = arith.constant 0 : index
    %c0_63 = arith.constant 0 : index
    %c0_64 = arith.constant 0 : index
    %137 = vector.load %arg18[%c0_62, %c0_63, %c0_64] : memref<1x1x32xf32, #tpu.memory_space<vmem>>, vector<1x1x32xf32>
    %138 = vector.shape_cast %137 : vector<1x1x32xf32> to vector<1x32xf32>
    %c0_65 = arith.constant 0 : index
    %c0_66 = arith.constant 0 : index
    %c0_67 = arith.constant 0 : index
    %139 = vector.load %arg19[%c0_65, %c0_66, %c0_67] : memref<1x1x32xf32, #tpu.memory_space<vmem>>, vector<1x1x32xf32>
    %140 = vector.shape_cast %139 : vector<1x1x32xf32> to vector<1x32xf32>
    %cst_68 = arith.constant dense<0.000000e+00> : vector<32xf32>
    %141 = vector.multi_reduction <add>, %136, %cst_68 [1] : vector<32x32xf32> to vector<32xf32>
    %142 = vector.shape_cast %141 : vector<32xf32> to vector<32x1xf32>
    %cst_69 = arith.constant 3.200000e+01 : f32
    %143 = vector.broadcast %cst_69 : f32 to vector<32x1xf32>
    %144 = arith.divf %142, %143 : vector<32x1xf32>
    %145 = vector.broadcast %144 : vector<32x1xf32> to vector<32x32xf32>
    %146 = arith.subf %136, %145 : vector<32x32xf32>
    %147 = arith.mulf %146, %146 : vector<32x32xf32>
    %cst_70 = arith.constant dense<0.000000e+00> : vector<32xf32>
    %148 = vector.multi_reduction <add>, %147, %cst_70 [1] : vector<32x32xf32> to vector<32xf32>
    %149 = vector.shape_cast %148 : vector<32xf32> to vector<32x1xf32>
    %cst_71 = arith.constant 3.200000e+01 : f32
    %150 = vector.broadcast %cst_71 : f32 to vector<32x1xf32>
    %151 = arith.divf %149, %150 : vector<32x1xf32>
    %152 = vector.broadcast %144 : vector<32x1xf32> to vector<32x32xf32>
    %153 = arith.subf %136, %152 : vector<32x32xf32>
    %cst_72 = arith.constant 9.99999974E-6 : f32
    %154 = vector.broadcast %cst_72 : f32 to vector<32x1xf32>
    %155 = arith.addf %151, %154 : vector<32x1xf32>
    %156 = math.rsqrt %155 : vector<32x1xf32>
    %157 = vector.broadcast %156 : vector<32x1xf32> to vector<32x32xf32>
    %158 = arith.mulf %153, %157 : vector<32x32xf32>
    %159 = vector.broadcast %138 : vector<1x32xf32> to vector<32x32xf32>
    %160 = arith.mulf %158, %159 : vector<32x32xf32>
    %161 = vector.broadcast %140 : vector<1x32xf32> to vector<32x32xf32>
    %162 = arith.addf %160, %161 : vector<32x32xf32>
    %c0_73 = arith.constant 0 : index
    %c0_74 = arith.constant 0 : index
    %c0_75 = arith.constant 0 : index
    %163 = vector.load %arg14[%c0_73, %c0_74, %c0_75] : memref<1x32x64xf32, #tpu.memory_space<vmem>>, vector<1x32x64xf32>
    %164 = vector.shape_cast %163 : vector<1x32x64xf32> to vector<32x64xf32>
    %165 = arith.truncf %162 : vector<32x32xf32> to vector<32x32xbf16>
    %166 = arith.truncf %164 : vector<32x64xf32> to vector<32x64xbf16>
    %cst_76 = arith.constant dense<0.000000e+00> : vector<32x64xf32>
    %167 = tpu.matmul %165, %166, %cst_76 {dimension_numbers = #tpu.dot_dimension_numbers<[1], [0], [0], [1], [0, 0, 1, 1], [], []>} : vector<32x32xbf16>, vector<32x64xbf16>, vector<32x64xf32> -> vector<32x64xf32>
    %c0_77 = arith.constant 0 : index
    %c0_78 = arith.constant 0 : index
    %c0_79 = arith.constant 0 : index
    %168 = vector.load %arg15[%c0_77, %c0_78, %c0_79] : memref<1x1x64xf32, #tpu.memory_space<vmem>>, vector<1x1x64xf32>
    %169 = vector.shape_cast %168 : vector<1x1x64xf32> to vector<1x64xf32>
    %170 = vector.broadcast %169 : vector<1x64xf32> to vector<32x64xf32>
    %171 = arith.addf %167, %170 : vector<32x64xf32>
    %cst_80 = arith.constant 0.000000e+00 : f32
    %172 = vector.broadcast %cst_80 : f32 to vector<32x64xf32>
    %173 = arith.maximumf %171, %172 : vector<32x64xf32>
    %c0_81 = arith.constant 0 : index
    %c0_82 = arith.constant 0 : index
    %c0_83 = arith.constant 0 : index
    %174 = vector.load %arg16[%c0_81, %c0_82, %c0_83] : memref<1x64x32xf32, #tpu.memory_space<vmem>>, vector<1x64x32xf32>
    %175 = vector.shape_cast %174 : vector<1x64x32xf32> to vector<64x32xf32>
    %176 = arith.truncf %173 : vector<32x64xf32> to vector<32x64xbf16>
    %177 = arith.truncf %175 : vector<64x32xf32> to vector<64x32xbf16>
    %cst_84 = arith.constant dense<0.000000e+00> : vector<32x32xf32>
    %178 = tpu.matmul %176, %177, %cst_84 {dimension_numbers = #tpu.dot_dimension_numbers<[1], [0], [0], [1], [0, 0, 1, 1], [], []>} : vector<32x64xbf16>, vector<64x32xbf16>, vector<32x32xf32> -> vector<32x32xf32>
    %c0_85 = arith.constant 0 : index
    %c0_86 = arith.constant 0 : index
    %c0_87 = arith.constant 0 : index
    %179 = vector.load %arg17[%c0_85, %c0_86, %c0_87] : memref<1x1x32xf32, #tpu.memory_space<vmem>>, vector<1x1x32xf32>
    %180 = vector.shape_cast %179 : vector<1x1x32xf32> to vector<1x32xf32>
    %181 = vector.broadcast %180 : vector<1x32xf32> to vector<32x32xf32>
    %182 = arith.addf %178, %181 : vector<32x32xf32>
    %183 = arith.addf %162, %182 : vector<32x32xf32>
    %c0_88 = arith.constant 0 : index
    %c0_89 = arith.constant 0 : index
    %c0_90 = arith.constant 0 : index
    %184 = vector.load %arg20[%c0_88, %c0_89, %c0_90] : memref<1x1x32xf32, #tpu.memory_space<vmem>>, vector<1x1x32xf32>
    %185 = vector.shape_cast %184 : vector<1x1x32xf32> to vector<1x32xf32>
    %c0_91 = arith.constant 0 : index
    %c0_92 = arith.constant 0 : index
    %c0_93 = arith.constant 0 : index
    %186 = vector.load %arg21[%c0_91, %c0_92, %c0_93] : memref<1x1x32xf32, #tpu.memory_space<vmem>>, vector<1x1x32xf32>
    %187 = vector.shape_cast %186 : vector<1x1x32xf32> to vector<1x32xf32>
    %cst_94 = arith.constant dense<0.000000e+00> : vector<32xf32>
    %188 = vector.multi_reduction <add>, %183, %cst_94 [1] : vector<32x32xf32> to vector<32xf32>
    %189 = vector.shape_cast %188 : vector<32xf32> to vector<32x1xf32>
    %cst_95 = arith.constant 3.200000e+01 : f32
    %190 = vector.broadcast %cst_95 : f32 to vector<32x1xf32>
    %191 = arith.divf %189, %190 : vector<32x1xf32>
    %192 = vector.broadcast %191 : vector<32x1xf32> to vector<32x32xf32>
    %193 = arith.subf %183, %192 : vector<32x32xf32>
    %194 = arith.mulf %193, %193 : vector<32x32xf32>
    %cst_96 = arith.constant dense<0.000000e+00> : vector<32xf32>
    %195 = vector.multi_reduction <add>, %194, %cst_96 [1] : vector<32x32xf32> to vector<32xf32>
    %196 = vector.shape_cast %195 : vector<32xf32> to vector<32x1xf32>
    %cst_97 = arith.constant 3.200000e+01 : f32
    %197 = vector.broadcast %cst_97 : f32 to vector<32x1xf32>
    %198 = arith.divf %196, %197 : vector<32x1xf32>
    %199 = vector.broadcast %191 : vector<32x1xf32> to vector<32x32xf32>
    %200 = arith.subf %183, %199 : vector<32x32xf32>
    %cst_98 = arith.constant 9.99999974E-6 : f32
    %201 = vector.broadcast %cst_98 : f32 to vector<32x1xf32>
    %202 = arith.addf %198, %201 : vector<32x1xf32>
    %203 = math.rsqrt %202 : vector<32x1xf32>
    %204 = vector.broadcast %203 : vector<32x1xf32> to vector<32x32xf32>
    %205 = arith.mulf %200, %204 : vector<32x32xf32>
    %206 = vector.broadcast %185 : vector<1x32xf32> to vector<32x32xf32>
    %207 = arith.mulf %205, %206 : vector<32x32xf32>
    %208 = vector.broadcast %187 : vector<1x32xf32> to vector<32x32xf32>
    %209 = arith.addf %207, %208 : vector<32x32xf32>
    %210 = arith.addf %209, %3 : vector<32x32xf32>
    %c0_99 = arith.constant 0 : index
    %c0_100 = arith.constant 0 : index
    %211 = vector.load %arg46[%c0_99, %c0_100] : memref<1x32xf32, #tpu.memory_space<vmem>>, vector<1x32xf32>
    %c0_101 = arith.constant 0 : index
    %c0_102 = arith.constant 0 : index
    %212 = vector.load %arg47[%c0_101, %c0_102] : memref<1x32xf32, #tpu.memory_space<vmem>>, vector<1x32xf32>
    %cst_103 = arith.constant 0.000000e+00 : f32
    %213 = vector.broadcast %cst_103 : f32 to vector<8x32xf32>
    %214 = arith.addf %213, %5 : vector<8x32xf32>
    %c0_104 = arith.constant 0 : index
    %c0_105 = arith.constant 0 : index
    %c0_106 = arith.constant 0 : index
    %215 = vector.load %arg22[%c0_104, %c0_105, %c0_106] : memref<2x32x64xf32, #tpu.memory_space<vmem>>, vector<1x32x64xf32>
    %216 = vector.shape_cast %215 : vector<1x32x64xf32> to vector<32x64xf32>
    %217 = arith.truncf %214 : vector<8x32xf32> to vector<8x32xbf16>
    %218 = arith.truncf %216 : vector<32x64xf32> to vector<32x64xbf16>
    %cst_107 = arith.constant dense<0.000000e+00> : vector<8x64xf32>
    %219 = tpu.matmul %217, %218, %cst_107 {dimension_numbers = #tpu.dot_dimension_numbers<[1], [0], [0], [1], [0, 0, 1, 1], [], []>} : vector<8x32xbf16>, vector<32x64xbf16>, vector<8x64xf32> -> vector<8x64xf32>
    %c0_108 = arith.constant 0 : index
    %c0_109 = arith.constant 0 : index
    %c0_110 = arith.constant 0 : index
    %220 = vector.load %arg23[%c0_108, %c0_109, %c0_110] : memref<2x1x64xf32, #tpu.memory_space<vmem>>, vector<1x1x64xf32>
    %221 = vector.shape_cast %220 : vector<1x1x64xf32> to vector<1x64xf32>
    %222 = vector.broadcast %221 : vector<1x64xf32> to vector<8x64xf32>
    %223 = arith.addf %219, %222 : vector<8x64xf32>
    %224 = vector.extract_strided_slice %223 {offsets = [0, 0], sizes = [8, 32], strides = [1, 1]} : vector<8x64xf32> to vector<8x32xf32>
    %225 = vector.extract_strided_slice %223 {offsets = [0, 32], sizes = [8, 32], strides = [1, 1]} : vector<8x64xf32> to vector<8x32xf32>
    %c0_111 = arith.constant 0 : index
    %c0_112 = arith.constant 0 : index
    %c0_113 = arith.constant 0 : index
    %226 = vector.load %arg24[%c0_111, %c0_112, %c0_113] : memref<2x32x32xf32, #tpu.memory_space<vmem>>, vector<1x32x32xf32>
    %227 = vector.shape_cast %226 : vector<1x32x32xf32> to vector<32x32xf32>
    %228 = arith.truncf %213 : vector<8x32xf32> to vector<8x32xbf16>
    %229 = arith.truncf %227 : vector<32x32xf32> to vector<32x32xbf16>
    %cst_114 = arith.constant dense<0.000000e+00> : vector<8x32xf32>
    %230 = tpu.matmul %228, %229, %cst_114 {dimension_numbers = #tpu.dot_dimension_numbers<[1], [0], [0], [1], [0, 0, 1, 1], [], []>} : vector<8x32xbf16>, vector<32x32xbf16>, vector<8x32xf32> -> vector<8x32xf32>
    %c0_115 = arith.constant 0 : index
    %c0_116 = arith.constant 0 : index
    %c0_117 = arith.constant 0 : index
    %231 = vector.load %arg25[%c0_115, %c0_116, %c0_117] : memref<2x1x32xf32, #tpu.memory_space<vmem>>, vector<1x1x32xf32>
    %232 = vector.shape_cast %231 : vector<1x1x32xf32> to vector<1x32xf32>
    %233 = vector.broadcast %232 : vector<1x32xf32> to vector<8x32xf32>
    %234 = arith.addf %230, %233 : vector<8x32xf32>
    %c0_118 = arith.constant 0 : index
    %c0_119 = arith.constant 0 : index
    %c0_120 = arith.constant 0 : index
    %235 = vector.load %arg26[%c0_118, %c0_119, %c0_120] : memref<2x32x32xf32, #tpu.memory_space<vmem>>, vector<1x32x32xf32>
    %236 = vector.shape_cast %235 : vector<1x32x32xf32> to vector<32x32xf32>
    %c0_121 = arith.constant 0 : index
    %c0_122 = arith.constant 0 : index
    %c0_123 = arith.constant 0 : index
    %237 = vector.load %arg27[%c0_121, %c0_122, %c0_123] : memref<2x1x32xf32, #tpu.memory_space<vmem>>, vector<1x1x32xf32>
    %238 = vector.shape_cast %237 : vector<1x1x32xf32> to vector<1x32xf32>
    %239 = vector.extract_strided_slice %224 {offsets = [0, 0], sizes = [8, 8], strides = [1, 1]} : vector<8x32xf32> to vector<8x8xf32>
    %240 = vector.extract_strided_slice %225 {offsets = [0, 0], sizes = [8, 8], strides = [1, 1]} : vector<8x32xf32> to vector<8x8xf32>
    %241 = vector.extract_strided_slice %234 {offsets = [0, 0], sizes = [8, 8], strides = [1, 1]} : vector<8x32xf32> to vector<8x8xf32>
    %242 = tpu.transpose %240, [1, 0] : vector<8x8xf32> -> vector<8x8xf32>
    %cst_124 = arith.constant dense<0.000000e+00> : vector<8x8xf32>
    %243 = tpu.matmul %239, %242, %cst_124 {dimension_numbers = #tpu.dot_dimension_numbers<[1], [0], [0], [1], [0, 0, 1, 1], [], []>} : vector<8x8xf32>, vector<8x8xf32>, vector<8x8xf32> -> vector<8x8xf32>
    %cst_125 = arith.constant 0.353553385 : f32
    %244 = vector.broadcast %cst_125 : f32 to vector<8x8xf32>
    %245 = arith.mulf %243, %244 : vector<8x8xf32>
    %cst_126 = arith.constant dense<0xFF800000> : vector<8xf32>
    %246 = vector.multi_reduction <maximumf>, %245, %cst_126 [1] : vector<8x8xf32> to vector<8xf32>
    %247 = vector.shape_cast %246 : vector<8xf32> to vector<8x1xf32>
    %248 = vector.broadcast %247 : vector<8x1xf32> to vector<8x8xf32>
    %249 = arith.subf %245, %248 : vector<8x8xf32>
    %250 = math.exp %249 : vector<8x8xf32>
    %cst_127 = arith.constant dense<0.000000e+00> : vector<8xf32>
    %251 = vector.multi_reduction <add>, %250, %cst_127 [1] : vector<8x8xf32> to vector<8xf32>
    %252 = vector.shape_cast %251 : vector<8xf32> to vector<8x1xf32>
    %253 = tpu.reciprocal %252 {approx = true} : vector<8x1xf32> -> vector<8x1xf32>
    %254 = vector.broadcast %253 : vector<8x1xf32> to vector<8x8xf32>
    %255 = arith.mulf %250, %254 : vector<8x8xf32>
    %cst_128 = arith.constant dense<0.000000e+00> : vector<8x8xf32>
    %256 = tpu.matmul %255, %241, %cst_128 {dimension_numbers = #tpu.dot_dimension_numbers<[1], [0], [0], [1], [0, 0, 1, 1], [], []>} : vector<8x8xf32>, vector<8x8xf32>, vector<8x8xf32> -> vector<8x8xf32>
    %257 = vector.extract_strided_slice %236 {offsets = [0, 0], sizes = [8, 32], strides = [1, 1]} : vector<32x32xf32> to vector<8x32xf32>
    %258 = arith.truncf %256 : vector<8x8xf32> to vector<8x8xbf16>
    %259 = arith.truncf %257 : vector<8x32xf32> to vector<8x32xbf16>
    %cst_129 = arith.constant dense<0.000000e+00> : vector<8x32xf32>
    %260 = tpu.matmul %258, %259, %cst_129 {dimension_numbers = #tpu.dot_dimension_numbers<[1], [0], [0], [1], [0, 0, 1, 1], [], []>} : vector<8x8xbf16>, vector<8x32xbf16>, vector<8x32xf32> -> vector<8x32xf32>
    %261 = vector.extract_strided_slice %224 {offsets = [0, 8], sizes = [8, 8], strides = [1, 1]} : vector<8x32xf32> to vector<8x8xf32>
    %262 = vector.extract_strided_slice %225 {offsets = [0, 8], sizes = [8, 8], strides = [1, 1]} : vector<8x32xf32> to vector<8x8xf32>
    %263 = vector.extract_strided_slice %234 {offsets = [0, 8], sizes = [8, 8], strides = [1, 1]} : vector<8x32xf32> to vector<8x8xf32>
    %264 = tpu.transpose %262, [1, 0] : vector<8x8xf32> -> vector<8x8xf32>
    %cst_130 = arith.constant dense<0.000000e+00> : vector<8x8xf32>
    %265 = tpu.matmul %261, %264, %cst_130 {dimension_numbers = #tpu.dot_dimension_numbers<[1], [0], [0], [1], [0, 0, 1, 1], [], []>} : vector<8x8xf32>, vector<8x8xf32>, vector<8x8xf32> -> vector<8x8xf32>
    %cst_131 = arith.constant 0.353553385 : f32
    %266 = vector.broadcast %cst_131 : f32 to vector<8x8xf32>
    %267 = arith.mulf %265, %266 : vector<8x8xf32>
    %cst_132 = arith.constant dense<0xFF800000> : vector<8xf32>
    %268 = vector.multi_reduction <maximumf>, %267, %cst_132 [1] : vector<8x8xf32> to vector<8xf32>
    %269 = vector.shape_cast %268 : vector<8xf32> to vector<8x1xf32>
    %270 = vector.broadcast %269 : vector<8x1xf32> to vector<8x8xf32>
    %271 = arith.subf %267, %270 : vector<8x8xf32>
    %272 = math.exp %271 : vector<8x8xf32>
    %cst_133 = arith.constant dense<0.000000e+00> : vector<8xf32>
    %273 = vector.multi_reduction <add>, %272, %cst_133 [1] : vector<8x8xf32> to vector<8xf32>
    %274 = vector.shape_cast %273 : vector<8xf32> to vector<8x1xf32>
    %275 = tpu.reciprocal %274 {approx = true} : vector<8x1xf32> -> vector<8x1xf32>
    %276 = vector.broadcast %275 : vector<8x1xf32> to vector<8x8xf32>
    %277 = arith.mulf %272, %276 : vector<8x8xf32>
    %cst_134 = arith.constant dense<0.000000e+00> : vector<8x8xf32>
    %278 = tpu.matmul %277, %263, %cst_134 {dimension_numbers = #tpu.dot_dimension_numbers<[1], [0], [0], [1], [0, 0, 1, 1], [], []>} : vector<8x8xf32>, vector<8x8xf32>, vector<8x8xf32> -> vector<8x8xf32>
    %279 = vector.extract_strided_slice %236 {offsets = [8, 0], sizes = [8, 32], strides = [1, 1]} : vector<32x32xf32> to vector<8x32xf32>
    %280 = arith.truncf %278 : vector<8x8xf32> to vector<8x8xbf16>
    %281 = arith.truncf %279 : vector<8x32xf32> to vector<8x32xbf16>
    %cst_135 = arith.constant dense<0.000000e+00> : vector<8x32xf32>
    %282 = tpu.matmul %280, %281, %cst_135 {dimension_numbers = #tpu.dot_dimension_numbers<[1], [0], [0], [1], [0, 0, 1, 1], [], []>} : vector<8x8xbf16>, vector<8x32xbf16>, vector<8x32xf32> -> vector<8x32xf32>
    %283 = arith.addf %260, %282 : vector<8x32xf32>
    %284 = vector.extract_strided_slice %224 {offsets = [0, 16], sizes = [8, 8], strides = [1, 1]} : vector<8x32xf32> to vector<8x8xf32>
    %285 = vector.extract_strided_slice %225 {offsets = [0, 16], sizes = [8, 8], strides = [1, 1]} : vector<8x32xf32> to vector<8x8xf32>
    %286 = vector.extract_strided_slice %234 {offsets = [0, 16], sizes = [8, 8], strides = [1, 1]} : vector<8x32xf32> to vector<8x8xf32>
    %287 = tpu.transpose %285, [1, 0] : vector<8x8xf32> -> vector<8x8xf32>
    %cst_136 = arith.constant dense<0.000000e+00> : vector<8x8xf32>
    %288 = tpu.matmul %284, %287, %cst_136 {dimension_numbers = #tpu.dot_dimension_numbers<[1], [0], [0], [1], [0, 0, 1, 1], [], []>} : vector<8x8xf32>, vector<8x8xf32>, vector<8x8xf32> -> vector<8x8xf32>
    %cst_137 = arith.constant 0.353553385 : f32
    %289 = vector.broadcast %cst_137 : f32 to vector<8x8xf32>
    %290 = arith.mulf %288, %289 : vector<8x8xf32>
    %cst_138 = arith.constant dense<0xFF800000> : vector<8xf32>
    %291 = vector.multi_reduction <maximumf>, %290, %cst_138 [1] : vector<8x8xf32> to vector<8xf32>
    %292 = vector.shape_cast %291 : vector<8xf32> to vector<8x1xf32>
    %293 = vector.broadcast %292 : vector<8x1xf32> to vector<8x8xf32>
    %294 = arith.subf %290, %293 : vector<8x8xf32>
    %295 = math.exp %294 : vector<8x8xf32>
    %cst_139 = arith.constant dense<0.000000e+00> : vector<8xf32>
    %296 = vector.multi_reduction <add>, %295, %cst_139 [1] : vector<8x8xf32> to vector<8xf32>
    %297 = vector.shape_cast %296 : vector<8xf32> to vector<8x1xf32>
    %298 = tpu.reciprocal %297 {approx = true} : vector<8x1xf32> -> vector<8x1xf32>
    %299 = vector.broadcast %298 : vector<8x1xf32> to vector<8x8xf32>
    %300 = arith.mulf %295, %299 : vector<8x8xf32>
    %cst_140 = arith.constant dense<0.000000e+00> : vector<8x8xf32>
    %301 = tpu.matmul %300, %286, %cst_140 {dimension_numbers = #tpu.dot_dimension_numbers<[1], [0], [0], [1], [0, 0, 1, 1], [], []>} : vector<8x8xf32>, vector<8x8xf32>, vector<8x8xf32> -> vector<8x8xf32>
    %302 = vector.extract_strided_slice %236 {offsets = [16, 0], sizes = [8, 32], strides = [1, 1]} : vector<32x32xf32> to vector<8x32xf32>
    %303 = arith.truncf %301 : vector<8x8xf32> to vector<8x8xbf16>
    %304 = arith.truncf %302 : vector<8x32xf32> to vector<8x32xbf16>
    %cst_141 = arith.constant dense<0.000000e+00> : vector<8x32xf32>
    %305 = tpu.matmul %303, %304, %cst_141 {dimension_numbers = #tpu.dot_dimension_numbers<[1], [0], [0], [1], [0, 0, 1, 1], [], []>} : vector<8x8xbf16>, vector<8x32xbf16>, vector<8x32xf32> -> vector<8x32xf32>
    %306 = arith.addf %283, %305 : vector<8x32xf32>
    %307 = vector.extract_strided_slice %224 {offsets = [0, 24], sizes = [8, 8], strides = [1, 1]} : vector<8x32xf32> to vector<8x8xf32>
    %308 = vector.extract_strided_slice %225 {offsets = [0, 24], sizes = [8, 8], strides = [1, 1]} : vector<8x32xf32> to vector<8x8xf32>
    %309 = vector.extract_strided_slice %234 {offsets = [0, 24], sizes = [8, 8], strides = [1, 1]} : vector<8x32xf32> to vector<8x8xf32>
    %310 = tpu.transpose %308, [1, 0] : vector<8x8xf32> -> vector<8x8xf32>
    %cst_142 = arith.constant dense<0.000000e+00> : vector<8x8xf32>
    %311 = tpu.matmul %307, %310, %cst_142 {dimension_numbers = #tpu.dot_dimension_numbers<[1], [0], [0], [1], [0, 0, 1, 1], [], []>} : vector<8x8xf32>, vector<8x8xf32>, vector<8x8xf32> -> vector<8x8xf32>
    %cst_143 = arith.constant 0.353553385 : f32
    %312 = vector.broadcast %cst_143 : f32 to vector<8x8xf32>
    %313 = arith.mulf %311, %312 : vector<8x8xf32>
    %cst_144 = arith.constant dense<0xFF800000> : vector<8xf32>
    %314 = vector.multi_reduction <maximumf>, %313, %cst_144 [1] : vector<8x8xf32> to vector<8xf32>
    %315 = vector.shape_cast %314 : vector<8xf32> to vector<8x1xf32>
    %316 = vector.broadcast %315 : vector<8x1xf32> to vector<8x8xf32>
    %317 = arith.subf %313, %316 : vector<8x8xf32>
    %318 = math.exp %317 : vector<8x8xf32>
    %cst_145 = arith.constant dense<0.000000e+00> : vector<8xf32>
    %319 = vector.multi_reduction <add>, %318, %cst_145 [1] : vector<8x8xf32> to vector<8xf32>
    %320 = vector.shape_cast %319 : vector<8xf32> to vector<8x1xf32>
    %321 = tpu.reciprocal %320 {approx = true} : vector<8x1xf32> -> vector<8x1xf32>
    %322 = vector.broadcast %321 : vector<8x1xf32> to vector<8x8xf32>
    %323 = arith.mulf %318, %322 : vector<8x8xf32>
    %cst_146 = arith.constant dense<0.000000e+00> : vector<8x8xf32>
    %324 = tpu.matmul %323, %309, %cst_146 {dimension_numbers = #tpu.dot_dimension_numbers<[1], [0], [0], [1], [0, 0, 1, 1], [], []>} : vector<8x8xf32>, vector<8x8xf32>, vector<8x8xf32> -> vector<8x8xf32>
    %325 = vector.extract_strided_slice %236 {offsets = [24, 0], sizes = [8, 32], strides = [1, 1]} : vector<32x32xf32> to vector<8x32xf32>
    %326 = arith.truncf %324 : vector<8x8xf32> to vector<8x8xbf16>
    %327 = arith.truncf %325 : vector<8x32xf32> to vector<8x32xbf16>
    %cst_147 = arith.constant dense<0.000000e+00> : vector<8x32xf32>
    %328 = tpu.matmul %326, %327, %cst_147 {dimension_numbers = #tpu.dot_dimension_numbers<[1], [0], [0], [1], [0, 0, 1, 1], [], []>} : vector<8x8xbf16>, vector<8x32xbf16>, vector<8x32xf32> -> vector<8x32xf32>
    %329 = arith.addf %306, %328 : vector<8x32xf32>
    %330 = vector.broadcast %238 : vector<1x32xf32> to vector<8x32xf32>
    %331 = arith.addf %329, %330 : vector<8x32xf32>
    %332 = arith.addf %213, %331 : vector<8x32xf32>
    %c0_148 = arith.constant 0 : index
    %c0_149 = arith.constant 0 : index
    %c0_150 = arith.constant 0 : index
    %333 = vector.load %arg40[%c0_148, %c0_149, %c0_150] : memref<2x1x32xf32, #tpu.memory_space<vmem>>, vector<1x1x32xf32>
    %334 = vector.shape_cast %333 : vector<1x1x32xf32> to vector<1x32xf32>
    %c0_151 = arith.constant 0 : index
    %c0_152 = arith.constant 0 : index
    %c0_153 = arith.constant 0 : index
    %335 = vector.load %arg41[%c0_151, %c0_152, %c0_153] : memref<2x1x32xf32, #tpu.memory_space<vmem>>, vector<1x1x32xf32>
    %336 = vector.shape_cast %335 : vector<1x1x32xf32> to vector<1x32xf32>
    %cst_154 = arith.constant dense<0.000000e+00> : vector<8xf32>
    %337 = vector.multi_reduction <add>, %332, %cst_154 [1] : vector<8x32xf32> to vector<8xf32>
    %338 = vector.shape_cast %337 : vector<8xf32> to vector<8x1xf32>
    %cst_155 = arith.constant 3.200000e+01 : f32
    %339 = vector.broadcast %cst_155 : f32 to vector<8x1xf32>
    %340 = arith.divf %338, %339 : vector<8x1xf32>
    %341 = vector.broadcast %340 : vector<8x1xf32> to vector<8x32xf32>
    %342 = arith.subf %332, %341 : vector<8x32xf32>
    %343 = arith.mulf %342, %342 : vector<8x32xf32>
    %cst_156 = arith.constant dense<0.000000e+00> : vector<8xf32>
    %344 = vector.multi_reduction <add>, %343, %cst_156 [1] : vector<8x32xf32> to vector<8xf32>
    %345 = vector.shape_cast %344 : vector<8xf32> to vector<8x1xf32>
    %cst_157 = arith.constant 3.200000e+01 : f32
    %346 = vector.broadcast %cst_157 : f32 to vector<8x1xf32>
    %347 = arith.divf %345, %346 : vector<8x1xf32>
    %348 = vector.broadcast %340 : vector<8x1xf32> to vector<8x32xf32>
    %349 = arith.subf %332, %348 : vector<8x32xf32>
    %cst_158 = arith.constant 9.99999974E-6 : f32
    %350 = vector.broadcast %cst_158 : f32 to vector<8x1xf32>
    %351 = arith.addf %347, %350 : vector<8x1xf32>
    %352 = math.rsqrt %351 : vector<8x1xf32>
    %353 = vector.broadcast %352 : vector<8x1xf32> to vector<8x32xf32>
    %354 = arith.mulf %349, %353 : vector<8x32xf32>
    %355 = vector.broadcast %334 : vector<1x32xf32> to vector<8x32xf32>
    %356 = arith.mulf %354, %355 : vector<8x32xf32>
    %357 = vector.broadcast %336 : vector<1x32xf32> to vector<8x32xf32>
    %358 = arith.addf %356, %357 : vector<8x32xf32>
    %359 = arith.addf %358, %5 : vector<8x32xf32>
    %c0_159 = arith.constant 0 : index
    %c0_160 = arith.constant 0 : index
    %c0_161 = arith.constant 0 : index
    %360 = vector.load %arg28[%c0_159, %c0_160, %c0_161] : memref<2x32x32xf32, #tpu.memory_space<vmem>>, vector<1x32x32xf32>
    %361 = vector.shape_cast %360 : vector<1x32x32xf32> to vector<32x32xf32>
    %362 = arith.truncf %359 : vector<8x32xf32> to vector<8x32xbf16>
    %363 = arith.truncf %361 : vector<32x32xf32> to vector<32x32xbf16>
    %cst_162 = arith.constant dense<0.000000e+00> : vector<8x32xf32>
    %364 = tpu.matmul %362, %363, %cst_162 {dimension_numbers = #tpu.dot_dimension_numbers<[1], [0], [0], [1], [0, 0, 1, 1], [], []>} : vector<8x32xbf16>, vector<32x32xbf16>, vector<8x32xf32> -> vector<8x32xf32>
    %c0_163 = arith.constant 0 : index
    %c0_164 = arith.constant 0 : index
    %c0_165 = arith.constant 0 : index
    %365 = vector.load %arg29[%c0_163, %c0_164, %c0_165] : memref<2x1x32xf32, #tpu.memory_space<vmem>>, vector<1x1x32xf32>
    %366 = vector.shape_cast %365 : vector<1x1x32xf32> to vector<1x32xf32>
    %367 = vector.broadcast %366 : vector<1x32xf32> to vector<8x32xf32>
    %368 = arith.addf %364, %367 : vector<8x32xf32>
    %c0_166 = arith.constant 0 : index
    %c0_167 = arith.constant 0 : index
    %c0_168 = arith.constant 0 : index
    %369 = vector.load %arg30[%c0_166, %c0_167, %c0_168] : memref<2x32x32xf32, #tpu.memory_space<vmem>>, vector<1x32x32xf32>
    %370 = vector.shape_cast %369 : vector<1x32x32xf32> to vector<32x32xf32>
    %371 = arith.truncf %210 : vector<32x32xf32> to vector<32x32xbf16>
    %372 = arith.truncf %370 : vector<32x32xf32> to vector<32x32xbf16>
    %cst_169 = arith.constant dense<0.000000e+00> : vector<32x32xf32>
    %373 = tpu.matmul %371, %372, %cst_169 {dimension_numbers = #tpu.dot_dimension_numbers<[1], [0], [0], [1], [0, 0, 1, 1], [], []>} : vector<32x32xbf16>, vector<32x32xbf16>, vector<32x32xf32> -> vector<32x32xf32>
    %c0_170 = arith.constant 0 : index
    %c0_171 = arith.constant 0 : index
    %c0_172 = arith.constant 0 : index
    %374 = vector.load %arg31[%c0_170, %c0_171, %c0_172] : memref<2x1x32xf32, #tpu.memory_space<vmem>>, vector<1x1x32xf32>
    %375 = vector.shape_cast %374 : vector<1x1x32xf32> to vector<1x32xf32>
    %376 = vector.broadcast %375 : vector<1x32xf32> to vector<32x32xf32>
    %377 = arith.addf %373, %376 : vector<32x32xf32>
    %c0_173 = arith.constant 0 : index
    %c0_174 = arith.constant 0 : index
    %c0_175 = arith.constant 0 : index
    %378 = vector.load %arg32[%c0_173, %c0_174, %c0_175] : memref<2x32x32xf32, #tpu.memory_space<vmem>>, vector<1x32x32xf32>
    %379 = vector.shape_cast %378 : vector<1x32x32xf32> to vector<32x32xf32>
    %380 = arith.truncf %209 : vector<32x32xf32> to vector<32x32xbf16>
    %381 = arith.truncf %379 : vector<32x32xf32> to vector<32x32xbf16>
    %cst_176 = arith.constant dense<0.000000e+00> : vector<32x32xf32>
    %382 = tpu.matmul %380, %381, %cst_176 {dimension_numbers = #tpu.dot_dimension_numbers<[1], [0], [0], [1], [0, 0, 1, 1], [], []>} : vector<32x32xbf16>, vector<32x32xbf16>, vector<32x32xf32> -> vector<32x32xf32>
    %c0_177 = arith.constant 0 : index
    %c0_178 = arith.constant 0 : index
    %c0_179 = arith.constant 0 : index
    %383 = vector.load %arg33[%c0_177, %c0_178, %c0_179] : memref<2x1x32xf32, #tpu.memory_space<vmem>>, vector<1x1x32xf32>
    %384 = vector.shape_cast %383 : vector<1x1x32xf32> to vector<1x32xf32>
    %385 = vector.broadcast %384 : vector<1x32xf32> to vector<32x32xf32>
    %386 = arith.addf %382, %385 : vector<32x32xf32>
    %c0_180 = arith.constant 0 : index
    %c0_181 = arith.constant 0 : index
    %c0_182 = arith.constant 0 : index
    %387 = vector.load %arg34[%c0_180, %c0_181, %c0_182] : memref<2x32x32xf32, #tpu.memory_space<vmem>>, vector<1x32x32xf32>
    %388 = vector.shape_cast %387 : vector<1x32x32xf32> to vector<32x32xf32>
    %c0_183 = arith.constant 0 : index
    %c0_184 = arith.constant 0 : index
    %c0_185 = arith.constant 0 : index
    %389 = vector.load %arg35[%c0_183, %c0_184, %c0_185] : memref<2x1x32xf32, #tpu.memory_space<vmem>>, vector<1x1x32xf32>
    %390 = vector.shape_cast %389 : vector<1x1x32xf32> to vector<1x32xf32>
    %391 = vector.extract_strided_slice %368 {offsets = [0, 0], sizes = [8, 8], strides = [1, 1]} : vector<8x32xf32> to vector<8x8xf32>
    %392 = vector.extract_strided_slice %377 {offsets = [0, 0], sizes = [32, 8], strides = [1, 1]} : vector<32x32xf32> to vector<32x8xf32>
    %393 = vector.extract_strided_slice %386 {offsets = [0, 0], sizes = [32, 8], strides = [1, 1]} : vector<32x32xf32> to vector<32x8xf32>
    %394 = tpu.transpose %392, [1, 0] : vector<32x8xf32> -> vector<8x32xf32>
    %cst_186 = arith.constant dense<0.000000e+00> : vector<8x32xf32>
    %395 = tpu.matmul %391, %394, %cst_186 {dimension_numbers = #tpu.dot_dimension_numbers<[1], [0], [0], [1], [0, 0, 1, 1], [], []>} : vector<8x8xf32>, vector<8x32xf32>, vector<8x32xf32> -> vector<8x32xf32>
    %cst_187 = arith.constant 0.353553385 : f32
    %396 = vector.broadcast %cst_187 : f32 to vector<8x32xf32>
    %397 = arith.mulf %395, %396 : vector<8x32xf32>
    %cst_188 = arith.constant dense<0xFF800000> : vector<8xf32>
    %398 = vector.multi_reduction <maximumf>, %397, %cst_188 [1] : vector<8x32xf32> to vector<8xf32>
    %399 = vector.shape_cast %398 : vector<8xf32> to vector<8x1xf32>
    %400 = vector.broadcast %399 : vector<8x1xf32> to vector<8x32xf32>
    %401 = arith.subf %397, %400 : vector<8x32xf32>
    %402 = math.exp %401 : vector<8x32xf32>
    %cst_189 = arith.constant dense<0.000000e+00> : vector<8xf32>
    %403 = vector.multi_reduction <add>, %402, %cst_189 [1] : vector<8x32xf32> to vector<8xf32>
    %404 = vector.shape_cast %403 : vector<8xf32> to vector<8x1xf32>
    %405 = tpu.reciprocal %404 {approx = true} : vector<8x1xf32> -> vector<8x1xf32>
    %406 = vector.broadcast %405 : vector<8x1xf32> to vector<8x32xf32>
    %407 = arith.mulf %402, %406 : vector<8x32xf32>
    %cst_190 = arith.constant dense<0.000000e+00> : vector<8x8xf32>
    %408 = tpu.matmul %407, %393, %cst_190 {dimension_numbers = #tpu.dot_dimension_numbers<[1], [0], [0], [1], [0, 0, 1, 1], [], []>} : vector<8x32xf32>, vector<32x8xf32>, vector<8x8xf32> -> vector<8x8xf32>
    %409 = vector.extract_strided_slice %388 {offsets = [0, 0], sizes = [8, 32], strides = [1, 1]} : vector<32x32xf32> to vector<8x32xf32>
    %410 = arith.truncf %408 : vector<8x8xf32> to vector<8x8xbf16>
    %411 = arith.truncf %409 : vector<8x32xf32> to vector<8x32xbf16>
    %cst_191 = arith.constant dense<0.000000e+00> : vector<8x32xf32>
    %412 = tpu.matmul %410, %411, %cst_191 {dimension_numbers = #tpu.dot_dimension_numbers<[1], [0], [0], [1], [0, 0, 1, 1], [], []>} : vector<8x8xbf16>, vector<8x32xbf16>, vector<8x32xf32> -> vector<8x32xf32>
    %413 = vector.extract_strided_slice %368 {offsets = [0, 8], sizes = [8, 8], strides = [1, 1]} : vector<8x32xf32> to vector<8x8xf32>
    %414 = vector.extract_strided_slice %377 {offsets = [0, 8], sizes = [32, 8], strides = [1, 1]} : vector<32x32xf32> to vector<32x8xf32>
    %415 = vector.extract_strided_slice %386 {offsets = [0, 8], sizes = [32, 8], strides = [1, 1]} : vector<32x32xf32> to vector<32x8xf32>
    %416 = tpu.transpose %414, [1, 0] : vector<32x8xf32> -> vector<8x32xf32>
    %cst_192 = arith.constant dense<0.000000e+00> : vector<8x32xf32>
    %417 = tpu.matmul %413, %416, %cst_192 {dimension_numbers = #tpu.dot_dimension_numbers<[1], [0], [0], [1], [0, 0, 1, 1], [], []>} : vector<8x8xf32>, vector<8x32xf32>, vector<8x32xf32> -> vector<8x32xf32>
    %cst_193 = arith.constant 0.353553385 : f32
    %418 = vector.broadcast %cst_193 : f32 to vector<8x32xf32>
    %419 = arith.mulf %417, %418 : vector<8x32xf32>
    %cst_194 = arith.constant dense<0xFF800000> : vector<8xf32>
    %420 = vector.multi_reduction <maximumf>, %419, %cst_194 [1] : vector<8x32xf32> to vector<8xf32>
    %421 = vector.shape_cast %420 : vector<8xf32> to vector<8x1xf32>
    %422 = vector.broadcast %421 : vector<8x1xf32> to vector<8x32xf32>
    %423 = arith.subf %419, %422 : vector<8x32xf32>
    %424 = math.exp %423 : vector<8x32xf32>
    %cst_195 = arith.constant dense<0.000000e+00> : vector<8xf32>
    %425 = vector.multi_reduction <add>, %424, %cst_195 [1] : vector<8x32xf32> to vector<8xf32>
    %426 = vector.shape_cast %425 : vector<8xf32> to vector<8x1xf32>
    %427 = tpu.reciprocal %426 {approx = true} : vector<8x1xf32> -> vector<8x1xf32>
    %428 = vector.broadcast %427 : vector<8x1xf32> to vector<8x32xf32>
    %429 = arith.mulf %424, %428 : vector<8x32xf32>
    %cst_196 = arith.constant dense<0.000000e+00> : vector<8x8xf32>
    %430 = tpu.matmul %429, %415, %cst_196 {dimension_numbers = #tpu.dot_dimension_numbers<[1], [0], [0], [1], [0, 0, 1, 1], [], []>} : vector<8x32xf32>, vector<32x8xf32>, vector<8x8xf32> -> vector<8x8xf32>
    %431 = vector.extract_strided_slice %388 {offsets = [8, 0], sizes = [8, 32], strides = [1, 1]} : vector<32x32xf32> to vector<8x32xf32>
    %432 = arith.truncf %430 : vector<8x8xf32> to vector<8x8xbf16>
    %433 = arith.truncf %431 : vector<8x32xf32> to vector<8x32xbf16>
    %cst_197 = arith.constant dense<0.000000e+00> : vector<8x32xf32>
    %434 = tpu.matmul %432, %433, %cst_197 {dimension_numbers = #tpu.dot_dimension_numbers<[1], [0], [0], [1], [0, 0, 1, 1], [], []>} : vector<8x8xbf16>, vector<8x32xbf16>, vector<8x32xf32> -> vector<8x32xf32>
    %435 = arith.addf %412, %434 : vector<8x32xf32>
    %436 = vector.extract_strided_slice %368 {offsets = [0, 16], sizes = [8, 8], strides = [1, 1]} : vector<8x32xf32> to vector<8x8xf32>
    %437 = vector.extract_strided_slice %377 {offsets = [0, 16], sizes = [32, 8], strides = [1, 1]} : vector<32x32xf32> to vector<32x8xf32>
    %438 = vector.extract_strided_slice %386 {offsets = [0, 16], sizes = [32, 8], strides = [1, 1]} : vector<32x32xf32> to vector<32x8xf32>
    %439 = tpu.transpose %437, [1, 0] : vector<32x8xf32> -> vector<8x32xf32>
    %cst_198 = arith.constant dense<0.000000e+00> : vector<8x32xf32>
    %440 = tpu.matmul %436, %439, %cst_198 {dimension_numbers = #tpu.dot_dimension_numbers<[1], [0], [0], [1], [0, 0, 1, 1], [], []>} : vector<8x8xf32>, vector<8x32xf32>, vector<8x32xf32> -> vector<8x32xf32>
    %cst_199 = arith.constant 0.353553385 : f32
    %441 = vector.broadcast %cst_199 : f32 to vector<8x32xf32>
    %442 = arith.mulf %440, %441 : vector<8x32xf32>
    %cst_200 = arith.constant dense<0xFF800000> : vector<8xf32>
    %443 = vector.multi_reduction <maximumf>, %442, %cst_200 [1] : vector<8x32xf32> to vector<8xf32>
    %444 = vector.shape_cast %443 : vector<8xf32> to vector<8x1xf32>
    %445 = vector.broadcast %444 : vector<8x1xf32> to vector<8x32xf32>
    %446 = arith.subf %442, %445 : vector<8x32xf32>
    %447 = math.exp %446 : vector<8x32xf32>
    %cst_201 = arith.constant dense<0.000000e+00> : vector<8xf32>
    %448 = vector.multi_reduction <add>, %447, %cst_201 [1] : vector<8x32xf32> to vector<8xf32>
    %449 = vector.shape_cast %448 : vector<8xf32> to vector<8x1xf32>
    %450 = tpu.reciprocal %449 {approx = true} : vector<8x1xf32> -> vector<8x1xf32>
    %451 = vector.broadcast %450 : vector<8x1xf32> to vector<8x32xf32>
    %452 = arith.mulf %447, %451 : vector<8x32xf32>
    %cst_202 = arith.constant dense<0.000000e+00> : vector<8x8xf32>
    %453 = tpu.matmul %452, %438, %cst_202 {dimension_numbers = #tpu.dot_dimension_numbers<[1], [0], [0], [1], [0, 0, 1, 1], [], []>} : vector<8x32xf32>, vector<32x8xf32>, vector<8x8xf32> -> vector<8x8xf32>
    %454 = vector.extract_strided_slice %388 {offsets = [16, 0], sizes = [8, 32], strides = [1, 1]} : vector<32x32xf32> to vector<8x32xf32>
    %455 = arith.truncf %453 : vector<8x8xf32> to vector<8x8xbf16>
    %456 = arith.truncf %454 : vector<8x32xf32> to vector<8x32xbf16>
    %cst_203 = arith.constant dense<0.000000e+00> : vector<8x32xf32>
    %457 = tpu.matmul %455, %456, %cst_203 {dimension_numbers = #tpu.dot_dimension_numbers<[1], [0], [0], [1], [0, 0, 1, 1], [], []>} : vector<8x8xbf16>, vector<8x32xbf16>, vector<8x32xf32> -> vector<8x32xf32>
    %458 = arith.addf %435, %457 : vector<8x32xf32>
    %459 = vector.extract_strided_slice %368 {offsets = [0, 24], sizes = [8, 8], strides = [1, 1]} : vector<8x32xf32> to vector<8x8xf32>
    %460 = vector.extract_strided_slice %377 {offsets = [0, 24], sizes = [32, 8], strides = [1, 1]} : vector<32x32xf32> to vector<32x8xf32>
    %461 = vector.extract_strided_slice %386 {offsets = [0, 24], sizes = [32, 8], strides = [1, 1]} : vector<32x32xf32> to vector<32x8xf32>
    %462 = tpu.transpose %460, [1, 0] : vector<32x8xf32> -> vector<8x32xf32>
    %cst_204 = arith.constant dense<0.000000e+00> : vector<8x32xf32>
    %463 = tpu.matmul %459, %462, %cst_204 {dimension_numbers = #tpu.dot_dimension_numbers<[1], [0], [0], [1], [0, 0, 1, 1], [], []>} : vector<8x8xf32>, vector<8x32xf32>, vector<8x32xf32> -> vector<8x32xf32>
    %cst_205 = arith.constant 0.353553385 : f32
    %464 = vector.broadcast %cst_205 : f32 to vector<8x32xf32>
    %465 = arith.mulf %463, %464 : vector<8x32xf32>
    %cst_206 = arith.constant dense<0xFF800000> : vector<8xf32>
    %466 = vector.multi_reduction <maximumf>, %465, %cst_206 [1] : vector<8x32xf32> to vector<8xf32>
    %467 = vector.shape_cast %466 : vector<8xf32> to vector<8x1xf32>
    %468 = vector.broadcast %467 : vector<8x1xf32> to vector<8x32xf32>
    %469 = arith.subf %465, %468 : vector<8x32xf32>
    %470 = math.exp %469 : vector<8x32xf32>
    %cst_207 = arith.constant dense<0.000000e+00> : vector<8xf32>
    %471 = vector.multi_reduction <add>, %470, %cst_207 [1] : vector<8x32xf32> to vector<8xf32>
    %472 = vector.shape_cast %471 : vector<8xf32> to vector<8x1xf32>
    %473 = tpu.reciprocal %472 {approx = true} : vector<8x1xf32> -> vector<8x1xf32>
    %474 = vector.broadcast %473 : vector<8x1xf32> to vector<8x32xf32>
    %475 = arith.mulf %470, %474 : vector<8x32xf32>
    %cst_208 = arith.constant dense<0.000000e+00> : vector<8x8xf32>
    %476 = tpu.matmul %475, %461, %cst_208 {dimension_numbers = #tpu.dot_dimension_numbers<[1], [0], [0], [1], [0, 0, 1, 1], [], []>} : vector<8x32xf32>, vector<32x8xf32>, vector<8x8xf32> -> vector<8x8xf32>
    %477 = vector.extract_strided_slice %388 {offsets = [24, 0], sizes = [8, 32], strides = [1, 1]} : vector<32x32xf32> to vector<8x32xf32>
    %478 = arith.truncf %476 : vector<8x8xf32> to vector<8x8xbf16>
    %479 = arith.truncf %477 : vector<8x32xf32> to vector<8x32xbf16>
    %cst_209 = arith.constant dense<0.000000e+00> : vector<8x32xf32>
    %480 = tpu.matmul %478, %479, %cst_209 {dimension_numbers = #tpu.dot_dimension_numbers<[1], [0], [0], [1], [0, 0, 1, 1], [], []>} : vector<8x8xbf16>, vector<8x32xbf16>, vector<8x32xf32> -> vector<8x32xf32>
    %481 = arith.addf %458, %480 : vector<8x32xf32>
    %482 = vector.broadcast %390 : vector<1x32xf32> to vector<8x32xf32>
    %483 = arith.addf %481, %482 : vector<8x32xf32>
    %484 = arith.addf %358, %483 : vector<8x32xf32>
    %c0_210 = arith.constant 0 : index
    %c0_211 = arith.constant 0 : index
    %c0_212 = arith.constant 0 : index
    %485 = vector.load %arg42[%c0_210, %c0_211, %c0_212] : memref<2x1x32xf32, #tpu.memory_space<vmem>>, vector<1x1x32xf32>
    %486 = vector.shape_cast %485 : vector<1x1x32xf32> to vector<1x32xf32>
    %c0_213 = arith.constant 0 : index
    %c0_214 = arith.constant 0 : index
    %c0_215 = arith.constant 0 : index
    %487 = vector.load %arg43[%c0_213, %c0_214, %c0_215] : memref<2x1x32xf32, #tpu.memory_space<vmem>>, vector<1x1x32xf32>
    %488 = vector.shape_cast %487 : vector<1x1x32xf32> to vector<1x32xf32>
    %cst_216 = arith.constant dense<0.000000e+00> : vector<8xf32>
    %489 = vector.multi_reduction <add>, %484, %cst_216 [1] : vector<8x32xf32> to vector<8xf32>
    %490 = vector.shape_cast %489 : vector<8xf32> to vector<8x1xf32>
    %cst_217 = arith.constant 3.200000e+01 : f32
    %491 = vector.broadcast %cst_217 : f32 to vector<8x1xf32>
    %492 = arith.divf %490, %491 : vector<8x1xf32>
    %493 = vector.broadcast %492 : vector<8x1xf32> to vector<8x32xf32>
    %494 = arith.subf %484, %493 : vector<8x32xf32>
    %495 = arith.mulf %494, %494 : vector<8x32xf32>
    %cst_218 = arith.constant dense<0.000000e+00> : vector<8xf32>
    %496 = vector.multi_reduction <add>, %495, %cst_218 [1] : vector<8x32xf32> to vector<8xf32>
    %497 = vector.shape_cast %496 : vector<8xf32> to vector<8x1xf32>
    %cst_219 = arith.constant 3.200000e+01 : f32
    %498 = vector.broadcast %cst_219 : f32 to vector<8x1xf32>
    %499 = arith.divf %497, %498 : vector<8x1xf32>
    %500 = vector.broadcast %492 : vector<8x1xf32> to vector<8x32xf32>
    %501 = arith.subf %484, %500 : vector<8x32xf32>
    %cst_220 = arith.constant 9.99999974E-6 : f32
    %502 = vector.broadcast %cst_220 : f32 to vector<8x1xf32>
    %503 = arith.addf %499, %502 : vector<8x1xf32>
    %504 = math.rsqrt %503 : vector<8x1xf32>
    %505 = vector.broadcast %504 : vector<8x1xf32> to vector<8x32xf32>
    %506 = arith.mulf %501, %505 : vector<8x32xf32>
    %507 = vector.broadcast %486 : vector<1x32xf32> to vector<8x32xf32>
    %508 = arith.mulf %506, %507 : vector<8x32xf32>
    %509 = vector.broadcast %488 : vector<1x32xf32> to vector<8x32xf32>
    %510 = arith.addf %508, %509 : vector<8x32xf32>
    %c0_221 = arith.constant 0 : index
    %c0_222 = arith.constant 0 : index
    %c0_223 = arith.constant 0 : index
    %511 = vector.load %arg36[%c0_221, %c0_222, %c0_223] : memref<2x32x64xf32, #tpu.memory_space<vmem>>, vector<1x32x64xf32>
    %512 = vector.shape_cast %511 : vector<1x32x64xf32> to vector<32x64xf32>
    %513 = arith.truncf %510 : vector<8x32xf32> to vector<8x32xbf16>
    %514 = arith.truncf %512 : vector<32x64xf32> to vector<32x64xbf16>
    %cst_224 = arith.constant dense<0.000000e+00> : vector<8x64xf32>
    %515 = tpu.matmul %513, %514, %cst_224 {dimension_numbers = #tpu.dot_dimension_numbers<[1], [0], [0], [1], [0, 0, 1, 1], [], []>} : vector<8x32xbf16>, vector<32x64xbf16>, vector<8x64xf32> -> vector<8x64xf32>
    %c0_225 = arith.constant 0 : index
    %c0_226 = arith.constant 0 : index
    %c0_227 = arith.constant 0 : index
    %516 = vector.load %arg37[%c0_225, %c0_226, %c0_227] : memref<2x1x64xf32, #tpu.memory_space<vmem>>, vector<1x1x64xf32>
    %517 = vector.shape_cast %516 : vector<1x1x64xf32> to vector<1x64xf32>
    %518 = vector.broadcast %517 : vector<1x64xf32> to vector<8x64xf32>
    %519 = arith.addf %515, %518 : vector<8x64xf32>
    %cst_228 = arith.constant 0.000000e+00 : f32
    %520 = vector.broadcast %cst_228 : f32 to vector<8x64xf32>
    %521 = arith.maximumf %519, %520 : vector<8x64xf32>
    %c0_229 = arith.constant 0 : index
    %c0_230 = arith.constant 0 : index
    %c0_231 = arith.constant 0 : index
    %522 = vector.load %arg38[%c0_229, %c0_230, %c0_231] : memref<2x64x32xf32, #tpu.memory_space<vmem>>, vector<1x64x32xf32>
    %523 = vector.shape_cast %522 : vector<1x64x32xf32> to vector<64x32xf32>
    %524 = arith.truncf %521 : vector<8x64xf32> to vector<8x64xbf16>
    %525 = arith.truncf %523 : vector<64x32xf32> to vector<64x32xbf16>
    %cst_232 = arith.constant dense<0.000000e+00> : vector<8x32xf32>
    %526 = tpu.matmul %524, %525, %cst_232 {dimension_numbers = #tpu.dot_dimension_numbers<[1], [0], [0], [1], [0, 0, 1, 1], [], []>} : vector<8x64xbf16>, vector<64x32xbf16>, vector<8x32xf32> -> vector<8x32xf32>
    %c0_233 = arith.constant 0 : index
    %c0_234 = arith.constant 0 : index
    %c0_235 = arith.constant 0 : index
    %527 = vector.load %arg39[%c0_233, %c0_234, %c0_235] : memref<2x1x32xf32, #tpu.memory_space<vmem>>, vector<1x1x32xf32>
    %528 = vector.shape_cast %527 : vector<1x1x32xf32> to vector<1x32xf32>
    %529 = vector.broadcast %528 : vector<1x32xf32> to vector<8x32xf32>
    %530 = arith.addf %526, %529 : vector<8x32xf32>
    %531 = arith.addf %510, %530 : vector<8x32xf32>
    %c0_236 = arith.constant 0 : index
    %c0_237 = arith.constant 0 : index
    %c0_238 = arith.constant 0 : index
    %532 = vector.load %arg44[%c0_236, %c0_237, %c0_238] : memref<2x1x32xf32, #tpu.memory_space<vmem>>, vector<1x1x32xf32>
    %533 = vector.shape_cast %532 : vector<1x1x32xf32> to vector<1x32xf32>
    %c0_239 = arith.constant 0 : index
    %c0_240 = arith.constant 0 : index
    %c0_241 = arith.constant 0 : index
    %534 = vector.load %arg45[%c0_239, %c0_240, %c0_241] : memref<2x1x32xf32, #tpu.memory_space<vmem>>, vector<1x1x32xf32>
    %535 = vector.shape_cast %534 : vector<1x1x32xf32> to vector<1x32xf32>
    %cst_242 = arith.constant dense<0.000000e+00> : vector<8xf32>
    %536 = vector.multi_reduction <add>, %531, %cst_242 [1] : vector<8x32xf32> to vector<8xf32>
    %537 = vector.shape_cast %536 : vector<8xf32> to vector<8x1xf32>
    %cst_243 = arith.constant 3.200000e+01 : f32
    %538 = vector.broadcast %cst_243 : f32 to vector<8x1xf32>
    %539 = arith.divf %537, %538 : vector<8x1xf32>
    %540 = vector.broadcast %539 : vector<8x1xf32> to vector<8x32xf32>
    %541 = arith.subf %531, %540 : vector<8x32xf32>
    %542 = arith.mulf %541, %541 : vector<8x32xf32>
    %cst_244 = arith.constant dense<0.000000e+00> : vector<8xf32>
    %543 = vector.multi_reduction <add>, %542, %cst_244 [1] : vector<8x32xf32> to vector<8xf32>
    %544 = vector.shape_cast %543 : vector<8xf32> to vector<8x1xf32>
    %cst_245 = arith.constant 3.200000e+01 : f32
    %545 = vector.broadcast %cst_245 : f32 to vector<8x1xf32>
    %546 = arith.divf %544, %545 : vector<8x1xf32>
    %547 = vector.broadcast %539 : vector<8x1xf32> to vector<8x32xf32>
    %548 = arith.subf %531, %547 : vector<8x32xf32>
    %cst_246 = arith.constant 9.99999974E-6 : f32
    %549 = vector.broadcast %cst_246 : f32 to vector<8x1xf32>
    %550 = arith.addf %546, %549 : vector<8x1xf32>
    %551 = math.rsqrt %550 : vector<8x1xf32>
    %552 = vector.broadcast %551 : vector<8x1xf32> to vector<8x32xf32>
    %553 = arith.mulf %548, %552 : vector<8x32xf32>
    %554 = vector.broadcast %533 : vector<1x32xf32> to vector<8x32xf32>
    %555 = arith.mulf %553, %554 : vector<8x32xf32>
    %556 = vector.broadcast %535 : vector<1x32xf32> to vector<8x32xf32>
    %557 = arith.addf %555, %556 : vector<8x32xf32>
    %cst_247 = arith.constant dense<0.000000e+00> : vector<8xf32>
    %558 = vector.multi_reduction <add>, %557, %cst_247 [1] : vector<8x32xf32> to vector<8xf32>
    %559 = vector.shape_cast %558 : vector<8xf32> to vector<8x1xf32>
    %cst_248 = arith.constant 3.200000e+01 : f32
    %560 = vector.broadcast %cst_248 : f32 to vector<8x1xf32>
    %561 = arith.divf %559, %560 : vector<8x1xf32>
    %562 = vector.broadcast %561 : vector<8x1xf32> to vector<8x32xf32>
    %563 = arith.subf %557, %562 : vector<8x32xf32>
    %564 = arith.mulf %563, %563 : vector<8x32xf32>
    %cst_249 = arith.constant dense<0.000000e+00> : vector<8xf32>
    %565 = vector.multi_reduction <add>, %564, %cst_249 [1] : vector<8x32xf32> to vector<8xf32>
    %566 = vector.shape_cast %565 : vector<8xf32> to vector<8x1xf32>
    %cst_250 = arith.constant 3.200000e+01 : f32
    %567 = vector.broadcast %cst_250 : f32 to vector<8x1xf32>
    %568 = arith.divf %566, %567 : vector<8x1xf32>
    %569 = vector.broadcast %561 : vector<8x1xf32> to vector<8x32xf32>
    %570 = arith.subf %557, %569 : vector<8x32xf32>
    %cst_251 = arith.constant 9.99999974E-6 : f32
    %571 = vector.broadcast %cst_251 : f32 to vector<8x1xf32>
    %572 = arith.addf %568, %571 : vector<8x1xf32>
    %573 = math.rsqrt %572 : vector<8x1xf32>
    %574 = vector.broadcast %573 : vector<8x1xf32> to vector<8x32xf32>
    %575 = arith.mulf %570, %574 : vector<8x32xf32>
    %576 = vector.broadcast %211 : vector<1x32xf32> to vector<8x32xf32>
    %577 = arith.mulf %575, %576 : vector<8x32xf32>
    %578 = vector.broadcast %212 : vector<1x32xf32> to vector<8x32xf32>
    %579 = arith.addf %577, %578 : vector<8x32xf32>
    %c0_252 = arith.constant 0 : index
    %c0_253 = arith.constant 0 : index
    %580 = vector.load %arg48[%c0_252, %c0_253] : memref<32x32xf32, #tpu.memory_space<vmem>>, vector<32x32xf32>
    %581 = arith.truncf %579 : vector<8x32xf32> to vector<8x32xbf16>
    %582 = arith.truncf %580 : vector<32x32xf32> to vector<32x32xbf16>
    %cst_254 = arith.constant dense<0.000000e+00> : vector<8x32xf32>
    %583 = tpu.matmul %581, %582, %cst_254 {dimension_numbers = #tpu.dot_dimension_numbers<[1], [0], [0], [1], [0, 0, 1, 1], [], []>} : vector<8x32xbf16>, vector<32x32xbf16>, vector<8x32xf32> -> vector<8x32xf32>
    %c0_255 = arith.constant 0 : index
    %c0_256 = arith.constant 0 : index
    %584 = vector.load %arg49[%c0_255, %c0_256] : memref<1x32xf32, #tpu.memory_space<vmem>>, vector<1x32xf32>
    %585 = vector.broadcast %584 : vector<1x32xf32> to vector<8x32xf32>
    %586 = arith.addf %583, %585 : vector<8x32xf32>
    %cst_257 = arith.constant 0.000000e+00 : f32
    %587 = vector.broadcast %cst_257 : f32 to vector<8x32xf32>
    %588 = arith.maximumf %586, %587 : vector<8x32xf32>
    %c0_258 = arith.constant 0 : index
    %c0_259 = arith.constant 0 : index
    %589 = vector.load %arg50[%c0_258, %c0_259] : memref<32x32xf32, #tpu.memory_space<vmem>>, vector<32x32xf32>
    %590 = arith.truncf %588 : vector<8x32xf32> to vector<8x32xbf16>
    %591 = arith.truncf %589 : vector<32x32xf32> to vector<32x32xbf16>
    %cst_260 = arith.constant dense<0.000000e+00> : vector<8x32xf32>
    %592 = tpu.matmul %590, %591, %cst_260 {dimension_numbers = #tpu.dot_dimension_numbers<[1], [0], [0], [1], [0, 0, 1, 1], [], []>} : vector<8x32xbf16>, vector<32x32xbf16>, vector<8x32xf32> -> vector<8x32xf32>
    %c0_261 = arith.constant 0 : index
    %c0_262 = arith.constant 0 : index
    %593 = vector.load %arg51[%c0_261, %c0_262] : memref<1x32xf32, #tpu.memory_space<vmem>>, vector<1x32xf32>
    %594 = vector.broadcast %593 : vector<1x32xf32> to vector<8x32xf32>
    %595 = arith.addf %592, %594 : vector<8x32xf32>
    %cst_263 = arith.constant 0.000000e+00 : f32
    %596 = vector.broadcast %cst_263 : f32 to vector<8x32xf32>
    %597 = arith.maximumf %595, %596 : vector<8x32xf32>
    %c0_264 = arith.constant 0 : index
    %c0_265 = arith.constant 0 : index
    %598 = vector.load %arg52[%c0_264, %c0_265] : memref<32x2xf32, #tpu.memory_space<vmem>>, vector<32x2xf32>
    %cst_266 = arith.constant dense<0.000000e+00> : vector<8x2xf32>
    %599 = tpu.matmul %597, %598, %cst_266 {dimension_numbers = #tpu.dot_dimension_numbers<[1], [0], [0], [1], [0, 0, 1, 1], [], []>} : vector<8x32xf32>, vector<32x2xf32>, vector<8x2xf32> -> vector<8x2xf32>
    %c0_267 = arith.constant 0 : index
    %c0_268 = arith.constant 0 : index
    %600 = vector.load %arg53[%c0_267, %c0_268] : memref<1x2xf32, #tpu.memory_space<vmem>>, vector<1x2xf32>
    %601 = vector.broadcast %600 : vector<1x2xf32> to vector<8x2xf32>
    %602 = arith.addf %599, %601 : vector<8x2xf32>
    %c0_269 = arith.constant 0 : index
    %c0_270 = arith.constant 0 : index
    %c0_271 = arith.constant 0 : index
    %c0_272 = arith.constant 0 : index
    %603 = vector.load %arg54[%c0_269, %c0_270, %c0_271, %c0_272] : memref<2x1x8x2xf32, #tpu.memory_space<vmem>>, vector<1x1x8x2xf32>
    %604 = vector.shape_cast %603 : vector<1x1x8x2xf32> to vector<8x2xf32>
    %605 = vector.shape_cast %602 : vector<8x2xf32> to vector<1x1x8x2xf32>
    tpu.vector_store %arg54[%c0_269, %c0_270, %c0_271, %c0_272], %605 {strides = array<i32>} : memref<2x1x8x2xf32, #tpu.memory_space<vmem>>, vector<1x1x8x2xf32>,
    %606 = arith.addf %557, %5 : vector<8x32xf32>
    %c1 = arith.constant 1 : index
    %c0_273 = arith.constant 0 : index
    %c0_274 = arith.constant 0 : index
    %607 = vector.load %arg22[%c1, %c0_273, %c0_274] : memref<2x32x64xf32, #tpu.memory_space<vmem>>, vector<1x32x64xf32>
    %608 = vector.shape_cast %607 : vector<1x32x64xf32> to vector<32x64xf32>
    %609 = arith.truncf %606 : vector<8x32xf32> to vector<8x32xbf16>
    %610 = arith.truncf %608 : vector<32x64xf32> to vector<32x64xbf16>
    %cst_275 = arith.constant dense<0.000000e+00> : vector<8x64xf32>
    %611 = tpu.matmul %609, %610, %cst_275 {dimension_numbers = #tpu.dot_dimension_numbers<[1], [0], [0], [1], [0, 0, 1, 1], [], []>} : vector<8x32xbf16>, vector<32x64xbf16>, vector<8x64xf32> -> vector<8x64xf32>
    %c1_276 = arith.constant 1 : index
    %c0_277 = arith.constant 0 : index
    %c0_278 = arith.constant 0 : index
    %612 = vector.load %arg23[%c1_276, %c0_277, %c0_278] : memref<2x1x64xf32, #tpu.memory_space<vmem>>, vector<1x1x64xf32>
    %613 = vector.shape_cast %612 : vector<1x1x64xf32> to vector<1x64xf32>
    %614 = vector.broadcast %613 : vector<1x64xf32> to vector<8x64xf32>
    %615 = arith.addf %611, %614 : vector<8x64xf32>
    %616 = vector.extract_strided_slice %615 {offsets = [0, 0], sizes = [8, 32], strides = [1, 1]} : vector<8x64xf32> to vector<8x32xf32>
    %617 = vector.extract_strided_slice %615 {offsets = [0, 32], sizes = [8, 32], strides = [1, 1]} : vector<8x64xf32> to vector<8x32xf32>
    %c1_279 = arith.constant 1 : index
    %c0_280 = arith.constant 0 : index
    %c0_281 = arith.constant 0 : index
    %618 = vector.load %arg24[%c1_279, %c0_280, %c0_281] : memref<2x32x32xf32, #tpu.memory_space<vmem>>, vector<1x32x32xf32>
    %619 = vector.shape_cast %618 : vector<1x32x32xf32> to vector<32x32xf32>
    %620 = arith.truncf %557 : vector<8x32xf32> to vector<8x32xbf16>
    %621 = arith.truncf %619 : vector<32x32xf32> to vector<32x32xbf16>
    %cst_282 = arith.constant dense<0.000000e+00> : vector<8x32xf32>
    %622 = tpu.matmul %620, %621, %cst_282 {dimension_numbers = #tpu.dot_dimension_numbers<[1], [0], [0], [1], [0, 0, 1, 1], [], []>} : vector<8x32xbf16>, vector<32x32xbf16>, vector<8x32xf32> -> vector<8x32xf32>
    %c1_283 = arith.constant 1 : index
    %c0_284 = arith.constant 0 : index
    %c0_285 = arith.constant 0 : index
    %623 = vector.load %arg25[%c1_283, %c0_284, %c0_285] : memref<2x1x32xf32, #tpu.memory_space<vmem>>, vector<1x1x32xf32>
    %624 = vector.shape_cast %623 : vector<1x1x32xf32> to vector<1x32xf32>
    %625 = vector.broadcast %624 : vector<1x32xf32> to vector<8x32xf32>
    %626 = arith.addf %622, %625 : vector<8x32xf32>
    %c1_286 = arith.constant 1 : index
    %c0_287 = arith.constant 0 : index
    %c0_288 = arith.constant 0 : index
    %627 = vector.load %arg26[%c1_286, %c0_287, %c0_288] : memref<2x32x32xf32, #tpu.memory_space<vmem>>, vector<1x32x32xf32>
    %628 = vector.shape_cast %627 : vector<1x32x32xf32> to vector<32x32xf32>
    %c1_289 = arith.constant 1 : index
    %c0_290 = arith.constant 0 : index
    %c0_291 = arith.constant 0 : index
    %629 = vector.load %arg27[%c1_289, %c0_290, %c0_291] : memref<2x1x32xf32, #tpu.memory_space<vmem>>, vector<1x1x32xf32>
    %630 = vector.shape_cast %629 : vector<1x1x32xf32> to vector<1x32xf32>
    %631 = vector.extract_strided_slice %616 {offsets = [0, 0], sizes = [8, 8], strides = [1, 1]} : vector<8x32xf32> to vector<8x8xf32>
    %632 = vector.extract_strided_slice %617 {offsets = [0, 0], sizes = [8, 8], strides = [1, 1]} : vector<8x32xf32> to vector<8x8xf32>
    %633 = vector.extract_strided_slice %626 {offsets = [0, 0], sizes = [8, 8], strides = [1, 1]} : vector<8x32xf32> to vector<8x8xf32>
    %634 = tpu.transpose %632, [1, 0] : vector<8x8xf32> -> vector<8x8xf32>
    %cst_292 = arith.constant dense<0.000000e+00> : vector<8x8xf32>
    %635 = tpu.matmul %631, %634, %cst_292 {dimension_numbers = #tpu.dot_dimension_numbers<[1], [0], [0], [1], [0, 0, 1, 1], [], []>} : vector<8x8xf32>, vector<8x8xf32>, vector<8x8xf32> -> vector<8x8xf32>
    %cst_293 = arith.constant 0.353553385 : f32
    %636 = vector.broadcast %cst_293 : f32 to vector<8x8xf32>
    %637 = arith.mulf %635, %636 : vector<8x8xf32>
    %cst_294 = arith.constant dense<0xFF800000> : vector<8xf32>
    %638 = vector.multi_reduction <maximumf>, %637, %cst_294 [1] : vector<8x8xf32> to vector<8xf32>
    %639 = vector.shape_cast %638 : vector<8xf32> to vector<8x1xf32>
    %640 = vector.broadcast %639 : vector<8x1xf32> to vector<8x8xf32>
    %641 = arith.subf %637, %640 : vector<8x8xf32>
    %642 = math.exp %641 : vector<8x8xf32>
    %cst_295 = arith.constant dense<0.000000e+00> : vector<8xf32>
    %643 = vector.multi_reduction <add>, %642, %cst_295 [1] : vector<8x8xf32> to vector<8xf32>
    %644 = vector.shape_cast %643 : vector<8xf32> to vector<8x1xf32>
    %645 = tpu.reciprocal %644 {approx = true} : vector<8x1xf32> -> vector<8x1xf32>
    %646 = vector.broadcast %645 : vector<8x1xf32> to vector<8x8xf32>
    %647 = arith.mulf %642, %646 : vector<8x8xf32>
    %cst_296 = arith.constant dense<0.000000e+00> : vector<8x8xf32>
    %648 = tpu.matmul %647, %633, %cst_296 {dimension_numbers = #tpu.dot_dimension_numbers<[1], [0], [0], [1], [0, 0, 1, 1], [], []>} : vector<8x8xf32>, vector<8x8xf32>, vector<8x8xf32> -> vector<8x8xf32>
    %649 = vector.extract_strided_slice %628 {offsets = [0, 0], sizes = [8, 32], strides = [1, 1]} : vector<32x32xf32> to vector<8x32xf32>
    %650 = arith.truncf %648 : vector<8x8xf32> to vector<8x8xbf16>
    %651 = arith.truncf %649 : vector<8x32xf32> to vector<8x32xbf16>
    %cst_297 = arith.constant dense<0.000000e+00> : vector<8x32xf32>
    %652 = tpu.matmul %650, %651, %cst_297 {dimension_numbers = #tpu.dot_dimension_numbers<[1], [0], [0], [1], [0, 0, 1, 1], [], []>} : vector<8x8xbf16>, vector<8x32xbf16>, vector<8x32xf32> -> vector<8x32xf32>
    %653 = vector.extract_strided_slice %616 {offsets = [0, 8], sizes = [8, 8], strides = [1, 1]} : vector<8x32xf32> to vector<8x8xf32>
    %654 = vector.extract_strided_slice %617 {offsets = [0, 8], sizes = [8, 8], strides = [1, 1]} : vector<8x32xf32> to vector<8x8xf32>
    %655 = vector.extract_strided_slice %626 {offsets = [0, 8], sizes = [8, 8], strides = [1, 1]} : vector<8x32xf32> to vector<8x8xf32>
    %656 = tpu.transpose %654, [1, 0] : vector<8x8xf32> -> vector<8x8xf32>
    %cst_298 = arith.constant dense<0.000000e+00> : vector<8x8xf32>
    %657 = tpu.matmul %653, %656, %cst_298 {dimension_numbers = #tpu.dot_dimension_numbers<[1], [0], [0], [1], [0, 0, 1, 1], [], []>} : vector<8x8xf32>, vector<8x8xf32>, vector<8x8xf32> -> vector<8x8xf32>
    %cst_299 = arith.constant 0.353553385 : f32
    %658 = vector.broadcast %cst_299 : f32 to vector<8x8xf32>
    %659 = arith.mulf %657, %658 : vector<8x8xf32>
    %cst_300 = arith.constant dense<0xFF800000> : vector<8xf32>
    %660 = vector.multi_reduction <maximumf>, %659, %cst_300 [1] : vector<8x8xf32> to vector<8xf32>
    %661 = vector.shape_cast %660 : vector<8xf32> to vector<8x1xf32>
    %662 = vector.broadcast %661 : vector<8x1xf32> to vector<8x8xf32>
    %663 = arith.subf %659, %662 : vector<8x8xf32>
    %664 = math.exp %663 : vector<8x8xf32>
    %cst_301 = arith.constant dense<0.000000e+00> : vector<8xf32>
    %665 = vector.multi_reduction <add>, %664, %cst_301 [1] : vector<8x8xf32> to vector<8xf32>
    %666 = vector.shape_cast %665 : vector<8xf32> to vector<8x1xf32>
    %667 = tpu.reciprocal %666 {approx = true} : vector<8x1xf32> -> vector<8x1xf32>
    %668 = vector.broadcast %667 : vector<8x1xf32> to vector<8x8xf32>
    %669 = arith.mulf %664, %668 : vector<8x8xf32>
    %cst_302 = arith.constant dense<0.000000e+00> : vector<8x8xf32>
    %670 = tpu.matmul %669, %655, %cst_302 {dimension_numbers = #tpu.dot_dimension_numbers<[1], [0], [0], [1], [0, 0, 1, 1], [], []>} : vector<8x8xf32>, vector<8x8xf32>, vector<8x8xf32> -> vector<8x8xf32>
    %671 = vector.extract_strided_slice %628 {offsets = [8, 0], sizes = [8, 32], strides = [1, 1]} : vector<32x32xf32> to vector<8x32xf32>
    %672 = arith.truncf %670 : vector<8x8xf32> to vector<8x8xbf16>
    %673 = arith.truncf %671 : vector<8x32xf32> to vector<8x32xbf16>
    %cst_303 = arith.constant dense<0.000000e+00> : vector<8x32xf32>
    %674 = tpu.matmul %672, %673, %cst_303 {dimension_numbers = #tpu.dot_dimension_numbers<[1], [0], [0], [1], [0, 0, 1, 1], [], []>} : vector<8x8xbf16>, vector<8x32xbf16>, vector<8x32xf32> -> vector<8x32xf32>
    %675 = arith.addf %652, %674 : vector<8x32xf32>
    %676 = vector.extract_strided_slice %616 {offsets = [0, 16], sizes = [8, 8], strides = [1, 1]} : vector<8x32xf32> to vector<8x8xf32>
    %677 = vector.extract_strided_slice %617 {offsets = [0, 16], sizes = [8, 8], strides = [1, 1]} : vector<8x32xf32> to vector<8x8xf32>
    %678 = vector.extract_strided_slice %626 {offsets = [0, 16], sizes = [8, 8], strides = [1, 1]} : vector<8x32xf32> to vector<8x8xf32>
    %679 = tpu.transpose %677, [1, 0] : vector<8x8xf32> -> vector<8x8xf32>
    %cst_304 = arith.constant dense<0.000000e+00> : vector<8x8xf32>
    %680 = tpu.matmul %676, %679, %cst_304 {dimension_numbers = #tpu.dot_dimension_numbers<[1], [0], [0], [1], [0, 0, 1, 1], [], []>} : vector<8x8xf32>, vector<8x8xf32>, vector<8x8xf32> -> vector<8x8xf32>
    %cst_305 = arith.constant 0.353553385 : f32
    %681 = vector.broadcast %cst_305 : f32 to vector<8x8xf32>
    %682 = arith.mulf %680, %681 : vector<8x8xf32>
    %cst_306 = arith.constant dense<0xFF800000> : vector<8xf32>
    %683 = vector.multi_reduction <maximumf>, %682, %cst_306 [1] : vector<8x8xf32> to vector<8xf32>
    %684 = vector.shape_cast %683 : vector<8xf32> to vector<8x1xf32>
    %685 = vector.broadcast %684 : vector<8x1xf32> to vector<8x8xf32>
    %686 = arith.subf %682, %685 : vector<8x8xf32>
    %687 = math.exp %686 : vector<8x8xf32>
    %cst_307 = arith.constant dense<0.000000e+00> : vector<8xf32>
    %688 = vector.multi_reduction <add>, %687, %cst_307 [1] : vector<8x8xf32> to vector<8xf32>
    %689 = vector.shape_cast %688 : vector<8xf32> to vector<8x1xf32>
    %690 = tpu.reciprocal %689 {approx = true} : vector<8x1xf32> -> vector<8x1xf32>
    %691 = vector.broadcast %690 : vector<8x1xf32> to vector<8x8xf32>
    %692 = arith.mulf %687, %691 : vector<8x8xf32>
    %cst_308 = arith.constant dense<0.000000e+00> : vector<8x8xf32>
    %693 = tpu.matmul %692, %678, %cst_308 {dimension_numbers = #tpu.dot_dimension_numbers<[1], [0], [0], [1], [0, 0, 1, 1], [], []>} : vector<8x8xf32>, vector<8x8xf32>, vector<8x8xf32> -> vector<8x8xf32>
    %694 = vector.extract_strided_slice %628 {offsets = [16, 0], sizes = [8, 32], strides = [1, 1]} : vector<32x32xf32> to vector<8x32xf32>
    %695 = arith.truncf %693 : vector<8x8xf32> to vector<8x8xbf16>
    %696 = arith.truncf %694 : vector<8x32xf32> to vector<8x32xbf16>
    %cst_309 = arith.constant dense<0.000000e+00> : vector<8x32xf32>
    %697 = tpu.matmul %695, %696, %cst_309 {dimension_numbers = #tpu.dot_dimension_numbers<[1], [0], [0], [1], [0, 0, 1, 1], [], []>} : vector<8x8xbf16>, vector<8x32xbf16>, vector<8x32xf32> -> vector<8x32xf32>
    %698 = arith.addf %675, %697 : vector<8x32xf32>
    %699 = vector.extract_strided_slice %616 {offsets = [0, 24], sizes = [8, 8], strides = [1, 1]} : vector<8x32xf32> to vector<8x8xf32>
    %700 = vector.extract_strided_slice %617 {offsets = [0, 24], sizes = [8, 8], strides = [1, 1]} : vector<8x32xf32> to vector<8x8xf32>
    %701 = vector.extract_strided_slice %626 {offsets = [0, 24], sizes = [8, 8], strides = [1, 1]} : vector<8x32xf32> to vector<8x8xf32>
    %702 = tpu.transpose %700, [1, 0] : vector<8x8xf32> -> vector<8x8xf32>
    %cst_310 = arith.constant dense<0.000000e+00> : vector<8x8xf32>
    %703 = tpu.matmul %699, %702, %cst_310 {dimension_numbers = #tpu.dot_dimension_numbers<[1], [0], [0], [1], [0, 0, 1, 1], [], []>} : vector<8x8xf32>, vector<8x8xf32>, vector<8x8xf32> -> vector<8x8xf32>
    %cst_311 = arith.constant 0.353553385 : f32
    %704 = vector.broadcast %cst_311 : f32 to vector<8x8xf32>
    %705 = arith.mulf %703, %704 : vector<8x8xf32>
    %cst_312 = arith.constant dense<0xFF800000> : vector<8xf32>
    %706 = vector.multi_reduction <maximumf>, %705, %cst_312 [1] : vector<8x8xf32> to vector<8xf32>
    %707 = vector.shape_cast %706 : vector<8xf32> to vector<8x1xf32>
    %708 = vector.broadcast %707 : vector<8x1xf32> to vector<8x8xf32>
    %709 = arith.subf %705, %708 : vector<8x8xf32>
    %710 = math.exp %709 : vector<8x8xf32>
    %cst_313 = arith.constant dense<0.000000e+00> : vector<8xf32>
    %711 = vector.multi_reduction <add>, %710, %cst_313 [1] : vector<8x8xf32> to vector<8xf32>
    %712 = vector.shape_cast %711 : vector<8xf32> to vector<8x1xf32>
    %713 = tpu.reciprocal %712 {approx = true} : vector<8x1xf32> -> vector<8x1xf32>
    %714 = vector.broadcast %713 : vector<8x1xf32> to vector<8x8xf32>
    %715 = arith.mulf %710, %714 : vector<8x8xf32>
    %cst_314 = arith.constant dense<0.000000e+00> : vector<8x8xf32>
    %716 = tpu.matmul %715, %701, %cst_314 {dimension_numbers = #tpu.dot_dimension_numbers<[1], [0], [0], [1], [0, 0, 1, 1], [], []>} : vector<8x8xf32>, vector<8x8xf32>, vector<8x8xf32> -> vector<8x8xf32>
    %717 = vector.extract_strided_slice %628 {offsets = [24, 0], sizes = [8, 32], strides = [1, 1]} : vector<32x32xf32> to vector<8x32xf32>
    %718 = arith.truncf %716 : vector<8x8xf32> to vector<8x8xbf16>
    %719 = arith.truncf %717 : vector<8x32xf32> to vector<8x32xbf16>
    %cst_315 = arith.constant dense<0.000000e+00> : vector<8x32xf32>
    %720 = tpu.matmul %718, %719, %cst_315 {dimension_numbers = #tpu.dot_dimension_numbers<[1], [0], [0], [1], [0, 0, 1, 1], [], []>} : vector<8x8xbf16>, vector<8x32xbf16>, vector<8x32xf32> -> vector<8x32xf32>
    %721 = arith.addf %698, %720 : vector<8x32xf32>
    %722 = vector.broadcast %630 : vector<1x32xf32> to vector<8x32xf32>
    %723 = arith.addf %721, %722 : vector<8x32xf32>
    %724 = arith.addf %557, %723 : vector<8x32xf32>
    %c1_316 = arith.constant 1 : index
    %c0_317 = arith.constant 0 : index
    %c0_318 = arith.constant 0 : index
    %725 = vector.load %arg40[%c1_316, %c0_317, %c0_318] : memref<2x1x32xf32, #tpu.memory_space<vmem>>, vector<1x1x32xf32>
    %726 = vector.shape_cast %725 : vector<1x1x32xf32> to vector<1x32xf32>
    %c1_319 = arith.constant 1 : index
    %c0_320 = arith.constant 0 : index
    %c0_321 = arith.constant 0 : index
    %727 = vector.load %arg41[%c1_319, %c0_320, %c0_321] : memref<2x1x32xf32, #tpu.memory_space<vmem>>, vector<1x1x32xf32>
    %728 = vector.shape_cast %727 : vector<1x1x32xf32> to vector<1x32xf32>
    %cst_322 = arith.constant dense<0.000000e+00> : vector<8xf32>
    %729 = vector.multi_reduction <add>, %724, %cst_322 [1] : vector<8x32xf32> to vector<8xf32>
    %730 = vector.shape_cast %729 : vector<8xf32> to vector<8x1xf32>
    %cst_323 = arith.constant 3.200000e+01 : f32
    %731 = vector.broadcast %cst_323 : f32 to vector<8x1xf32>
    %732 = arith.divf %730, %731 : vector<8x1xf32>
    %733 = vector.broadcast %732 : vector<8x1xf32> to vector<8x32xf32>
    %734 = arith.subf %724, %733 : vector<8x32xf32>
    %735 = arith.mulf %734, %734 : vector<8x32xf32>
    %cst_324 = arith.constant dense<0.000000e+00> : vector<8xf32>
    %736 = vector.multi_reduction <add>, %735, %cst_324 [1] : vector<8x32xf32> to vector<8xf32>
    %737 = vector.shape_cast %736 : vector<8xf32> to vector<8x1xf32>
    %cst_325 = arith.constant 3.200000e+01 : f32
    %738 = vector.broadcast %cst_325 : f32 to vector<8x1xf32>
    %739 = arith.divf %737, %738 : vector<8x1xf32>
    %740 = vector.broadcast %732 : vector<8x1xf32> to vector<8x32xf32>
    %741 = arith.subf %724, %740 : vector<8x32xf32>
    %cst_326 = arith.constant 9.99999974E-6 : f32
    %742 = vector.broadcast %cst_326 : f32 to vector<8x1xf32>
    %743 = arith.addf %739, %742 : vector<8x1xf32>
    %744 = math.rsqrt %743 : vector<8x1xf32>
    %745 = vector.broadcast %744 : vector<8x1xf32> to vector<8x32xf32>
    %746 = arith.mulf %741, %745 : vector<8x32xf32>
    %747 = vector.broadcast %726 : vector<1x32xf32> to vector<8x32xf32>
    %748 = arith.mulf %746, %747 : vector<8x32xf32>
    %749 = vector.broadcast %728 : vector<1x32xf32> to vector<8x32xf32>
    %750 = arith.addf %748, %749 : vector<8x32xf32>
    %751 = arith.addf %750, %5 : vector<8x32xf32>
    %c1_327 = arith.constant 1 : index
    %c0_328 = arith.constant 0 : index
    %c0_329 = arith.constant 0 : index
    %752 = vector.load %arg28[%c1_327, %c0_328, %c0_329] : memref<2x32x32xf32, #tpu.memory_space<vmem>>, vector<1x32x32xf32>
    %753 = vector.shape_cast %752 : vector<1x32x32xf32> to vector<32x32xf32>
    %754 = arith.truncf %751 : vector<8x32xf32> to vector<8x32xbf16>
    %755 = arith.truncf %753 : vector<32x32xf32> to vector<32x32xbf16>
    %cst_330 = arith.constant dense<0.000000e+00> : vector<8x32xf32>
    %756 = tpu.matmul %754, %755, %cst_330 {dimension_numbers = #tpu.dot_dimension_numbers<[1], [0], [0], [1], [0, 0, 1, 1], [], []>} : vector<8x32xbf16>, vector<32x32xbf16>, vector<8x32xf32> -> vector<8x32xf32>
    %c1_331 = arith.constant 1 : index
    %c0_332 = arith.constant 0 : index
    %c0_333 = arith.constant 0 : index
    %757 = vector.load %arg29[%c1_331, %c0_332, %c0_333] : memref<2x1x32xf32, #tpu.memory_space<vmem>>, vector<1x1x32xf32>
    %758 = vector.shape_cast %757 : vector<1x1x32xf32> to vector<1x32xf32>
    %759 = vector.broadcast %758 : vector<1x32xf32> to vector<8x32xf32>
    %760 = arith.addf %756, %759 : vector<8x32xf32>
    %c1_334 = arith.constant 1 : index
    %c0_335 = arith.constant 0 : index
    %c0_336 = arith.constant 0 : index
    %761 = vector.load %arg30[%c1_334, %c0_335, %c0_336] : memref<2x32x32xf32, #tpu.memory_space<vmem>>, vector<1x32x32xf32>
    %762 = vector.shape_cast %761 : vector<1x32x32xf32> to vector<32x32xf32>
    %763 = arith.truncf %210 : vector<32x32xf32> to vector<32x32xbf16>
    %764 = arith.truncf %762 : vector<32x32xf32> to vector<32x32xbf16>
    %cst_337 = arith.constant dense<0.000000e+00> : vector<32x32xf32>
    %765 = tpu.matmul %763, %764, %cst_337 {dimension_numbers = #tpu.dot_dimension_numbers<[1], [0], [0], [1], [0, 0, 1, 1], [], []>} : vector<32x32xbf16>, vector<32x32xbf16>, vector<32x32xf32> -> vector<32x32xf32>
    %c1_338 = arith.constant 1 : index
    %c0_339 = arith.constant 0 : index
    %c0_340 = arith.constant 0 : index
    %766 = vector.load %arg31[%c1_338, %c0_339, %c0_340] : memref<2x1x32xf32, #tpu.memory_space<vmem>>, vector<1x1x32xf32>
    %767 = vector.shape_cast %766 : vector<1x1x32xf32> to vector<1x32xf32>
    %768 = vector.broadcast %767 : vector<1x32xf32> to vector<32x32xf32>
    %769 = arith.addf %765, %768 : vector<32x32xf32>
    %c1_341 = arith.constant 1 : index
    %c0_342 = arith.constant 0 : index
    %c0_343 = arith.constant 0 : index
    %770 = vector.load %arg32[%c1_341, %c0_342, %c0_343] : memref<2x32x32xf32, #tpu.memory_space<vmem>>, vector<1x32x32xf32>
    %771 = vector.shape_cast %770 : vector<1x32x32xf32> to vector<32x32xf32>
    %772 = arith.truncf %209 : vector<32x32xf32> to vector<32x32xbf16>
    %773 = arith.truncf %771 : vector<32x32xf32> to vector<32x32xbf16>
    %cst_344 = arith.constant dense<0.000000e+00> : vector<32x32xf32>
    %774 = tpu.matmul %772, %773, %cst_344 {dimension_numbers = #tpu.dot_dimension_numbers<[1], [0], [0], [1], [0, 0, 1, 1], [], []>} : vector<32x32xbf16>, vector<32x32xbf16>, vector<32x32xf32> -> vector<32x32xf32>
    %c1_345 = arith.constant 1 : index
    %c0_346 = arith.constant 0 : index
    %c0_347 = arith.constant 0 : index
    %775 = vector.load %arg33[%c1_345, %c0_346, %c0_347] : memref<2x1x32xf32, #tpu.memory_space<vmem>>, vector<1x1x32xf32>
    %776 = vector.shape_cast %775 : vector<1x1x32xf32> to vector<1x32xf32>
    %777 = vector.broadcast %776 : vector<1x32xf32> to vector<32x32xf32>
    %778 = arith.addf %774, %777 : vector<32x32xf32>
    %c1_348 = arith.constant 1 : index
    %c0_349 = arith.constant 0 : index
    %c0_350 = arith.constant 0 : index
    %779 = vector.load %arg34[%c1_348, %c0_349, %c0_350] : memref<2x32x32xf32, #tpu.memory_space<vmem>>, vector<1x32x32xf32>
    %780 = vector.shape_cast %779 : vector<1x32x32xf32> to vector<32x32xf32>
    %c1_351 = arith.constant 1 : index
    %c0_352 = arith.constant 0 : index
    %c0_353 = arith.constant 0 : index
    %781 = vector.load %arg35[%c1_351, %c0_352, %c0_353] : memref<2x1x32xf32, #tpu.memory_space<vmem>>, vector<1x1x32xf32>
    %782 = vector.shape_cast %781 : vector<1x1x32xf32> to vector<1x32xf32>
    %783 = vector.extract_strided_slice %760 {offsets = [0, 0], sizes = [8, 8], strides = [1, 1]} : vector<8x32xf32> to vector<8x8xf32>
    %784 = vector.extract_strided_slice %769 {offsets = [0, 0], sizes = [32, 8], strides = [1, 1]} : vector<32x32xf32> to vector<32x8xf32>
    %785 = vector.extract_strided_slice %778 {offsets = [0, 0], sizes = [32, 8], strides = [1, 1]} : vector<32x32xf32> to vector<32x8xf32>
    %786 = tpu.transpose %784, [1, 0] : vector<32x8xf32> -> vector<8x32xf32>
    %cst_354 = arith.constant dense<0.000000e+00> : vector<8x32xf32>
    %787 = tpu.matmul %783, %786, %cst_354 {dimension_numbers = #tpu.dot_dimension_numbers<[1], [0], [0], [1], [0, 0, 1, 1], [], []>} : vector<8x8xf32>, vector<8x32xf32>, vector<8x32xf32> -> vector<8x32xf32>
    %cst_355 = arith.constant 0.353553385 : f32
    %788 = vector.broadcast %cst_355 : f32 to vector<8x32xf32>
    %789 = arith.mulf %787, %788 : vector<8x32xf32>
    %cst_356 = arith.constant dense<0xFF800000> : vector<8xf32>
    %790 = vector.multi_reduction <maximumf>, %789, %cst_356 [1] : vector<8x32xf32> to vector<8xf32>
    %791 = vector.shape_cast %790 : vector<8xf32> to vector<8x1xf32>
    %792 = vector.broadcast %791 : vector<8x1xf32> to vector<8x32xf32>
    %793 = arith.subf %789, %792 : vector<8x32xf32>
    %794 = math.exp %793 : vector<8x32xf32>
    %cst_357 = arith.constant dense<0.000000e+00> : vector<8xf32>
    %795 = vector.multi_reduction <add>, %794, %cst_357 [1] : vector<8x32xf32> to vector<8xf32>
    %796 = vector.shape_cast %795 : vector<8xf32> to vector<8x1xf32>
    %797 = tpu.reciprocal %796 {approx = true} : vector<8x1xf32> -> vector<8x1xf32>
    %798 = vector.broadcast %797 : vector<8x1xf32> to vector<8x32xf32>
    %799 = arith.mulf %794, %798 : vector<8x32xf32>
    %cst_358 = arith.constant dense<0.000000e+00> : vector<8x8xf32>
    %800 = tpu.matmul %799, %785, %cst_358 {dimension_numbers = #tpu.dot_dimension_numbers<[1], [0], [0], [1], [0, 0, 1, 1], [], []>} : vector<8x32xf32>, vector<32x8xf32>, vector<8x8xf32> -> vector<8x8xf32>
    %801 = vector.extract_strided_slice %780 {offsets = [0, 0], sizes = [8, 32], strides = [1, 1]} : vector<32x32xf32> to vector<8x32xf32>
    %802 = arith.truncf %800 : vector<8x8xf32> to vector<8x8xbf16>
    %803 = arith.truncf %801 : vector<8x32xf32> to vector<8x32xbf16>
    %cst_359 = arith.constant dense<0.000000e+00> : vector<8x32xf32>
    %804 = tpu.matmul %802, %803, %cst_359 {dimension_numbers = #tpu.dot_dimension_numbers<[1], [0], [0], [1], [0, 0, 1, 1], [], []>} : vector<8x8xbf16>, vector<8x32xbf16>, vector<8x32xf32> -> vector<8x32xf32>
    %805 = vector.extract_strided_slice %760 {offsets = [0, 8], sizes = [8, 8], strides = [1, 1]} : vector<8x32xf32> to vector<8x8xf32>
    %806 = vector.extract_strided_slice %769 {offsets = [0, 8], sizes = [32, 8], strides = [1, 1]} : vector<32x32xf32> to vector<32x8xf32>
    %807 = vector.extract_strided_slice %778 {offsets = [0, 8], sizes = [32, 8], strides = [1, 1]} : vector<32x32xf32> to vector<32x8xf32>
    %808 = tpu.transpose %806, [1, 0] : vector<32x8xf32> -> vector<8x32xf32>
    %cst_360 = arith.constant dense<0.000000e+00> : vector<8x32xf32>
    %809 = tpu.matmul %805, %808, %cst_360 {dimension_numbers = #tpu.dot_dimension_numbers<[1], [0], [0], [1], [0, 0, 1, 1], [], []>} : vector<8x8xf32>, vector<8x32xf32>, vector<8x32xf32> -> vector<8x32xf32>
    %cst_361 = arith.constant 0.353553385 : f32
    %810 = vector.broadcast %cst_361 : f32 to vector<8x32xf32>
    %811 = arith.mulf %809, %810 : vector<8x32xf32>
    %cst_362 = arith.constant dense<0xFF800000> : vector<8xf32>
    %812 = vector.multi_reduction <maximumf>, %811, %cst_362 [1] : vector<8x32xf32> to vector<8xf32>
    %813 = vector.shape_cast %812 : vector<8xf32> to vector<8x1xf32>
    %814 = vector.broadcast %813 : vector<8x1xf32> to vector<8x32xf32>
    %815 = arith.subf %811, %814 : vector<8x32xf32>
    %816 = math.exp %815 : vector<8x32xf32>
    %cst_363 = arith.constant dense<0.000000e+00> : vector<8xf32>
    %817 = vector.multi_reduction <add>, %816, %cst_363 [1] : vector<8x32xf32> to vector<8xf32>
    %818 = vector.shape_cast %817 : vector<8xf32> to vector<8x1xf32>
    %819 = tpu.reciprocal %818 {approx = true} : vector<8x1xf32> -> vector<8x1xf32>
    %820 = vector.broadcast %819 : vector<8x1xf32> to vector<8x32xf32>
    %821 = arith.mulf %816, %820 : vector<8x32xf32>
    %cst_364 = arith.constant dense<0.000000e+00> : vector<8x8xf32>
    %822 = tpu.matmul %821, %807, %cst_364 {dimension_numbers = #tpu.dot_dimension_numbers<[1], [0], [0], [1], [0, 0, 1, 1], [], []>} : vector<8x32xf32>, vector<32x8xf32>, vector<8x8xf32> -> vector<8x8xf32>
    %823 = vector.extract_strided_slice %780 {offsets = [8, 0], sizes = [8, 32], strides = [1, 1]} : vector<32x32xf32> to vector<8x32xf32>
    %824 = arith.truncf %822 : vector<8x8xf32> to vector<8x8xbf16>
    %825 = arith.truncf %823 : vector<8x32xf32> to vector<8x32xbf16>
    %cst_365 = arith.constant dense<0.000000e+00> : vector<8x32xf32>
    %826 = tpu.matmul %824, %825, %cst_365 {dimension_numbers = #tpu.dot_dimension_numbers<[1], [0], [0], [1], [0, 0, 1, 1], [], []>} : vector<8x8xbf16>, vector<8x32xbf16>, vector<8x32xf32> -> vector<8x32xf32>
    %827 = arith.addf %804, %826 : vector<8x32xf32>
    %828 = vector.extract_strided_slice %760 {offsets = [0, 16], sizes = [8, 8], strides = [1, 1]} : vector<8x32xf32> to vector<8x8xf32>
    %829 = vector.extract_strided_slice %769 {offsets = [0, 16], sizes = [32, 8], strides = [1, 1]} : vector<32x32xf32> to vector<32x8xf32>
    %830 = vector.extract_strided_slice %778 {offsets = [0, 16], sizes = [32, 8], strides = [1, 1]} : vector<32x32xf32> to vector<32x8xf32>
    %831 = tpu.transpose %829, [1, 0] : vector<32x8xf32> -> vector<8x32xf32>
    %cst_366 = arith.constant dense<0.000000e+00> : vector<8x32xf32>
    %832 = tpu.matmul %828, %831, %cst_366 {dimension_numbers = #tpu.dot_dimension_numbers<[1], [0], [0], [1], [0, 0, 1, 1], [], []>} : vector<8x8xf32>, vector<8x32xf32>, vector<8x32xf32> -> vector<8x32xf32>
    %cst_367 = arith.constant 0.353553385 : f32
    %833 = vector.broadcast %cst_367 : f32 to vector<8x32xf32>
    %834 = arith.mulf %832, %833 : vector<8x32xf32>
    %cst_368 = arith.constant dense<0xFF800000> : vector<8xf32>
    %835 = vector.multi_reduction <maximumf>, %834, %cst_368 [1] : vector<8x32xf32> to vector<8xf32>
    %836 = vector.shape_cast %835 : vector<8xf32> to vector<8x1xf32>
    %837 = vector.broadcast %836 : vector<8x1xf32> to vector<8x32xf32>
    %838 = arith.subf %834, %837 : vector<8x32xf32>
    %839 = math.exp %838 : vector<8x32xf32>
    %cst_369 = arith.constant dense<0.000000e+00> : vector<8xf32>
    %840 = vector.multi_reduction <add>, %839, %cst_369 [1] : vector<8x32xf32> to vector<8xf32>
    %841 = vector.shape_cast %840 : vector<8xf32> to vector<8x1xf32>
    %842 = tpu.reciprocal %841 {approx = true} : vector<8x1xf32> -> vector<8x1xf32>
    %843 = vector.broadcast %842 : vector<8x1xf32> to vector<8x32xf32>
    %844 = arith.mulf %839, %843 : vector<8x32xf32>
    %cst_370 = arith.constant dense<0.000000e+00> : vector<8x8xf32>
    %845 = tpu.matmul %844, %830, %cst_370 {dimension_numbers = #tpu.dot_dimension_numbers<[1], [0], [0], [1], [0, 0, 1, 1], [], []>} : vector<8x32xf32>, vector<32x8xf32>, vector<8x8xf32> -> vector<8x8xf32>
    %846 = vector.extract_strided_slice %780 {offsets = [16, 0], sizes = [8, 32], strides = [1, 1]} : vector<32x32xf32> to vector<8x32xf32>
    %847 = arith.truncf %845 : vector<8x8xf32> to vector<8x8xbf16>
    %848 = arith.truncf %846 : vector<8x32xf32> to vector<8x32xbf16>
    %cst_371 = arith.constant dense<0.000000e+00> : vector<8x32xf32>
    %849 = tpu.matmul %847, %848, %cst_371 {dimension_numbers = #tpu.dot_dimension_numbers<[1], [0], [0], [1], [0, 0, 1, 1], [], []>} : vector<8x8xbf16>, vector<8x32xbf16>, vector<8x32xf32> -> vector<8x32xf32>
    %850 = arith.addf %827, %849 : vector<8x32xf32>
    %851 = vector.extract_strided_slice %760 {offsets = [0, 24], sizes = [8, 8], strides = [1, 1]} : vector<8x32xf32> to vector<8x8xf32>
    %852 = vector.extract_strided_slice %769 {offsets = [0, 24], sizes = [32, 8], strides = [1, 1]} : vector<32x32xf32> to vector<32x8xf32>
    %853 = vector.extract_strided_slice %778 {offsets = [0, 24], sizes = [32, 8], strides = [1, 1]} : vector<32x32xf32> to vector<32x8xf32>
    %854 = tpu.transpose %852, [1, 0] : vector<32x8xf32> -> vector<8x32xf32>
    %cst_372 = arith.constant dense<0.000000e+00> : vector<8x32xf32>
    %855 = tpu.matmul %851, %854, %cst_372 {dimension_numbers = #tpu.dot_dimension_numbers<[1], [0], [0], [1], [0, 0, 1, 1], [], []>} : vector<8x8xf32>, vector<8x32xf32>, vector<8x32xf32> -> vector<8x32xf32>
    %cst_373 = arith.constant 0.353553385 : f32
    %856 = vector.broadcast %cst_373 : f32 to vector<8x32xf32>
    %857 = arith.mulf %855, %856 : vector<8x32xf32>
    %cst_374 = arith.constant dense<0xFF800000> : vector<8xf32>
    %858 = vector.multi_reduction <maximumf>, %857, %cst_374 [1] : vector<8x32xf32> to vector<8xf32>
    %859 = vector.shape_cast %858 : vector<8xf32> to vector<8x1xf32>
    %860 = vector.broadcast %859 : vector<8x1xf32> to vector<8x32xf32>
    %861 = arith.subf %857, %860 : vector<8x32xf32>
    %862 = math.exp %861 : vector<8x32xf32>
    %cst_375 = arith.constant dense<0.000000e+00> : vector<8xf32>
    %863 = vector.multi_reduction <add>, %862, %cst_375 [1] : vector<8x32xf32> to vector<8xf32>
    %864 = vector.shape_cast %863 : vector<8xf32> to vector<8x1xf32>
    %865 = tpu.reciprocal %864 {approx = true} : vector<8x1xf32> -> vector<8x1xf32>
    %866 = vector.broadcast %865 : vector<8x1xf32> to vector<8x32xf32>
    %867 = arith.mulf %862, %866 : vector<8x32xf32>
    %cst_376 = arith.constant dense<0.000000e+00> : vector<8x8xf32>
    %868 = tpu.matmul %867, %853, %cst_376 {dimension_numbers = #tpu.dot_dimension_numbers<[1], [0], [0], [1], [0, 0, 1, 1], [], []>} : vector<8x32xf32>, vector<32x8xf32>, vector<8x8xf32> -> vector<8x8xf32>
    %869 = vector.extract_strided_slice %780 {offsets = [24, 0], sizes = [8, 32], strides = [1, 1]} : vector<32x32xf32> to vector<8x32xf32>
    %870 = arith.truncf %868 : vector<8x8xf32> to vector<8x8xbf16>
    %871 = arith.truncf %869 : vector<8x32xf32> to vector<8x32xbf16>
    %cst_377 = arith.constant dense<0.000000e+00> : vector<8x32xf32>
    %872 = tpu.matmul %870, %871, %cst_377 {dimension_numbers = #tpu.dot_dimension_numbers<[1], [0], [0], [1], [0, 0, 1, 1], [], []>} : vector<8x8xbf16>, vector<8x32xbf16>, vector<8x32xf32> -> vector<8x32xf32>
    %873 = arith.addf %850, %872 : vector<8x32xf32>
    %874 = vector.broadcast %782 : vector<1x32xf32> to vector<8x32xf32>
    %875 = arith.addf %873, %874 : vector<8x32xf32>
    %876 = arith.addf %750, %875 : vector<8x32xf32>
    %c1_378 = arith.constant 1 : index
    %c0_379 = arith.constant 0 : index
    %c0_380 = arith.constant 0 : index
    %877 = vector.load %arg42[%c1_378, %c0_379, %c0_380] : memref<2x1x32xf32, #tpu.memory_space<vmem>>, vector<1x1x32xf32>
    %878 = vector.shape_cast %877 : vector<1x1x32xf32> to vector<1x32xf32>
    %c1_381 = arith.constant 1 : index
    %c0_382 = arith.constant 0 : index
    %c0_383 = arith.constant 0 : index
    %879 = vector.load %arg43[%c1_381, %c0_382, %c0_383] : memref<2x1x32xf32, #tpu.memory_space<vmem>>, vector<1x1x32xf32>
    %880 = vector.shape_cast %879 : vector<1x1x32xf32> to vector<1x32xf32>
    %cst_384 = arith.constant dense<0.000000e+00> : vector<8xf32>
    %881 = vector.multi_reduction <add>, %876, %cst_384 [1] : vector<8x32xf32> to vector<8xf32>
    %882 = vector.shape_cast %881 : vector<8xf32> to vector<8x1xf32>
    %cst_385 = arith.constant 3.200000e+01 : f32
    %883 = vector.broadcast %cst_385 : f32 to vector<8x1xf32>
    %884 = arith.divf %882, %883 : vector<8x1xf32>
    %885 = vector.broadcast %884 : vector<8x1xf32> to vector<8x32xf32>
    %886 = arith.subf %876, %885 : vector<8x32xf32>
    %887 = arith.mulf %886, %886 : vector<8x32xf32>
    %cst_386 = arith.constant dense<0.000000e+00> : vector<8xf32>
    %888 = vector.multi_reduction <add>, %887, %cst_386 [1] : vector<8x32xf32> to vector<8xf32>
    %889 = vector.shape_cast %888 : vector<8xf32> to vector<8x1xf32>
    %cst_387 = arith.constant 3.200000e+01 : f32
    %890 = vector.broadcast %cst_387 : f32 to vector<8x1xf32>
    %891 = arith.divf %889, %890 : vector<8x1xf32>
    %892 = vector.broadcast %884 : vector<8x1xf32> to vector<8x32xf32>
    %893 = arith.subf %876, %892 : vector<8x32xf32>
    %cst_388 = arith.constant 9.99999974E-6 : f32
    %894 = vector.broadcast %cst_388 : f32 to vector<8x1xf32>
    %895 = arith.addf %891, %894 : vector<8x1xf32>
    %896 = math.rsqrt %895 : vector<8x1xf32>
    %897 = vector.broadcast %896 : vector<8x1xf32> to vector<8x32xf32>
    %898 = arith.mulf %893, %897 : vector<8x32xf32>
    %899 = vector.broadcast %878 : vector<1x32xf32> to vector<8x32xf32>
    %900 = arith.mulf %898, %899 : vector<8x32xf32>
    %901 = vector.broadcast %880 : vector<1x32xf32> to vector<8x32xf32>
    %902 = arith.addf %900, %901 : vector<8x32xf32>
    %c1_389 = arith.constant 1 : index
    %c0_390 = arith.constant 0 : index
    %c0_391 = arith.constant 0 : index
    %903 = vector.load %arg36[%c1_389, %c0_390, %c0_391] : memref<2x32x64xf32, #tpu.memory_space<vmem>>, vector<1x32x64xf32>
    %904 = vector.shape_cast %903 : vector<1x32x64xf32> to vector<32x64xf32>
    %905 = arith.truncf %902 : vector<8x32xf32> to vector<8x32xbf16>
    %906 = arith.truncf %904 : vector<32x64xf32> to vector<32x64xbf16>
    %cst_392 = arith.constant dense<0.000000e+00> : vector<8x64xf32>
    %907 = tpu.matmul %905, %906, %cst_392 {dimension_numbers = #tpu.dot_dimension_numbers<[1], [0], [0], [1], [0, 0, 1, 1], [], []>} : vector<8x32xbf16>, vector<32x64xbf16>, vector<8x64xf32> -> vector<8x64xf32>
    %c1_393 = arith.constant 1 : index
    %c0_394 = arith.constant 0 : index
    %c0_395 = arith.constant 0 : index
    %908 = vector.load %arg37[%c1_393, %c0_394, %c0_395] : memref<2x1x64xf32, #tpu.memory_space<vmem>>, vector<1x1x64xf32>
    %909 = vector.shape_cast %908 : vector<1x1x64xf32> to vector<1x64xf32>
    %910 = vector.broadcast %909 : vector<1x64xf32> to vector<8x64xf32>
    %911 = arith.addf %907, %910 : vector<8x64xf32>
    %cst_396 = arith.constant 0.000000e+00 : f32
    %912 = vector.broadcast %cst_396 : f32 to vector<8x64xf32>
    %913 = arith.maximumf %911, %912 : vector<8x64xf32>
    %c1_397 = arith.constant 1 : index
    %c0_398 = arith.constant 0 : index
    %c0_399 = arith.constant 0 : index
    %914 = vector.load %arg38[%c1_397, %c0_398, %c0_399] : memref<2x64x32xf32, #tpu.memory_space<vmem>>, vector<1x64x32xf32>
    %915 = vector.shape_cast %914 : vector<1x64x32xf32> to vector<64x32xf32>
    %916 = arith.truncf %913 : vector<8x64xf32> to vector<8x64xbf16>
    %917 = arith.truncf %915 : vector<64x32xf32> to vector<64x32xbf16>
    %cst_400 = arith.constant dense<0.000000e+00> : vector<8x32xf32>
    %918 = tpu.matmul %916, %917, %cst_400 {dimension_numbers = #tpu.dot_dimension_numbers<[1], [0], [0], [1], [0, 0, 1, 1], [], []>} : vector<8x64xbf16>, vector<64x32xbf16>, vector<8x32xf32> -> vector<8x32xf32>
    %c1_401 = arith.constant 1 : index
    %c0_402 = arith.constant 0 : index
    %c0_403 = arith.constant 0 : index
    %919 = vector.load %arg39[%c1_401, %c0_402, %c0_403] : memref<2x1x32xf32, #tpu.memory_space<vmem>>, vector<1x1x32xf32>
    %920 = vector.shape_cast %919 : vector<1x1x32xf32> to vector<1x32xf32>
    %921 = vector.broadcast %920 : vector<1x32xf32> to vector<8x32xf32>
    %922 = arith.addf %918, %921 : vector<8x32xf32>
    %923 = arith.addf %902, %922 : vector<8x32xf32>
    %c1_404 = arith.constant 1 : index
    %c0_405 = arith.constant 0 : index
    %c0_406 = arith.constant 0 : index
    %924 = vector.load %arg44[%c1_404, %c0_405, %c0_406] : memref<2x1x32xf32, #tpu.memory_space<vmem>>, vector<1x1x32xf32>
    %925 = vector.shape_cast %924 : vector<1x1x32xf32> to vector<1x32xf32>
    %c1_407 = arith.constant 1 : index
    %c0_408 = arith.constant 0 : index
    %c0_409 = arith.constant 0 : index
    %926 = vector.load %arg45[%c1_407, %c0_408, %c0_409] : memref<2x1x32xf32, #tpu.memory_space<vmem>>, vector<1x1x32xf32>
    %927 = vector.shape_cast %926 : vector<1x1x32xf32> to vector<1x32xf32>
    %cst_410 = arith.constant dense<0.000000e+00> : vector<8xf32>
    %928 = vector.multi_reduction <add>, %923, %cst_410 [1] : vector<8x32xf32> to vector<8xf32>
    %929 = vector.shape_cast %928 : vector<8xf32> to vector<8x1xf32>
    %cst_411 = arith.constant 3.200000e+01 : f32
    %930 = vector.broadcast %cst_411 : f32 to vector<8x1xf32>
    %931 = arith.divf %929, %930 : vector<8x1xf32>
    %932 = vector.broadcast %931 : vector<8x1xf32> to vector<8x32xf32>
    %933 = arith.subf %923, %932 : vector<8x32xf32>
    %934 = arith.mulf %933, %933 : vector<8x32xf32>
    %cst_412 = arith.constant dense<0.000000e+00> : vector<8xf32>
    %935 = vector.multi_reduction <add>, %934, %cst_412 [1] : vector<8x32xf32> to vector<8xf32>
    %936 = vector.shape_cast %935 : vector<8xf32> to vector<8x1xf32>
    %cst_413 = arith.constant 3.200000e+01 : f32
    %937 = vector.broadcast %cst_413 : f32 to vector<8x1xf32>
    %938 = arith.divf %936, %937 : vector<8x1xf32>
    %939 = vector.broadcast %931 : vector<8x1xf32> to vector<8x32xf32>
    %940 = arith.subf %923, %939 : vector<8x32xf32>
    %cst_414 = arith.constant 9.99999974E-6 : f32
    %941 = vector.broadcast %cst_414 : f32 to vector<8x1xf32>
    %942 = arith.addf %938, %941 : vector<8x1xf32>
    %943 = math.rsqrt %942 : vector<8x1xf32>
    %944 = vector.broadcast %943 : vector<8x1xf32> to vector<8x32xf32>
    %945 = arith.mulf %940, %944 : vector<8x32xf32>
    %946 = vector.broadcast %925 : vector<1x32xf32> to vector<8x32xf32>
    %947 = arith.mulf %945, %946 : vector<8x32xf32>
    %948 = vector.broadcast %927 : vector<1x32xf32> to vector<8x32xf32>
    %949 = arith.addf %947, %948 : vector<8x32xf32>
    %cst_415 = arith.constant dense<0.000000e+00> : vector<8xf32>
    %950 = vector.multi_reduction <add>, %949, %cst_415 [1] : vector<8x32xf32> to vector<8xf32>
    %951 = vector.shape_cast %950 : vector<8xf32> to vector<8x1xf32>
    %cst_416 = arith.constant 3.200000e+01 : f32
    %952 = vector.broadcast %cst_416 : f32 to vector<8x1xf32>
    %953 = arith.divf %951, %952 : vector<8x1xf32>
    %954 = vector.broadcast %953 : vector<8x1xf32> to vector<8x32xf32>
    %955 = arith.subf %949, %954 : vector<8x32xf32>
    %956 = arith.mulf %955, %955 : vector<8x32xf32>
    %cst_417 = arith.constant dense<0.000000e+00> : vector<8xf32>
    %957 = vector.multi_reduction <add>, %956, %cst_417 [1] : vector<8x32xf32> to vector<8xf32>
    %958 = vector.shape_cast %957 : vector<8xf32> to vector<8x1xf32>
    %cst_418 = arith.constant 3.200000e+01 : f32
    %959 = vector.broadcast %cst_418 : f32 to vector<8x1xf32>
    %960 = arith.divf %958, %959 : vector<8x1xf32>
    %961 = vector.broadcast %953 : vector<8x1xf32> to vector<8x32xf32>
    %962 = arith.subf %949, %961 : vector<8x32xf32>
    %cst_419 = arith.constant 9.99999974E-6 : f32
    %963 = vector.broadcast %cst_419 : f32 to vector<8x1xf32>
    %964 = arith.addf %960, %963 : vector<8x1xf32>
    %965 = math.rsqrt %964 : vector<8x1xf32>
    %966 = vector.broadcast %965 : vector<8x1xf32> to vector<8x32xf32>
    %967 = arith.mulf %962, %966 : vector<8x32xf32>
    %968 = vector.broadcast %211 : vector<1x32xf32> to vector<8x32xf32>
    %969 = arith.mulf %967, %968 : vector<8x32xf32>
    %970 = vector.broadcast %212 : vector<1x32xf32> to vector<8x32xf32>
    %971 = arith.addf %969, %970 : vector<8x32xf32>
    %c0_420 = arith.constant 0 : index
    %c0_421 = arith.constant 0 : index
    %972 = vector.load %arg48[%c0_420, %c0_421] : memref<32x32xf32, #tpu.memory_space<vmem>>, vector<32x32xf32>
    %973 = arith.truncf %971 : vector<8x32xf32> to vector<8x32xbf16>
    %974 = arith.truncf %972 : vector<32x32xf32> to vector<32x32xbf16>
    %cst_422 = arith.constant dense<0.000000e+00> : vector<8x32xf32>
    %975 = tpu.matmul %973, %974, %cst_422 {dimension_numbers = #tpu.dot_dimension_numbers<[1], [0], [0], [1], [0, 0, 1, 1], [], []>} : vector<8x32xbf16>, vector<32x32xbf16>, vector<8x32xf32> -> vector<8x32xf32>
    %c0_423 = arith.constant 0 : index
    %c0_424 = arith.constant 0 : index
    %976 = vector.load %arg49[%c0_423, %c0_424] : memref<1x32xf32, #tpu.memory_space<vmem>>, vector<1x32xf32>
    %977 = vector.broadcast %976 : vector<1x32xf32> to vector<8x32xf32>
    %978 = arith.addf %975, %977 : vector<8x32xf32>
    %cst_425 = arith.constant 0.000000e+00 : f32
    %979 = vector.broadcast %cst_425 : f32 to vector<8x32xf32>
    %980 = arith.maximumf %978, %979 : vector<8x32xf32>
    %c0_426 = arith.constant 0 : index
    %c0_427 = arith.constant 0 : index
    %981 = vector.load %arg50[%c0_426, %c0_427] : memref<32x32xf32, #tpu.memory_space<vmem>>, vector<32x32xf32>
    %982 = arith.truncf %980 : vector<8x32xf32> to vector<8x32xbf16>
    %983 = arith.truncf %981 : vector<32x32xf32> to vector<32x32xbf16>
    %cst_428 = arith.constant dense<0.000000e+00> : vector<8x32xf32>
    %984 = tpu.matmul %982, %983, %cst_428 {dimension_numbers = #tpu.dot_dimension_numbers<[1], [0], [0], [1], [0, 0, 1, 1], [], []>} : vector<8x32xbf16>, vector<32x32xbf16>, vector<8x32xf32> -> vector<8x32xf32>
    %c0_429 = arith.constant 0 : index
    %c0_430 = arith.constant 0 : index
    %985 = vector.load %arg51[%c0_429, %c0_430] : memref<1x32xf32, #tpu.memory_space<vmem>>, vector<1x32xf32>
    %986 = vector.broadcast %985 : vector<1x32xf32> to vector<8x32xf32>
    %987 = arith.addf %984, %986 : vector<8x32xf32>
    %cst_431 = arith.constant 0.000000e+00 : f32
    %988 = vector.broadcast %cst_431 : f32 to vector<8x32xf32>
    %989 = arith.maximumf %987, %988 : vector<8x32xf32>
    %c0_432 = arith.constant 0 : index
    %c0_433 = arith.constant 0 : index
    %990 = vector.load %arg52[%c0_432, %c0_433] : memref<32x2xf32, #tpu.memory_space<vmem>>, vector<32x2xf32>
    %cst_434 = arith.constant dense<0.000000e+00> : vector<8x2xf32>
    %991 = tpu.matmul %989, %990, %cst_434 {dimension_numbers = #tpu.dot_dimension_numbers<[1], [0], [0], [1], [0, 0, 1, 1], [], []>} : vector<8x32xf32>, vector<32x2xf32>, vector<8x2xf32> -> vector<8x2xf32>
    %c0_435 = arith.constant 0 : index
    %c0_436 = arith.constant 0 : index
    %992 = vector.load %arg53[%c0_435, %c0_436] : memref<1x2xf32, #tpu.memory_space<vmem>>, vector<1x2xf32>
    %993 = vector.broadcast %992 : vector<1x2xf32> to vector<8x2xf32>
    %994 = arith.addf %991, %993 : vector<8x2xf32>
    %c1_437 = arith.constant 1 : index
    %c0_438 = arith.constant 0 : index
    %c0_439 = arith.constant 0 : index
    %c0_440 = arith.constant 0 : index
    %995 = vector.load %arg54[%c1_437, %c0_438, %c0_439, %c0_440] : memref<2x1x8x2xf32, #tpu.memory_space<vmem>>, vector<1x1x8x2xf32>
    %996 = vector.shape_cast %995 : vector<1x1x8x2xf32> to vector<8x2xf32>
    %997 = vector.shape_cast %994 : vector<8x2xf32> to vector<1x1x8x2xf32>
    tpu.vector_store %arg54[%c1_437, %c0_438, %c0_439, %c0_440], %997 {strides = array<i32>} : memref<2x1x8x2xf32, #tpu.memory_space<vmem>>, vector<1x1x8x2xf32>,
    return
  }
  func.func @transform_0(%arg0: i32) -> (i32, i32, i32) {
    %c0_i32 = arith.constant 0 : i32
    %c0_i32_0 = arith.constant 0 : i32
    %c0_i32_1 = arith.constant 0 : i32
    return %arg0, %c0_i32, %c0_i32_0 : i32, i32, i32
  }
  func.func @transform_1(%arg0: i32) -> (i32, i32, i32) {
    %c0_i32 = arith.constant 0 : i32
    %c0_i32_0 = arith.constant 0 : i32
    %c0_i32_1 = arith.constant 0 : i32
    return %arg0, %c0_i32, %c0_i32_0 : i32, i32, i32
  }
  func.func @transform_2(%arg0: i32) -> (i32, i32, i32) {
    %c0_i32 = arith.constant 0 : i32
    %c0_i32_0 = arith.constant 0 : i32
    %c0_i32_1 = arith.constant 0 : i32
    return %arg0, %c0_i32, %c0_i32_0 : i32, i32, i32
  }
  func.func @transform_3(%arg0: i32) -> (i32, i32) {
    %c0_i32 = arith.constant 0 : i32
    %c0_i32_0 = arith.constant 0 : i32
    %c0_i32_1 = arith.constant 0 : i32
    return %c0_i32, %c0_i32_0 : i32, i32
  }
  func.func @transform_4(%arg0: i32) -> (i32, i32) {
    %c0_i32 = arith.constant 0 : i32
    %c0_i32_0 = arith.constant 0 : i32
    %c0_i32_1 = arith.constant 0 : i32
    return %c0_i32, %c0_i32_0 : i32, i32
  }
  func.func @transform_5(%arg0: i32) -> (i32, i32) {
    %c0_i32 = arith.constant 0 : i32
    %c0_i32_0 = arith.constant 0 : i32
    %c0_i32_1 = arith.constant 0 : i32
    return %c0_i32, %c0_i32_0 : i32, i32
  }
  func.func @transform_6(%arg0: i32) -> (i32, i32) {
    %c0_i32 = arith.constant 0 : i32
    %c0_i32_0 = arith.constant 0 : i32
    %c0_i32_1 = arith.constant 0 : i32
    return %c0_i32, %c0_i32_0 : i32, i32
  }
  func.func @transform_7(%arg0: i32) -> (i32, i32, i32) {
    %c0_i32 = arith.constant 0 : i32
    %c0_i32_0 = arith.constant 0 : i32
    %c0_i32_1 = arith.constant 0 : i32
    %c0_i32_2 = arith.constant 0 : i32
    return %c0_i32, %c0_i32_0, %c0_i32_1 : i32, i32, i32
  }
  func.func @transform_8(%arg0: i32) -> (i32, i32, i32) {
    %c0_i32 = arith.constant 0 : i32
    %c0_i32_0 = arith.constant 0 : i32
    %c0_i32_1 = arith.constant 0 : i32
    %c0_i32_2 = arith.constant 0 : i32
    return %c0_i32, %c0_i32_0, %c0_i32_1 : i32, i32, i32
  }
  func.func @transform_9(%arg0: i32) -> (i32, i32, i32) {
    %c0_i32 = arith.constant 0 : i32
    %c0_i32_0 = arith.constant 0 : i32
    %c0_i32_1 = arith.constant 0 : i32
    %c0_i32_2 = arith.constant 0 : i32
    return %c0_i32, %c0_i32_0, %c0_i32_1 : i32, i32, i32
  }
  func.func @transform_10(%arg0: i32) -> (i32, i32, i32) {
    %c0_i32 = arith.constant 0 : i32
    %c0_i32_0 = arith.constant 0 : i32
    %c0_i32_1 = arith.constant 0 : i32
    %c0_i32_2 = arith.constant 0 : i32
    return %c0_i32, %c0_i32_0, %c0_i32_1 : i32, i32, i32
  }
  func.func @transform_11(%arg0: i32) -> (i32, i32, i32) {
    %c0_i32 = arith.constant 0 : i32
    %c0_i32_0 = arith.constant 0 : i32
    %c0_i32_1 = arith.constant 0 : i32
    %c0_i32_2 = arith.constant 0 : i32
    return %c0_i32, %c0_i32_0, %c0_i32_1 : i32, i32, i32
  }
  func.func @transform_12(%arg0: i32) -> (i32, i32, i32) {
    %c0_i32 = arith.constant 0 : i32
    %c0_i32_0 = arith.constant 0 : i32
    %c0_i32_1 = arith.constant 0 : i32
    %c0_i32_2 = arith.constant 0 : i32
    return %c0_i32, %c0_i32_0, %c0_i32_1 : i32, i32, i32
  }
  func.func @transform_13(%arg0: i32) -> (i32, i32, i32) {
    %c0_i32 = arith.constant 0 : i32
    %c0_i32_0 = arith.constant 0 : i32
    %c0_i32_1 = arith.constant 0 : i32
    %c0_i32_2 = arith.constant 0 : i32
    return %c0_i32, %c0_i32_0, %c0_i32_1 : i32, i32, i32
  }
  func.func @transform_14(%arg0: i32) -> (i32, i32, i32) {
    %c0_i32 = arith.constant 0 : i32
    %c0_i32_0 = arith.constant 0 : i32
    %c0_i32_1 = arith.constant 0 : i32
    %c0_i32_2 = arith.constant 0 : i32
    return %c0_i32, %c0_i32_0, %c0_i32_1 : i32, i32, i32
  }
  func.func @transform_15(%arg0: i32) -> (i32, i32, i32) {
    %c0_i32 = arith.constant 0 : i32
    %c0_i32_0 = arith.constant 0 : i32
    %c0_i32_1 = arith.constant 0 : i32
    %c0_i32_2 = arith.constant 0 : i32
    return %c0_i32, %c0_i32_0, %c0_i32_1 : i32, i32, i32
  }
  func.func @transform_16(%arg0: i32) -> (i32, i32, i32) {
    %c0_i32 = arith.constant 0 : i32
    %c0_i32_0 = arith.constant 0 : i32
    %c0_i32_1 = arith.constant 0 : i32
    %c0_i32_2 = arith.constant 0 : i32
    return %c0_i32, %c0_i32_0, %c0_i32_1 : i32, i32, i32
  }
  func.func @transform_17(%arg0: i32) -> (i32, i32, i32) {
    %c0_i32 = arith.constant 0 : i32
    %c0_i32_0 = arith.constant 0 : i32
    %c0_i32_1 = arith.constant 0 : i32
    %c0_i32_2 = arith.constant 0 : i32
    return %c0_i32, %c0_i32_0, %c0_i32_1 : i32, i32, i32
  }
  func.func @transform_18(%arg0: i32) -> (i32, i32, i32) {
    %c0_i32 = arith.constant 0 : i32
    %c0_i32_0 = arith.constant 0 : i32
    %c0_i32_1 = arith.constant 0 : i32
    %c0_i32_2 = arith.constant 0 : i32
    return %c0_i32, %c0_i32_0, %c0_i32_1 : i32, i32, i32
  }
  func.func @transform_19(%arg0: i32) -> (i32, i32, i32) {
    %c0_i32 = arith.constant 0 : i32
    %c0_i32_0 = arith.constant 0 : i32
    %c0_i32_1 = arith.constant 0 : i32
    %c0_i32_2 = arith.constant 0 : i32
    return %c0_i32, %c0_i32_0, %c0_i32_1 : i32, i32, i32
  }
  func.func @transform_20(%arg0: i32) -> (i32, i32, i32) {
    %c0_i32 = arith.constant 0 : i32
    %c0_i32_0 = arith.constant 0 : i32
    %c0_i32_1 = arith.constant 0 : i32
    %c0_i32_2 = arith.constant 0 : i32
    return %c0_i32, %c0_i32_0, %c0_i32_1 : i32, i32, i32
  }
  func.func @transform_21(%arg0: i32) -> (i32, i32, i32) {
    %c0_i32 = arith.constant 0 : i32
    %c0_i32_0 = arith.constant 0 : i32
    %c0_i32_1 = arith.constant 0 : i32
    %c0_i32_2 = arith.constant 0 : i32
    return %c0_i32, %c0_i32_0, %c0_i32_1 : i32, i32, i32
  }
  func.func @transform_22(%arg0: i32) -> (i32, i32, i32) {
    %c0_i32 = arith.constant 0 : i32
    %c0_i32_0 = arith.constant 0 : i32
    %c0_i32_1 = arith.constant 0 : i32
    %c0_i32_2 = arith.constant 0 : i32
    return %c0_i32, %c0_i32_0, %c0_i32_1 : i32, i32, i32
  }
  func.func @transform_23(%arg0: i32) -> (i32, i32, i32) {
    %c0_i32 = arith.constant 0 : i32
    %c0_i32_0 = arith.constant 0 : i32
    %c0_i32_1 = arith.constant 0 : i32
    %c0_i32_2 = arith.constant 0 : i32
    return %c0_i32, %c0_i32_0, %c0_i32_1 : i32, i32, i32
  }
  func.func @transform_24(%arg0: i32) -> (i32, i32, i32) {
    %c0_i32 = arith.constant 0 : i32
    %c0_i32_0 = arith.constant 0 : i32
    %c0_i32_1 = arith.constant 0 : i32
    %c0_i32_2 = arith.constant 0 : i32
    return %c0_i32, %c0_i32_0, %c0_i32_1 : i32, i32, i32
  }
  func.func @transform_25(%arg0: i32) -> (i32, i32, i32) {
    %c0_i32 = arith.constant 0 : i32
    %c0_i32_0 = arith.constant 0 : i32
    %c0_i32_1 = arith.constant 0 : i32
    %c0_i32_2 = arith.constant 0 : i32
    return %c0_i32, %c0_i32_0, %c0_i32_1 : i32, i32, i32
  }
  func.func @transform_26(%arg0: i32) -> (i32, i32, i32) {
    %c0_i32 = arith.constant 0 : i32
    %c0_i32_0 = arith.constant 0 : i32
    %c0_i32_1 = arith.constant 0 : i32
    %c0_i32_2 = arith.constant 0 : i32
    return %c0_i32, %c0_i32_0, %c0_i32_1 : i32, i32, i32
  }
  func.func @transform_27(%arg0: i32) -> (i32, i32, i32) {
    %c0_i32 = arith.constant 0 : i32
    %c0_i32_0 = arith.constant 0 : i32
    %c0_i32_1 = arith.constant 0 : i32
    %c0_i32_2 = arith.constant 0 : i32
    return %c0_i32, %c0_i32_0, %c0_i32_1 : i32, i32, i32
  }
  func.func @transform_28(%arg0: i32) -> (i32, i32, i32) {
    %c0_i32 = arith.constant 0 : i32
    %c0_i32_0 = arith.constant 0 : i32
    %c0_i32_1 = arith.constant 0 : i32
    %c0_i32_2 = arith.constant 0 : i32
    return %c0_i32, %c0_i32_0, %c0_i32_1 : i32, i32, i32
  }
  func.func @transform_29(%arg0: i32) -> (i32, i32, i32) {
    %c0_i32 = arith.constant 0 : i32
    %c0_i32_0 = arith.constant 0 : i32
    %c0_i32_1 = arith.constant 0 : i32
    %c0_i32_2 = arith.constant 0 : i32
    return %c0_i32, %c0_i32_0, %c0_i32_1 : i32, i32, i32
  }
  func.func @transform_30(%arg0: i32) -> (i32, i32, i32) {
    %c0_i32 = arith.constant 0 : i32
    %c0_i32_0 = arith.constant 0 : i32
    %c0_i32_1 = arith.constant 0 : i32
    %c0_i32_2 = arith.constant 0 : i32
    return %c0_i32, %c0_i32_0, %c0_i32_1 : i32, i32, i32
  }
  func.func @transform_31(%arg0: i32) -> (i32, i32, i32) {
    %c0_i32 = arith.constant 0 : i32
    %c0_i32_0 = arith.constant 0 : i32
    %c0_i32_1 = arith.constant 0 : i32
    %c0_i32_2 = arith.constant 0 : i32
    return %c0_i32, %c0_i32_0, %c0_i32_1 : i32, i32, i32
  }
  func.func @transform_32(%arg0: i32) -> (i32, i32, i32) {
    %c0_i32 = arith.constant 0 : i32
    %c0_i32_0 = arith.constant 0 : i32
    %c0_i32_1 = arith.constant 0 : i32
    %c0_i32_2 = arith.constant 0 : i32
    return %c0_i32, %c0_i32_0, %c0_i32_1 : i32, i32, i32
  }
  func.func @transform_33(%arg0: i32) -> (i32, i32, i32) {
    %c0_i32 = arith.constant 0 : i32
    %c0_i32_0 = arith.constant 0 : i32
    %c0_i32_1 = arith.constant 0 : i32
    %c0_i32_2 = arith.constant 0 : i32
    return %c0_i32, %c0_i32_0, %c0_i32_1 : i32, i32, i32
  }
  func.func @transform_34(%arg0: i32) -> (i32, i32, i32) {
    %c0_i32 = arith.constant 0 : i32
    %c0_i32_0 = arith.constant 0 : i32
    %c0_i32_1 = arith.constant 0 : i32
    %c0_i32_2 = arith.constant 0 : i32
    return %c0_i32, %c0_i32_0, %c0_i32_1 : i32, i32, i32
  }
  func.func @transform_35(%arg0: i32) -> (i32, i32, i32) {
    %c0_i32 = arith.constant 0 : i32
    %c0_i32_0 = arith.constant 0 : i32
    %c0_i32_1 = arith.constant 0 : i32
    %c0_i32_2 = arith.constant 0 : i32
    return %c0_i32, %c0_i32_0, %c0_i32_1 : i32, i32, i32
  }
  func.func @transform_36(%arg0: i32) -> (i32, i32, i32) {
    %c0_i32 = arith.constant 0 : i32
    %c0_i32_0 = arith.constant 0 : i32
    %c0_i32_1 = arith.constant 0 : i32
    %c0_i32_2 = arith.constant 0 : i32
    return %c0_i32, %c0_i32_0, %c0_i32_1 : i32, i32, i32
  }
  func.func @transform_37(%arg0: i32) -> (i32, i32, i32) {
    %c0_i32 = arith.constant 0 : i32
    %c0_i32_0 = arith.constant 0 : i32
    %c0_i32_1 = arith.constant 0 : i32
    %c0_i32_2 = arith.constant 0 : i32
    return %c0_i32, %c0_i32_0, %c0_i32_1 : i32, i32, i32
  }
  func.func @transform_38(%arg0: i32) -> (i32, i32, i32) {
    %c0_i32 = arith.constant 0 : i32
    %c0_i32_0 = arith.constant 0 : i32
    %c0_i32_1 = arith.constant 0 : i32
    %c0_i32_2 = arith.constant 0 : i32
    return %c0_i32, %c0_i32_0, %c0_i32_1 : i32, i32, i32
  }
  func.func @transform_39(%arg0: i32) -> (i32, i32, i32) {
    %c0_i32 = arith.constant 0 : i32
    %c0_i32_0 = arith.constant 0 : i32
    %c0_i32_1 = arith.constant 0 : i32
    %c0_i32_2 = arith.constant 0 : i32
    return %c0_i32, %c0_i32_0, %c0_i32_1 : i32, i32, i32
  }
  func.func @transform_40(%arg0: i32) -> (i32, i32, i32) {
    %c0_i32 = arith.constant 0 : i32
    %c0_i32_0 = arith.constant 0 : i32
    %c0_i32_1 = arith.constant 0 : i32
    %c0_i32_2 = arith.constant 0 : i32
    return %c0_i32, %c0_i32_0, %c0_i32_1 : i32, i32, i32
  }
  func.func @transform_41(%arg0: i32) -> (i32, i32, i32) {
    %c0_i32 = arith.constant 0 : i32
    %c0_i32_0 = arith.constant 0 : i32
    %c0_i32_1 = arith.constant 0 : i32
    %c0_i32_2 = arith.constant 0 : i32
    return %c0_i32, %c0_i32_0, %c0_i32_1 : i32, i32, i32
  }
  func.func @transform_42(%arg0: i32) -> (i32, i32, i32) {
    %c0_i32 = arith.constant 0 : i32
    %c0_i32_0 = arith.constant 0 : i32
    %c0_i32_1 = arith.constant 0 : i32
    %c0_i32_2 = arith.constant 0 : i32
    return %c0_i32, %c0_i32_0, %c0_i32_1 : i32, i32, i32
  }
  func.func @transform_43(%arg0: i32) -> (i32, i32, i32) {
    %c0_i32 = arith.constant 0 : i32
    %c0_i32_0 = arith.constant 0 : i32
    %c0_i32_1 = arith.constant 0 : i32
    %c0_i32_2 = arith.constant 0 : i32
    return %c0_i32, %c0_i32_0, %c0_i32_1 : i32, i32, i32
  }
  func.func @transform_44(%arg0: i32) -> (i32, i32, i32) {
    %c0_i32 = arith.constant 0 : i32
    %c0_i32_0 = arith.constant 0 : i32
    %c0_i32_1 = arith.constant 0 : i32
    %c0_i32_2 = arith.constant 0 : i32
    return %c0_i32, %c0_i32_0, %c0_i32_1 : i32, i32, i32
  }
  func.func @transform_45(%arg0: i32) -> (i32, i32) {
    %c0_i32 = arith.constant 0 : i32
    %c0_i32_0 = arith.constant 0 : i32
    %c0_i32_1 = arith.constant 0 : i32
    return %c0_i32, %c0_i32_0 : i32, i32
  }
  func.func @transform_46(%arg0: i32) -> (i32, i32) {
    %c0_i32 = arith.constant 0 : i32
    %c0_i32_0 = arith.constant 0 : i32
    %c0_i32_1 = arith.constant 0 : i32
    return %c0_i32, %c0_i32_0 : i32, i32
  }
  func.func @transform_47(%arg0: i32) -> (i32, i32) {
    %c0_i32 = arith.constant 0 : i32
    %c0_i32_0 = arith.constant 0 : i32
    %c0_i32_1 = arith.constant 0 : i32
    return %c0_i32, %c0_i32_0 : i32, i32
  }
  func.func @transform_48(%arg0: i32) -> (i32, i32) {
    %c0_i32 = arith.constant 0 : i32
    %c0_i32_0 = arith.constant 0 : i32
    %c0_i32_1 = arith.constant 0 : i32
    return %c0_i32, %c0_i32_0 : i32, i32
  }
  func.func @transform_49(%arg0: i32) -> (i32, i32) {
    %c0_i32 = arith.constant 0 : i32
    %c0_i32_0 = arith.constant 0 : i32
    %c0_i32_1 = arith.constant 0 : i32
    return %c0_i32, %c0_i32_0 : i32, i32
  }
  func.func @transform_50(%arg0: i32) -> (i32, i32) {
    %c0_i32 = arith.constant 0 : i32
    %c0_i32_0 = arith.constant 0 : i32
    %c0_i32_1 = arith.constant 0 : i32
    return %c0_i32, %c0_i32_0 : i32, i32
  }
  func.func @transform_51(%arg0: i32) -> (i32, i32) {
    %c0_i32 = arith.constant 0 : i32
    %c0_i32_0 = arith.constant 0 : i32
    %c0_i32_1 = arith.constant 0 : i32
    return %c0_i32, %c0_i32_0 : i32, i32
  }
  func.func @transform_52(%arg0: i32) -> (i32, i32) {
    %c0_i32 = arith.constant 0 : i32
    %c0_i32_0 = arith.constant 0 : i32
    %c0_i32_1 = arith.constant 0 : i32
    return %c0_i32, %c0_i32_0 : i32, i32
  }
  func.func @transform_53(%arg0: i32) -> (i32, i32, i32, i32) {
    %c0_i32 = arith.constant 0 : i32
    %c0_i32_0 = arith.constant 0 : i32
    %c0_i32_1 = arith.constant 0 : i32
    %c0_i32_2 = arith.constant 0 : i32
    return %c0_i32, %arg0, %c0_i32_0, %c0_i32_1 : i32, i32, i32, i32
  }
}

</mosaic_0001>

<bundles_post_ra>
// kernel: mul.22
= control target key start
LH: loop header
LB: loop body
LE: loop exit
PB: predicated region body
PF: predicated region fallthrough
CT: control target
= control target key end

     0   :  { %s11_s10 = smov 3  ;;  %vm13_vm0 = vcmask 64512   ;;  %s32_s11 = smov 8   ;;  %vm20_vm1 = vcmask 130112   ;;  %s52_s0 = inlined_call_operand.vmem [shape: f32[2,8,2], index: 0, kind: input, shape index: {}]   ;;  %s53_s1 = inlined_call_operand.vmem [shape: f32[16,2], index: 1, kind: output, shape index: {}]  }
   0x1   :  { %v30_v0 = vld [vmem:[%s52_s0 + $0x2] sm:$0x3]  ;;  %v9_v1 = vld [vmem:[%s52_s0] sm:$0x3]  ;;  %s16_s0 = smov 3 }
   0x2   :  { %8 = vst [vmem:[#allocation1 + $0x8] sm:$0x3] %v30_v0  ;;  %10 = vst [vmem:[#allocation1] sm:$0x3] %v9_v1 }
   0x9   :  { %v17_v2 = vld [vmem:[#allocation1 + $0x1] ss:$8 sm:%s16_s0]   ;;  %v12_v3 = vld [vmem:[#allocation1] ss:$8 sm:%s11_s10]  }
   0xa   :  { %18 = vrot.lane.b32.xlu0 %v17_v2, %s32_s11  ;;  %14 = vst.msk [vmem:[#allocation0] sm:$0x3] %vm13_vm0, %v12_v3  }
  0x7c   :  { %v19_v4 = vpop.permute.xlu0 %18  }
  0x7d   :  { %21 = vst.msk [vmem:[#allocation0] sm:$0x3] %vm20_vm1, %v19_v4  }
  0x84   :  { %v26_v5 = vld [vmem:[#allocation0] sm:$0x3] }
  0x85   :  { %29 = vst [vmem:[%s53_s1] sm:$0x3] %v26_v5 }

// kernel: cotr_forward.1
= control target key start
LH: loop header
LB: loop body
LE: loop exit
PB: predicated region body
PF: predicated region fallthrough
CT: control target
= control target key end

     0   :  { %s11247_s6 = smov 1   ;;  %s11248_s10 = smov 2   ;;  %s12990_s0 = inlined_call_operand.smem [shape: u32[54], index: -1, kind: input, shape index: {}] }
   0x1   :  { %s11329_s5 = sld [smem:[%s12990_s0]]   ;;  %s11249_s14 = smov 3  }
   0x2   :  { %s11334_s9 = sld [smem:[%s12990_s0 + %s11247_s6]]   ;;  %s11250_s18 = smov 4  }
   0x3   :  { %s11339_s13 = sld [smem:[%s12990_s0 + %s11248_s10]]   ;;  %s11251_s22 = smov 5  }
   0x4   :  { %s11344_s17 = sld [smem:[%s12990_s0 + %s11249_s14]]   ;;  %s11252_s26 = smov 6  }
   0x5   :  { %s11349_s21 = sld [smem:[%s12990_s0 + %s11250_s18]]   ;;  %s11253_s30 = smov 7  }
   0x6   :  { %s11354_s25 = sld [smem:[%s12990_s0 + %s11251_s22]]   ;;  %s11254_s4 = smov 8  }
   0x7   :  { %13048 = sst [smem:[#allocation26_spill]] %s11329_s5  ;;  %s11255_s10 = smov 9  }
   0x8   :  { %13049 = sst [smem:[#allocation27_spill]] %s11334_s9  ;;  %s11256_s15 = smov 10  }
   0x9   :  { %13050 = sst [smem:[#allocation28_spill]] %s11339_s13  ;;  %s11257_s20 = smov 11  }
   0xa   :  { %13051 = sst [smem:[#allocation29_spill]] %s11344_s17  ;;  %s11259_s1 = smov 13  }
   0xb   :  { %13052 = sst [smem:[#allocation30_spill]] %s11349_s21  ;;  %s11260_s7 = smov 14  }
   0xc   :  { %13053 = sst [smem:[#allocation31_spill]] %s11354_s25  ;;  %s11262_s22 = smov 16  }
   0xd   :  { %s11359_s29 = sld [smem:[%s12990_s0 + %s11252_s26]]   ;;  %s11258_s26 = smov 12  }
   0xe   :  { %s11364_s3 = sld [smem:[%s12990_s0 + %s11253_s30]]   ;;  %s11263_s28 = smov 17  }
   0xf   :  { %s11369_s8 = sld [smem:[%s12990_s0 + %s11254_s4]]  }
  0x10   :  { %s11374_s14 = sld [smem:[%s12990_s0 + %s11255_s10]]  }
  0x11   :  { %s11379_s19 = sld [smem:[%s12990_s0 + %s11256_s15]]   ;;  %s11261_s15 = smov 15  }
  0x12   :  { %s11384_s24 = sld [smem:[%s12990_s0 + %s11257_s20]]  }
  0x13   :  { %13054 = sst [smem:[#allocation32_spill]] %s11359_s29 }
  0x14   :  { %13055 = sst [smem:[#allocation33_spill]] %s11364_s3 }
  0x15   :  { %13056 = sst [smem:[#allocation34_spill]] %s11369_s8 }
  0x16   :  { %13057 = sst [smem:[#allocation35_spill]] %s11374_s14 }
  0x17   :  { %13058 = sst [smem:[#allocation36_spill]] %s11379_s19 }
  0x18   :  { %13059 = sst [smem:[#allocation37_spill]] %s11384_s24 }
  0x19   :  { %s11389_s30 = sld [smem:[%s12990_s0 + %s11258_s26]]  }
  0x1a   :  { %s11394_s6 = sld [smem:[%s12990_s0 + %s11259_s1]]  }
  0x1b   :  { %s11399_s12 = sld [smem:[%s12990_s0 + %s11260_s7]]   ;;  %s11264_s7 = smov 18  }
  0x1c   :  { %s11404_s20 = sld [smem:[%s12990_s0 + %s11261_s15]]   ;;  %s11265_s15 = smov 19  }
  0x1d   :  { %s11409_s27 = sld [smem:[%s12990_s0 + %s11262_s22]]   ;;  %s11266_s22 = smov 20  }
  0x1e   :  { %s11414_s4 = sld [smem:[%s12990_s0 + %s11263_s28]]   ;;  %s11267_s28 = smov 21  }
  0x1f   :  { %13060 = sst [smem:[#allocation38_spill]] %s11389_s30 }
  0x20   :  { %13061 = sst [smem:[#allocation39_spill]] %s11394_s6 }
  0x21   :  { %13062 = sst [smem:[#allocation40_spill]] %s11399_s12 }
  0x22   :  { %13063 = sst [smem:[#allocation41_spill]] %s11404_s20 }
  0x23   :  { %13064 = sst [smem:[#allocation42_spill]] %s11409_s27 }
  0x24   :  { %13065 = sst [smem:[#allocation43_spill]] %s11414_s4 }
  0x25   :  { %s11419_s13 = sld [smem:[%s12990_s0 + %s11264_s7]]   ;;  %s11268_s7 = smov 22  }
  0x26   :  { %s11424_s20 = sld [smem:[%s12990_s0 + %s11265_s15]]   ;;  %s11269_s15 = smov 23  }
  0x27   :  { %s11429_s6 = sld [smem:[%s12990_s0 + %s11266_s22]]   ;;  %s11270_s22 = smov 24  }
  0x28   :  { %s11434_s30 = sld [smem:[%s12990_s0 + %s11267_s28]]   ;;  %s11271_s28 = smov 25  }
  0x29   :  { %s11439_s24 = sld [smem:[%s12990_s0 + %s11268_s7]]   ;;  %s11272_s7 = smov 26  }
  0x2a   :  { %s11444_s8 = sld [smem:[%s12990_s0 + %s11269_s15]]   ;;  %s11273_s15 = smov 27  }
  0x2b   :  { %13066 = sst [smem:[#allocation44_spill]] %s11419_s13 }
  0x2c   :  { %13067 = sst [smem:[#allocation45_spill]] %s11424_s20 }
  0x2d   :  { %13068 = sst [smem:[#allocation46_spill]] %s11429_s6 }
  0x2e   :  { %13069 = sst [smem:[#allocation47_spill]] %s11434_s30 }
  0x2f   :  { %13070 = sst [smem:[#allocation48_spill]] %s11439_s24 }
  0x30   :  { %13071 = sst [smem:[#allocation49_spill]] %s11444_s8 }
  0x31   :  { %s11449_s19 = sld [smem:[%s12990_s0 + %s11270_s22]]   ;;  %s11274_s22 = smov 28  }
  0x32   :  { %s11454_s30 = sld [smem:[%s12990_s0 + %s11271_s28]]   ;;  %s11275_s28 = smov 29  }
  0x33   :  { %s11459_s24 = sld [smem:[%s12990_s0 + %s11272_s7]]   ;;  %s11276_s7 = smov 30  }
  0x34   :  { %s11464_s8 = sld [smem:[%s12990_s0 + %s11273_s15]]   ;;  %s11277_s15 = smov 31  }
  0x37   :  { %13072 = sst [smem:[#allocation50_spill]] %s11449_s19 }
  0x38   :  { %13073 = sst [smem:[#allocation51_spill]] %s11454_s30 }
  0x39   :  { %13074 = sst [smem:[#allocation52_spill]] %s11459_s24 }
  0x3a   :  { %13075 = sst [smem:[#allocation53_spill]] %s11464_s8 }
  0x3b   :  { %s11469_s19 = sld [smem:[%s12990_s0 + %s11274_s22]]   ;;  %s11278_s22 = smov 32  }
  0x3c   :  { %s11474_s30 = sld [smem:[%s12990_s0 + %s11275_s28]]   ;;  %s11279_s28 = smov 33  }
  0x3d   :  { %s11479_s24 = sld [smem:[%s12990_s0 + %s11276_s7]]   ;;  %s11280_s7 = smov 34  }
  0x3e   :  { %s11484_s8 = sld [smem:[%s12990_s0 + %s11277_s15]]   ;;  %s11281_s15 = smov 35  }
  0x41   :  { %13076 = sst [smem:[#allocation54_spill]] %s11469_s19 }
  0x42   :  { %13077 = sst [smem:[#allocation55_spill]] %s11474_s30 }
  0x43   :  { %13078 = sst [smem:[#allocation56_spill]] %s11479_s24 }
  0x44   :  { %13079 = sst [smem:[#allocation57_spill]] %s11484_s8 }
  0x45   :  { %s11489_s19 = sld [smem:[%s12990_s0 + %s11278_s22]]   ;;  %s11282_s22 = smov 36  }
  0x46   :  { %s11494_s30 = sld [smem:[%s12990_s0 + %s11279_s28]]   ;;  %s11283_s28 = smov 37  }
  0x47   :  { %s11499_s24 = sld [smem:[%s12990_s0 + %s11280_s7]]   ;;  %s11284_s7 = smov 38  }
  0x48   :  { %s11504_s8 = sld [smem:[%s12990_s0 + %s11281_s15]]   ;;  %s11285_s15 = smov 39  }
  0x4b   :  { %13080 = sst [smem:[#allocation58_spill]] %s11489_s19 }
  0x4c   :  { %13081 = sst [smem:[#allocation59_spill]] %s11494_s30 }
  0x4d   :  { %13082 = sst [smem:[#allocation60_spill]] %s11499_s24 }
  0x4e   :  { %13083 = sst [smem:[#allocation61_spill]] %s11504_s8 }
  0x4f   :  { %s11509_s19 = sld [smem:[%s12990_s0 + %s11282_s22]]   ;;  %s11286_s22 = smov 40  }
  0x50   :  { %s11514_s30 = sld [smem:[%s12990_s0 + %s11283_s28]]   ;;  %s11287_s28 = smov 41  }
  0x51   :  { %s11519_s24 = sld [smem:[%s12990_s0 + %s11284_s7]]   ;;  %s11288_s7 = smov 42  }
  0x52   :  { %s11524_s8 = sld [smem:[%s12990_s0 + %s11285_s15]]   ;;  %s11289_s15 = smov 43  }
  0x55   :  { %13084 = sst [smem:[#allocation62_spill]] %s11509_s19 }
  0x56   :  { %13085 = sst [smem:[#allocation63_spill]] %s11514_s30 }
  0x57   :  { %13086 = sst [smem:[#allocation64_spill]] %s11519_s24 }
  0x58   :  { %13087 = sst [smem:[#allocation65_spill]] %s11524_s8 }
  0x59   :  { %s11529_s19 = sld [smem:[%s12990_s0 + %s11286_s22]]   ;;  %s11290_s22 = smov 44  }
  0x5a   :  { %s11534_s30 = sld [smem:[%s12990_s0 + %s11287_s28]]   ;;  %s11291_s28 = smov 45  }
  0x5b   :  { %s11539_s24 = sld [smem:[%s12990_s0 + %s11288_s7]]   ;;  %s11292_s7 = smov 46  }
  0x5c   :  { %s11544_s8 = sld [smem:[%s12990_s0 + %s11289_s15]]   ;;  %s11293_s15 = smov 47  }
  0x5f   :  { %13088 = sst [smem:[#allocation66_spill]] %s11529_s19 }
  0x60   :  { %13089 = sst [smem:[#allocation67_spill]] %s11534_s30 }
  0x61   :  { %13090 = sst [smem:[#allocation68_spill]] %s11539_s24 }
  0x62   :  { %13091 = sst [smem:[#allocation69_spill]] %s11544_s8 }
  0x63   :  { %s11549_s19 = sld [smem:[%s12990_s0 + %s11290_s22]]   ;;  %s11294_s22 = smov 48  }
  0x64   :  { %s11554_s30 = sld [smem:[%s12990_s0 + %s11291_s28]]   ;;  %s11295_s28 = smov 49  }
  0x65   :  { %s11559_s24 = sld [smem:[%s12990_s0 + %s11292_s7]]   ;;  %s11296_s7 = smov 50  }
  0x66   :  { %s11564_s8 = sld [smem:[%s12990_s0 + %s11293_s15]]   ;;  %s11297_s15 = smov 51  }
  0x67   :  { %s11574_s9 = sld [smem:[%s12990_s0 + %s11295_s28]]   ;;  %s11299_s28 = smov 53  }
  0x68   :  { %s11579_s29 = sld [smem:[%s12990_s0 + %s11296_s7]]  }
  0x69   :  { %13092 = sst [smem:[#allocation70_spill]] %s11549_s19 }
  0x6a   :  { %13093 = sst [smem:[#allocation71_spill]] %s11554_s30 }
  0x6b   :  { %13094 = sst [smem:[#allocation72_spill]] %s11559_s24 }
  0x6c   :  { %13095 = sst [smem:[#allocation73_spill]] %s11564_s8 }
  0x6d   :  { %s11569_s19 = sld [smem:[%s12990_s0 + %s11294_s22]]   ;;  %s11298_s22 = smov 52  }
  0x6e   :  { %13097 = sst [smem:[#allocation75_spill]] %s11574_s9 }
  0x6f   :  { %13098 = sst [smem:[#allocation76_spill]] %s11579_s29 }
  0x70   :  { %s11584_s8 = sld [smem:[%s12990_s0 + %s11297_s15]]  }
  0x71   :  { %s11589_s3 = sld [smem:[%s12990_s0 + %s11298_s22]]  }
  0x72   :  { %s11594_s9 = sld [smem:[%s12990_s0 + %s11299_s28]]  }
  0x73   :  { %13096 = sst [smem:[#allocation74_spill]] %s11569_s19 }
  0x77   :  { %13099 = sst [smem:[#allocation77_spill]] %s11589_s3 }
  0x78   :  { %13100 = sst [smem:[#allocation78_spill]] %s11594_s9 }
  0x79   :  { %112 = vsyncpa [#allocation3], 0 }
  0x7a   :  { %113 = vsyncpa [#allocation5], 0 }
  0x7b   :  { %114 = vsyncpa [#allocation8], 0 }
  0x7c   :  { %115 = vsyncpa [#allocation11], 0 }
  0x7d   :  { %116 = vsyncpa [#allocation14], 0 }
  0x7e   :  { %117 = vsyncpa [#allocation17], 0  ;;  %s11596_s7 = smov 0   ;;  %s11598_s10 = smov 0  }
  0x7f   :  { %s11600_s11 = smov 0  }
  0x80 LB: > { %s13101_s14 = sld [smem:[#allocation35_spill]]  ;;  %s11609_s0 = sadd.s32 4294967295, %s11245_s11   ;;  %s11237_s7 = sphi %s11596_s7, %s13196_s7   ;;  %s11245_s11 = sphi %s11600_s11, %s13195_s11   ;;  %s11241_s10 = sphi %s11598_s10, %s13197_s10  }
  0x81   : > { %13102 = sst [smem:[#allocation79_spill]] %s11241_s10  ;;  %s11611_s15 = sadd.s32 1, %s11245_s11  }
  0x82   : > { %13103 = sst [smem:[#allocation80_spill]] %s11609_s0  ;;  %s1255_s16 = ssub.s32 %s11245_s11, %s11611_s15 }
  0x83   : > { %13104 = sst [smem:[#allocation81_spill]] %s11611_s15  ;;  %s1258_s18 = sadd.s32 1, %s11241_s10 }
  0x84   : > { %p1256_p0 = scmp.eq.s32.totalorder %s1255_s16, 0  ;;  %p1268_p1 = scmp.ne.s32.totalorder %s11241_s10, %s11237_s7 }
  0x85   : > { %p1269_p2 = scmp.eq.s32.totalorder %s11609_s0, 1  ;;  %p9184_p3 = scmp.ge.s32.totalorder %s11245_s11, 1 }
  0x86   : > { %s11619_s22 = scalar_select %p1256_p0, %s11241_s10, %s1258_s18  }
  0x87   : > { %p11621_p4 = por %p1269_p2, %p1268_p1  ;;  %p1282_p5 = scmp.lt.s32.totalorder %s11245_s11, 3 }
  0x88   : > { %13105 = sst [smem:[#allocation82_spill]] %s11619_s22  ;;  %p13022_p6 = scmp.eq.s32.totalorder %s11609_s0, 0 }
  0x89   : > { %s13106_s23 = scalar_select %p11621_p4, 1, 0 }
  0x8a   : > { %p11626_p7 = pnand %p9184_p3, %p1282_p5  ;;  %s11300_s28 = smov [#allocation4]  }
  0x8b   : > { %13107 = sst [smem:[#allocation83_spill]] %s13106_s23  ;;  %s1342_s1 = sshll.u32 %s11300_s28, 4  ;;  %s1343_s1 = int_to_ptr.vmem [resolvable:$true] %s1342_s1 }
  0x8c   : > { %s13108_s26 = scalar_select %p11626_p7, 1, 0 }
  0x8d   : > { %p10592_p8 = pneg %p11626_p7  ;;  %s11301_s2 = smov [#allocation7]  }
  0x8e   : > { %s1364_s16 = sshll.u32 %s11301_s2, 4  ;;  %s11302_s11 = smov [#allocation10]   ;;  %s1365_s16 = int_to_ptr.vmem [resolvable:$true] %s1364_s16 }
  0x8f   : > { %p11634_p9 = pnand %p13022_p6, %p10592_p8  ;;  %s1386_s22 = sshll.u32 %s11302_s11, 4  ;;  %s11638_s22 = int_to_ptr.vmem [resolvable:$true] %s1386_s22 }
  0x90   : > { %s10924_s28 = scalar_lea.vmem %s1343_s1, 16  ;;  %s10931_s2 = scalar_lea.vmem %s1343_s1, 32 }
  0x91   : > { %p11642_p10 = pneg %p11634_p9  ;;  %p10925_p11 = scmp.ne.s32.totalorder %s1343_s1, %s10924_s28 }
  0x92   : > { %p10932_p0 = scmp.lt.s32.totalorder %s1343_s1, %s1343_s1  ;;  %p10933_p1 = scmp.lt.s32.totalorder %s10931_s2, %s10924_s28 }
  0x93   : > { %p10927_p12 = pnand %p10925_p11, %p11642_p10 }
  0x94   : > { %p10934_p2 = por %p10933_p1, %p10932_p0 }
  0x95   : > { %p10928_p13 = pneg %p10927_p12 }
  0x97   : > { %p10935_p3 = pnand %p10934_p2, %p10928_p13 }
  0x99   : > { %10938 = shalt.err (!%p10935_p3)
}
  0x9a   : > { %s13111_s27 = sld [smem:[#allocation42_spill]]  ;;  %s10950_s11 = scalar_lea.vmem %s1365_s16, 16 }
  0x9b   : > { %p10951_p5 = scmp.ne.s32.totalorder %s1365_s16, %s10950_s11  ;;  %s10957_s15 = scalar_lea.vmem %s1365_s16, 32 }
  0x9c   : > { %p10958_p4 = scmp.lt.s32.totalorder %s1365_s16, %s1365_s16  ;;  %p10959_p11 = scmp.lt.s32.totalorder %s10957_s15, %s10950_s11 }
  0x9d   : > { %p10953_p8 = pnand %p10951_p5, %p11642_p10 }
  0x9e   : > { %p10960_p12 = por %p10959_p11, %p10958_p4 }
  0x9f   : > { %p10954_p6 = pneg %p10953_p8 }
  0xa0   : > { %10598 = dma.hbm_to_vmem [thread:$0]  (!%p11634_p9), %s13111_s27, 16, %s1343_s1, [#allocation5]  }
  0xa1   : > { %p10961_p7 = pnand %p10960_p12, %p10954_p6 }
  0xa3   : > { %10964 = shalt.err (!%p10961_p7)
}
  0xa4   : > { %s13112_s13 = sld [smem:[#allocation44_spill]]  ;;  %s10976_s1 = scalar_lea.vmem %s11638_s22, 16 }
  0xa5   : > { %p10977_p13 = scmp.ne.s32.totalorder %s11638_s22, %s10976_s1  ;;  %s10983_s28 = scalar_lea.vmem %s11638_s22, 32 }
  0xa6   : > { %p10984_p2 = scmp.lt.s32.totalorder %s11638_s22, %s11638_s22  ;;  %p10985_p4 = scmp.lt.s32.totalorder %s10983_s28, %s10976_s1 }
  0xa7   : > { %p10979_p0 = pnand %p10977_p13, %p11642_p10 }
  0xa8   : > { %p10986_p6 = por %p10985_p4, %p10984_p2 }
  0xa9   : > { %p10980_p1 = pneg %p10979_p0 }
  0xaa   : > { %10604 = dma.hbm_to_vmem [thread:$0]  (!%p11634_p9), %s13112_s13, 16, %s1365_s16, [#allocation8]  }
  0xab   : > { %p10987_p7 = pnand %p10986_p6, %p10980_p1 }
  0xad   : > { %10990 = shalt.err (!%p10987_p7)
}
  0xae   : > { %s13113_s6 = sld [smem:[#allocation46_spill]]  ;;  %s11303_s15 = smov [#allocation13]  }
  0xaf   : > { %s1480_s16 = sshll.u32 %s11303_s15, 4  ;;  %s11304_s2 = smov [#allocation16]   ;;  %s1481_s16 = int_to_ptr.vmem [resolvable:$true] %s1480_s16 }
  0xb0   : > { %s1508_s11 = sshll.u32 %s11304_s2, 4  ;;  %s11002_s13 = scalar_lea.vmem %s1481_s16, 16  ;;  %s1509_s11 = int_to_ptr.vmem [resolvable:$true] %s1508_s11 }
  0xb1   : > { %p11003_p3 = scmp.ne.s32.totalorder %s1481_s16, %s11002_s13  ;;  %s11009_s1 = scalar_lea.vmem %s1481_s16, 32 }
  0xb2   : > { %p11010_p11 = scmp.lt.s32.totalorder %s1481_s16, %s1481_s16  ;;  %p11011_p12 = scmp.lt.s32.totalorder %s11009_s1, %s11002_s13 }
  0xb3   : > { %p11005_p5 = pnand %p11003_p3, %p11642_p10 }
  0xb4   : > { %10610 = dma.hbm_to_vmem [thread:$0]  (!%p11634_p9), %s13113_s6, 16, %s11638_s22, [#allocation11]  }
  0xb5   : > { %p11006_p8 = pneg %p11005_p5  ;;  %p11012_p13 = por %p11011_p12, %p11010_p11 }
  0xb7   : > { %p11013_p0 = pnand %p11012_p13, %p11006_p8 }
  0xb9   : > { %11016 = shalt.err (!%p11013_p0)
}
  0xba   : > { %s13114_s24 = sld [smem:[#allocation72_spill]]  ;;  %s11028_s22 = scalar_lea.vmem %s1509_s11, 16 }
  0xbb   : > { %p11029_p1 = scmp.ne.s32.totalorder %s1509_s11, %s11028_s22  ;;  %s11035_s28 = scalar_lea.vmem %s1509_s11, 32 }
  0xbc   : > { %p11036_p6 = scmp.lt.s32.totalorder %s1509_s11, %s1509_s11  ;;  %p11037_p7 = scmp.lt.s32.totalorder %s11035_s28, %s11028_s22 }
  0xbd   : > { %p11031_p2 = pnand %p11029_p1, %p11642_p10 }
  0xbe   : > { %p11038_p3 = por %p11037_p7, %p11036_p6 }
  0xbf   : > { %p11032_p4 = pneg %p11031_p2 }
  0xc0   : > { %10616 = dma.hbm_to_vmem [thread:$0]  (!%p11634_p9), %s13114_s24, 16, %s1481_s16, [#allocation14]  }
  0xc1   : > { %p11039_p5 = pnand %p11038_p3, %p11032_p4 }
  0xc3   : > { %11042 = shalt.err (!%p11039_p5)
}
  0xc4   : > { %s13115_s29 = sld [smem:[#allocation76_spill]]  ;;  %s11305_s13 = smov [#allocation2]  }
  0xc5   : > { %s1328_s15 = sshll.u32 %s11305_s13, 4  ;;  %s11306_s16 = smov [#allocation6]   ;;  %s1329_s15 = int_to_ptr.vmem [resolvable:$true] %s1328_s15 }
  0xc6   : > { %s1353_s2 = sshll.u32 %s11306_s16, 4  ;;  %s11054_s1 = scalar_lea.vmem %s1329_s15, 16  ;;  %s1354_s2 = int_to_ptr.vmem [resolvable:$true] %s1353_s2 }
  0xc7   : > { %p11055_p8 = scmp.ne.s32.totalorder %s1329_s15, %s11054_s1  ;;  %s11061_s6 = scalar_lea.vmem %s1329_s15, 32 }
  0xc8   : > { %p11062_p13 = scmp.lt.s32.totalorder %s1329_s15, %s1329_s15  ;;  %p11063_p0 = scmp.lt.s32.totalorder %s11061_s6, %s11054_s1 }
  0xc9   : > { %p11057_p11 = pnand %p11055_p8, %p11642_p10 }
  0xca   : > { %10622 = dma.hbm_to_vmem [thread:$0]  (!%p11634_p9), %s13115_s29, 16, %s1509_s11, [#allocation17]  }
  0xcb   : > { %p11058_p12 = pneg %p11057_p11  ;;  %p11064_p1 = por %p11063_p0, %p11062_p13 }
  0xcd   : > { %p11065_p2 = pnand %p11064_p1, %p11058_p12 }
  0xcf   : > { %11068 = shalt.err (!%p11065_p2)
}
  0xd0   : > { %s13116_s12 = sld [smem:[#allocation40_spill]]  ;;  %s11080_s11 = scalar_lea.vmem %s1354_s2, 16 }
  0xd1   : > { %p11081_p4 = scmp.ne.s32.totalorder %s1354_s2, %s11080_s11  ;;  %s11087_s22 = scalar_lea.vmem %s1354_s2, 32 }
  0xd2   : > { %p11088_p3 = scmp.lt.s32.totalorder %s1354_s2, %s1354_s2  ;;  %p11089_p5 = scmp.lt.s32.totalorder %s11087_s22, %s11080_s11 }
  0xd3   : > { %p11083_p6 = pnand %p11081_p4, %p11642_p10 }
  0xd4   : > { %p11090_p8 = por %p11089_p5, %p11088_p3 }
  0xd5   : > { %p11084_p7 = pneg %p11083_p6 }
  0xd6   : > { %10595 = dma.hbm_to_vmem [thread:$0]  (!%p11634_p9), %s13116_s12, 16, %s1329_s15, [#allocation3]  }
  0xd7   : > { %p11091_p11 = pnand %p11090_p8, %p11084_p7 }
  0xd9   : > { %11094 = shalt.err (!%p11091_p11)
}
  0xda   : > { %s13117_s4 = sld [smem:[#allocation43_spill]]  ;;  %s11307_s6 = smov [#allocation9]  }
  0xdb   : > { %s1375_s28 = sshll.u32 %s11307_s6, 4  ;;  %s11308_s13 = smov [#allocation12]   ;;  %s1376_s28 = int_to_ptr.vmem [resolvable:$true] %s1375_s28 }
  0xdc   : > { %s1469_s15 = sshll.u32 %s11308_s13, 4  ;;  %s11106_s16 = scalar_lea.vmem %s1376_s28, 16  ;;  %s1470_s15 = int_to_ptr.vmem [resolvable:$true] %s1469_s15 }
  0xdd   : > { %p11107_p12 = scmp.ne.s32.totalorder %s1376_s28, %s11106_s16  ;;  %s11113_s1 = scalar_lea.vmem %s1376_s28, 32 }
  0xde   : > { %p11114_p1 = scmp.lt.s32.totalorder %s1376_s28, %s1376_s28  ;;  %p11115_p2 = scmp.lt.s32.totalorder %s11113_s1, %s11106_s16 }
  0xdf   : > { %p11109_p13 = pnand %p11107_p12, %p11642_p10 }
  0xe0   : > { %10601 = dma.hbm_to_vmem [thread:$0]  (!%p11634_p9), %s13117_s4, 16, %s1354_s2, [#allocation5]  }
  0xe1   : > { %p11110_p0 = pneg %p11109_p13  ;;  %p11116_p4 = por %p11115_p2, %p11114_p1 }
  0xe3   : > { %p11117_p6 = pnand %p11116_p4, %p11110_p0 }
  0xe5   : > { %11120 = shalt.err (!%p11117_p6)
}
  0xe6   : > { %s13118_s20 = sld [smem:[#allocation45_spill]]  ;;  %s11132_s2 = scalar_lea.vmem %s1470_s15, 16 }
  0xe7   : > { %p11133_p7 = scmp.ne.s32.totalorder %s1470_s15, %s11132_s2  ;;  %s11139_s11 = scalar_lea.vmem %s1470_s15, 32 }
  0xe8   : > { %p11140_p8 = scmp.lt.s32.totalorder %s1470_s15, %s1470_s15  ;;  %p11141_p11 = scmp.lt.s32.totalorder %s11139_s11, %s11132_s2 }
  0xe9   : > { %p11135_p3 = pnand %p11133_p7, %p11642_p10 }
  0xea   : > { %p11142_p12 = por %p11141_p11, %p11140_p8 }
  0xeb   : > { %p11136_p5 = pneg %p11135_p3 }
  0xec   : > { %10607 = dma.hbm_to_vmem [thread:$0]  (!%p11634_p9), %s13118_s20, 16, %s1376_s28, [#allocation8]  }
  0xed   : > { %p11143_p13 = pnand %p11142_p12, %p11136_p5 }
  0xef   : > { %11146 = shalt.err (!%p11143_p13)
}
  0xf0   : > { %s13119_s30 = sld [smem:[#allocation71_spill]]  ;;  %s11309_s22 = smov [#allocation15]  }
  0xf1   : > { %s1494_s6 = sshll.u32 %s11309_s22, 4  ;;  %s11310_s28 = smov [#allocation18]   ;;  %s1495_s6 = int_to_ptr.vmem [resolvable:$true] %s1494_s6 }
  0xf2   : > { %s1522_s13 = sshll.u32 %s11310_s28, 4  ;;  %s11158_s16 = scalar_lea.vmem %s1495_s6, 16  ;;  %s1523_s13 = int_to_ptr.vmem [resolvable:$true] %s1522_s13 }
  0xf3   : > { %p11159_p0 = scmp.ne.s32.totalorder %s1495_s6, %s11158_s16  ;;  %s11165_s1 = scalar_lea.vmem %s1495_s6, 32 }
  0xf4   : > { %p11166_p4 = scmp.lt.s32.totalorder %s1495_s6, %s1495_s6  ;;  %p11167_p6 = scmp.lt.s32.totalorder %s11165_s1, %s11158_s16 }
  0xf5   : > { %p11161_p1 = pnand %p11159_p0, %p11642_p10 }
  0xf6   : > { %10613 = dma.hbm_to_vmem [thread:$0]  (!%p11634_p9), %s13119_s30, 16, %s1470_s15, [#allocation11]  }
  0xf7   : > { %p11162_p2 = pneg %p11161_p1  ;;  %p11168_p7 = por %p11167_p6, %p11166_p4 }
  0xf9   : > { %p11169_p3 = pnand %p11168_p7, %p11162_p2 }
  0xfb   : > { %11172 = shalt.err (!%p11169_p3)
}
  0xfc   : > { %s13120_s19 = sld [smem:[#allocation74_spill]]  ;;  %s11184_s15 = scalar_lea.vmem %s1523_s13, 16 }
  0xfd   : > { %p11185_p5 = scmp.ne.s32.totalorder %s1523_s13, %s11184_s15  ;;  %s11191_s2 = scalar_lea.vmem %s1523_s13, 32 }
  0xfe   : > { %p11192_p12 = scmp.lt.s32.totalorder %s1523_s13, %s1523_s13  ;;  %p11193_p13 = scmp.lt.s32.totalorder %s11191_s2, %s11184_s15 }
  0xff   : > { %p11187_p8 = pnand %p11185_p5, %p11642_p10 }
 0x100   : > { %p11194_p0 = por %p11193_p13, %p11192_p12 }
 0x101   : > { %p11188_p11 = pneg %p11187_p8 }
 0x102   : > { %10619 = dma.hbm_to_vmem [thread:$0]  (!%p11634_p9), %s13120_s19, 16, %s1495_s6, [#allocation14]  }
 0x103   : > { %p11195_p1 = pnand %p11194_p0, %p11188_p11 }
 0x105   : > { %11198 = shalt.err (!%p11195_p1)
}
 0x106   : > { %s13121_s3 = sld [smem:[#allocation77_spill]]  ;;  %p13122_p2 = scmp.ne.s32.totalorder %s13108_s26, 0 }
 0x107   : > { %p13123_p4 = scmp.eq.s32.totalorder (!%p13122_p2), %s11609_s0, 0 }
 0x108   : > { %1558 = sbr.rel (%p13122_p2) target bundleno = 17913 (0x45f9), region = 232 }
 0x10c   : > { %10625 = dma.hbm_to_vmem [thread:$0]  (!%p11634_p9), %s13121_s3, 16, %s1523_s13, [#allocation17]  }
 0x10d   : > { %11212 = dma.done.wait (%p13123_p4), [#allocation3], 16   ;;  %p13124_p6 = pmov %p13123_p4 }
 0x10e   : > { %p13125_p10 = pmov %p13123_p4 }
 0x10f   : > { %11214 = vsyncadd (%p13124_p6), [#allocation3], 4294967280 }
 0x110   : > { %11216 = dma.done.wait (%p13125_p10), [#allocation5], 32   ;;  %p13126_p7 = pmov %p13123_p4 }
 0x111   : > { %p13127_p3 = pmov %p13123_p4 }
 0x112   : > { %11218 = vsyncadd (%p13126_p7), [#allocation5], 4294967264 }
 0x113   : > { %11220 = dma.done.wait (%p13127_p3), [#allocation8], 32   ;;  %p13128_p9 = pmov %p13127_p3 }
 0x114   : > { %p13129_p5 = pmov %p13127_p3 }
 0x115   : > { %11222 = vsyncadd (%p13128_p9), [#allocation8], 4294967264 }
 0x116   : > { %11224 = dma.done.wait (%p13129_p5), [#allocation11], 32   ;;  %p13130_p8 = pmov %p13127_p3 }
 0x117   : > { %p13131_p11 = pmov %p13127_p3 }
 0x118   : > { %11226 = vsyncadd (%p13130_p8), [#allocation11], 4294967264 }
 0x119   : > { %11228 = dma.done.wait (%p13131_p11), [#allocation14], 32   ;;  %p13132_p12 = pmov %p13127_p3 }
 0x11a   : > { %p13133_p13 = pmov %p13127_p3 }
 0x11b   : > { %11230 = vsyncadd (%p13132_p12), [#allocation14], 4294967264 }
 0x11c   : > { %11232 = dma.done.wait (%p13133_p13), [#allocation17], 32   ;;  %p13134_p0 = pmov %p13127_p3 }
 0x11d   : > { %s13135_s5 = sld [smem:[#allocation26_spill]]  ;;  %p1730_p1 = scmp.lt.s32.totalorder %s11609_s0, 1  ;;  %vm1775_vm0 = vcmask 1042432   ;;  %vm1762_vm1 = vcmask 23552   ;;  %vm1876_vm2 = vcmask 64512   ;;  %v2051_v19 = vld [vmem:[%s13101_s14 + $0x10] sm:$0xff] }
 0x11e   : > { %11234 = vsyncadd (%p13134_p0), [#allocation17], 4294967264  ;;  %s13136_s17 = sld [smem:[#allocation29_spill]]  ;;  %v2052_v20 = vld [vmem:[%s13101_s14 + $0x18] sm:$0xff]  ;;  %v2049_v25 = vld [vmem:[%s13101_s14] sm:$0xff]  ;;  %vm1993_vm3 = vcmask 261120  }
 0x11f   : > { %s11735_s10 = scalar_select %p1730_p1, %s11609_s0, 1  ;;  %v2056_v21 = vpack.c.bf16 %v2052_v20, %v2051_v19  ;;  %v2050_v26 = vld [vmem:[%s13101_s14 + $0x8] sm:$0xff]  ;;  %vm2672_vm4 = vcmask 1043456   ;;  %vm11319_vm5 = vmmov 0   ;;  %vm3645_vm6 = vcmask 523264  }
 0x120   : > { %s13137_s25 = sld [smem:[#allocation31_spill]]  ;;  %v2055_v27 = vpack.c.bf16 %v2050_v26, %v2049_v25  ;;  %s13036_s15 = smov 96   ;;  %vm6343_vm7 = vcmask 15360  }
 0x121   : > { %s9508_s26 = sshll.u32 %s11735_s10, 5  ;;  %s13138_s21 = sld [smem:[#allocation30_spill]] }
 0x122   : > { %s13139_s11 = sld [smem:[#allocation33_spill]]  ;;  %s13038_s2 = smov 88  }
 0x123   : > { %s1734_s18 = scalar_lea.vmem %s13135_s5, %s9508_s26  ;;  %s13141_s6 = sld [smem:[#allocation32_spill]] }
 0x124   : > { %v1754_v0 = vld [vmem:[%s13136_s17] sm:$0x7]  ;;  %v1746_v2 = vld [vmem:[%s1734_s18 + $0x8] sm:$0xff]  ;;  %v1747_v3 = vld [vmem:[%s1734_s18 + $0x10] sm:$0xff]  ;;  %s13142_s28 = sld [smem:[#allocation27_spill]]  ;;  %s13158_s3 = smov 96  }
 0x125   : > { %v1745_v1 = vld [vmem:[%s1734_s18] sm:$0xff]  ;;  %9830 = vmatprep.subr.msk.mxu0 %vm1775_vm0, %v1754_v0  ;;  %v1748_v4 = vld [vmem:[%s1734_s18 + $0x18] sm:$0xff]  ;;  %s13143_s16 = sld [smem:[#allocation36_spill]]  ;;  %s13161_s4 = smov 112  }
 0x126   : > { %9832 = vmatprep.mubr.msk.f32.mxu0 %vm1762_vm1, %v1745_v1  ;;  %9831 = vmatpush3.msk.msra.mxu0 %vm1775_vm0, %v1754_v0  ;;  %v1868_v5 = vld [vmem:[%s13137_s25] sm:$0xff]  ;;  %s13144_s1 = sld [smem:[#allocation34_spill]]  ;;  %s13163_s12 = smov 104  }
 0x127   : > { %9833 = vmatmul.mubr.msk.f32.vlgmr.msra.gmra.mxu0 %vm1762_vm1, %v1746_v2  ;;  %9838 = vmatprep.subr.mxu1 %v1868_v5  ;;  %v9215_v6 = vld [vmem:[%s13138_s21] ss:$0 sm:$0xff]  ;;  %s13145_s18 = sld [smem:[#allocation37_spill]]  ;;  %s13164_s14 = smov 72  }
 0x128   : > { %9835 = vmatprep.mubr.msk.f32.mxu0 %vm1762_vm1, %v1747_v3  ;;  %9839 = vmatpush3.msra.mxu1 %v1868_v5  ;;  %s13140_s22 = smov %s13139_s11  ;;  %v1980_v22 = vld [vmem:[%s13139_s11 + $0x10] sm:$0xff]  ;;  %s13032_s11 = smov 80  }
 0x129   : > { %v1981_v23 = vld [vmem:[%s13140_s22 + $0x18] sm:$0xff]  ;;  %9854 = vmatprep.subr.bf16.mxu1 %v2056_v21  ;;  %v1978_v28 = vld [vmem:[%s13140_s22] sm:$0xff]  ;;  %v1979_v29 = vld [vmem:[%s13140_s22 + $0x8] sm:$0xff]  ;;  %s13162_s5 = sld [smem:[#allocation51_spill]] }
 0x12a   : > { %v1985_v24 = vpack.c.bf16 %v1981_v23, %v1980_v22  ;;  %v1984_v30 = vpack.c.bf16 %v1979_v29, %v1978_v28  ;;  %v9221_v31 = vld [vmem:[%s13141_s6] ss:$0 sm:$0xff]  ;;  %s11760_s13 = scalar_lea.vmem %s13142_s28, %s9508_s26  ;;  %s13034_s26 = smov 120  }
 0x12b   : > { %9836 = vmatmul.mubr.msk.f32.gmra.mxu0 %vm1762_vm1, %v1748_v4  ;;  %v1750_v34 = vld [vmem:[%s11760_s13 + $0x8] sm:$0xff]  ;;  %v1749_v35 = vld [vmem:[%s11760_s13] sm:$0xff]  ;;  %v1752_v43 = vld [vmem:[%s11760_s13 + $0x18] sm:$0xff]  ;;  %s13030_s6 = smov 112   ;;  %s13026_s28 = smov 72  }
 0x12c   : > { %9846 = vmatprep.subr.bf16.mxu0 %v1985_v24  ;;  %v1751_v44 = vld [vmem:[%s11760_s13 + $0x10] sm:$0xff]  ;;  %v9229_v55 = vld [vmem:[%s13143_s16] ss:$0 sm:$0xff]  ;;  %s13028_s16 = smov 104   ;;  %s13165_s17 = sld [smem:[#allocation52_spill]] }
 0x12d   : > { %9847 = vmatpush3.bf16.msra.mxu0 %v1985_v24  ;;  %v9226_v56 = vld [vmem:[%s13144_s1] ss:$0 sm:$0xff]  ;;  %s13146_s1 = sld [smem:[#allocation38_spill]] }
 0x12e   : > { %9848 = vmatprep.subr.bf16.mxu0 %v1984_v30  ;;  %s13167_s19 = sld [smem:[#allocation53_spill]] }
 0x12f   : > { %s13168_s20 = sld [smem:[#allocation57_spill]] }
 0x130   : > { %s13169_s21 = sld [smem:[#allocation65_spill]] }
 0x131   : > { %9849 = vmatpush3.bf16.msra.mxu0 %v1984_v30  ;;  %s13170_s22 = sld [smem:[#allocation66_spill]] }
 0x132   : > { %s13172_s24 = sld [smem:[#allocation54_spill]] }
 0x133   : > { %s13173_s25 = sld [smem:[#allocation58_spill]] }
 0x134   : > { %s13174_s27 = sld [smem:[#allocation59_spill]] }
 0x135   : > { %s13176_s29 = sld [smem:[#allocation61_spill]] }
 0x136   : > { %s13177_s30 = sld [smem:[#allocation63_spill]] }
 0x137   : > { %s13178_s9 = sld [smem:[#allocation67_spill]] }
 0x138   : > { %s13179_s0 = sld [smem:[#allocation68_spill]] }
 0x139   : > { %s13180_s23 = sld [smem:[#allocation62_spill]] }
 0x1e7   : > { %v9834_v7 = vpop.f32.mrf.mxu0 }
 0x1e8   : > { %v1851_v8 = vadd.f32 %v9834_v7, %v9215_v6 }
 0x1e9   : > { %v1845_v9 = vpop.f32.mrf.mxu0 }
 0x1ea   : > { %v1846_v10 = vadd.f32 %v9215_v6, %v1845_v9  ;;  %v1865_v13 = vmax.f32 %v1851_v8, 0.0 }
 0x1eb   : > { %v9837_v11 = vpop.f32.mrf.mxu0 }
 0x1ec   : > { %v1864_v12 = vmax.f32 %v1846_v10, 0.0  ;;  %v1861_v14 = vadd.f32 %v9837_v11, %v9215_v6 }
 0x1ed   : > { %v1855_v15 = vpop.f32.mrf.mxu0 }
 0x1ee   : > { %v1856_v16 = vadd.f32 %v9215_v6, %v1855_v15  ;;  %9840 = vmatprep.mubr.msk.f32.mxu1 %vm1876_vm2, %v1864_v12  ;;  %v1867_v18 = vmax.f32 %v1861_v14, 0.0 }
 0x1ef   : > { %9841 = vmatmul.mubr.msk.f32.vlgmr.msra.gmra.mxu1 %vm1876_vm2, %v1865_v13 }
 0x1f0   : > { %v1866_v17 = vmax.f32 %v1856_v16, 0.0  ;;  %9855 = vmatpush3.bf16.msra.mxu1 %v2056_v21 }
 0x1f1   : > { %9856 = vmatprep.subr.bf16.mxu1 %v2055_v27 }
 0x1f2   : > { %9843 = vmatprep.mubr.msk.f32.mxu1 %vm1876_vm2, %v1866_v17 }
 0x1f3   : > { %9844 = vmatmul.mubr.msk.f32.gmra.mxu1 %vm1876_vm2, %v1867_v18 }
 0x1f4   : > { %9857 = vmatpush3.bf16.msra.mxu1 %v2055_v27 }
 0x2af   : > { %v9842_v32 = vpop.f32.mrf.mxu1 }
 0x2b0   : > { %v11762_v33 = vadd.f32 %v9842_v32, %v9221_v31 }
 0x2b1   : > { %v1955_v36 = vpop.f32.mrf.mxu1 }
 0x2b2   : > { %v11766_v37 = vadd.f32 %v9221_v31, %v1955_v36  ;;  %v1975_v39 = vadd.f32 %v11762_v33, %v1750_v34 }
 0x2b3   : > { %v9845_v38 = vpop.f32.mrf.mxu1 }
 0x2b4   : > { %v1974_v40 = vadd.f32 %v11766_v37, %v1749_v35  ;;  %v2053_v41 = vpack.c.bf16 %v11762_v33, %v11766_v37  ;;  %v11772_v42 = vadd.f32 %v9845_v38, %v9221_v31 }
 0x2b5   : > { %v1965_v45 = vpop.f32.mrf.mxu1 }
 0x2b6   : > { %v11776_v46 = vadd.f32 %v9221_v31, %v1965_v45  ;;  %9858 = vmatprep.mubr.msk.bf16.mxu1 %vm1993_vm3, %v2053_v41  ;;  %v1982_v47 = vpack.c.bf16 %v1975_v39, %v1974_v40  ;;  %v1977_v48 = vadd.f32 %v11772_v42, %v1752_v43 }
 0x2b8   : > { %v1976_v49 = vadd.f32 %v11776_v46, %v1751_v44  ;;  %v2054_v50 = vpack.c.bf16 %v11772_v42, %v11776_v46  ;;  %9850 = vmatprep.mubr.msk.bf16.mxu0 %vm1993_vm3, %v1982_v47 }
 0x2ba   : > { %v1983_v51 = vpack.c.bf16 %v1977_v48, %v1976_v49  ;;  %9859 = vmatmul.mubr.msk.bf16.vlgmr.msra.gmra.mxu1 %vm1993_vm3, %v2054_v50 }
 0x2bc   : > { %9851 = vmatmul.mubr.msk.bf16.vlgmr.msra.gmra.mxu0 %vm1993_vm3, %v1983_v51 }
 0x37a   : > { %v9860_v52 = vpop.f32.mrf.mxu1 }
 0x37b   : > { %v11792_v63 = vadd.f32 %v9860_v52, %v9229_v55 }
 0x37c   : > { %v9852_v53 = vpop.f32.mrf.mxu0  ;;  %v2104_v54 = vpop.f32.mrf.mxu1 }
 0x37d   : > { %v11808_v4 = vadd.f32 %v9852_v53, %v9226_v56  ;;  %v11810_v5 = vadd.f32 %v9229_v55, %v2104_v54 }
 0x37e   : > { %v2034_v57 = vpop.f32.mrf.mxu0  ;;  %v9861_v58 = vpop.f32.mrf.mxu1 }
 0x37f   : > { %v11788_v59 = vadd.f32 %v9226_v56, %v2034_v57  ;;  %v11790_v60 = vadd.f32 %v9861_v58, %v9229_v55 }
 0x380   : > { %v9853_v61 = vpop.f32.mrf.mxu0  ;;  %v2107_v62 = vpop.f32.mrf.mxu1 }
 0x381   : > { %v11794_v0 = vadd.f32 %v9853_v61, %v9226_v56  ;;  %9870 = vmatprep.mubr.msk.f32.mxu0 %vm1876_vm2, %v11788_v59  ;;  %9876 = vmatprep.subr.mxu1 %v11790_v60  ;;  %v11800_v2 = vadd.f32 %v9229_v55, %v2107_v62 }
 0x382   : > { %v2037_v1 = vpop.f32.mrf.mxu0  ;;  %9877 = vmatpush3.msra.mxu1 %v11790_v60 }
 0x383   : > { %v11802_v3 = vadd.f32 %v9226_v56, %v2037_v1  ;;  %9878 = vmatprep.subr.mxu1 %v11792_v63  ;;  %2134 = vrot.lane.b32.xlu0 %v11794_v0, %s13036_s15 }
 0x384   : > { %9879 = vmatpush3.msra.mxu1 %v11792_v63 }
 0x385   : > { %9880 = vmatprep.subr.mxu1 %v11800_v2  ;;  %2130 = vrot.lane.b32.xlu1 %v11802_v3, %s13036_s15 }
 0x386   : > { %9881 = vmatpush3.msra.mxu1 %v11800_v2 }
 0x387   : > { %9882 = vmatprep.subr.mxu1 %v11810_v5  ;;  %2132 = vrot.lane.b32.xlu0 %v11808_v4, %s13036_s15 }
 0x388   : > { %9883 = vmatpush3.msra.mxu1 %v11810_v5 }
 0x389   : > { %2128 = vrot.lane.b32.xlu1 %v11788_v59, %s13036_s15 }
 0x3f5   : > { %v2135_v6 = vpop.permute.xlu0 %2134 }
 0x3f6   : > { %9862 = vmatprep.subr.msk.mxu0 %vm1876_vm2, %v2135_v6 }
 0x3f7   : > { %9863 = vmatpush3.xpose.msk.msra.mxu0 %vm1876_vm2, %v2135_v6  ;;  %v2131_v7 = vpop.permute.xlu1 %2130 }
 0x3f9   : > { %v2133_v8 = vpop.permute.xlu0 %2132 }
 0x3fa   : > { %9864 = vmatprep.subr.msk.mxu0 %vm1876_vm2, %v2133_v8 }
 0x3fb   : > { %9865 = vmatpush3.xpose.msk.msra.mxu0 %vm1876_vm2, %v2133_v8  ;;  %v2129_v9 = vpop.permute.xlu1 %2128 }
 0x3fc   : > { %9866 = vmatprep.subr.msk.mxu0 %vm1876_vm2, %v2131_v7 }
 0x3ff   : > { %9867 = vmatpush3.xpose.msk.msra.mxu0 %vm1876_vm2, %v2131_v7 }
 0x400   : > { %9868 = vmatprep.subr.msk.mxu0 %vm1876_vm2, %v2129_v9 }
 0x403   : > { %9869 = vmatpush3.xpose.msk.msra.mxu0 %vm1876_vm2, %v2129_v9 }
 0x406   : > { %9871 = vmatmul.mubr.msk.f32.vlgmr.msra.gmra.mxu0 %vm1876_vm2, %v11802_v3 }
 0x407   : > { %9873 = vmatprep.mubr.msk.f32.mxu0 %vm1876_vm2, %v11808_v4 }
 0x40a   : > { %9874 = vmatmul.mubr.msk.f32.gmra.mxu0 %vm1876_vm2, %v11794_v0 }
 0x4c6   : > { %v9872_v10 = vpop.f32.mrf.mxu0 }
 0x4c7   : > { %v2238_v11 = vmul.f32 0.35355338, %v9872_v10  ;;  %v2119_v10 = vld [vmem:[%s13145_s18] sm:$0xff] }
 0x4c8   : > { %v2218_v12 = vpop.f32.mrf.mxu0 }
 0x4c9   : > { %v2237_v13 = vmul.f32 0.35355338, %v2218_v12  ;;  %v2244_v14 = vsel %vm1993_vm3, %v2238_v11, -inf }
 0x4ca   : > { %2245 = vmax.xlane.f32.xlu1 %v2244_v14  ;;  %v9875_v15 = vpop.f32.mrf.mxu0 }
 0x4cb   : > { %v2241_v16 = vsel %vm1993_vm3, %v2237_v13, -inf  ;;  %v2240_v19 = vmul.f32 0.35355338, %v9875_v15 }
 0x4cc   : > { %2242 = vmax.xlane.f32.xlu0 %v2241_v16  ;;  %v2228_v17 = vpop.f32.mrf.mxu0 }
 0x4cd   : > { %v2239_v18 = vmul.f32 0.35355338, %v2228_v17  ;;  %v2250_v21 = vsel %vm1993_vm3, %v2240_v19, -inf }
 0x4cf   : > { %v2247_v20 = vsel %vm1993_vm3, %v2239_v18, -inf }
 0x4d0   : > { %2248 = vmax.xlane.f32.xlu0 %v2247_v20 }
 0x4d4   : > { %2251 = vmax.xlane.f32.xlu0 %v2250_v21 }
 0x4db   : > { %2399 = vrot.lane.b32.xlu1 %v11794_v0, %s13038_s2 }
 0x4df   : > { %2395 = vrot.lane.b32.xlu1 %v11802_v3, %s13038_s2 }
 0x553   : > { %v2246_v22 = vpop.xlane.xlu1 %2245 }
 0x554   : > { %v2254_v23 = vsub.f32 %v2238_v11, %v2246_v22  ;;  %v2384_v11 = vpack.c.bf16 %v2119_v10, %v2119_v10 }
 0x555   : > { %v2243_v24 = vpop.xlane.xlu0 %2242 }
 0x556   : > { %v2259_v25 = vmul.f32 1.442695, %v2254_v23  ;;  %v2253_v26 = vsub.f32 %v2237_v13, %v2243_v24  ;;  %v2732_v12 = vsel %vm2672_vm4, %v2384_v11, 0 }
 0x557   : > { %v2400_v27 = vpop.permute.xlu1 %2399 }
 0x558   : > { %10746 = vpow2.f32 %v2259_v25  ;;  %v2257_v28 = vmul.f32 1.442695, %v2253_v26  ;;  %9890 = vmatprep.subr.msk.mxu1 %vm1876_vm2, %v2400_v27 }
 0x559   : > { %v2249_v34 = vpop.xlane.xlu0 %2248 }
 0x55a   : > { %10748 = vpow2.f32 %v2257_v28  ;;  %v2255_v38 = vsub.f32 %v2239_v18, %v2249_v34 }
 0x55b   : > { %v2396_v47 = vpop.permute.xlu1 %2395 }
 0x55c   : > { %v2261_v40 = vmul.f32 1.442695, %v2255_v38 }
 0x55d   : > { %v2252_v35 = vpop.xlane.xlu0 %2251 }
 0x55e   : > { %v2256_v36 = vsub.f32 %v2240_v19, %v2252_v35 }
 0x560   : > { %v2263_v39 = vmul.f32 1.442695, %v2256_v36 }
 0x562   : > { %10750 = vpow2.f32 %v2263_v39 }
 0x563   : > { %10752 = vpow2.f32 %v2261_v40 }
 0x565   : > { %v10747_v29 = vpop.eup %10746 }
 0x566   : > { %v2268_v30 = vsel %vm1993_vm3, %v10747_v29, 0.0 }
 0x567   : > { %v10749_v31 = vpop.eup %10748  ;;  %2269 = vadd.xlane.f32.xlu0 %v2268_v30 }
 0x568   : > { %v2265_v32 = vsel %vm1993_vm3, %v10749_v31, 0.0 }
 0x569   : > { %2266 = vadd.xlane.f32.xlu1 %v2265_v32 }
 0x56f   : > { %v10751_v41 = vpop.eup %10750 }
 0x570   : > { %v10753_v43 = vpop.eup %10752  ;;  %v2274_v44 = vsel %vm1993_vm3, %v10751_v41, 0.0 }
 0x571   : > { %v2271_v45 = vsel %vm1993_vm3, %v10753_v43, 0.0 }
 0x57a   : > { %2393 = vrot.lane.b32.xlu1 %v11788_v59, %s13038_s2 }
 0x57d   : > { %2397 = vrot.lane.b32.xlu0 %v11808_v4, %s13038_s2 }
 0x59c   : > { %2275 = vadd.xlane.f32.xlu0 %v2274_v44 }
 0x59e   : > { %2272 = vadd.xlane.f32.xlu1 %v2271_v45 }
 0x5af   : > { %2387 = vrot.lane.b32.xlu1 %v11802_v3, %s13034_s26 }
 0x5b2   : > { %2385 = vrot.lane.b32.xlu0 %v11788_v59, %s13034_s26 }
 0x5b3   : > { %2391 = vrot.lane.b32.xlu1 %v11794_v0, %s13034_s26 }
 0x5b6   : > { %2389 = vrot.lane.b32.xlu0 %v11808_v4, %s13034_s26 }
 0x5f0   : > { %v2270_v48 = vpop.xlane.xlu0 %2269 }
 0x5f1   : > { %10754 = vrcp.f32 %v2270_v48 }
 0x5f2   : > { %v2267_v49 = vpop.xlane.xlu1 %2266 }
 0x5f3   : > { %10756 = vrcp.f32 %v2267_v49 }
 0x5f4   : > { %v2398_v54 = vpop.permute.xlu0 %2397 }
 0x5f6   : > { %v2394_v55 = vpop.permute.xlu1 %2393 }
 0x5fe   : > { %v10755_v50 = vpop.eup %10754 }
 0x5ff   : > { %v2282_v53 = vmul.f32 %v10755_v50, %v10747_v29 }
 0x600   : > { %v10757_v51 = vpop.eup %10756 }
 0x601   : > { %v2281_v52 = vmul.f32 %v10757_v51, %v10749_v31 }
 0x603   : > { %9884 = vmatprep.mubr.msk.f32.mxu1 %vm1993_vm3, %v2281_v52 }
 0x604   : > { %9885 = vmatmul.mubr.msk.f32.vlgmr.msra.gmra.mxu1 %vm1993_vm3, %v2282_v53 }
 0x605   : > { %9891 = vmatpush3.xpose.msk.msra.mxu1 %vm1876_vm2, %v2400_v27 }
 0x606   : > { %9892 = vmatprep.subr.msk.mxu1 %vm1876_vm2, %v2398_v54 }
 0x609   : > { %9893 = vmatpush3.xpose.msk.msra.mxu1 %vm1876_vm2, %v2398_v54 }
 0x60a   : > { %9894 = vmatprep.subr.msk.mxu1 %vm1876_vm2, %v2396_v47 }
 0x60d   : > { %9895 = vmatpush3.xpose.msk.msra.mxu1 %vm1876_vm2, %v2396_v47 }
 0x60e   : > { %9896 = vmatprep.subr.msk.mxu1 %vm1876_vm2, %v2394_v55 }
 0x611   : > { %9897 = vmatpush3.xpose.msk.msra.mxu1 %vm1876_vm2, %v2394_v55 }
 0x612   : > { %10545 = vmatprep.subr.msk.bf16.mxu1 %vm2672_vm4, %v2384_v11 }
 0x625   : > { %v2276_v56 = vpop.xlane.xlu0 %2275 }
 0x626   : > { %10758 = vrcp.f32 %v2276_v56 }
 0x627   : > { %v2273_v57 = vpop.xlane.xlu1 %2272 }
 0x628   : > { %10760 = vrcp.f32 %v2273_v57 }
 0x629   : > { %v2386_v1 = vpop.permute.xlu0 %2385 }
 0x62b   : > { %v2388_v7 = vpop.permute.xlu1 %2387 }
 0x62d   : > { %v2390_v8 = vpop.permute.xlu0 %2389 }
 0x62f   : > { %v2392_v9 = vpop.permute.xlu1 %2391 }
 0x633   : > { %v10759_v58 = vpop.eup %10758 }
 0x634   : > { %v2284_v6 = vmul.f32 %v10759_v58, %v10751_v41 }
 0x635   : > { %v10761_v61 = vpop.eup %10760 }
 0x636   : > { %v2283_v62 = vmul.f32 %v10761_v61, %v10753_v43 }
 0x638   : > { %9887 = vmatprep.mubr.msk.f32.mxu1 %vm1993_vm3, %v2283_v62 }
 0x639   : > { %9888 = vmatmul.mubr.msk.f32.gmra.mxu1 %vm1993_vm3, %v2284_v6 }
 0x63a   : > { %9898 = vmatprep.mubr.msk.f32.mxu1 %vm1876_vm2, %v2386_v1 }
 0x63d   : > { %9899 = vmatmul.mubr.msk.f32.vlgmr.msra.gmra.mxu1 %vm1876_vm2, %v2388_v7 }
 0x63e   : > { %9901 = vmatprep.mubr.msk.f32.mxu1 %vm1876_vm2, %v2390_v8  ;;  %9925 = vmatpush3.bf16.msra.mxu1 %v2732_v12 }
 0x641   : > { %9902 = vmatmul.mubr.msk.f32.gmra.mxu1 %vm1876_vm2, %v2392_v9 }
 0x6c4   : > { %v9886_v13 = vpop.f32.mrf.mxu1 }
 0x6c6   : > { %v2363_v14 = vpop.f32.mrf.mxu1 }
 0x6c7   : > { %v2382_v15 = vpack.c.bf16 %v9886_v13, %v2363_v14 }
 0x6c9   : > { %9926 = vmatprep.mubr.msk.bf16.mxu1 %vm1876_vm2, %v2382_v15 }
 0x6f9   : > { %v9889_v16 = vpop.f32.mrf.mxu1 }
 0x6fb   : > { %v2373_v17 = vpop.f32.mrf.mxu1 }
 0x6fc   : > { %v2383_v18 = vpack.c.bf16 %v9889_v16, %v2373_v17 }
 0x6fd   : > { %v9900_v19 = vpop.f32.mrf.mxu1 }
 0x6fe   : > { %v2503_v20 = vmul.f32 0.35355338, %v9900_v19  ;;  %9927 = vmatmul.mubr.msk.bf16.vlgmr.msra.gmra.mxu1 %vm1876_vm2, %v2383_v18 }
 0x6ff   : > { %v2483_v21 = vpop.f32.mrf.mxu1 }
 0x700   : > { %v2502_v22 = vmul.f32 0.35355338, %v2483_v21  ;;  %v2509_v23 = vsel %vm1993_vm3, %v2503_v20, -inf }
 0x701   : > { %2510 = vmax.xlane.f32.xlu1 %v2509_v23  ;;  %v9903_v24 = vpop.f32.mrf.mxu1 }
 0x702   : > { %v2506_v25 = vsel %vm1993_vm3, %v2502_v22, -inf  ;;  %v2505_v28 = vmul.f32 0.35355338, %v9903_v24 }
 0x703   : > { %2507 = vmax.xlane.f32.xlu0 %v2506_v25  ;;  %v2493_v26 = vpop.f32.mrf.mxu1 }
 0x704   : > { %v2504_v27 = vmul.f32 0.35355338, %v2493_v26  ;;  %v2515_v30 = vsel %vm1993_vm3, %v2505_v28, -inf }
 0x706   : > { %v2512_v29 = vsel %vm1993_vm3, %v2504_v27, -inf }
 0x707   : > { %2513 = vmax.xlane.f32.xlu0 %v2512_v29 }
 0x70b   : > { %2516 = vmax.xlane.f32.xlu0 %v2515_v30 }
 0x712   : > { %2560 = vrot.lane.b32.xlu1 %v11790_v60, %s13034_s26 }
 0x78a   : > { %v2511_v31 = vpop.xlane.xlu1 %2510 }
 0x78b   : > { %v2519_v32 = vsub.f32 %v2503_v20, %v2511_v31 }
 0x78c   : > { %v2508_v34 = vpop.xlane.xlu0 %2507 }
 0x78d   : > { %v2524_v35 = vmul.f32 1.442695, %v2519_v32  ;;  %v2518_v36 = vsub.f32 %v2502_v22, %v2508_v34 }
 0x78e   : > { %v2561_v38 = vpop.permute.xlu1 %2560 }
 0x78f   : > { %10762 = vpow2.f32 %v2524_v35  ;;  %v2522_v39 = vmul.f32 1.442695, %v2518_v36  ;;  %9904 = vmatprep.subr.mxu0 %v2561_v38 }
 0x790   : > { %9905 = vmatpush3.msra.mxu0 %v2561_v38  ;;  %v2514_v40 = vpop.xlane.xlu0 %2513 }
 0x791   : > { %10764 = vpow2.f32 %v2522_v39  ;;  %v2520_v52 = vsub.f32 %v2504_v27, %v2514_v40 }
 0x793   : > { %v2526_v53 = vmul.f32 1.442695, %v2520_v52 }
 0x794   : > { %v2517_v41 = vpop.xlane.xlu0 %2516 }
 0x795   : > { %v2521_v43 = vsub.f32 %v2505_v28, %v2517_v41 }
 0x797   : > { %v2528_v44 = vmul.f32 1.442695, %v2521_v43 }
 0x799   : > { %10766 = vpow2.f32 %v2528_v44 }
 0x79a   : > { %10768 = vpow2.f32 %v2526_v53 }
 0x79c   : > { %v10763_v45 = vpop.eup %10762 }
 0x79d   : > { %v2533_v47 = vsel %vm1993_vm3, %v10763_v45, 0.0 }
 0x79e   : > { %v10765_v48 = vpop.eup %10764  ;;  %2534 = vadd.xlane.f32.xlu0 %v2533_v47 }
 0x79f   : > { %v2530_v49 = vsel %vm1993_vm3, %v10765_v48, 0.0 }
 0x7a0   : > { %2531 = vadd.xlane.f32.xlu1 %v2530_v49 }
 0x7a6   : > { %v11889_v50 = vpop.eup %10766 }
 0x7a7   : > { %v2539_v51 = vsel %vm1993_vm3, %v11889_v50, 0.0  ;;  %v10769_v54 = vpop.eup %10768 }
 0x7a8   : > { %2540 = vadd.xlane.f32.xlu0 %v2539_v51  ;;  %v2536_v55 = vsel %vm1993_vm3, %v10769_v54, 0.0 }
 0x7b1   : > { %2556 = vrot.lane.b32.xlu1 %v11800_v2, %s13034_s26 }
 0x7be   : > { %2558 = vrot.lane.b32.xlu0 %v11792_v63, %s13034_s26 }
 0x7c2   : > { %2797 = vrot.lane.b32.xlu0 %v11794_v0, %s13032_s11 }
 0x7c6   : > { %2793 = vrot.lane.b32.xlu0 %v11802_v3, %s13032_s11 }
 0x7ca   : > { %2783 = vrot.lane.b32.xlu0 %v11788_v59, %s13030_s6 }
 0x7ce   : > { %2787 = vrot.lane.b32.xlu0 %v11808_v4, %s13030_s6 }
 0x7d2   : > { %3136 = vrot.lane.b32.xlu0 %v11794_v0, %s13026_s28 }
 0x7d5   : > { %2537 = vadd.xlane.f32.xlu1 %v2536_v55 }
 0x7d6   : > { %3132 = vrot.lane.b32.xlu0 %v11802_v3, %s13026_s28 }
 0x7da   : > { %3122 = vrot.lane.b32.xlu0 %v11788_v59, %s13028_s16 }
 0x7de   : > { %3126 = vrot.lane.b32.xlu0 %v11808_v4, %s13028_s16 }
 0x7e6   : > { %2554 = vrot.lane.b32.xlu1 %v11810_v5, %s13034_s26 }
 0x7ea   : > { %2795 = vrot.lane.b32.xlu1 %v11808_v4, %s13032_s11 }
 0x7ee   : > { %2791 = vrot.lane.b32.xlu1 %v11788_v59, %s13032_s11  ;;  %s9214_s11 = sshll.u32 %s11735_s10, 3  ;;  %s13151_s10 = sld [smem:[#allocation49_spill]] }
 0x7f2   : > { %2785 = vrot.lane.b32.xlu1 %v11802_v3, %s13030_s6 }
 0x7f6   : > { %2789 = vrot.lane.b32.xlu1 %v11794_v0, %s13030_s6 }
 0x7fa   : > { %3134 = vrot.lane.b32.xlu1 %v11808_v4, %s13026_s28 }
 0x7fe   : > { %3130 = vrot.lane.b32.xlu1 %v11788_v59, %s13026_s28  ;;  %v2120_v59 = vld [vmem:[%s13145_s18 + $0x8] sm:$0xff]  ;;  %s13148_s28 = sld [smem:[#allocation41_spill]] }
 0x802   : > { %3124 = vrot.lane.b32.xlu1 %v11802_v3, %s13028_s16 }
 0x806   : > { %3128 = vrot.lane.b32.xlu1 %v11794_v0, %s13028_s16  ;;  %v2665_v0 = vpack.c.bf16 %v2120_v59, %v2120_v59 }
 0x808   : > { %v2674_v9 = vsel %vm2672_vm4, %v2665_v0, 0 }
 0x827   : > { %v2535_v57 = vpop.xlane.xlu0 %2534 }
 0x829   : > { %v2532_v56 = vpop.xlane.xlu1 %2531 }
 0x82a   : > { %10770 = vrcp.f32 %v2532_v56 }
 0x82b   : > { %10772 = vrcp.f32 %v2535_v57 }
 0x82d   : > { %v2557_v1 = vpop.permute.xlu1 %2556 }
 0x831   : > { %v2541_v58 = vpop.xlane.xlu0 %2540 }
 0x832   : > { %10774 = vrcp.f32 %v2541_v58 }
 0x835   : > { %v2559_v61 = vpop.permute.xlu0 %2558 }
 0x836   : > { %9906 = vmatprep.subr.mxu0 %v2559_v61 }
 0x837   : > { %v10771_v62 = vpop.eup %10770  ;;  %9907 = vmatpush3.msra.mxu0 %v2559_v61 }
 0x838   : > { %9908 = vmatprep.subr.mxu0 %v2557_v1  ;;  %v2546_v4 = vmul.f32 %v10771_v62, %v10765_v48  ;;  %v10773_v6 = vpop.eup %10772 }
 0x839   : > { %9909 = vmatpush3.msra.mxu0 %v2557_v1  ;;  %v2547_v8 = vmul.f32 %v10773_v6, %v10763_v45  ;;  %v2798_v10 = vpop.permute.xlu0 %2797 }
 0x83a   : > { %9912 = vmatprep.mubr.msk.f32.mxu0 %vm1993_vm3, %v2546_v4 }
 0x83d   : > { %v2794_v18 = vpop.permute.xlu0 %2793 }
 0x83f   : > { %v10775_v11 = vpop.eup %10774 }
 0x840   : > { %v2549_v14 = vmul.f32 %v10775_v11, %v11889_v50 }
 0x841   : > { %v2784_v21 = vpop.permute.xlu0 %2783 }
 0x845   : > { %v2788_v25 = vpop.permute.xlu0 %2787 }
 0x849   : > { %v3137_v27 = vpop.permute.xlu0 %3136 }
 0x84d   : > { %v3133_v29 = vpop.permute.xlu0 %3132 }
 0x851   : > { %v3123_v31 = vpop.permute.xlu0 %3122 }
 0x855   : > { %v3127_v35 = vpop.permute.xlu0 %3126 }
 0x85e   : > { %v2538_v3 = vpop.xlane.xlu1 %2537 }
 0x85f   : > { %10776 = vrcp.f32 %v2538_v3 }
 0x862   : > { %v2555_v7 = vpop.permute.xlu1 %2554 }
 0x863   : > { %9910 = vmatprep.subr.mxu0 %v2555_v7 }
 0x864   : > { %9911 = vmatpush3.msra.mxu0 %v2555_v7 }
 0x865   : > { %9913 = vmatmul.mubr.msk.f32.vlgmr.msra.gmra.mxu0 %vm1993_vm3, %v2547_v8  ;;  %10544 = vmatprep.subr.msk.bf16.mxu0 %vm2672_vm4, %v2665_v0 }
 0x866   : > { %9919 = vmatpush3.bf16.msra.mxu0 %v2674_v9  ;;  %v2796_v19 = vpop.permute.xlu1 %2795 }
 0x867   : > { %9930 = vmatprep.subr.msk.mxu0 %vm1876_vm2, %v2798_v10 }
 0x86a   : > { %v2792_v24 = vpop.permute.xlu1 %2791 }
 0x86c   : > { %v10777_v12 = vpop.eup %10776 }
 0x86d   : > { %v2548_v13 = vmul.f32 %v10777_v12, %v10769_v54 }
 0x86e   : > { %v2786_v26 = vpop.permute.xlu1 %2785 }
 0x86f   : > { %9915 = vmatprep.mubr.msk.f32.mxu0 %vm1993_vm3, %v2548_v13 }
 0x870   : > { %9916 = vmatmul.mubr.msk.f32.gmra.mxu0 %vm1993_vm3, %v2549_v14 }
 0x872   : > { %v2790_v28 = vpop.permute.xlu1 %2789 }
 0x876   : > { %v3135_v30 = vpop.permute.xlu1 %3134 }
 0x87a   : > { %v3131_v32 = vpop.permute.xlu1 %3130 }
 0x87e   : > { %v3125_v34 = vpop.permute.xlu1 %3124 }
 0x882   : > { %v3129_v36 = vpop.permute.xlu1 %3128 }
 0x925   : > { %v9914_v15 = vpop.f32.mrf.mxu0 }
 0x927   : > { %v2644_v16 = vpop.f32.mrf.mxu0 }
 0x928   : > { %v2663_v17 = vpack.c.bf16 %v9914_v15, %v2644_v16 }
 0x92a   : > { %9920 = vmatprep.mubr.msk.bf16.mxu0 %vm1876_vm2, %v2663_v17 }
 0x930   : > { %v9917_v20 = vpop.f32.mrf.mxu0 }
 0x932   : > { %v2654_v22 = vpop.f32.mrf.mxu0 }
 0x933   : > { %v2664_v23 = vpack.c.bf16 %v9917_v20, %v2654_v22 }
 0x935   : > { %9921 = vmatmul.mubr.msk.bf16.vlgmr.msra.gmra.mxu0 %vm1876_vm2, %v2664_v23 }
 0x936   : > { %9931 = vmatpush3.xpose.msk.msra.mxu0 %vm1876_vm2, %v2798_v10  ;;  %9938 = vmatprep.mubr.msk.f32.mxu0 %vm1876_vm2, %v2784_v21 }
 0x937   : > { %9932 = vmatprep.subr.msk.mxu0 %vm1876_vm2, %v2796_v19 }
 0x93a   : > { %9933 = vmatpush3.xpose.msk.msra.mxu0 %vm1876_vm2, %v2796_v19 }
 0x93b   : > { %9934 = vmatprep.subr.msk.mxu0 %vm1876_vm2, %v2794_v18 }
 0x93e   : > { %9935 = vmatpush3.xpose.msk.msra.mxu0 %vm1876_vm2, %v2794_v18 }
 0x93f   : > { %9936 = vmatprep.subr.msk.mxu0 %vm1876_vm2, %v2792_v24 }
 0x942   : > { %9937 = vmatpush3.xpose.msk.msra.mxu0 %vm1876_vm2, %v2792_v24 }
 0x943   : > { %9964 = vmatprep.subr.msk.mxu0 %vm1876_vm2, %v3137_v27 }
 0x945   : > { %9939 = vmatmul.mubr.msk.f32.vlgmr.msra.gmra.mxu0 %vm1876_vm2, %v2786_v26 }
 0x946   : > { %9941 = vmatprep.mubr.msk.f32.mxu0 %vm1876_vm2, %v2788_v25  ;;  %9965 = vmatpush3.xpose.msk.msra.mxu0 %vm1876_vm2, %v3137_v27 }
 0x947   : > { %9966 = vmatprep.subr.msk.mxu0 %vm1876_vm2, %v3135_v30 }
 0x949   : > { %9942 = vmatmul.mubr.msk.f32.gmra.mxu0 %vm1876_vm2, %v2790_v28 }
 0x94a   : > { %9967 = vmatpush3.xpose.msk.msra.mxu0 %vm1876_vm2, %v3135_v30  ;;  %9972 = vmatprep.mubr.msk.f32.mxu0 %vm1876_vm2, %v3123_v31 }
 0x94b   : > { %9968 = vmatprep.subr.msk.mxu0 %vm1876_vm2, %v3133_v29 }
 0x94e   : > { %9969 = vmatpush3.xpose.msk.msra.mxu0 %vm1876_vm2, %v3133_v29 }
 0x94f   : > { %9970 = vmatprep.subr.msk.mxu0 %vm1876_vm2, %v3131_v32 }
 0x952   : > { %9971 = vmatpush3.xpose.msk.msra.mxu0 %vm1876_vm2, %v3131_v32 }
 0x955   : > { %9973 = vmatmul.mubr.msk.f32.vlgmr.msra.gmra.mxu0 %vm1876_vm2, %v3125_v34 }
 0x956   : > { %9975 = vmatprep.mubr.msk.f32.mxu0 %vm1876_vm2, %v3127_v35 }
 0x959   : > { %9976 = vmatmul.mubr.msk.f32.gmra.mxu0 %vm1876_vm2, %v3129_v36 }
 0x9f5   : > { %v11966_v38 = vpop.f32.mrf.mxu0 }
 0x9f7   : > { %v11968_v39 = vpop.f32.mrf.mxu0 }
 0x9f9   : > { %v11970_v40 = vpop.f32.mrf.mxu0 }
 0x9fb   : > { %v11972_v41 = vpop.f32.mrf.mxu0 }
 0xa05   : > { %v9940_v43 = vpop.f32.mrf.mxu0 }
 0xa06   : > { %v2901_v44 = vmul.f32 0.35355338, %v9940_v43  ;;  %v2121_v43 = vld [vmem:[%s13145_s18 + $0x10] sm:$0xff] }
 0xa07   : > { %v2881_v45 = vpop.f32.mrf.mxu0 }
 0xa08   : > { %v2900_v47 = vmul.f32 0.35355338, %v2881_v45  ;;  %v2907_v48 = vsel %vm1993_vm3, %v2901_v44, -inf }
 0xa09   : > { %2908 = vmax.xlane.f32.xlu1 %v2907_v48  ;;  %v9943_v49 = vpop.f32.mrf.mxu0 }
 0xa0a   : > { %v2904_v50 = vsel %vm1993_vm3, %v2900_v47, -inf  ;;  %v2903_v53 = vmul.f32 0.35355338, %v9943_v49 }
 0xa0b   : > { %2905 = vmax.xlane.f32.xlu0 %v2904_v50  ;;  %v2891_v51 = vpop.f32.mrf.mxu0 }
 0xa0c   : > { %v2902_v52 = vmul.f32 0.35355338, %v2891_v51  ;;  %v2913_v55 = vsel %vm1993_vm3, %v2903_v53, -inf }
 0xa0e   : > { %v2910_v54 = vsel %vm1993_vm3, %v2902_v52, -inf }
 0xa0f   : > { %2911 = vmax.xlane.f32.xlu0 %v2910_v54 }
 0xa13   : > { %2914 = vmax.xlane.f32.xlu0 %v2913_v55 }
 0xa15   : > { %v9974_v15 = vpop.f32.mrf.mxu0 }
 0xa16   : > { %v3240_v27 = vmul.f32 0.35355338, %v9974_v15 }
 0xa17   : > { %v3220_v17 = vpop.f32.mrf.mxu0 }
 0xa18   : > { %v3239_v20 = vmul.f32 0.35355338, %v3220_v17  ;;  %v3246_v28 = vsel %vm1993_vm3, %v3240_v27, -inf }
 0xa19   : > { %v9977_v19 = vpop.f32.mrf.mxu0 }
 0xa1a   : > { %2954 = vrot.lane.b32.xlu1 %v11790_v60, %s13030_s6  ;;  %v3243_v23 = vsel %vm1993_vm3, %v3239_v20, -inf  ;;  %v3242_v24 = vmul.f32 0.35355338, %v9977_v19 }
 0xa1b   : > { %v3230_v21 = vpop.f32.mrf.mxu0 }
 0xa1c   : > { %v11991_v22 = vmul.f32 0.35355338, %v3230_v21  ;;  %v3252_v26 = vsel %vm1993_vm3, %v3242_v24, -inf }
 0xa1e   : > { %v3249_v25 = vsel %vm1993_vm3, %v11991_v22, -inf }
 0xa92   : > { %v2909_v56 = vpop.xlane.xlu1 %2908 }
 0xa93   : > { %v2917_v57 = vsub.f32 %v2901_v44, %v2909_v56 }
 0xa94   : > { %v2906_v58 = vpop.xlane.xlu0 %2905 }
 0xa95   : > { %v2922_v61 = vmul.f32 1.442695, %v2917_v57  ;;  %v2916_v62 = vsub.f32 %v2900_v47, %v2906_v58 }
 0xa96   : > { %v2955_v1 = vpop.permute.xlu1 %2954 }
 0xa97   : > { %10778 = vpow2.f32 %v2922_v61  ;;  %v2920_v4 = vmul.f32 1.442695, %v2916_v62  ;;  %9944 = vmatprep.subr.mxu1 %v2955_v1 }
 0xa98   : > { %9945 = vmatpush3.msra.mxu1 %v2955_v1  ;;  %v2912_v59 = vpop.xlane.xlu0 %2911 }
 0xa99   : > { %10780 = vpow2.f32 %v2920_v4  ;;  %v2918_v13 = vsub.f32 %v2902_v52, %v2912_v59 }
 0xa9b   : > { %v2924_v14 = vmul.f32 1.442695, %v2918_v13 }
 0xa9c   : > { %v2915_v3 = vpop.xlane.xlu0 %2914 }
 0xa9d   : > { %v2919_v0 = vsub.f32 %v2903_v53, %v2915_v3 }
 0xa9f   : > { %v2926_v6 = vmul.f32 1.442695, %v2919_v0 }
 0xaa1   : > { %10782 = vpow2.f32 %v2926_v6 }
 0xaa2   : > { %10784 = vpow2.f32 %v2924_v14  ;;  %v9928_v14 = vpop.f32.mrf.mxu1 }
 0xaa4   : > { %v10779_v7 = vpop.eup %10778  ;;  %v2768_v15 = vpop.f32.mrf.mxu1 }
 0xaa5   : > { %v2931_v8 = vsel %vm1993_vm3, %v10779_v7, 0.0 }
 0xaa6   : > { %v10781_v9 = vpop.eup %10780  ;;  %2932 = vadd.xlane.f32.xlu0 %v2931_v8 }
 0xaa7   : > { %v2928_v10 = vsel %vm1993_vm3, %v10781_v9, 0.0 }
 0xaa8   : > { %2929 = vadd.xlane.f32.xlu1 %v2928_v10 }
 0xaae   : > { %v11982_v11 = vpop.eup %10782 }
 0xaaf   : > { %v2937_v12 = vsel %vm1993_vm3, %v11982_v11, 0.0  ;;  %v10785_v16 = vpop.eup %10784 }
 0xab0   : > { %2938 = vadd.xlane.f32.xlu0 %v2937_v12  ;;  %v2934_v18 = vsel %vm1993_vm3, %v10785_v16, 0.0 }
 0xab9   : > { %2950 = vrot.lane.b32.xlu1 %v11800_v2, %s13030_s6 }
 0xac6   : > { %2952 = vrot.lane.b32.xlu0 %v11792_v63, %s13030_s6 }
 0xadd   : > { %2935 = vadd.xlane.f32.xlu1 %v2934_v18 }
 0xae5   : > { %3244 = vmax.xlane.f32.xlu0 %v3243_v23 }
 0xae9   : > { %3250 = vmax.xlane.f32.xlu0 %v3249_v25 }
 0xaed   : > { %3253 = vmax.xlane.f32.xlu0 %v3252_v26 }
 0xaee   : > { %2948 = vrot.lane.b32.xlu1 %v11810_v5, %s13030_s6  ;;  %s13150_s6 = sld [smem:[#allocation28_spill]] }
 0xaf4   : > { %s12074_s26 = scalar_lea.vmem %s13150_s6, %s9214_s11  ;;  %s13152_s6 = smov %s13151_s10 }
 0xaf5   : > { %s13153_s11 = sld [smem:[#allocation48_spill]] }
 0xafb   : > { %s13154_s15 = smov %s13153_s11 }
 0xb12   : > { %3247 = vmax.xlane.f32.xlu1 %v3246_v28 }
 0xb23   : > { %3293 = vrot.lane.b32.xlu1 %v11790_v60, %s13028_s16  ;;  %v3059_v60 = vpack.c.bf16 %v2121_v43, %v2121_v43 }
 0xb25   : > { %v3067_v49 = vsel %vm2672_vm4, %v3059_v60, 0 }
 0xb2f   : > { %v2933_v30 = vpop.xlane.xlu0 %2932 }
 0xb31   : > { %v2930_v29 = vpop.xlane.xlu1 %2929 }
 0xb32   : > { %10786 = vrcp.f32 %v2930_v29 }
 0xb33   : > { %10788 = vrcp.f32 %v2933_v30 }
 0xb35   : > { %v2951_v35 = vpop.permute.xlu1 %2950 }
 0xb39   : > { %v2939_v31 = vpop.xlane.xlu0 %2938 }
 0xb3a   : > { %10790 = vrcp.f32 %v2939_v31 }
 0xb3d   : > { %v2953_v32 = vpop.permute.xlu0 %2952 }
 0xb3e   : > { %9946 = vmatprep.subr.mxu1 %v2953_v32 }
 0xb3f   : > { %v10787_v34 = vpop.eup %10786  ;;  %9947 = vmatpush3.msra.mxu1 %v2953_v32 }
 0xb40   : > { %9948 = vmatprep.subr.mxu1 %v2951_v35  ;;  %v2944_v36 = vmul.f32 %v10787_v34, %v10781_v9  ;;  %v10789_v45 = vpop.eup %10788 }
 0xb41   : > { %9949 = vmatpush3.msra.mxu1 %v2951_v35  ;;  %v2945_v48 = vmul.f32 %v10789_v45, %v10779_v7 }
 0xb42   : > { %9952 = vmatprep.mubr.msk.f32.mxu1 %vm1993_vm3, %v2944_v36 }
 0xb47   : > { %v10791_v53 = vpop.eup %10790 }
 0xb48   : > { %v2947_v56 = vmul.f32 %v10791_v53, %v11982_v11 }
 0xb66   : > { %v2936_v44 = vpop.xlane.xlu1 %2935 }
 0xb67   : > { %10792 = vrcp.f32 %v2936_v44  ;;  %v2122_v44 = vld [vmem:[%s13145_s18 + $0x18] sm:$0xff]  ;;  %s13166_s18 = sld [smem:[#allocation55_spill]] }
 0xb6a   : > { %v2949_v47 = vpop.permute.xlu1 %2948 }
 0xb6b   : > { %9950 = vmatprep.subr.mxu1 %v2949_v47 }
 0xb6c   : > { %9951 = vmatpush3.msra.mxu1 %v2949_v47  ;;  %v2777_v47 = vadd.f32 %v9928_v14, %v11966_v38  ;;  %v2769_v38 = vadd.f32 %v2768_v15, %v11968_v39 }
 0xb6d   : > { %9953 = vmatmul.mubr.msk.f32.vlgmr.msra.gmra.mxu1 %vm1993_vm3, %v2945_v48  ;;  %10546 = vmatprep.subr.msk.bf16.mxu1 %vm2672_vm4, %v3059_v60  ;;  %v3398_v60 = vpack.c.bf16 %v2122_v44, %v2122_v44 }
 0xb6e   : > { %v3245_v50 = vpop.xlane.xlu0 %3244  ;;  %9959 = vmatpush3.bf16.msra.mxu1 %v3067_v49 }
 0xb6f   : > { %v3255_v51 = vsub.f32 %v3239_v20, %v3245_v50  ;;  %v3406_v45 = vsel %vm2672_vm4, %v3398_v60, 0 }
 0xb71   : > { %v3259_v52 = vmul.f32 1.442695, %v3255_v51 }
 0xb72   : > { %v3251_v61 = vpop.xlane.xlu0 %3250 }
 0xb73   : > { %10794 = vpow2.f32 %v3259_v52  ;;  %v3257_v3 = vsub.f32 %v11991_v22, %v3251_v61 }
 0xb74   : > { %v10793_v54 = vpop.eup %10792 }
 0xb75   : > { %v2946_v55 = vmul.f32 %v10793_v54, %v10785_v16  ;;  %v3263_v8 = vmul.f32 1.442695, %v3257_v3  ;;  %v9929_v16 = vpop.f32.mrf.mxu1 }
 0xb76   : > { %v3254_v62 = vpop.xlane.xlu0 %3253  ;;  %v2780_v51 = vadd.f32 %v9929_v16, %v11970_v40  ;;  %v9288_v40 = vld [vmem:[%s13146_s1] ss:$0 sm:$0xff]  ;;  %s13147_s1 = sld [smem:[#allocation39_spill]] }
 0xb77   : > { %9955 = vmatprep.mubr.msk.f32.mxu1 %vm1993_vm3, %v2946_v55  ;;  %v3258_v1 = vsub.f32 %v3242_v24, %v3254_v62  ;;  %v12021_v18 = vpop.f32.mrf.mxu1 }
 0xb78   : > { %9956 = vmatmul.mubr.msk.f32.gmra.mxu1 %vm1993_vm3, %v2947_v56 }
 0xb79   : > { %v3265_v0 = vmul.f32 1.442695, %v3258_v1 }
 0xb80   : > { %v10795_v57 = vpop.eup %10794 }
 0xb81   : > { %v3267_v58 = vsel %vm1993_vm3, %v10795_v57, 0.0 }
 0xb82   : > { %3268 = vadd.xlane.f32.xlu1 %v3267_v58 }
 0xb93   : > { %3289 = vrot.lane.b32.xlu1 %v11800_v2, %s13028_s16 }
 0xb9b   : > { %v3248_v4 = vpop.xlane.xlu1 %3247 }
 0xb9c   : > { %v3256_v59 = vsub.f32 %v3240_v27, %v3248_v4 }
 0xb9e   : > { %v3261_v6 = vmul.f32 1.442695, %v3256_v59 }
 0xb9f   : > { %v3294_v7 = vpop.permute.xlu1 %3293 }
 0xba0   : > { %10796 = vpow2.f32 %v3261_v6  ;;  %9978 = vmatprep.subr.mxu1 %v3294_v7 }
 0xba1   : > { %10798 = vpow2.f32 %v3265_v0  ;;  %v2772_v0 = vadd.f32 %v12021_v18, %v11972_v41 }
 0xba2   : > { %10800 = vpow2.f32 %v3263_v8 }
 0xbad   : > { %v10797_v9 = vpop.eup %10796 }
 0xbae   : > { %v3270_v10 = vsel %vm1993_vm3, %v10797_v9, 0.0  ;;  %v10799_v11 = vpop.eup %10798 }
 0xbaf   : > { %3271 = vadd.xlane.f32.xlu0 %v3270_v10  ;;  %v3276_v2 = vsel %vm1993_vm3, %v10799_v11, 0.0  ;;  %v10801_v12 = vpop.eup %10800 }
 0xbb0   : > { %v3273_v13 = vsel %vm1993_vm3, %v10801_v12, 0.0 }
 0xbb3   : > { %3277 = vadd.xlane.f32.xlu0 %v3276_v2 }
 0xbb7   : > { %3274 = vadd.xlane.f32.xlu1 %v3273_v13 }
 0xbc8   : > { %3287 = vrot.lane.b32.xlu1 %v11810_v5, %s13028_s16 }
 0xbc9   : > { %3291 = vrot.lane.b32.xlu0 %v11792_v63, %s13028_s16  ;;  %s13149_s16 = sld [smem:[#allocation47_spill]] }
 0xc0b   : > { %v3269_v17 = vpop.xlane.xlu1 %3268 }
 0xc0c   : > { %10802 = vrcp.f32 %v3269_v17 }
 0xc0f   : > { %v3290_v26 = vpop.permute.xlu1 %3289 }
 0xc19   : > { %v10803_v24 = vpop.eup %10802 }
 0xc1a   : > { %v3283_v27 = vmul.f32 %v10803_v24, %v10795_v57 }
 0xc2d   : > { %v9954_v19 = vpop.f32.mrf.mxu1 }
 0xc2f   : > { %v3038_v20 = vpop.f32.mrf.mxu1 }
 0xc30   : > { %v3057_v21 = vpack.c.bf16 %v9954_v19, %v3038_v20 }
 0xc32   : > { %9960 = vmatprep.mubr.msk.bf16.mxu1 %vm1876_vm2, %v3057_v21 }
 0xc38   : > { %v9957_v22 = vpop.f32.mrf.mxu1  ;;  %v3272_v23 = vpop.xlane.xlu0 %3271 }
 0xc39   : > { %10804 = vrcp.f32 %v3272_v23 }
 0xc3a   : > { %v3048_v5 = vpop.f32.mrf.mxu1 }
 0xc3b   : > { %v3058_v25 = vpack.c.bf16 %v9957_v22, %v3048_v5 }
 0xc3c   : > { %v3278_v63 = vpop.xlane.xlu0 %3277 }
 0xc3d   : > { %9961 = vmatmul.mubr.msk.bf16.vlgmr.msra.gmra.mxu1 %vm1876_vm2, %v3058_v25  ;;  %10806 = vrcp.f32 %v3278_v63 }
 0xc3e   : > { %9979 = vmatpush3.msra.mxu1 %v3294_v7  ;;  %9986 = vmatprep.mubr.msk.f32.mxu1 %vm1993_vm3, %v3283_v27 }
 0xc40   : > { %v3275_v28 = vpop.xlane.xlu1 %3274  ;;  %v3292_v29 = vpop.permute.xlu0 %3291 }
 0xc41   : > { %10808 = vrcp.f32 %v3275_v28  ;;  %9980 = vmatprep.subr.mxu1 %v3292_v29 }
 0xc42   : > { %9981 = vmatpush3.msra.mxu1 %v3292_v29 }
 0xc43   : > { %9982 = vmatprep.subr.mxu1 %v3290_v26 }
 0xc44   : > { %v3288_v30 = vpop.permute.xlu1 %3287  ;;  %9983 = vmatpush3.msra.mxu1 %v3290_v26 }
 0xc45   : > { %9984 = vmatprep.subr.mxu1 %v3288_v30 }
 0xc46   : > { %v10805_v31 = vpop.eup %10804  ;;  %9985 = vmatpush3.msra.mxu1 %v3288_v30 }
 0xc47   : > { %v3284_v32 = vmul.f32 %v10805_v31, %v10797_v9  ;;  %10547 = vmatprep.subr.msk.bf16.mxu1 %vm2672_vm4, %v3398_v60  ;;  %v3550_v60 = vld [vmem:[%s13147_s1] sm:$0xff] }
 0xc49   : > { %9987 = vmatmul.mubr.msk.f32.vlgmr.msra.gmra.mxu1 %vm1993_vm3, %v3284_v32 }
 0xc4a   : > { %v10807_v34 = vpop.eup %10806  ;;  %9993 = vmatpush3.bf16.msra.mxu1 %v3406_v45  ;;  %v3551_v45 = vld [vmem:[%s13147_s1 + $0x8] sm:$0xff] }
 0xc4b   : > { %v3286_v43 = vmul.f32 %v10807_v34, %v10799_v11 }
 0xc4e   : > { %v10809_v35 = vpop.eup %10808 }
 0xc4f   : > { %v3285_v36 = vmul.f32 %v10809_v35, %v10801_v12 }
 0xc51   : > { %9989 = vmatprep.mubr.msk.f32.mxu1 %vm1993_vm3, %v3285_v36  ;;  %v3552_v36 = vld [vmem:[%s13147_s1 + $0x10] sm:$0xff] }
 0xc52   : > { %9990 = vmatmul.mubr.msk.f32.gmra.mxu1 %vm1993_vm3, %v3286_v43  ;;  %v3553_v43 = vld [vmem:[%s13147_s1 + $0x18] sm:$0xff]  ;;  %s13157_s1 = smov 88  }
 0xc53   : > { %v3557_v44 = vpack.c.bf16 %v3553_v43, %v3552_v36  ;;  %v11320_v43 = vmov 0  }
 0xc55   : > { %9998 = vmatprep.subr.bf16.mxu0 %v3557_v44 }
 0xc56   : > { %9999 = vmatpush3.bf16.msra.mxu0 %v3557_v44 }
 0xcfd   : > { %v9962_v48 = vpop.f32.mrf.mxu1 }
 0xcfe   : > { %v3120_v49 = vadd.f32 %v9962_v48, %v2777_v47  ;;  %v3556_v47 = vpack.c.bf16 %v3551_v45, %v3550_v60  ;;  %v11318_v48 = vmov 0.0   ;;  %v9291_v45 = vld [vmem:[#allocation2] ss:$0 sm:$0xff] }
 0xcff   : > { %v3103_v50 = vpop.f32.mrf.mxu1 }
 0xd00   : > { %v3118_v4 = vadd.f32 %v3103_v50, %v2769_v38  ;;  %10000 = vmatprep.subr.bf16.mxu0 %v3556_v47  ;;  %v3631_v50 = vld [vmem:[%s13148_s28 + $0x38] sm:$0xff] }
 0xd01   : > { %v9963_v52 = vpop.f32.mrf.mxu1  ;;  %10001 = vmatpush3.bf16.msra.mxu0 %v3556_v47 }
 0xd02   : > { %v3121_v53 = vadd.f32 %v9963_v52, %v2780_v51  ;;  %10018 = vmatprep.subr.bf16.mxu0 %v11318_v48 }
 0xd03   : > { %v3106_v54 = vpop.f32.mrf.mxu1 }
 0xd04   : > { %v3119_v8 = vadd.f32 %v3106_v54, %v2772_v0 }
 0xd09   : > { %v9988_v55 = vpop.f32.mrf.mxu1 }
 0xd0b   : > { %v3377_v56 = vpop.f32.mrf.mxu1 }
 0xd0c   : > { %v3396_v57 = vpack.c.bf16 %v9988_v55, %v3377_v56 }
 0xd0e   : > { %9994 = vmatprep.mubr.msk.bf16.mxu1 %vm1876_vm2, %v3396_v57 }
 0xd12   : > { %v9991_v58 = vpop.f32.mrf.mxu1 }
 0xd14   : > { %v3387_v61 = vpop.f32.mrf.mxu1 }
 0xd15   : > { %v3397_v62 = vpack.c.bf16 %v9991_v58, %v3387_v61 }
 0xd17   : > { %9995 = vmatmul.mubr.msk.bf16.vlgmr.msra.gmra.mxu1 %vm1876_vm2, %v3397_v62 }
 0xdd7   : > { %v9996_v1 = vpop.f32.mrf.mxu1 }
 0xdd8   : > { %v3459_v59 = vadd.f32 %v9996_v1, %v3120_v49  ;;  %v3630_v49 = vld [vmem:[%s13148_s28 + $0x30] sm:$0xff] }
 0xdd9   : > { %v3442_v3 = vpop.f32.mrf.mxu1  ;;  %v3637_v51 = vpack.c.bf16 %v3631_v50, %v3630_v49 }
 0xdda   : > { %v3457_v6 = vadd.f32 %v3442_v3, %v3118_v4  ;;  %v3469_v9 = vadd.f32 %v9288_v40, %v3459_v59  ;;  %v9289_v3 = vld [vmem:[#allocation6] ss:$0 sm:$0xff] }
 0xddb   : > { %v9997_v7 = vpop.f32.mrf.mxu1  ;;  %10006 = vmatprep.subr.bf16.mxu1 %v3637_v51 }
 0xddc   : > { %v3467_v10 = vadd.f32 %v9288_v40, %v3457_v6  ;;  %v3460_v11 = vadd.f32 %v9997_v7, %v3121_v53  ;;  %v3473_v16 = vadd.f32 %v3469_v9, %v11776_v46  ;;  %10007 = vmatpush3.bf16.msra.mxu1 %v3637_v51 }
 0xddd   : > { %v3445_v2 = vpop.f32.mrf.mxu1 }
 0xdde   : > { %v3458_v12 = vadd.f32 %v3445_v2, %v3119_v8  ;;  %v3471_v13 = vadd.f32 %v3467_v10, %v11766_v37  ;;  %v3470_v14 = vadd.f32 %v9288_v40, %v3460_v11  ;;  %v3483_v41 = vsel %vm1993_vm3, %v3473_v16, 0.0  ;;  %v9290_v10 = vld [vmem:[#allocation7] ss:$0 sm:$0xff] }
 0xde0   : > { %v3468_v39 = vadd.f32 %v9288_v40, %v3458_v12  ;;  %v3477_v15 = vsel %vm1993_vm3, %v3471_v13, 0.0  ;;  %v3474_v19 = vadd.f32 %v3470_v14, %v11772_v42 }
 0xde1   : > { %3478 = vadd.xlane.f32.xlu0 %v3477_v15 }
 0xde2   : > { %v3472_v17 = vadd.f32 %v3468_v39, %v11762_v33  ;;  %v3486_v20 = vsel %vm1993_vm3, %v3474_v19, 0.0 }
 0xde4   : > { %v3480_v18 = vsel %vm1993_vm3, %v3472_v17, 0.0 }
 0xde5   : > { %3484 = vadd.xlane.f32.xlu0 %v3483_v41  ;;  %3481 = vadd.xlane.f32.xlu1 %v3480_v18  ;;  %v3789_v41 = vld [vmem:[%s13149_s16 + $0x18] sm:$0xff] }
 0xde9   : > { %3487 = vadd.xlane.f32.xlu0 %v3486_v20 }
 0xe6a   : > { %v3479_v37 = vpop.xlane.xlu0 %3478 }
 0xe6b   : > { %v3490_v21 = vmul.f32 0.03125, %v3479_v37 }
 0xe6d   : > { %v3494_v22 = vsub.f32 %v3471_v13, %v3490_v21  ;;  %v3786_v21 = vld [vmem:[%s13149_s16] sm:$0xff] }
 0xe6e   : > { %v3485_v23 = vpop.xlane.xlu0 %3484  ;;  %v3482_v24 = vpop.xlane.xlu1 %3481 }
 0xe6f   : > { %v3492_v46 = vmul.f32 0.03125, %v3485_v23  ;;  %v3491_v5 = vmul.f32 0.03125, %v3482_v24  ;;  %v3498_v25 = vmul.f32 %v3494_v22, %v3494_v22  ;;  %v12082_v23 = vld [vmem:[%s12074_s26] sm:$0xff] }
 0xe71   : > { %v3496_v33 = vsub.f32 %v3473_v16, %v3492_v46  ;;  %v3495_v26 = vsub.f32 %v3472_v17, %v3491_v5  ;;  %v3502_v63 = vsel %vm1993_vm3, %v3498_v25, 0.0  ;;  %v3788_v17 = vld [vmem:[%s13149_s16 + $0x10] sm:$0xff]  ;;  %v3790_v46 = vpack.c.bf16 %v12082_v23, %v12082_v23  ;;  %v3628_v5 = vld [vmem:[%s13148_s28 + $0x20] sm:$0xff]  ;;  %v3629_v25 = vld [vmem:[%s13148_s28 + $0x28] sm:$0xff] }
 0xe72   : > { %v3488_v42 = vpop.xlane.xlu0 %3487  ;;  %3503 = vadd.xlane.f32.xlu1 %v3502_v63  ;;  %v3792_v20 = vpack.c.bf16 %v3789_v41, %v3788_v17  ;;  %v3627_v63 = vld [vmem:[%s13148_s28 + $0x18] sm:$0xff] }
 0xe73   : > { %v3493_v27 = vmul.f32 0.03125, %v3488_v42  ;;  %v3500_v28 = vmul.f32 %v3496_v33, %v3496_v33  ;;  %v3499_v29 = vmul.f32 %v3495_v26, %v3495_v26 }
 0xe75   : > { %v3497_v30 = vsub.f32 %v3474_v19, %v3493_v27  ;;  %v3508_v31 = vsel %vm1993_vm3, %v3500_v28, 0.0  ;;  %v3505_v32 = vsel %vm1993_vm3, %v3499_v29, 0.0  ;;  %v3624_v27 = vld [vmem:[%s13148_s28] sm:$0xff]  ;;  %v3625_v28 = vld [vmem:[%s13148_s28 + $0x8] sm:$0xff] }
 0xe76   : > { %3509 = vadd.xlane.f32.xlu1 %v3508_v31  ;;  %3506 = vadd.xlane.f32.xlu0 %v3505_v32  ;;  %v3634_v29 = vpack.c.bf16 %v3625_v28, %v3624_v27  ;;  %v3846_v31 = vld [vmem:[%s13152_s6 + $0x18] sm:$0xff]  ;;  %v3843_v32 = vld [vmem:[%s13152_s6] sm:$0xff] }
 0xe77   : > { %v3501_v34 = vmul.f32 %v3497_v30, %v3497_v30 }
 0xe79   : > { %v3511_v35 = vsel %vm1993_vm3, %v3501_v34, 0.0 }
 0xe7a   : > { %3512 = vadd.xlane.f32.xlu0 %v3511_v35  ;;  %v3844_v35 = vld [vmem:[%s13152_s6 + $0x8] sm:$0xff] }
 0xe7b   : > { %v3847_v36 = vpack.c.bf16 %v3844_v35, %v3843_v32 }
 0xefb   : > { %v3504_v52 = vpop.xlane.xlu1 %3503 }
 0xefc   : > { %v3514_v53 = vmul.f32 0.03125, %v3504_v52 }
 0xefe   : > { %v3518_v54 = vadd.f32 1e-05, %v3514_v53  ;;  %v9299_v53 = vld [vmem:[%s13153_s11] ss:$0 sm:$0xff]  ;;  %s13159_s11 = smov 120  }
 0xeff   : > { %v3507_v55 = vpop.xlane.xlu0 %3506  ;;  %v3510_v56 = vpop.xlane.xlu1 %3509 }
 0xf00   : > { %10810 = vrsqrt.f32 %v3518_v54  ;;  %v3515_v57 = vmul.f32 0.03125, %v3507_v55  ;;  %v3516_v58 = vmul.f32 0.03125, %v3510_v56 }
 0xf02   : > { %v3519_v61 = vadd.f32 1e-05, %v3515_v57  ;;  %v3520_v62 = vadd.f32 1e-05, %v3516_v58 }
 0xf03   : > { %v3513_v38 = vpop.xlane.xlu0 %3512 }
 0xf04   : > { %10812 = vrsqrt.f32 %v3519_v61  ;;  %v3517_v1 = vmul.f32 0.03125, %v3513_v38 }
 0xf05   : > { %10814 = vrsqrt.f32 %v3520_v62 }
 0xf06   : > { %v3521_v4 = vadd.f32 1e-05, %v3517_v1 }
 0xf08   : > { %10816 = vrsqrt.f32 %v3521_v4 }
 0xf0d   : > { %v10811_v59 = vpop.eup %10810 }
 0xf0e   : > { %v3526_v40 = vmul.f32 %v10811_v59, %v3494_v22  ;;  %v3787_v22 = vld [vmem:[%s13149_s16 + $0x8] sm:$0xff] }
 0xf0f   : > { %v3791_v24 = vpack.c.bf16 %v3787_v22, %v3786_v21 }
 0xf10   : > { %v3536_v8 = vmul.f32 %v9289_v3, %v3526_v40 }
 0xf11   : > { %v10813_v0 = vpop.eup %10812 }
 0xf12   : > { %v10815_v6 = vpop.eup %10814  ;;  %v3527_v7 = vmul.f32 %v10813_v0, %v3495_v26  ;;  %v12059_v14 = vadd.f32 %v9290_v10, %v3536_v8  ;;  %v3626_v26 = vld [vmem:[%s13148_s28 + $0x10] sm:$0xff]  ;;  %s13175_s28 = sld [smem:[#allocation60_spill]] }
 0xf13   : > { %v3528_v9 = vmul.f32 %v10815_v6, %v3496_v33  ;;  %v3636_v33 = vpack.c.bf16 %v3629_v25, %v3628_v5  ;;  %v3635_v42 = vpack.c.bf16 %v3627_v63, %v3626_v26 }
 0xf14   : > { %v3537_v11 = vmul.f32 %v9289_v3, %v3527_v7 }
 0xf15   : > { %v10817_v2 = vpop.eup %10816  ;;  %v3538_v13 = vmul.f32 %v9289_v3, %v3528_v9  ;;  %10008 = vmatprep.subr.bf16.mxu1 %v3636_v33 }
 0xf16   : > { %v3529_v12 = vmul.f32 %v10817_v2, %v3497_v30  ;;  %v12061_v39 = vadd.f32 %v9290_v10, %v3537_v11  ;;  %10009 = vmatpush3.bf16.msra.mxu1 %v3636_v33  ;;  %v3845_v30 = vld [vmem:[%s13151_s10 + $0x10] sm:$0xff]  ;;  %s13155_s10 = sld [smem:[#allocation50_spill]] }
 0xf17   : > { %v12068_v18 = vadd.f32 %v9290_v10, %v3538_v13  ;;  %10010 = vmatprep.subr.bf16.mxu1 %v3635_v42  ;;  %v3848_v34 = vpack.c.bf16 %v3846_v31, %v3845_v30 }
 0xf18   : > { %v3539_v15 = vmul.f32 %v9289_v3, %v3529_v12  ;;  %v3554_v16 = vpack.c.bf16 %v12061_v39, %v12059_v14 }
 0xf1a   : > { %v12070_v19 = vadd.f32 %v9290_v10, %v3539_v15  ;;  %10002 = vmatprep.mubr.msk.bf16.mxu0 %vm1993_vm3, %v3554_v16  ;;  %10011 = vmatpush3.bf16.msra.mxu1 %v3635_v42 }
 0xf1b   : > { %10012 = vmatprep.subr.bf16.mxu1 %v3634_v29 }
 0xf1c   : > { %v3555_v37 = vpack.c.bf16 %v12070_v19, %v12068_v18  ;;  %s13156_s2 = smov %s13155_s10  ;;  %v9301_v8 = vld [vmem:[%s13155_s10] ss:$0 sm:$0xff]  ;;  %s13160_s10 = smov 80  }
 0xf1e   : > { %10003 = vmatmul.mubr.msk.bf16.vlgmr.msra.gmra.mxu0 %vm1993_vm3, %v3555_v37  ;;  %10013 = vmatpush3.bf16.msra.mxu1 %v3634_v29 }
 0xf1f   : > { %10019 = vmatpush3.bf16.msra.mxu0 %v3792_v20  ;;  %10022 = vmatprep.mubr.msk.bf16.mxu0 %vm11319_vm5, %v11318_v48 }
 0xf20   : > { %10020 = vmatprep.subr.bf16.mxu0 %v11318_v48  ;;  %10034 = vmatprep.subr.mxu1 %v11318_v48 }
 0xf23   : > { %10021 = vmatpush3.bf16.msra.mxu0 %v3791_v24 }
 0xf24   : > { %10026 = vmatprep.subr.bf16.mxu0 %v11318_v48 }
 0xf26   : > { %10023 = vmatmul.mubr.msk.bf16.vlgmr.msra.gmra.mxu0 %vm1993_vm3, %v3790_v46 }
 0xf27   : > { %10030 = vmatprep.mubr.msk.bf16.mxu0 %vm11319_vm5, %v11318_v48  ;;  %10027 = vmatpush3.bf16.msra.mxu0 %v3848_v34 }
 0xf28   : > { %10028 = vmatprep.subr.bf16.mxu0 %v11318_v48 }
 0xf2b   : > { %10029 = vmatpush3.bf16.msra.mxu0 %v3847_v36 }
 0xf2c   : > { %10044 = vmatprep.subr.mxu0 %v11318_v48 }
 0xf2e   : > { %10031 = vmatmul.mubr.bf16.vlgmr.msra.gmra.mxu0 %v11320_v43 }
 0xf2f   : > { %10046 = vmatprep.mubr.msk.f32.mxu0 %vm11319_vm5, %v11318_v48 }
 0xfde   : > { %v10004_v44 = vpop.f32.mrf.mxu0 }
 0xfdf   : > { %v3614_v51 = vadd.f32 %v10004_v44, %v9291_v45 }
 0xfe0   : > { %v3605_v60 = vpop.f32.mrf.mxu0 }
 0xfe1   : > { %v3606_v49 = vadd.f32 %v9291_v45, %v3605_v60  ;;  %v3622_v62 = vmax.f32 %v3614_v51, 0.0  ;;  %v3899_v60 = vld [vmem:[%s13162_s5] sm:$0xff] }
 0xfe2   : > { %v10005_v47 = vpop.f32.mrf.mxu0 }
 0xfe3   : > { %v3617_v50 = vadd.f32 %v10005_v47, %v9291_v45  ;;  %v3620_v57 = vmax.f32 %v3606_v49, 0.0  ;;  %v3900_v49 = vld [vmem:[%s13162_s5 + $0x8] sm:$0xff] }
 0xfe4   : > { %v3608_v52 = vpop.f32.mrf.mxu0 }
 0xfe5   : > { %v3609_v54 = vadd.f32 %v9291_v45, %v3608_v52  ;;  %v3623_v55 = vmax.f32 %v3617_v50, 0.0  ;;  %v4067_v45 = vpack.c.bf16 %v3899_v60, %v3899_v60  ;;  %v4236_v50 = vpack.c.bf16 %v3900_v49, %v3900_v49 }
 0xfe6   : > { %v3837_v56 = vpop.f32.mrf.mxu0 }
 0xfe7   : > { %v3621_v58 = vmax.f32 %v3609_v54, 0.0  ;;  %v12109_v61 = vadd.f32 %v9299_v53, %v3837_v56  ;;  %v3633_v4 = vpack.c.bf16 %v3623_v55, %v3622_v62  ;;  %v4287_v47 = vsel %vm2672_vm4, %v4067_v45, 0 }
 0xfe8   : > { %v10024_v38 = vpop.f32.mrf.mxu0  ;;  %v4241_v51 = vsel %vm2672_vm4, %v4236_v50, 0 }
 0xfe9   : > { %v3632_v1 = vpack.c.bf16 %v3621_v58, %v3620_v57  ;;  %4070 = vrot.lane.b32.xlu0 %v12109_v61, %s13157_s1  ;;  %3905 = vrot.lane.b32.xlu1 %v12109_v61, %s13158_s3 }
 0xfea   : > { %v3840_v59 = vpop.f32.mrf.mxu0 }
 0xfeb   : > { %10014 = vmatprep.mubr.msk.bf16.mxu1 %vm3645_vm6, %v3632_v1 }
 0xfec   : > { %10015 = vmatmul.mubr.msk.bf16.vlgmr.msra.gmra.mxu1 %vm3645_vm6, %v3633_v4  ;;  %v10025_v40 = vpop.f32.mrf.mxu0 }
 0xfed   : > { %4068 = vrot.lane.b32.xlu1 %v12109_v61, %s13159_s11  ;;  %10036 = vmatprep.mubr.msk.f32.mxu1 %vm11319_vm5, %v11318_v48 }
 0xfee   : > { %v3893_v3 = vpop.f32.mrf.mxu0 }
 0xfef   : > { %v12124_v11 = vadd.f32 %v9301_v8, %v3893_v3 }
 0xff0   : > { %v10032_v0 = vpop.f32.mrf.mxu0 }
 0xff2   : > { %v3896_v6 = vpop.f32.mrf.mxu0 }
 0xff4   : > { %v10033_v7 = vpop.f32.mrf.mxu0 }
0x105b   : > { %v4071_v9 = vpop.permute.xlu0 %4070  ;;  %v3906_v10 = vpop.permute.xlu1 %3905 }
0x105c   : > { %10035 = vmatpush3.xpose.msk.msra.mxu1 %vm1876_vm2, %v3906_v10  ;;  %10045 = vmatpush3.xpose.msk.msra.mxu0 %vm1876_vm2, %v4071_v9 }
0x105d   : > { %10039 = vmatprep.subr.mxu1 %v11318_v48  ;;  %10054 = vmatprep.subr.bf16.mxu0 %v11318_v48 }
0x105f   : > { %v4069_v2 = vpop.permute.xlu1 %4068  ;;  %10037 = vmatmul.mubr.msk.f32.vlgmr.msra.gmra.mxu1 %vm1876_vm2, %v12109_v61 }
0x1060   : > { %10047 = vmatmul.mubr.msk.f32.vlgmr.msra.gmra.mxu0 %vm1876_vm2, %v4069_v2  ;;  %10040 = vmatpush3.msra.mxu1 %v12124_v11 }
0x1061   : > { %10041 = vmatprep.mubr.msk.f32.mxu1 %vm11319_vm5, %v11318_v48  ;;  %10049 = vmatprep.subr.mxu1 %v11318_v48 }
0x1062   : > { %10056 = vmatprep.mubr.msk.bf16.mxu0 %vm11319_vm5, %v11318_v48  ;;  %10055 = vmatpush3.bf16.msra.mxu0 %v4241_v51 }
0x1063   : > { %10066 = vmatprep.subr.mxu0 %v11318_v48 }
0x10ac   : > { %v12137_v12 = vpop.f32.mrf.mxu1 }
0x10ae   : > { %v12139_v13 = vpop.f32.mrf.mxu1 }
0x10b0   : > { %v12141_v15 = vpop.f32.mrf.mxu1 }
0x10b2   : > { %v12143_v16 = vpop.f32.mrf.mxu1 }
0x111f   : > { %v3977_v17 = vpop.f32.mrf.mxu1 }
0x1120   : > { %v3981_v41 = vmul.f32 0.35355338, %v3977_v17  ;;  %v4142_v20 = vpop.f32.mrf.mxu0 }
0x1121   : > { %v4146_v37 = vmul.f32 0.35355338, %v4142_v20  ;;  %v10038_v21 = vpop.f32.mrf.mxu1 }
0x1122   : > { %v10048_v22 = vpop.f32.mrf.mxu0  ;;  %v3982_v24 = vsel %vm1876_vm2, %v3981_v41, -inf }
0x1123   : > { %3983 = vmax.xlane.f32.xlu1 %v3982_v24  ;;  %v4147_v46 = vsel %vm1876_vm2, %v4146_v37, -inf }
0x1124   : > { %4148 = vmax.xlane.f32.xlu0 %v4147_v46 }
0x11ac   : > { %v3984_v5 = vpop.xlane.xlu1 %3983 }
0x11ad   : > { %v3985_v25 = vsub.f32 %v3981_v41, %v3984_v5  ;;  %v4149_v33 = vpop.xlane.xlu0 %4148 }
0x11ae   : > { %v4150_v26 = vsub.f32 %v4146_v37, %v4149_v33 }
0x11af   : > { %v3986_v63 = vmul.f32 1.442695, %v3985_v25 }
0x11b0   : > { %v4151_v42 = vmul.f32 1.442695, %v4150_v26 }
0x11b1   : > { %10818 = vpow2.f32 %v3986_v63 }
0x11b2   : > { %10820 = vpow2.f32 %v4151_v42 }
0x11be   : > { %v10819_v27 = vpop.eup %10818 }
0x11bf   : > { %v10821_v28 = vpop.eup %10820  ;;  %v3988_v29 = vsel %vm1876_vm2, %v10819_v27, 0.0 }
0x11c0   : > { %3989 = vadd.xlane.f32.xlu0 %v3988_v29  ;;  %v4153_v30 = vsel %vm1876_vm2, %v10821_v28, 0.0 }
0x11c1   : > { %4154 = vadd.xlane.f32.xlu1 %v4153_v30 }
0x11d2   : > { %4331 = vrot.lane.b32.xlu1 %v12109_v61, %s13160_s10 }
0x11d6   : > { %4329 = vrot.lane.b32.xlu1 %v12109_v61, %s13161_s4  ;;  %4159 = vrot.lane.b32.xlu0 %v12124_v11, %s13159_s11 }
0x1249   : > { %v3990_v31 = vpop.xlane.xlu0 %3989 }
0x124a   : > { %10822 = vrcp.f32 %v3990_v31  ;;  %v4155_v32 = vpop.xlane.xlu1 %4154 }
0x124b   : > { %10824 = vrcp.f32 %v4155_v32 }
0x124d   : > { %v4160_v43 = vpop.permute.xlu0 %4159 }
0x124e   : > { %v4332_v58 = vpop.permute.xlu1 %4331 }
0x1252   : > { %v4330_v62 = vpop.permute.xlu1 %4329 }
0x1257   : > { %v10823_v34 = vpop.eup %10822 }
0x1258   : > { %v3992_v35 = vmul.f32 %v10823_v34, %v10819_v27  ;;  %v10825_v36 = vpop.eup %10824 }
0x1259   : > { %v4157_v44 = vmul.f32 %v10825_v36, %v10821_v28  ;;  %v9294_v28 = vld [vmem:[#allocation4] ss:$0 sm:$0xff] }
0x125a   : > { %10042 = vmatmul.mubr.msk.f32.vlgmr.msra.gmra.mxu1 %vm1876_vm2, %v3992_v35  ;;  %v3687_v30 = vadd.f32 %v9294_v28, %v12139_v13  ;;  %v3690_v35 = vadd.f32 %v9294_v28, %v12143_v16 }
0x125b   : > { %10050 = vmatpush3.msra.mxu1 %v4160_v43  ;;  %10051 = vmatprep.mubr.msk.f32.mxu1 %vm11319_vm5, %v11318_v48 }
0x125c   : > { %10060 = vmatprep.subr.bf16.mxu1 %v11318_v48  ;;  %v3701_v43 = vadd.f32 %v3687_v30, %v12059_v14  ;;  %v3702_v60 = vadd.f32 %v3690_v35, %v12061_v39 }
0x125e   : > { %10052 = vmatmul.mubr.msk.f32.vlgmr.msra.gmra.mxu1 %vm1876_vm2, %v4157_v44  ;;  %v3695_v44 = vadd.f32 %v12137_v12, %v9294_v28  ;;  %v3707_v13 = vsel %vm1993_vm3, %v3701_v43, 0.0  ;;  %v3710_v49 = vsel %vm1993_vm3, %v3702_v60, 0.0 }
0x125f   : > { %10062 = vmatprep.mubr.msk.bf16.mxu1 %vm11319_vm5, %v11318_v48  ;;  %10061 = vmatpush3.bf16.msra.mxu1 %v4287_v47  ;;  %v3698_v47 = vadd.f32 %v12141_v15, %v9294_v28 }
0x1260   : > { %10071 = vmatprep.subr.mxu1 %v11318_v48  ;;  %v3703_v45 = vadd.f32 %v3695_v44, %v12068_v18 }
0x1261   : > { %v3704_v16 = vadd.f32 %v3698_v47, %v12070_v19 }
0x1262   : > { %v3713_v50 = vsel %vm1993_vm3, %v3703_v45, 0.0 }
0x1263   : > { %v3716_v14 = vsel %vm1993_vm3, %v3704_v16, 0.0 }
0x131a   : > { %v4062_v52 = vpop.f32.mrf.mxu1 }
0x131b   : > { %v4066_v53 = vpack.c.bf16 %v4062_v52, %v4062_v52 }
0x131c   : > { %v10043_v54 = vpop.f32.mrf.mxu1 }
0x131d   : > { %10063 = vmatmul.mubr.msk.bf16.vlgmr.msra.gmra.mxu1 %vm1876_vm2, %v4066_v53 }
0x131e   : > { %v4231_v55 = vpop.f32.mrf.mxu1  ;;  %10073 = vmatprep.mubr.msk.f32.mxu1 %vm11319_vm5, %v11318_v48 }
0x131f   : > { %v4235_v56 = vpack.c.bf16 %v4231_v55, %v4231_v55 }
0x1320   : > { %v10053_v57 = vpop.f32.mrf.mxu1 }
0x1321   : > { %10057 = vmatmul.mubr.msk.bf16.vlgmr.msra.gmra.mxu0 %vm1876_vm2, %v4235_v56 }
0x1322   : > { %10067 = vmatpush3.xpose.msk.msra.mxu0 %vm1876_vm2, %v4332_v58  ;;  %10068 = vmatprep.mubr.msk.f32.mxu0 %vm11319_vm5, %v11318_v48 }
0x1323   : > { %10076 = vmatprep.subr.bf16.mxu0 %v11318_v48 }
0x1329   : > { %10069 = vmatmul.mubr.msk.f32.vlgmr.msra.gmra.mxu0 %vm1876_vm2, %v4330_v62 }
0x132a   : > { %10078 = vmatprep.mubr.msk.bf16.mxu0 %vm11319_vm5, %v11318_v48 }
0x13dd   : > { %v4323_v38 = vpop.f32.mrf.mxu1 }
0x13df   : > { %v10064_v1 = vpop.f32.mrf.mxu1 }
0x13e1   : > { %v4277_v4 = vpop.f32.mrf.mxu0  ;;  %v4326_v59 = vpop.f32.mrf.mxu1 }
0x13e2   : > { %v12179_v40 = vadd.f32 %v4323_v38, %v4277_v4 }
0x13e3   : > { %v10058_v3 = vpop.f32.mrf.mxu0  ;;  %v10065_v0 = vpop.f32.mrf.mxu1 }
0x13e4   : > { %v3902_v3 = vld [vmem:[%s13162_s5 + $0x18] sm:$0xff] }
0x13e5   : > { %v4280_v6 = vpop.f32.mrf.mxu0  ;;  %v4711_v0 = vpack.c.bf16 %v3902_v3, %v3902_v3 }
0x13e7   : > { %v10059_v7 = vpop.f32.mrf.mxu0  ;;  %v4716_v6 = vsel %vm2672_vm4, %v4711_v0, 0 }
0x13e9   : > { %v4403_v8 = vpop.f32.mrf.mxu0 }
0x13ea   : > { %v4407_v9 = vmul.f32 0.35355338, %v4403_v8 }
0x13eb   : > { %v10070_v10 = vpop.f32.mrf.mxu0 }
0x13ec   : > { %v4408_v2 = vsel %vm1876_vm2, %v4407_v9, -inf }
0x13ed   : > { %4409 = vmax.xlane.f32.xlu0 %v4408_v2 }
0x1403   : > { %4419 = vrot.lane.b32.xlu0 %v12124_v11, %s13161_s4 }
0x1407   : > { %4544 = vrot.lane.b32.xlu0 %v12109_v61, %s13163_s12 }
0x1476   : > { %v4410_v17 = vpop.xlane.xlu0 %4409 }
0x1477   : > { %v4411_v41 = vsub.f32 %v4407_v9, %v4410_v17  ;;  %v9318_v17 = vld [vmem:[%s13165_s17] ss:$0 sm:$0xff] }
0x1479   : > { %v4412_v20 = vmul.f32 1.442695, %v4411_v41 }
0x147a   : > { %v4420_v37 = vpop.permute.xlu0 %4419 }
0x147b   : > { %10826 = vpow2.f32 %v4412_v20  ;;  %10072 = vmatpush3.msra.mxu1 %v4420_v37 }
0x147c   : > { %10082 = vmatprep.subr.mxu1 %v11318_v48 }
0x147e   : > { %v4545_v33 = vpop.permute.xlu0 %4544 }
0x1488   : > { %v10827_v21 = vpop.eup %10826 }
0x1489   : > { %v4414_v22 = vsel %vm1876_vm2, %v10827_v21, 0.0 }
0x148a   : > { %4415 = vadd.xlane.f32.xlu1 %v4414_v22 }
0x149b   : > { %4546 = vrot.lane.b32.xlu1 %v12109_v61, %s13164_s14  ;;  %v3901_v61 = vld [vmem:[%s13162_s5 + $0x10] sm:$0xff] }
0x149c   : > { %v4496_v26 = vpack.c.bf16 %v3901_v61, %v3901_v61 }
0x149e   : > { %v4501_v63 = vsel %vm2672_vm4, %v4496_v26, 0 }
0x149f   : > { %10077 = vmatpush3.bf16.msra.mxu0 %v4501_v63 }
0x14a0   : > { %10092 = vmatprep.subr.bf16.mxu0 %v11318_v48 }
0x1513   : > { %v4416_v24 = vpop.xlane.xlu1 %4415 }
0x1514   : > { %10828 = vrcp.f32 %v4416_v24 }
0x1517   : > { %v4547_v25 = vpop.permute.xlu1 %4546 }
0x1521   : > { %v10829_v46 = vpop.eup %10828 }
0x1522   : > { %v4418_v5 = vmul.f32 %v10829_v46, %v10827_v21 }
0x1524   : > { %10074 = vmatmul.mubr.msk.f32.vlgmr.msra.gmra.mxu1 %vm1876_vm2, %v4418_v5 }
0x1525   : > { %10083 = vmatpush3.xpose.msk.msra.mxu1 %vm1876_vm2, %v4547_v25  ;;  %10084 = vmatprep.mubr.msk.f32.mxu1 %vm11319_vm5, %v11318_v48 }
0x1526   : > { %10087 = vmatprep.subr.mxu1 %v11318_v48 }
0x1528   : > { %10085 = vmatmul.mubr.msk.f32.vlgmr.msra.gmra.mxu1 %vm1876_vm2, %v4545_v33 }
0x1529   : > { %10089 = vmatprep.mubr.msk.f32.mxu1 %vm11319_vm5, %v11318_v48 }
0x15e4   : > { %v4491_v42 = vpop.f32.mrf.mxu1 }
0x15e5   : > { %v4495_v27 = vpack.c.bf16 %v4491_v42, %v4491_v42 }
0x15e6   : > { %v10075_v29 = vpop.f32.mrf.mxu1 }
0x15e7   : > { %10079 = vmatmul.mubr.msk.bf16.vlgmr.msra.gmra.mxu0 %vm1876_vm2, %v4495_v27 }
0x15e8   : > { %v4618_v31 = vpop.f32.mrf.mxu1  ;;  %10094 = vmatprep.mubr.msk.bf16.mxu0 %vm11319_vm5, %v11318_v48  ;;  %10093 = vmatpush3.bf16.msra.mxu0 %v4716_v6  ;;  %v10906_v6 = vld [vmem:[%s11760_s13] sm:$0xff] }
0x15e9   : > { %v4622_v32 = vmul.f32 0.35355338, %v4618_v31 }
0x15ea   : > { %v10086_v34 = vpop.f32.mrf.mxu1 }
0x15eb   : > { %v4623_v36 = vsel %vm1876_vm2, %v4622_v32, -inf  ;;  %v4857_v34 = vld [vmem:[%s13166_s18 + $0x18] sm:$0xff] }
0x15ec   : > { %4624 = vmax.xlane.f32.xlu1 %v4623_v36  ;;  %v4854_v36 = vld [vmem:[%s13166_s18] sm:$0xff] }
0x15f0   : > { %3708 = vadd.xlane.f32.xlu1 %v3707_v13 }
0x15f4   : > { %3711 = vadd.xlane.f32.xlu1 %v3710_v49 }
0x15f8   : > { %3714 = vadd.xlane.f32.xlu1 %v3713_v50 }
0x15fc   : > { %3717 = vadd.xlane.f32.xlu1 %v3716_v14 }
0x1675   : > { %v4625_v12 = vpop.xlane.xlu1 %4624 }
0x1676   : > { %v4626_v39 = vsub.f32 %v4622_v32, %v4625_v12  ;;  %v4856_v32 = vld [vmem:[%s13166_s18 + $0x10] sm:$0xff] }
0x1677   : > { %v4861_v35 = vpack.c.bf16 %v4857_v34, %v4856_v32 }
0x1678   : > { %v4627_v51 = vmul.f32 1.442695, %v4626_v39 }
0x1679   : > { %v3709_v53 = vpop.xlane.xlu1 %3708  ;;  %10106 = vmatprep.subr.bf16.mxu0 %v4861_v35 }
0x167a   : > { %10830 = vpow2.f32 %v4627_v51  ;;  %v3719_v2 = vmul.f32 0.03125, %v3709_v53 }
0x167c   : > { %v3723_v20 = vsub.f32 %v3701_v43, %v3719_v2  ;;  %v4855_v43 = vld [vmem:[%s13166_s18 + $0x8] sm:$0xff] }
0x167d   : > { %v3712_v57 = vpop.xlane.xlu1 %3711  ;;  %v4860_v44 = vpack.c.bf16 %v4855_v43, %v4854_v36  ;;  %v9319_v36 = vld [vmem:[%s13169_s21] ss:$0 sm:$0xff] }
0x167e   : > { %v3720_v58 = vmul.f32 0.03125, %v3712_v57  ;;  %v3727_v26 = vmul.f32 %v3723_v20, %v3723_v20  ;;  %v9297_v57 = vld [vmem:[#allocation9] ss:$0 sm:$0xff] }
0x1680   : > { %v12221_v62 = vsub.f32 %v3702_v60, %v3720_v58  ;;  %v3731_v27 = vsel %vm1993_vm3, %v3727_v26, 0.0  ;;  %v4798_v26 = vld [vmem:[%s13167_s19 + $0x8] sm:$0xff] }
0x1681   : > { %v3715_v10 = vpop.xlane.xlu1 %3714 }
0x1682   : > { %v3728_v38 = vmul.f32 %v12221_v62, %v12221_v62  ;;  %v3721_v37 = vmul.f32 0.03125, %v3715_v10 }
0x1684   : > { %v3734_v1 = vsel %vm1993_vm3, %v3728_v38, 0.0  ;;  %v3725_v25 = vsub.f32 %v3703_v45, %v3721_v37 }
0x1685   : > { %v3718_v22 = vpop.xlane.xlu1 %3717 }
0x1686   : > { %v3722_v33 = vmul.f32 0.03125, %v3718_v22  ;;  %v3729_v28 = vmul.f32 %v3725_v25, %v3725_v25  ;;  %v4800_v22 = vld [vmem:[%s13167_s19 + $0x18] sm:$0xff] }
0x1687   : > { %v10831_v52 = vpop.eup %10830 }
0x1688   : > { %v4629_v18 = vsel %vm1876_vm2, %v10831_v52, 0.0  ;;  %v3726_v42 = vsub.f32 %v3704_v16, %v3722_v33  ;;  %v3737_v29 = vsel %vm1993_vm3, %v3729_v28, 0.0  ;;  %v4926_v28 = vld [vmem:[%s13168_s20 + $0x10] sm:$0xff] }
0x1689   : > { %4630 = vadd.xlane.f32.xlu0 %v4629_v18 }
0x168a   : > { %v3730_v30 = vmul.f32 %v3726_v42, %v3726_v42 }
0x168c   : > { %v3740_v31 = vsel %vm1993_vm3, %v3730_v30, 0.0 }
0x169f   : > { %4634 = vrot.lane.b32.xlu0 %v12124_v11, %s13163_s12 }
0x16a7   : > { %v4537_v15 = vpop.f32.mrf.mxu0 }
0x16a8   : > { %v4543_v19 = vadd.f32 %v4537_v15, %v12179_v40 }
0x16a9   : > { %v10080_v54 = vpop.f32.mrf.mxu0 }
0x16ab   : > { %v4540_v55 = vpop.f32.mrf.mxu0 }
0x16ad   : > { %v10081_v56 = vpop.f32.mrf.mxu0 }
0x16be   : > { %3735 = vadd.xlane.f32.xlu0 %v3734_v1  ;;  %v9298_v1 = vld [vmem:[#allocation10] ss:$0 sm:$0xff] }
0x1712   : > { %v4631_v4 = vpop.xlane.xlu0 %4630 }
0x1713   : > { %10832 = vrcp.f32 %v4631_v4 }
0x1716   : > { %v4635_v11 = vpop.permute.xlu0 %4634 }
0x1717   : > { %10088 = vmatpush3.msra.mxu1 %v4635_v11 }
0x1718   : > { %10098 = vmatprep.subr.bf16.mxu1 %v11318_v48 }
0x1720   : > { %v10833_v59 = vpop.eup %10832 }
0x1721   : > { %v4633_v40 = vmul.f32 %v10833_v59, %v10831_v52 }
0x1723   : > { %10090 = vmatmul.mubr.msk.f32.vlgmr.msra.gmra.mxu1 %vm1876_vm2, %v4633_v40 }
0x1724   : > { %10102 = vmatprep.mubr.msk.bf16.mxu1 %vm11319_vm5, %v11318_v48 }
0x1747   : > { %v3736_v60 = vpop.xlane.xlu0 %3735 }
0x1748   : > { %v3744_v13 = vmul.f32 0.03125, %v3736_v60 }
0x174a   : > { %v3748_v45 = vadd.f32 1e-05, %v3744_v13 }
0x174c   : > { %10834 = vrsqrt.f32 %v3748_v45  ;;  %v4924_v45 = vld [vmem:[%s13168_s20] sm:$0xff] }
0x1759   : > { %v10835_v54 = vpop.eup %10834 }
0x175a   : > { %v3756_v56 = vmul.f32 %v10835_v54, %v12221_v62  ;;  %v9321_v54 = vld [vmem:[%s13172_s24] ss:$0 sm:$0xff] }
0x175c   : > { %v3766_v58 = vmul.f32 %v9297_v57, %v3756_v56 }
0x175e   : > { %v3776_v59 = vadd.f32 %v9298_v1, %v3766_v58 }
0x17e3   : > { %v4706_v7 = vpop.f32.mrf.mxu1 }
0x17e4   : > { %v4710_v8 = vpack.c.bf16 %v4706_v7, %v4706_v7 }
0x17e5   : > { %v10091_v9 = vpop.f32.mrf.mxu1 }
0x17e6   : > { %10095 = vmatmul.mubr.msk.bf16.vlgmr.msra.gmra.mxu0 %vm1876_vm2, %v4710_v8  ;;  %v10907_v8 = vld [vmem:[%s11760_s13 + $0x8] sm:$0xff] }
0x17e7   : > { %10107 = vmatpush3.bf16.msra.mxu0 %v4861_v35  ;;  %v3780_v9 = vadd.f32 %v10907_v8, %v3776_v59 }
0x17e8   : > { %10108 = vmatprep.subr.bf16.mxu0 %v4860_v44 }
0x17eb   : > { %10109 = vmatpush3.bf16.msra.mxu0 %v4860_v44  ;;  %v9320_v44 = vld [vmem:[%s13170_s22] ss:$0 sm:$0xff] }
0x17ec   : > { %10122 = vmatprep.subr.mxu0 %v11318_v48 }
0x18a6   : > { %v4752_v41 = vpop.f32.mrf.mxu0 }
0x18a7   : > { %v4758_v21 = vadd.f32 %v4752_v41, %v4543_v19 }
0x18a8   : > { %v10096_v24 = vpop.f32.mrf.mxu0 }
0x18a9   : > { %v4765_v46 = vadd.f32 %v9318_v17, %v4758_v21  ;;  %v4799_v21 = vld [vmem:[%s13167_s19 + $0x10] sm:$0xff]  ;;  %v4797_v24 = vld [vmem:[%s13167_s19] sm:$0xff] }
0x18aa   : > { %v4755_v5 = vpop.f32.mrf.mxu0 }
0x18ab   : > { %v4769_v61 = vsel %vm1993_vm3, %v4765_v46, 0.0 }
0x18ac   : > { %v10097_v63 = vpop.f32.mrf.mxu0  ;;  %4770 = vadd.xlane.f32.xlu1 %v4769_v61  ;;  %v4803_v61 = vpack.c.bf16 %v4800_v22, %v4799_v21 }
0x18ae   : > { %10099 = vmatpush3.bf16.msra.mxu1 %v4803_v61 }
0x18af   : > { %10100 = vmatprep.subr.bf16.mxu1 %v11318_v48 }
0x18b0   : > { %3732 = vadd.xlane.f32.xlu1 %v3731_v27  ;;  %v4802_v27 = vpack.c.bf16 %v4798_v26, %v4797_v24 }
0x18b2   : > { %10101 = vmatpush3.bf16.msra.mxu1 %v4802_v27 }
0x18b4   : > { %3738 = vadd.xlane.f32.xlu1 %v3737_v29  ;;  %v4927_v29 = vld [vmem:[%s13168_s20 + $0x18] sm:$0xff] }
0x18b5   : > { %v4931_v30 = vpack.c.bf16 %v4927_v29, %v4926_v28  ;;  %v4994_v28 = vld [vmem:[%s13174_s27] sm:$0xff] }
0x18b6   : > { %v5170_v29 = vpack.c.bf16 %v4994_v28, %v4994_v28 }
0x18b7   : > { %10114 = vmatprep.subr.bf16.mxu1 %v4931_v30 }
0x18b8   : > { %3741 = vadd.xlane.f32.xlu1 %v3740_v31 }
0x1935   : > { %v4771_v47 = vpop.xlane.xlu1 %4770 }
0x1936   : > { %v4772_v49 = vmul.f32 0.03125, %v4771_v47  ;;  %v4925_v47 = vld [vmem:[%s13168_s20 + $0x8] sm:$0xff] }
0x1938   : > { %v12243_v16 = vsub.f32 %v4765_v46, %v4772_v49  ;;  %v10908_v46 = vld [vmem:[%s11760_s13 + $0x10] sm:$0xff] }
0x1939   : > { %v3733_v50 = vpop.xlane.xlu1 %3732 }
0x193a   : > { %v3743_v14 = vmul.f32 0.03125, %v3733_v50  ;;  %v4774_v12 = vmul.f32 %v12243_v16, %v12243_v16 }
0x193c   : > { %v3747_v39 = vadd.f32 1e-05, %v3743_v14  ;;  %v4775_v51 = vsel %vm1993_vm3, %v4774_v12, 0.0  ;;  %v4930_v14 = vpack.c.bf16 %v4925_v47, %v4924_v45 }
0x193d   : > { %4776 = vadd.xlane.f32.xlu1 %v4775_v51  ;;  %v3739_v52 = vpop.xlane.xlu1 %3738 }
0x193e   : > { %10836 = vrsqrt.f32 %v3747_v39  ;;  %v3745_v18 = vmul.f32 0.03125, %v3739_v52 }
0x1940   : > { %v3749_v15 = vadd.f32 1e-05, %v3745_v18 }
0x1941   : > { %v3742_v53 = vpop.xlane.xlu1 %3741 }
0x1942   : > { %10838 = vrsqrt.f32 %v3749_v15  ;;  %v3746_v19 = vmul.f32 0.03125, %v3742_v53 }
0x1944   : > { %v3750_v55 = vadd.f32 1e-05, %v3746_v19 }
0x1946   : > { %10840 = vrsqrt.f32 %v3750_v55 }
0x194b   : > { %v10837_v38 = vpop.eup %10836 }
0x194c   : > { %v3755_v4 = vmul.f32 %v10837_v38, %v3723_v20 }
0x194e   : > { %v3765_v11 = vmul.f32 %v9297_v57, %v3755_v4 }
0x194f   : > { %v10839_v40 = vpop.eup %10838 }
0x1950   : > { %v3757_v3 = vmul.f32 %v10839_v40, %v3725_v25  ;;  %v3775_v0 = vadd.f32 %v9298_v1, %v3765_v11  ;;  %v10909_v25 = vld [vmem:[%s11760_s13 + $0x18] sm:$0xff]  ;;  %s13171_s13 = sld [smem:[#allocation56_spill]]  ;;  %v9326_v11 = vld [vmem:[%s13173_s25] ss:$0 sm:$0xff] }
0x1952   : > { %v3779_v7 = vadd.f32 %v10906_v6, %v3775_v0  ;;  %v3767_v62 = vmul.f32 %v9297_v57, %v3757_v3  ;;  %v12281_v12 = vpack.c.bf16 %v3776_v59, %v3775_v0 }
0x1953   : > { %v10841_v10 = vpop.eup %10840 }
0x1954   : > { %v3758_v2 = vmul.f32 %v10841_v10, %v3726_v42  ;;  %v12251_v17 = vpack.c.bf16 %v3780_v9, %v3779_v7  ;;  %v3777_v20 = vadd.f32 %v9298_v1, %v3767_v62 }
0x1956   : > { %10110 = vmatprep.mubr.msk.bf16.mxu0 %vm1993_vm3, %v12251_v17  ;;  %v3768_v41 = vmul.f32 %v9297_v57, %v3758_v2  ;;  %v3781_v5 = vadd.f32 %v10908_v46, %v3777_v20 }
0x1958   : > { %v3778_v37 = vadd.f32 %v9298_v1, %v3768_v41 }
0x195a   : > { %v3782_v33 = vadd.f32 %v10909_v25, %v3778_v37  ;;  %v12261_v63 = vpack.c.bf16 %v3778_v37, %v3777_v20 }
0x195c   : > { %v12263_v42 = vpack.c.bf16 %v3782_v33, %v3781_v5 }
0x195e   : > { %10111 = vmatmul.mubr.msk.bf16.vlgmr.msra.gmra.mxu0 %vm1993_vm3, %v12263_v42 }
0x195f   : > { %10130 = vmatprep.mubr.msk.f32.mxu0 %vm11319_vm5, %v11318_v48 }
0x19c6   : > { %v4777_v31 = vpop.xlane.xlu1 %4776 }
0x19c7   : > { %v4778_v32 = vmul.f32 0.03125, %v4777_v31 }
0x19c9   : > { %v4779_v34 = vadd.f32 1e-05, %v4778_v32 }
0x19cb   : > { %10842 = vrsqrt.f32 %v4779_v34 }
0x19d8   : > { %v10843_v35 = vpop.eup %10842 }
0x19d9   : > { %v4781_v43 = vmul.f32 %v10843_v35, %v12243_v16 }
0x19db   : > { %v4788_v60 = vmul.f32 %v9319_v36, %v4781_v43 }
0x19dd   : > { %v12275_v13 = vadd.f32 %v9320_v44, %v4788_v60 }
0x19df   : > { %v4796_v49 = vadd.f32 %v12275_v13, %v12082_v23  ;;  %v9323_v23 = vld [vmem:[%s13171_s13] ss:$0 sm:$0xff] }
0x19e1   : > { %v4801_v50 = vpack.c.bf16 %v4796_v49, %v4796_v49 }
0x19e3   : > { %10103 = vmatmul.mubr.msk.bf16.vlgmr.msra.gmra.mxu1 %vm1993_vm3, %v4801_v50 }
0x19e4   : > { %10115 = vmatpush3.bf16.msra.mxu1 %v4931_v30  ;;  %10118 = vmatprep.mubr.msk.bf16.mxu1 %vm1993_vm3, %v12281_v12  ;;  %v5414_v30 = vsel %vm2672_vm4, %v5170_v29, 0 }
0x19e5   : > { %10116 = vmatprep.subr.bf16.mxu1 %v4930_v14 }
0x19e8   : > { %10117 = vmatpush3.bf16.msra.mxu1 %v4930_v14 }
0x19e9   : > { %10133 = vmatprep.subr.mxu1 %v11318_v48 }
0x19eb   : > { %10119 = vmatmul.mubr.msk.bf16.vlgmr.msra.gmra.mxu1 %vm1993_vm3, %v12261_v63 }
0x19ec   : > { %10141 = vmatprep.mubr.msk.f32.mxu1 %vm11319_vm5, %v11318_v48 }
0x1a1e   : > { %v10112_v16 = vpop.f32.mrf.mxu0 }
0x1a1f   : > { %v12292_v39 = vadd.f32 %v10112_v16, %v9323_v23 }
0x1a20   : > { %v4909_v51 = vpop.f32.mrf.mxu0 }
0x1a21   : > { %5177 = vrot.lane.b32.xlu0 %v12292_v39, %s13159_s11  ;;  %v12309_v19 = vadd.f32 %v9323_v23, %v4909_v51 }
0x1a22   : > { %v10113_v52 = vpop.f32.mrf.mxu0 }
0x1a23   : > { %v12296_v18 = vadd.f32 %v10113_v52, %v9323_v23 }
0x1a24   : > { %v4912_v15 = vpop.f32.mrf.mxu0 }
0x1a25   : > { %10123 = vmatpush3.xpose.msk.msra.mxu0 %vm1876_vm2, %v12296_v18  ;;  %v12304_v53 = vadd.f32 %v9323_v23, %v4912_v15 }
0x1a26   : > { %10124 = vmatprep.subr.mxu0 %v11318_v48 }
0x1a29   : > { %10125 = vmatpush3.xpose.msk.msra.mxu0 %vm1876_vm2, %v12292_v39 }
0x1a2a   : > { %10126 = vmatprep.subr.mxu0 %v11318_v48 }
0x1a2d   : > { %10127 = vmatpush3.xpose.msk.msra.mxu0 %vm1876_vm2, %v12304_v53 }
0x1a2e   : > { %10128 = vmatprep.subr.mxu0 %v11318_v48 }
0x1a31   : > { %10129 = vmatpush3.xpose.msk.msra.mxu0 %vm1876_vm2, %v12309_v19 }
0x1a32   : > { %10155 = vmatprep.subr.mxu0 %v11318_v48 }
0x1a93   : > { %v5178_v8 = vpop.permute.xlu0 %5177 }
0x1aa3   : > { %v4848_v55 = vpop.f32.mrf.mxu1 }
0x1aa4   : > { %v12315_v56 = vadd.f32 %v9321_v54, %v4848_v55 }
0x1aa5   : > { %v10104_v57 = vpop.f32.mrf.mxu1 }
0x1aa6   : > { %10131 = vmatmul.mubr.msk.f32.vlgmr.msra.gmra.mxu0 %vm1876_vm2, %v12315_v56 }
0x1aa7   : > { %v4851_v58 = vpop.f32.mrf.mxu1  ;;  %10163 = vmatprep.mubr.msk.f32.mxu0 %vm11319_vm5, %v11318_v48 }
0x1aa9   : > { %v10105_v38 = vpop.f32.mrf.mxu1 }
0x1aab   : > { %v10120_v1 = vpop.f32.mrf.mxu1 }
0x1aac   : > { %v12324_v0 = vadd.f32 %v10120_v1, %v9326_v11 }
0x1aad   : > { %v4979_v4 = vpop.f32.mrf.mxu1 }
0x1aae   : > { %v12334_v7 = vadd.f32 %v9326_v11, %v4979_v4 }
0x1aaf   : > { %v10121_v59 = vpop.f32.mrf.mxu1 }
0x1ab0   : > { %v12322_v40 = vadd.f32 %v10121_v59, %v9326_v11 }
0x1ab1   : > { %v4982_v3 = vpop.f32.mrf.mxu1 }
0x1ab2   : > { %5283 = vrot.lane.b32.xlu0 %v12322_v40, %s13159_s11  ;;  %10134 = vmatpush3.msra.mxu1 %v12322_v40  ;;  %v12330_v6 = vadd.f32 %v9326_v11, %v4982_v3 }
0x1ab3   : > { %10135 = vmatprep.subr.mxu1 %v11318_v48 }
0x1ab4   : > { %10136 = vmatpush3.msra.mxu1 %v12324_v0 }
0x1ab5   : > { %10137 = vmatprep.subr.mxu1 %v11318_v48 }
0x1ab6   : > { %10138 = vmatpush3.msra.mxu1 %v12330_v6 }
0x1ab7   : > { %10139 = vmatprep.subr.mxu1 %v11318_v48 }
0x1ab8   : > { %10140 = vmatpush3.msra.mxu1 %v12334_v7 }
0x1ab9   : > { %10144 = vmatprep.subr.mxu1 %v11318_v48 }
0x1b24   : > { %v5284_v9 = vpop.permute.xlu0 %5283 }
0x1b25   : > { %10156 = vmatpush3.msra.mxu0 %v5284_v9 }
0x1b26   : > { %10157 = vmatprep.subr.mxu0 %v11318_v48 }
0x1b66   : > { %v5080_v62 = vpop.f32.mrf.mxu0 }
0x1b67   : > { %v5084_v10 = vmul.f32 0.35355338, %v5080_v62 }
0x1b68   : > { %v10132_v2 = vpop.f32.mrf.mxu0 }
0x1b69   : > { %v5085_v41 = vsel %vm1993_vm3, %v5084_v10, -inf }
0x1b6a   : > { %5086 = vmax.xlane.f32.xlu1 %v5085_v41 }
0x1b7b   : > { %5179 = vrot.lane.b32.xlu1 %v12296_v18, %s13159_s11 }
0x1bf3   : > { %v5087_v20 = vpop.xlane.xlu1 %5086 }
0x1bf4   : > { %v5088_v37 = vsub.f32 %v5084_v10, %v5087_v20 }
0x1bf6   : > { %v5089_v21 = vmul.f32 1.442695, %v5088_v37 }
0x1bf7   : > { %v5180_v46 = vpop.permute.xlu1 %5179 }
0x1bf8   : > { %10844 = vpow2.f32 %v5089_v21 }
0x1c05   : > { %v10845_v22 = vpop.eup %10844 }
0x1c06   : > { %v5091_v24 = vsel %vm1993_vm3, %v10845_v22, 0.0 }
0x1c07   : > { %5092 = vadd.xlane.f32.xlu1 %v5091_v24 }
0x1c18   : > { %5175 = vrot.lane.b32.xlu1 %v12304_v53, %s13159_s11 }
0x1c1c   : > { %5173 = vrot.lane.b32.xlu1 %v12309_v19, %s13159_s11 }
0x1c20   : > { %5171 = vrot.lane.b32.xlu1 %v12315_v56, %s13159_s11 }
0x1c90   : > { %v5093_v5 = vpop.xlane.xlu1 %5092 }
0x1c91   : > { %10846 = vrcp.f32 %v5093_v5 }
0x1c94   : > { %v5176_v61 = vpop.permute.xlu1 %5175 }
0x1c98   : > { %v5174_v26 = vpop.permute.xlu1 %5173 }
0x1c9c   : > { %v5172_v27 = vpop.permute.xlu1 %5171 }
0x1c9e   : > { %v10847_v25 = vpop.eup %10846 }
0x1c9f   : > { %v5095_v33 = vmul.f32 %v10847_v25, %v10845_v22 }
0x1ca1   : > { %10142 = vmatmul.mubr.msk.f32.vlgmr.msra.gmra.mxu1 %vm1993_vm3, %v5095_v33 }
0x1ca2   : > { %10145 = vmatpush3.xpose.msk.msra.mxu1 %vm1876_vm2, %v5180_v46  ;;  %10152 = vmatprep.mubr.msk.f32.mxu1 %vm11319_vm5, %v11318_v48 }
0x1ca3   : > { %10146 = vmatprep.subr.mxu1 %v11318_v48 }
0x1ca6   : > { %10147 = vmatpush3.xpose.msk.msra.mxu1 %vm1876_vm2, %v5178_v8 }
0x1ca7   : > { %10148 = vmatprep.subr.mxu1 %v11318_v48 }
0x1caa   : > { %10149 = vmatpush3.xpose.msk.msra.mxu1 %vm1876_vm2, %v5176_v61 }
0x1cab   : > { %10150 = vmatprep.subr.mxu1 %v11318_v48 }
0x1cae   : > { %10151 = vmatpush3.xpose.msk.msra.mxu1 %vm1876_vm2, %v5174_v26 }
0x1caf   : > { %10172 = vmatprep.subr.bf16.mxu1 %v11318_v48 }
0x1cb1   : > { %10153 = vmatmul.mubr.msk.f32.vlgmr.msra.gmra.mxu1 %vm1876_vm2, %v5172_v27 }
0x1cb2   : > { %10174 = vmatprep.mubr.msk.bf16.mxu1 %vm11319_vm5, %v11318_v48  ;;  %10173 = vmatpush3.bf16.msra.mxu1 %v5414_v30 }
0x1cb3   : > { %10189 = vmatprep.subr.mxu1 %v11318_v48 }
0x1d61   : > { %v5165_v31 = vpop.f32.mrf.mxu1 }
0x1d62   : > { %v5169_v32 = vpack.c.bf16 %v5165_v31, %v5165_v31 }
0x1d63   : > { %v10143_v34 = vpop.f32.mrf.mxu1 }
0x1d64   : > { %10175 = vmatmul.mubr.msk.bf16.vlgmr.msra.gmra.mxu1 %vm1876_vm2, %v5169_v32 }
0x1d65   : > { %10197 = vmatprep.mubr.msk.f32.mxu1 %vm11319_vm5, %v11318_v48 }
0x1d71   : > { %v5257_v35 = vpop.f32.mrf.mxu1 }
0x1d72   : > { %v5261_v36 = vmul.f32 0.35355338, %v5257_v35 }
0x1d73   : > { %v10154_v43 = vpop.f32.mrf.mxu1 }
0x1d74   : > { %v5262_v44 = vsel %vm1993_vm3, %v5261_v36, -inf }
0x1d75   : > { %5263 = vmax.xlane.f32.xlu1 %v5262_v44 }
0x1d86   : > { %5281 = vrot.lane.b32.xlu1 %v12324_v0, %s13159_s11 }
0x1d8a   : > { %5279 = vrot.lane.b32.xlu1 %v12330_v6, %s13159_s11 }
0x1d8e   : > { %5464 = vrot.lane.b32.xlu1 %v12296_v18, %s13161_s4 }
0x1d92   : > { %5460 = vrot.lane.b32.xlu1 %v12304_v53, %s13161_s4 }
0x1d96   : > { %5456 = vrot.lane.b32.xlu1 %v12315_v56, %s13161_s4 }
0x1d9a   : > { %5698 = vrot.lane.b32.xlu1 %v12292_v39, %s13163_s12 }
0x1d9e   : > { %5694 = vrot.lane.b32.xlu1 %v12309_v19, %s13163_s12 }
0x1dfe   : > { %v5264_v60 = vpop.xlane.xlu1 %5263 }
0x1dff   : > { %v5265_v45 = vsub.f32 %v5261_v36, %v5264_v60 }
0x1e01   : > { %v5266_v47 = vmul.f32 1.442695, %v5265_v45 }
0x1e02   : > { %v5282_v49 = vpop.permute.xlu1 %5281 }
0x1e03   : > { %10848 = vpow2.f32 %v5266_v47  ;;  %10158 = vmatpush3.msra.mxu0 %v5282_v49  ;;  %v4996_v47 = vld [vmem:[%s13174_s27 + $0x10] sm:$0xff] }
0x1e04   : > { %10159 = vmatprep.subr.mxu0 %v11318_v48  ;;  %v5644_v49 = vpack.c.bf16 %v4996_v47, %v4996_v47  ;;  %v9359_v47 = vld [vmem:[%s13179_s0] ss:$0 sm:$0xff]  ;;  %s13182_s0 = sld [smem:[#allocation69_spill]] }
0x1e06   : > { %v5280_v50 = vpop.permute.xlu1 %5279 }
0x1e07   : > { %10160 = vmatpush3.msra.mxu0 %v5280_v50 }
0x1e08   : > { %10161 = vmatprep.subr.mxu0 %v11318_v48 }
0x1e0a   : > { %v5465_v9 = vpop.permute.xlu1 %5464 }
0x1e0e   : > { %v5461_v62 = vpop.permute.xlu1 %5460 }
0x1e10   : > { %v10849_v14 = vpop.eup %10848 }
0x1e11   : > { %v5268_v23 = vsel %vm1993_vm3, %v10849_v14, 0.0 }
0x1e12   : > { %5269 = vadd.xlane.f32.xlu0 %v5268_v23  ;;  %v5457_v10 = vpop.permute.xlu1 %5456 }
0x1e16   : > { %v5699_v2 = vpop.permute.xlu1 %5698 }
0x1e1a   : > { %v5695_v41 = vpop.permute.xlu1 %5694 }
0x1e24   : > { %v12389_v16 = vpop.f32.mrf.mxu1 }
0x1e26   : > { %v10176_v51 = vpop.f32.mrf.mxu1 }
0x1e28   : > { %5277 = vrot.lane.b32.xlu0 %v12334_v7, %s13159_s11  ;;  %v5453_v52 = vpop.f32.mrf.mxu1 }
0x1e2a   : > { %v10177_v15 = vpop.f32.mrf.mxu1 }
0x1e2c   : > { %5462 = vrot.lane.b32.xlu0 %v12292_v39, %s13161_s4 }
0x1e30   : > { %5458 = vrot.lane.b32.xlu0 %v12309_v19, %s13161_s4  ;;  %v4995_v19 = vld [vmem:[%s13174_s27 + $0x8] sm:$0xff] }
0x1e31   : > { %v5363_v57 = vpack.c.bf16 %v4995_v19, %v4995_v19 }
0x1e34   : > { %5700 = vrot.lane.b32.xlu0 %v12296_v18, %s13163_s12 }
0x1e38   : > { %5696 = vrot.lane.b32.xlu0 %v12304_v53, %s13163_s12  ;;  %v5368_v53 = vsel %vm2672_vm4, %v5363_v57, 0 }
0x1e3c   : > { %5692 = vrot.lane.b32.xlu0 %v12315_v56, %s13163_s12 }
0x1e40   : > { %5564 = vrot.lane.b32.xlu0 %v12322_v40, %s13161_s4 }
0x1e9b   : > { %v5270_v54 = vpop.xlane.xlu0 %5269 }
0x1e9c   : > { %10850 = vrcp.f32 %v5270_v54 }
0x1e9f   : > { %v5278_v55 = vpop.permute.xlu0 %5277 }
0x1ea0   : > { %10162 = vmatpush3.msra.mxu0 %v5278_v55 }
0x1ea1   : > { %10166 = vmatprep.subr.bf16.mxu0 %v11318_v48 }
0x1ea3   : > { %v5463_v39 = vpop.permute.xlu0 %5462 }
0x1ea7   : > { %v5459_v58 = vpop.permute.xlu0 %5458 }
0x1ea9   : > { %v10851_v18 = vpop.eup %10850 }
0x1eaa   : > { %v5272_v38 = vmul.f32 %v10851_v18, %v10849_v14  ;;  %v5649_v14 = vsel %vm2672_vm4, %v5644_v49, 0 }
0x1eab   : > { %v5701_v1 = vpop.permute.xlu0 %5700 }
0x1eac   : > { %10164 = vmatmul.mubr.msk.f32.vlgmr.msra.gmra.mxu0 %vm1993_vm3, %v5272_v38 }
0x1ead   : > { %10167 = vmatpush3.bf16.msra.mxu0 %v5368_v53  ;;  %10168 = vmatprep.mubr.msk.bf16.mxu0 %vm11319_vm5, %v11318_v48 }
0x1eae   : > { %10178 = vmatprep.subr.mxu0 %v11318_v48 }
0x1eaf   : > { %v5697_v56 = vpop.permute.xlu0 %5696 }
0x1eb3   : > { %v5693_v4 = vpop.permute.xlu0 %5692 }
0x1eb7   : > { %v5565_v11 = vpop.permute.xlu0 %5564 }
0x1eb8   : > { %10190 = vmatpush3.msra.mxu1 %v5565_v11 }
0x1eb9   : > { %10191 = vmatprep.subr.mxu1 %v11318_v48 }
0x1f6c   : > { %v5358_v59 = vpop.f32.mrf.mxu0 }
0x1f6d   : > { %v5362_v3 = vpack.c.bf16 %v5358_v59, %v5358_v59 }
0x1f6e   : > { %v10165_v8 = vpop.f32.mrf.mxu0 }
0x1f6f   : > { %10169 = vmatmul.mubr.msk.bf16.vlgmr.msra.gmra.mxu0 %vm1876_vm2, %v5362_v3 }
0x1f70   : > { %10179 = vmatpush3.xpose.msk.msra.mxu0 %vm1876_vm2, %v5465_v9  ;;  %10186 = vmatprep.mubr.msk.f32.mxu0 %vm11319_vm5, %v11318_v48 }
0x1f71   : > { %10180 = vmatprep.subr.mxu0 %v11318_v48 }
0x1f74   : > { %10181 = vmatpush3.xpose.msk.msra.mxu0 %vm1876_vm2, %v5463_v39 }
0x1f75   : > { %10182 = vmatprep.subr.mxu0 %v11318_v48 }
0x1f78   : > { %10183 = vmatpush3.xpose.msk.msra.mxu0 %vm1876_vm2, %v5461_v62  ;;  %v9357_v62 = vld [vmem:[%s13175_s28] ss:$0 sm:$0xff] }
0x1f79   : > { %10184 = vmatprep.subr.mxu0 %v11318_v48 }
0x1f7c   : > { %10185 = vmatpush3.xpose.msk.msra.mxu0 %vm1876_vm2, %v5459_v58  ;;  %v4997_v58 = vld [vmem:[%s13174_s27 + $0x18] sm:$0xff] }
0x1f7d   : > { %10206 = vmatprep.subr.mxu0 %v11318_v48  ;;  %v5880_v18 = vpack.c.bf16 %v4997_v58, %v4997_v58 }
0x1f7f   : > { %10187 = vmatmul.mubr.msk.f32.vlgmr.msra.gmra.mxu0 %vm1876_vm2, %v5457_v10  ;;  %v5885_v38 = vsel %vm2672_vm4, %v5880_v18, 0 }
0x1f80   : > { %10207 = vmatpush3.xpose.msk.msra.mxu0 %vm1876_vm2, %v5701_v1  ;;  %10214 = vmatprep.mubr.msk.f32.mxu0 %vm11319_vm5, %v11318_v48 }
0x1f81   : > { %10208 = vmatprep.subr.mxu0 %v11318_v48 }
0x1f84   : > { %10209 = vmatpush3.xpose.msk.msra.mxu0 %vm1876_vm2, %v5699_v2 }
0x1f85   : > { %10210 = vmatprep.subr.mxu0 %v11318_v48 }
0x1f88   : > { %10211 = vmatpush3.xpose.msk.msra.mxu0 %vm1876_vm2, %v5697_v56 }
0x1f89   : > { %10212 = vmatprep.subr.mxu0 %v11318_v48 }
0x1f8c   : > { %10213 = vmatpush3.xpose.msk.msra.mxu0 %vm1876_vm2, %v5695_v41 }
0x1f8d   : > { %10242 = vmatprep.subr.bf16.mxu0 %v11318_v48 }
0x1f8f   : > { %10215 = vmatmul.mubr.msk.f32.vlgmr.msra.gmra.mxu0 %vm1876_vm2, %v5693_v4 }
0x1f90   : > { %10250 = vmatprep.mubr.msk.bf16.mxu0 %vm11319_vm5, %v11318_v48 }
0x202f   : > { %v12438_v20 = vpop.f32.mrf.mxu0 }
0x2030   : > { %v5451_v53 = vadd.f32 %v12389_v16, %v12438_v20 }
0x2031   : > { %v10170_v37 = vpop.f32.mrf.mxu0 }
0x2033   : > { %v5407_v21 = vpop.f32.mrf.mxu0 }
0x2035   : > { %v10171_v22 = vpop.f32.mrf.mxu0 }
0x203f   : > { %v5542_v24 = vpop.f32.mrf.mxu0 }
0x2040   : > { %v5546_v46 = vmul.f32 0.35355338, %v5542_v24 }
0x2041   : > { %v10188_v5 = vpop.f32.mrf.mxu0 }
0x2042   : > { %v5547_v25 = vsel %vm1993_vm3, %v5546_v46, -inf }
0x2043   : > { %5548 = vmax.xlane.f32.xlu1 %v5547_v25 }
0x204f   : > { %v5778_v33 = vpop.f32.mrf.mxu0 }
0x2050   : > { %v5782_v26 = vmul.f32 0.35355338, %v5778_v33 }
0x2051   : > { %v10216_v61 = vpop.f32.mrf.mxu0 }
0x2052   : > { %v5783_v27 = vsel %vm1993_vm3, %v5782_v26, -inf  ;;  %v5967_v61 = vld [vmem:[%s13176_s29 + $0x10] sm:$0xff] }
0x2054   : > { %5562 = vrot.lane.b32.xlu1 %v12324_v0, %s13161_s4 }
0x2058   : > { %5560 = vrot.lane.b32.xlu1 %v12330_v6, %s13161_s4 }
0x207c   : > { %5784 = vmax.xlane.f32.xlu1 %v5783_v27 }
0x208d   : > { %5798 = vrot.lane.b32.xlu1 %v12324_v0, %s13163_s12 }
0x2091   : > { %5796 = vrot.lane.b32.xlu1 %v12330_v6, %s13163_s12 }
0x20cc   : > { %v5549_v28 = vpop.xlane.xlu1 %5548 }
0x20cd   : > { %v5550_v29 = vsub.f32 %v5546_v46, %v5549_v28  ;;  %v5965_v28 = vld [vmem:[%s13176_s29] sm:$0xff] }
0x20cf   : > { %v5551_v30 = vmul.f32 1.442695, %v5550_v29 }
0x20d0   : > { %v5563_v31 = vpop.permute.xlu1 %5562 }
0x20d1   : > { %10852 = vpow2.f32 %v5551_v30  ;;  %10192 = vmatpush3.msra.mxu1 %v5563_v31  ;;  %v6029_v30 = vld [vmem:[%s13177_s30 + $0x30] sm:$0xff]  ;;  %v6030_v31 = vld [vmem:[%s13177_s30 + $0x38] sm:$0xff] }
0x20d2   : > { %10193 = vmatprep.subr.mxu1 %v11318_v48 }
0x20d4   : > { %v5561_v32 = vpop.permute.xlu1 %5560 }
0x20d5   : > { %10194 = vmatpush3.msra.mxu1 %v5561_v32  ;;  %v6027_v32 = vld [vmem:[%s13177_s30 + $0x20] sm:$0xff] }
0x20d6   : > { %10195 = vmatprep.subr.mxu1 %v11318_v48 }
0x20de   : > { %v10853_v34 = vpop.eup %10852 }
0x20df   : > { %v5553_v35 = vsel %vm1993_vm3, %v10853_v34, 0.0 }
0x20e0   : > { %5554 = vadd.xlane.f32.xlu0 %v5553_v35  ;;  %v6028_v35 = vld [vmem:[%s13177_s30 + $0x28] sm:$0xff] }
0x20f6   : > { %5558 = vrot.lane.b32.xlu0 %v12334_v7, %s13161_s4 }
0x20fa   : > { %5800 = vrot.lane.b32.xlu0 %v12322_v40, %s13163_s12 }
0x2105   : > { %v5785_v0 = vpop.xlane.xlu1 %5784 }
0x2106   : > { %v5786_v6 = vsub.f32 %v5782_v26, %v5785_v0  ;;  %v5968_v26 = vld [vmem:[%s13176_s29 + $0x18] sm:$0xff]  ;;  %v6034_v0 = vpack.c.bf16 %v6028_v35, %v6027_v32 }
0x2107   : > { %v5971_v27 = vpack.c.bf16 %v5968_v26, %v5967_v61 }
0x2108   : > { %v5787_v36 = vmul.f32 1.442695, %v5786_v6 }
0x2109   : > { %v5799_v52 = vpop.permute.xlu1 %5798 }
0x210a   : > { %10854 = vpow2.f32 %v5787_v36 }
0x210d   : > { %v5797_v39 = vpop.permute.xlu1 %5796 }
0x2117   : > { %v10855_v43 = vpop.eup %10854 }
0x2118   : > { %v5789_v44 = vsel %vm1993_vm3, %v10855_v43, 0.0 }
0x2119   : > { %5790 = vadd.xlane.f32.xlu0 %v5789_v44 }
0x212f   : > { %5794 = vrot.lane.b32.xlu0 %v12334_v7, %s13163_s12 }
0x2169   : > { %v5555_v60 = vpop.xlane.xlu0 %5554 }
0x216a   : > { %10856 = vrcp.f32 %v5555_v60  ;;  %v9358_v60 = vld [vmem:[%s13178_s9] ss:$0 sm:$0xff] }
0x216d   : > { %v5559_v45 = vpop.permute.xlu0 %5558 }
0x216e   : > { %10196 = vmatpush3.msra.mxu1 %v5559_v45 }
0x216f   : > { %10200 = vmatprep.subr.bf16.mxu1 %v11318_v48 }
0x2171   : > { %v5801_v7 = vpop.permute.xlu0 %5800 }
0x2177   : > { %v10857_v40 = vpop.eup %10856 }
0x2178   : > { %v5557_v50 = vmul.f32 %v10857_v40, %v10853_v34  ;;  %v6035_v34 = vpack.c.bf16 %v6030_v31, %v6029_v30 }
0x217a   : > { %10198 = vmatmul.mubr.msk.f32.vlgmr.msra.gmra.mxu1 %vm1993_vm3, %v5557_v50  ;;  %10243 = vmatpush3.bf16.msra.mxu0 %v6035_v34 }
0x217b   : > { %10201 = vmatpush3.bf16.msra.mxu1 %v5649_v14  ;;  %10202 = vmatprep.mubr.msk.bf16.mxu1 %vm11319_vm5, %v11318_v48  ;;  %v6025_v14 = vld [vmem:[%s13177_s30 + $0x10] sm:$0xff] }
0x217c   : > { %10217 = vmatprep.subr.mxu1 %v11318_v48  ;;  %10244 = vmatprep.subr.bf16.mxu0 %v11318_v48 }
0x217e   : > { %10245 = vmatpush3.bf16.msra.mxu0 %v6034_v0 }
0x217f   : > { %10246 = vmatprep.subr.bf16.mxu0 %v11318_v48 }
0x21a2   : > { %v5791_v23 = vpop.xlane.xlu0 %5790 }
0x21a3   : > { %10858 = vrcp.f32 %v5791_v23 }
0x21a6   : > { %v5795_v19 = vpop.permute.xlu0 %5794 }
0x21b0   : > { %v10859_v55 = vpop.eup %10858 }
0x21b1   : > { %v5793_v57 = vmul.f32 %v10859_v55, %v10855_v43 }
0x223a   : > { %v5639_v51 = vpop.f32.mrf.mxu1 }
0x223b   : > { %v5643_v15 = vpack.c.bf16 %v5639_v51, %v5639_v51  ;;  %v6023_v51 = vld [vmem:[%s13177_s30] sm:$0xff] }
0x223c   : > { %v10199_v54 = vpop.f32.mrf.mxu1 }
0x223d   : > { %10203 = vmatmul.mubr.msk.bf16.vlgmr.msra.gmra.mxu1 %vm1876_vm2, %v5643_v15  ;;  %v9360_v54 = vld [vmem:[%s13180_s23] ss:$0 sm:$0xff]  ;;  %s13183_s23 = sld [smem:[#allocation70_spill]] }
0x223e   : > { %10218 = vmatpush3.msra.mxu1 %v5801_v7  ;;  %10225 = vmatprep.mubr.msk.f32.mxu1 %vm11319_vm5, %v11318_v48  ;;  %v6026_v7 = vld [vmem:[%s13177_s30 + $0x18] sm:$0xff] }
0x223f   : > { %10219 = vmatprep.subr.mxu1 %v11318_v48  ;;  %v6033_v23 = vpack.c.bf16 %v6026_v7, %v6025_v14 }
0x2240   : > { %10220 = vmatpush3.msra.mxu1 %v5799_v52  ;;  %v6024_v52 = vld [vmem:[%s13177_s30 + $0x8] sm:$0xff] }
0x2241   : > { %10221 = vmatprep.subr.mxu1 %v11318_v48  ;;  %10247 = vmatpush3.bf16.msra.mxu0 %v6033_v23  ;;  %v6032_v15 = vpack.c.bf16 %v6024_v52, %v6023_v51 }
0x2242   : > { %10222 = vmatpush3.msra.mxu1 %v5797_v39  ;;  %10248 = vmatprep.subr.bf16.mxu0 %v11318_v48 }
0x2243   : > { %10223 = vmatprep.subr.mxu1 %v11318_v48 }
0x2244   : > { %10224 = vmatpush3.msra.mxu1 %v5795_v19 }
0x2245   : > { %10226 = vmatmul.mubr.msk.f32.vlgmr.msra.gmra.mxu1 %vm1993_vm3, %v5793_v57  ;;  %10228 = vmatprep.subr.bf16.mxu1 %v11318_v48 }
0x2246   : > { %10230 = vmatprep.mubr.msk.bf16.mxu1 %vm11319_vm5, %v11318_v48  ;;  %10229 = vmatpush3.bf16.msra.mxu1 %v5885_v38 }
0x2247   : > { %10234 = vmatprep.subr.bf16.mxu1 %v11318_v48  ;;  %10249 = vmatpush3.bf16.msra.mxu0 %v6032_v15  ;;  %v6262_v15 = vld [vmem:[%s11584_s8 + $0x18] sm:$0xff] }
0x2248   : > { %10270 = vmatprep.subr.mxu0 %v11318_v48 }
0x22fd   : > { %v5685_v1 = vpop.f32.mrf.mxu1 }
0x22fe   : > { %v5691_v56 = vadd.f32 %v5685_v1, %v5451_v53 }
0x22ff   : > { %v10204_v4 = vpop.f32.mrf.mxu1 }
0x2301   : > { %v5688_v11 = vpop.f32.mrf.mxu1 }
0x2303   : > { %v10205_v59 = vpop.f32.mrf.mxu1 }
0x2305   : > { %v5875_v3 = vpop.f32.mrf.mxu1 }
0x2306   : > { %v5879_v8 = vpack.c.bf16 %v5875_v3, %v5875_v3 }
0x2307   : > { %v10227_v9 = vpop.f32.mrf.mxu1 }
0x2308   : > { %10231 = vmatmul.mubr.msk.bf16.vlgmr.msra.gmra.mxu1 %vm1876_vm2, %v5879_v8 }
0x2309   : > { %10238 = vmatprep.mubr.msk.bf16.mxu1 %vm11319_vm5, %v11318_v48  ;;  %10235 = vmatpush3.bf16.msra.mxu1 %v5971_v27 }
0x230a   : > { %10236 = vmatprep.subr.bf16.mxu1 %v11318_v48 }
0x23c8   : > { %v5921_v10 = vpop.f32.mrf.mxu1 }
0x23c9   : > { %v5927_v2 = vadd.f32 %v5921_v10, %v5691_v56 }
0x23ca   : > { %v10232_v41 = vpop.f32.mrf.mxu1 }
0x23cb   : > { %v5934_v16 = vadd.f32 %v9357_v62, %v5927_v2 }
0x23cc   : > { %v5924_v20 = vpop.f32.mrf.mxu1 }
0x23cd   : > { %v5935_v37 = vadd.f32 %v5934_v16, %v12275_v13  ;;  %v5966_v13 = vld [vmem:[%s13176_s29 + $0x8] sm:$0xff]  ;;  %s13181_s29 = sld [smem:[#allocation64_spill]] }
0x23ce   : > { %v10233_v21 = vpop.f32.mrf.mxu1  ;;  %v5970_v29 = vpack.c.bf16 %v5966_v13, %v5965_v28 }
0x23cf   : > { %v5938_v22 = vsel %vm1993_vm3, %v5935_v37, 0.0 }
0x23d0   : > { %5939 = vadd.xlane.f32.xlu1 %v5938_v22  ;;  %10237 = vmatpush3.bf16.msra.mxu1 %v5970_v29  ;;  %v9364_v22 = vld [vmem:[%s13182_s0] ss:$0 sm:$0xff] }
0x23d1   : > { %10254 = vmatprep.subr.bf16.mxu1 %v11318_v48 }
0x23d3   : > { %v9362_v53 = vld [vmem:[%s13181_s29] ss:$0 sm:$0xff]  ;;  %s13184_s29 = sld [smem:[#allocation73_spill]] }
0x23d9   : > { %v6145_v29 = vld [vmem:[%s13184_s29 + $0x10] sm:$0xff]  ;;  %v6146_v30 = vld [vmem:[%s13184_s29 + $0x18] sm:$0xff]  ;;  %v6143_v32 = vld [vmem:[%s13184_s29] sm:$0xff] }
0x23da   : > { %v6149_v31 = vpack.c.bf16 %v6146_v30, %v6145_v29  ;;  %v6144_v34 = vld [vmem:[%s13184_s29 + $0x8] sm:$0xff] }
0x23db   : > { %v6148_v35 = vpack.c.bf16 %v6144_v34, %v6143_v32 }
0x2459   : > { %v5940_v24 = vpop.xlane.xlu1 %5939 }
0x245a   : > { %v5941_v46 = vmul.f32 0.03125, %v5940_v24 }
0x245c   : > { %v5942_v5 = vsub.f32 %v5935_v37, %v5941_v46  ;;  %v9365_v46 = vld [vmem:[%s13183_s23] ss:$0 sm:$0xff]  ;;  %s13185_s23 = sld [smem:[#allocation75_spill]] }
0x245e   : > { %v5943_v25 = vmul.f32 %v5942_v5, %v5942_v5 }
0x2460   : > { %v5944_v33 = vsel %vm1993_vm3, %v5943_v25, 0.0 }
0x2461   : > { %5945 = vadd.xlane.f32.xlu0 %v5944_v33 }
0x2462   : > { %v6204_v14 = vld [vmem:[%s13185_s23 + $0x18] sm:$0xff]  ;;  %v6201_v23 = vld [vmem:[%s13185_s23] sm:$0xff]  ;;  %v6202_v51 = vld [vmem:[%s13185_s23 + $0x8] sm:$0xff] }
0x2463   : > { %v6206_v52 = vpack.c.bf16 %v6202_v51, %v6201_v23 }
0x24ea   : > { %v5946_v6 = vpop.xlane.xlu0 %5945 }
0x24eb   : > { %v5947_v36 = vmul.f32 0.03125, %v5946_v6 }
0x24ed   : > { %v5948_v43 = vadd.f32 1e-05, %v5947_v36 }
0x24ef   : > { %10860 = vrsqrt.f32 %v5948_v43 }
0x24fc   : > { %v10861_v44 = vpop.eup %10860 }
0x24fd   : > { %v5950_v45 = vmul.f32 %v10861_v44, %v5942_v5  ;;  %v9366_v44 = vld [vmem:[#allocation12] ss:$0 sm:$0xff] }
0x24ff   : > { %v5957_v49 = vmul.f32 %v9358_v60, %v5950_v45  ;;  %v9367_v45 = vld [vmem:[#allocation13] ss:$0 sm:$0xff] }
0x2501   : > { %v5964_v40 = vadd.f32 %v9359_v47, %v5957_v49 }
0x2503   : > { %v5969_v50 = vpack.c.bf16 %v5964_v40, %v5964_v40 }
0x2505   : > { %10239 = vmatmul.mubr.msk.bf16.vlgmr.msra.gmra.mxu1 %vm1993_vm3, %v5969_v50  ;;  %v6203_v50 = vld [vmem:[%s13185_s23 + $0x10] sm:$0xff] }
0x2506   : > { %10258 = vmatprep.mubr.msk.bf16.mxu1 %vm11319_vm5, %v11318_v48  ;;  %10255 = vmatpush3.bf16.msra.mxu1 %v6149_v31  ;;  %v6207_v7 = vpack.c.bf16 %v6204_v14, %v6203_v50 }
0x2507   : > { %10256 = vmatprep.subr.bf16.mxu1 %v11318_v48 }
0x250a   : > { %10257 = vmatpush3.bf16.msra.mxu1 %v6148_v35 }
0x250b   : > { %10262 = vmatprep.subr.bf16.mxu1 %v11318_v48 }
0x25c5   : > { %v6016_v55 = vpop.f32.mrf.mxu1 }
0x25c6   : > { %v6017_v39 = vadd.f32 %v9360_v54, %v6016_v55  ;;  %v6261_v54 = vld [vmem:[%s11584_s8 + $0x10] sm:$0xff] }
0x25c7   : > { %v10240_v19 = vpop.f32.mrf.mxu1  ;;  %v9368_v55 = vld [vmem:[#allocation15] ss:$0 sm:$0xff] }
0x25c8   : > { %v6022_v57 = vmax.f32 %v6017_v39, 0.0 }
0x25c9   : > { %v6019_v58 = vpop.f32.mrf.mxu1 }
0x25ca   : > { %v6031_v18 = vpack.c.bf16 %v6022_v57, %v6022_v57  ;;  %v9376_v57 = vld [vmem:[%s13149_s16 + $0x30] sm:$0xff]  ;;  %v9377_v58 = vld [vmem:[%s13149_s16 + $0x38] sm:$0xff] }
0x25cb   : > { %v10241_v38 = vpop.f32.mrf.mxu1 }
0x25cc   : > { %10251 = vmatmul.mubr.msk.bf16.vlgmr.msra.gmra.mxu0 %vm3645_vm6, %v6031_v18 }
0x25cd   : > { %10278 = vmatprep.mubr.msk.f32.mxu0 %vm11319_vm5, %v11318_v48  ;;  %10271 = vmatpush3.msra.mxu0 %v6262_v15 }
0x25ce   : > { %10272 = vmatprep.subr.mxu0 %v11318_v48 }
0x25cf   : > { %10273 = vmatpush3.msra.mxu0 %v6261_v54 }
0x25d0   : > { %10274 = vmatprep.subr.mxu0 %v11318_v48 }
0x268c   : > { %v6080_v1 = vpop.f32.mrf.mxu0 }
0x268d   : > { %v6081_v56 = vadd.f32 %v9362_v53, %v6080_v1  ;;  %v6353_v1 = vpack.c.bf16 %v9377_v58, %v9376_v57 }
0x268e   : > { %v10252_v4 = vpop.f32.mrf.mxu0 }
0x268f   : > { %v6086_v11 = vadd.f32 %v6081_v56, %v5964_v40  ;;  %v9374_v4 = vld [vmem:[%s13149_s16 + $0x20] sm:$0xff] }
0x2690   : > { %v6083_v59 = vpop.f32.mrf.mxu0 }
0x2691   : > { %v6089_v3 = vsel %vm1993_vm3, %v6086_v11, 0.0 }
0x2692   : > { %6090 = vadd.xlane.f32.xlu0 %v6089_v3  ;;  %v10253_v8 = vpop.f32.mrf.mxu0 }
0x2693   : > { %v12555_v8 = vld [vmem:[%s12074_s26] sm:$0xff] }
0x271b   : > { %v6091_v9 = vpop.xlane.xlu0 %6090 }
0x271c   : > { %v6092_v62 = vmul.f32 0.03125, %v6091_v9 }
0x271e   : > { %v6093_v10 = vsub.f32 %v6086_v11, %v6092_v62  ;;  %v9375_v11 = vld [vmem:[%s13149_s16 + $0x28] sm:$0xff] }
0x271f   : > { %v6352_v3 = vpack.c.bf16 %v9375_v11, %v9374_v4 }
0x2720   : > { %v6094_v2 = vmul.f32 %v6093_v10, %v6093_v10 }
0x2722   : > { %v6095_v41 = vsel %vm1993_vm3, %v6094_v2, 0.0  ;;  %v6259_v2 = vld [vmem:[%s11584_s8] sm:$0xff] }
0x2723   : > { %6096 = vadd.xlane.f32.xlu0 %v6095_v41  ;;  %v9370_v41 = vld [vmem:[#allocation16] ss:$0 sm:$0xff] }
0x27ac   : > { %v6097_v16 = vpop.xlane.xlu0 %6096 }
0x27ad   : > { %v6098_v20 = vmul.f32 0.03125, %v6097_v16  ;;  %v9383_v16 = vld [vmem:[%s13152_s6 + $0x30] sm:$0xff] }
0x27af   : > { %v6099_v37 = vadd.f32 1e-05, %v6098_v20  ;;  %v9384_v20 = vld [vmem:[%s13152_s6 + $0x38] sm:$0xff] }
0x27b1   : > { %10862 = vrsqrt.f32 %v6099_v37 }
0x27be   : > { %v10863_v21 = vpop.eup %10862 }
0x27bf   : > { %v6101_v24 = vmul.f32 %v10863_v21, %v6093_v10  ;;  %v6260_v10 = vld [vmem:[%s11584_s8 + $0x8] sm:$0xff] }
0x27c0   : > { %10275 = vmatpush3.msra.mxu0 %v6260_v10 }
0x27c1   : > { %v6108_v5 = vmul.f32 %v9364_v22, %v6101_v24  ;;  %10276 = vmatprep.subr.mxu0 %v11318_v48  ;;  %v6412_v24 = vpack.c.bf16 %v9384_v20, %v9383_v16  ;;  %v9388_v16 = vld [vmem:[%s13162_s5 + $0x20] sm:$0xff] }
0x27c2   : > { %10277 = vmatpush3.msra.mxu0 %v6259_v2  ;;  %v6634_v20 = vpack.c.bf16 %v9388_v16, %v9388_v16 }
0x27c3   : > { %v12521_v25 = vadd.f32 %v9365_v46, %v6108_v5  ;;  %10289 = vmatprep.subr.bf16.mxu0 %v11318_v48  ;;  %v9381_v5 = vld [vmem:[%s13152_s6 + $0x20] sm:$0xff] }
0x27c5   : > { %v6116_v33 = vsel %vm1993_vm3, %v12521_v25, 0.0  ;;  %v6345_v9 = vadd.f32 %v12555_v8, %v12521_v25  ;;  %v6410_v31 = vpack.c.bf16 %v12521_v25, %v12521_v25 }
0x27c6   : > { %6117 = vadd.xlane.f32.xlu1 %v6116_v33  ;;  %v9382_v33 = vld [vmem:[%s13152_s6 + $0x28] sm:$0xff] }
0x27c7   : > { %v6351_v62 = vpack.c.bf16 %v6345_v9, %v6345_v9 }
0x284f   : > { %v6118_v61 = vpop.xlane.xlu1 %6117 }
0x2850   : > { %v6119_v26 = vmul.f32 0.03125, %v6118_v61 }
0x2852   : > { %v6120_v27 = vsub.f32 %v12521_v25, %v6119_v26 }
0x2854   : > { %v6121_v28 = vmul.f32 %v6120_v27, %v6120_v27 }
0x2856   : > { %v6122_v13 = vsel %vm1993_vm3, %v6121_v28, 0.0  ;;  %v6411_v28 = vpack.c.bf16 %v9382_v33, %v9381_v5 }
0x2857   : > { %6123 = vadd.xlane.f32.xlu0 %v6122_v13 }
0x28e0   : > { %v6124_v0 = vpop.xlane.xlu0 %6123 }
0x28e1   : > { %v6125_v6 = vmul.f32 0.03125, %v6124_v0 }
0x28e3   : > { %v6126_v36 = vadd.f32 1e-05, %v6125_v6 }
0x28e5   : > { %10864 = vrsqrt.f32 %v6126_v36  ;;  %v9372_v36 = vld [vmem:[#allocation18] ss:$0 sm:$0xff] }
0x28f2   : > { %v10865_v43 = vpop.eup %10864 }
0x28f3   : > { %v6128_v60 = vmul.f32 %v10865_v43, %v6120_v27  ;;  %v9379_v27 = vld [vmem:[%s13154_s15 + $0x1] ss:$0 sm:$0xff] }
0x28f5   : > { %v6135_v47 = vmul.f32 %v9366_v44, %v6128_v60 }
0x28f7   : > { %v6142_v49 = vadd.f32 %v9367_v45, %v6135_v47  ;;  %v9386_v45 = vld [vmem:[%s13156_s2 + $0x1] ss:$0 sm:$0xff] }
0x28f9   : > { %v6147_v40 = vpack.c.bf16 %v6142_v49, %v6142_v49 }
0x28fb   : > { %10259 = vmatmul.mubr.msk.bf16.vlgmr.msra.gmra.mxu1 %vm1993_vm3, %v6147_v40 }
0x28fc   : > { %10266 = vmatprep.mubr.msk.bf16.mxu1 %vm11319_vm5, %v11318_v48  ;;  %10263 = vmatpush3.bf16.msra.mxu1 %v6207_v7 }
0x28fd   : > { %10264 = vmatprep.subr.bf16.mxu1 %v11318_v48 }
0x2900   : > { %10265 = vmatpush3.bf16.msra.mxu1 %v6206_v52 }
0x2901   : > { %10281 = vmatprep.subr.bf16.mxu1 %v11318_v48 }
0x29bb   : > { %v6194_v39 = vpop.f32.mrf.mxu1 }
0x29bc   : > { %v6195_v19 = vadd.f32 %v9368_v55, %v6194_v39 }
0x29bd   : > { %v10260_v18 = vpop.f32.mrf.mxu1 }
0x29be   : > { %v6200_v38 = vmax.f32 %v6195_v19, 0.0 }
0x29bf   : > { %v6197_v53 = vpop.f32.mrf.mxu1 }
0x29c0   : > { %v6205_v56 = vpack.c.bf16 %v6200_v38, %v6200_v38 }
0x29c1   : > { %v10261_v59 = vpop.f32.mrf.mxu1 }
0x29c2   : > { %10267 = vmatmul.mubr.msk.bf16.vlgmr.msra.gmra.mxu1 %vm1993_vm3, %v6205_v56 }
0x29c3   : > { %10282 = vmatpush3.bf16.msra.mxu1 %v6353_v1  ;;  %10285 = vmatprep.mubr.msk.bf16.mxu1 %vm11319_vm5, %v11318_v48 }
0x29c4   : > { %10283 = vmatprep.subr.bf16.mxu1 %v11318_v48 }
0x29c7   : > { %10284 = vmatpush3.bf16.msra.mxu1 %v6352_v3 }
0x29c8   : > { %10297 = vmatprep.subr.mxu1 %v11318_v48 }
0x29ca   : > { %10286 = vmatmul.mubr.msk.bf16.vlgmr.msra.gmra.mxu1 %vm1993_vm3, %v6351_v62 }
0x29cb   : > { %10299 = vmatprep.mubr.msk.f32.mxu1 %vm11319_vm5, %v11318_v48 }
0x2a82   : > { %v6252_v37 = vpop.f32.mrf.mxu1 }
0x2a83   : > { %v6253_v21 = vadd.f32 %v9370_v41, %v6252_v37  ;;  %v6854_v37 = vsel %vm2672_vm4, %v6634_v20, 0 }
0x2a84   : > { %v10268_v22 = vpop.f32.mrf.mxu1 }
0x2a85   : > { %v6258_v46 = vmax.f32 %v6253_v21, 0.0  ;;  %v9389_v21 = vld [vmem:[%s13162_s5 + $0x28] sm:$0xff] }
0x2a86   : > { %v6255_v61 = vpop.f32.mrf.mxu1  ;;  %v6803_v22 = vpack.c.bf16 %v9389_v21, %v9389_v21 }
0x2a87   : > { %10279 = vmatmul.mubr.msk.f32.vlgmr.msra.gmra.mxu0 %vm1993_vm3, %v6258_v46 }
0x2a88   : > { %10290 = vmatpush3.bf16.msra.mxu0 %v6412_v24  ;;  %v10269_v26 = vpop.f32.mrf.mxu1  ;;  %10293 = vmatprep.mubr.msk.bf16.mxu0 %vm11319_vm5, %v11318_v48  ;;  %v6808_v24 = vsel %vm2672_vm4, %v6803_v22, 0 }
0x2a89   : > { %10291 = vmatprep.subr.bf16.mxu0 %v11318_v48 }
0x2a8a   : > { %v6399_v13 = vpop.f32.mrf.mxu1 }
0x2a8b   : > { %v12576_v29 = vadd.f32 %v9379_v27, %v6399_v13 }
0x2a8c   : > { %10292 = vmatpush3.bf16.msra.mxu0 %v6411_v28  ;;  %v10287_v30 = vpop.f32.mrf.mxu1 }
0x2a8d   : > { %6637 = vrot.lane.b32.xlu0 %v12576_v29, %s13157_s1  ;;  %6472 = vrot.lane.b32.xlu1 %v12576_v29, %s13158_s3  ;;  %s1727_s3 = sand.u32 1, %s11237_s7   ;;  %s13189_s7 = sld [smem:[#allocation64_spill]] }
0x2a8e   : > { %v6402_v32 = vpop.f32.mrf.mxu1  ;;  %10302 = vmatprep.subr.mxu0 %v11318_v48  ;;  %s9209_s26 = sshll.u32 %s1727_s3, 4 }
0x2a8f   : > { %10294 = vmatmul.mubr.msk.bf16.vlgmr.msra.gmra.mxu0 %vm1993_vm3, %v6410_v31  ;;  %s12602_s1 = scalar_lea.vmem [#allocation19], %s9209_s26 }
0x2a90   : > { %v10288_v34 = vpop.f32.mrf.mxu1  ;;  %10304 = vmatprep.mubr.msk.f32.mxu0 %vm11319_vm5, %v11318_v48 }
0x2a91   : > { %6635 = vrot.lane.b32.xlu1 %v12576_v29, %s13159_s11 }
0x2aff   : > { %v6473_v35 = vpop.permute.xlu1 %6472  ;;  %v6638_v0 = vpop.permute.xlu0 %6637 }
0x2b00   : > { %10298 = vmatpush3.xpose.msk.msra.mxu1 %vm1876_vm2, %v6473_v35 }
0x2b01   : > { %10307 = vmatprep.subr.mxu1 %v11318_v48 }
0x2b03   : > { %10300 = vmatmul.mubr.msk.f32.vlgmr.msra.gmra.mxu1 %vm1876_vm2, %v12576_v29  ;;  %v6636_v6 = vpop.permute.xlu1 %6635 }
0x2b04   : > { %10308 = vmatpush3.xpose.msk.msra.mxu1 %vm1876_vm2, %v6638_v0  ;;  %10309 = vmatprep.mubr.msk.f32.mxu1 %vm11319_vm5, %v11318_v48 }
0x2b05   : > { %10317 = vmatprep.subr.bf16.mxu1 %v11318_v48 }
0x2b07   : > { %10310 = vmatmul.mubr.msk.f32.vlgmr.msra.gmra.mxu1 %vm1876_vm2, %v6636_v6 }
0x2b08   : > { %10319 = vmatprep.mubr.msk.bf16.mxu1 %vm11319_vm5, %v11318_v48  ;;  %10318 = vmatpush3.bf16.msra.mxu1 %v6808_v24  ;;  %v9391_v24 = vld [vmem:[%s13162_s5 + $0x38] sm:$0xff] }
0x2b09   : > { %10329 = vmatprep.subr.mxu1 %v11318_v48 }
0x2b47   : > { %v6339_v43 = vpop.f32.mrf.mxu0 }
0x2b48   : > { %v6340_v44 = vadd.f32 %v9372_v36, %v6339_v43 }
0x2b49   : > { %v10280_v60 = vpop.f32.mrf.mxu0 }
0x2b4a   : > { %6344 = vst.msk [vmem:[%s12602_s1] sm:$0xff] %vm6343_vm7, %v6340_v44 }
0x2b4f   : > { %v6458_v47 = vpop.f32.mrf.mxu0 }
0x2b50   : > { %v12607_v49 = vadd.f32 %v9386_v45, %v6458_v47 }
0x2b51   : > { %v10295_v40 = vpop.f32.mrf.mxu0 }
0x2b52   : > { %10303 = vmatpush3.msra.mxu0 %v12607_v49 }
0x2b53   : > { %v6461_v50 = vpop.f32.mrf.mxu0  ;;  %10312 = vmatprep.subr.mxu0 %v11318_v48 }
0x2b55   : > { %v10296_v14 = vpop.f32.mrf.mxu0 }
0x2bc3   : > { %v6544_v7 = vpop.f32.mrf.mxu1 }
0x2bc4   : > { %v6548_v23 = vmul.f32 0.35355338, %v6544_v7 }
0x2bc5   : > { %v10301_v51 = vpop.f32.mrf.mxu1 }
0x2bc6   : > { %v6549_v52 = vsel %vm1876_vm2, %v6548_v23, -inf }
0x2bc7   : > { %6550 = vmax.xlane.f32.xlu1 %v6549_v52  ;;  %v6709_v15 = vpop.f32.mrf.mxu1 }
0x2bc8   : > { %v6713_v54 = vmul.f32 0.35355338, %v6709_v15 }
0x2bc9   : > { %v10311_v55 = vpop.f32.mrf.mxu1 }
0x2bca   : > { %v6714_v39 = vsel %vm1876_vm2, %v6713_v54, -inf }
0x2bcb   : > { %6715 = vmax.xlane.f32.xlu0 %v6714_v39  ;;  %v9390_v39 = vld [vmem:[%s13162_s5 + $0x30] sm:$0xff] }
0x2c50   : > { %v6551_v19 = vpop.xlane.xlu1 %6550 }
0x2c51   : > { %v6552_v57 = vsub.f32 %v6548_v23, %v6551_v19  ;;  %v7063_v19 = vpack.c.bf16 %v9390_v39, %v9390_v39  ;;  %v9417_v39 = vld [vmem:[%s13167_s19 + $0x38] sm:$0xff] }
0x2c53   : > { %v6553_v58 = vmul.f32 1.442695, %v6552_v57  ;;  %v7068_v57 = vsel %vm2672_vm4, %v7063_v19, 0  ;;  %v9414_v19 = vld [vmem:[%s13167_s19 + $0x20] sm:$0xff] }
0x2c54   : > { %v6716_v18 = vpop.xlane.xlu0 %6715 }
0x2c55   : > { %10866 = vpow2.f32 %v6553_v58  ;;  %v6717_v38 = vsub.f32 %v6713_v54, %v6716_v18 }
0x2c57   : > { %v6718_v53 = vmul.f32 1.442695, %v6717_v38 }
0x2c59   : > { %10868 = vpow2.f32 %v6718_v53 }
0x2c62   : > { %v10867_v1 = vpop.eup %10866 }
0x2c63   : > { %v6555_v56 = vsel %vm1876_vm2, %v10867_v1, 0.0 }
0x2c64   : > { %6556 = vadd.xlane.f32.xlu0 %v6555_v56 }
0x2c66   : > { %v10869_v4 = vpop.eup %10868 }
0x2c67   : > { %v6720_v11 = vsel %vm1876_vm2, %v10869_v4, 0.0 }
0x2c68   : > { %6721 = vadd.xlane.f32.xlu1 %v6720_v11 }
0x2c79   : > { %6898 = vrot.lane.b32.xlu1 %v12576_v29, %s13160_s10  ;;  %s13191_s10 = sld [smem:[#allocation83_spill]] }
0x2c7a   : > { %6726 = vrot.lane.b32.xlu0 %v12607_v49, %s13159_s11 }
0x2c7d   : > { %6896 = vrot.lane.b32.xlu1 %v12576_v29, %s13161_s4 }
0x2c7f   : > { %p13192_p2 = scmp.ne.s32.totalorder %s13191_s10, 0 }
0x2c80   : > { %s13193_s3 = sld [smem:[#allocation80_spill]] (%p13192_p2) }
0x2c81   : > { %s13194_s26 = sld [smem:[#allocation78_spill]] (%p13192_p2) }
0x2ced   : > { %v6557_v59 = vpop.xlane.xlu0 %6556 }
0x2cee   : > { %10870 = vrcp.f32 %v6557_v59 }
0x2cf1   : > { %v6722_v3 = vpop.xlane.xlu1 %6721  ;;  %v6727_v10 = vpop.permute.xlu0 %6726 }
0x2cf2   : > { %10872 = vrcp.f32 %v6722_v3 }
0x2cf5   : > { %v6899_v28 = vpop.permute.xlu1 %6898 }
0x2cf9   : > { %v6897_v13 = vpop.permute.xlu1 %6896 }
0x2cfb   : > { %v10871_v9 = vpop.eup %10870 }
0x2cfc   : > { %v6559_v62 = vmul.f32 %v10871_v9, %v10867_v1 }
0x2cfe   : > { %10305 = vmatmul.mubr.msk.f32.vlgmr.msra.gmra.mxu0 %vm1876_vm2, %v6559_v62 }
0x2cff   : > { %v10873_v2 = vpop.eup %10872  ;;  %10313 = vmatpush3.msra.mxu0 %v6727_v10  ;;  %10314 = vmatprep.mubr.msk.f32.mxu0 %vm11319_vm5, %v11318_v48 }
0x2d00   : > { %v6724_v41 = vmul.f32 %v10873_v2, %v10869_v4  ;;  %10323 = vmatprep.subr.bf16.mxu0 %v11318_v48 }
0x2d02   : > { %10315 = vmatmul.mubr.msk.f32.vlgmr.msra.gmra.mxu0 %vm1876_vm2, %v6724_v41 }
0x2d03   : > { %10325 = vmatprep.mubr.msk.bf16.mxu0 %vm11319_vm5, %v11318_v48  ;;  %10324 = vmatpush3.bf16.msra.mxu0 %v6854_v37 }
0x2d04   : > { %10334 = vmatprep.subr.mxu0 %v11318_v48 }
0x2dbe   : > { %v6629_v46 = vpop.f32.mrf.mxu0 }
0x2dbf   : > { %v6633_v5 = vpack.c.bf16 %v6629_v46, %v6629_v46  ;;  %v7278_v46 = vpack.c.bf16 %v9391_v24, %v9391_v24 }
0x2dc0   : > { %v10306_v33 = vpop.f32.mrf.mxu0 }
0x2dc1   : > { %10326 = vmatmul.mubr.msk.bf16.vlgmr.msra.gmra.mxu0 %vm1876_vm2, %v6633_v5  ;;  %v7283_v5 = vsel %vm2672_vm4, %v7278_v46, 0  ;;  %v9423_v33 = vld [vmem:[%s13166_s18 + $0x30] sm:$0xff] }
0x2dc2   : > { %v6798_v61 = vpop.f32.mrf.mxu0  ;;  %10336 = vmatprep.mubr.msk.f32.mxu0 %vm11319_vm5, %v11318_v48 }
0x2dc3   : > { %v6802_v26 = vpack.c.bf16 %v6798_v61, %v6798_v61  ;;  %v9424_v61 = vld [vmem:[%s13166_s18 + $0x38] sm:$0xff] }
0x2dc4   : > { %v10316_v27 = vpop.f32.mrf.mxu0 }
0x2dc5   : > { %10320 = vmatmul.mubr.msk.bf16.vlgmr.msra.gmra.mxu1 %vm1876_vm2, %v6802_v26  ;;  %v7431_v26 = vpack.c.bf16 %v9424_v61, %v9423_v33  ;;  %v9421_v27 = vld [vmem:[%s13166_s18 + $0x20] sm:$0xff] }
0x2dc6   : > { %10330 = vmatpush3.xpose.msk.msra.mxu1 %vm1876_vm2, %v6899_v28  ;;  %10331 = vmatprep.mubr.msk.f32.mxu1 %vm11319_vm5, %v11318_v48  ;;  %v9422_v28 = vld [vmem:[%s13166_s18 + $0x28] sm:$0xff]  ;;  %v9434_v33 = vld [vmem:[%s13173_s25 + $0x1] ss:$0 sm:$0xff] }
0x2dc7   : > { %10339 = vmatprep.subr.bf16.mxu1 %v11318_v48 }
0x2dcd   : > { %10332 = vmatmul.mubr.msk.f32.vlgmr.msra.gmra.mxu1 %vm1876_vm2, %v6897_v13 }
0x2dce   : > { %10341 = vmatprep.mubr.msk.bf16.mxu1 %vm11319_vm5, %v11318_v48  ;;  %10340 = vmatpush3.bf16.msra.mxu1 %v7068_v57 }
0x2dcf   : > { %10355 = vmatprep.subr.bf16.mxu1 %v11318_v48 }
0x2e81   : > { %v6890_v30 = vpop.f32.mrf.mxu0 }
0x2e83   : > { %v10327_v31 = vpop.f32.mrf.mxu0 }
0x2e84   : > { %v7430_v31 = vpack.c.bf16 %v9422_v28, %v9421_v27 }
0x2e85   : > { %v6844_v32 = vpop.f32.mrf.mxu1  ;;  %v6893_v34 = vpop.f32.mrf.mxu0 }
0x2e86   : > { %v6891_v35 = vadd.f32 %v6890_v30, %v6844_v32  ;;  %v9409_v34 = vld [vmem:[%s13165_s17 + $0x1] ss:$0 sm:$0xff] }
0x2e87   : > { %v10321_v0 = vpop.f32.mrf.mxu1  ;;  %v10328_v6 = vpop.f32.mrf.mxu0 }
0x2e89   : > { %v6847_v36 = vpop.f32.mrf.mxu1 }
0x2e8b   : > { %v10322_v43 = vpop.f32.mrf.mxu1 }
0x2e8d   : > { %v6970_v44 = vpop.f32.mrf.mxu1 }
0x2e8e   : > { %v6974_v60 = vmul.f32 0.35355338, %v6970_v44 }
0x2e8f   : > { %v10333_v45 = vpop.f32.mrf.mxu1 }
0x2e90   : > { %v6975_v47 = vsel %vm1876_vm2, %v6974_v60, -inf }
0x2e91   : > { %6976 = vmax.xlane.f32.xlu1 %v6975_v47 }
0x2ea2   : > { %7113 = vrot.lane.b32.xlu1 %v12576_v29, %s13164_s14  ;;  %s13186_s14 = sld [smem:[#allocation61_spill]] }
0x2ea6   : > { %7111 = vrot.lane.b32.xlu1 %v12576_v29, %s13163_s12 }
0x2f1a   : > { %v6977_v40 = vpop.xlane.xlu1 %6976 }
0x2f1b   : > { %v6978_v50 = vsub.f32 %v6974_v60, %v6977_v40  ;;  %v9426_v40 = vld [vmem:[%s13171_s13 + $0x1] ss:$0 sm:$0xff] }
0x2f1d   : > { %v6979_v14 = vmul.f32 1.442695, %v6978_v50 }
0x2f1e   : > { %v7114_v29 = vpop.permute.xlu1 %7113 }
0x2f1f   : > { %10874 = vpow2.f32 %v6979_v14 }
0x2f22   : > { %v7112_v55 = vpop.permute.xlu1 %7111 }
0x2f2c   : > { %v10875_v7 = vpop.eup %10874 }
0x2f2d   : > { %v6981_v23 = vsel %vm1876_vm2, %v10875_v7, 0.0 }
0x2f2e   : > { %6982 = vadd.xlane.f32.xlu0 %v6981_v23 }
0x2f44   : > { %6986 = vrot.lane.b32.xlu0 %v12607_v49, %s13161_s4 }
0x2fb7   : > { %v6983_v51 = vpop.xlane.xlu0 %6982 }
0x2fb8   : > { %10876 = vrcp.f32 %v6983_v51 }
0x2fbb   : > { %v6987_v52 = vpop.permute.xlu0 %6986 }
0x2fbc   : > { %10335 = vmatpush3.msra.mxu0 %v6987_v52 }
0x2fbd   : > { %10345 = vmatprep.subr.mxu0 %v11318_v48 }
0x2fc5   : > { %v10877_v15 = vpop.eup %10876 }
0x2fc6   : > { %v6985_v54 = vmul.f32 %v10877_v15, %v10875_v7 }
0x2fc8   : > { %10337 = vmatmul.mubr.msk.f32.vlgmr.msra.gmra.mxu0 %vm1876_vm2, %v6985_v54 }
0x2fc9   : > { %10346 = vmatpush3.xpose.msk.msra.mxu0 %vm1876_vm2, %v7114_v29  ;;  %10347 = vmatprep.mubr.msk.f32.mxu0 %vm11319_vm5, %v11318_v48 }
0x2fca   : > { %10350 = vmatprep.subr.mxu0 %v11318_v48 }
0x2fcc   : > { %10348 = vmatmul.mubr.msk.f32.vlgmr.msra.gmra.mxu0 %vm1876_vm2, %v7112_v55  ;;  %v9416_v55 = vld [vmem:[%s13167_s19 + $0x30] sm:$0xff] }
0x2fcd   : > { %10352 = vmatprep.mubr.msk.f32.mxu0 %vm11319_vm5, %v11318_v48  ;;  %v7373_v57 = vpack.c.bf16 %v9417_v39, %v9416_v55 }
0x3088   : > { %v7058_v58 = vpop.f32.mrf.mxu0 }
0x3089   : > { %v7062_v18 = vpack.c.bf16 %v7058_v58, %v7058_v58  ;;  %v9415_v58 = vld [vmem:[%s13167_s19 + $0x28] sm:$0xff] }
0x308a   : > { %v10338_v38 = vpop.f32.mrf.mxu0 }
0x308b   : > { %10342 = vmatmul.mubr.msk.bf16.vlgmr.msra.gmra.mxu1 %vm1876_vm2, %v7062_v18  ;;  %v7372_v18 = vpack.c.bf16 %v9415_v58, %v9414_v19  ;;  %v9431_v38 = vld [vmem:[%s13168_s20 + $0x30] sm:$0xff] }
0x308c   : > { %v7185_v53 = vpop.f32.mrf.mxu0  ;;  %10357 = vmatprep.mubr.msk.bf16.mxu1 %vm11319_vm5, %v11318_v48  ;;  %10356 = vmatpush3.bf16.msra.mxu1 %v7283_v5 }
0x308d   : > { %v7189_v1 = vmul.f32 0.35355338, %v7185_v53  ;;  %10369 = vmatprep.subr.bf16.mxu1 %v7431_v26  ;;  %v9432_v53 = vld [vmem:[%s13168_s20 + $0x38] sm:$0xff] }
0x308e   : > { %v10349_v56 = vpop.f32.mrf.mxu0 }
0x308f   : > { %v7190_v4 = vsel %vm1876_vm2, %v7189_v1, -inf }
0x3090   : > { %7191 = vmax.xlane.f32.xlu0 %v7190_v4 }
0x30a6   : > { %7201 = vrot.lane.b32.xlu0 %v12607_v49, %s13163_s12 }
0x3119   : > { %v7192_v11 = vpop.xlane.xlu0 %7191 }
0x311a   : > { %v7193_v59 = vsub.f32 %v7189_v1, %v7192_v11  ;;  %v7495_v1 = vpack.c.bf16 %v9432_v53, %v9431_v38 }
0x311c   : > { %v7194_v3 = vmul.f32 1.442695, %v7193_v59 }
0x311d   : > { %v7202_v9 = vpop.permute.xlu0 %7201 }
0x311e   : > { %10878 = vpow2.f32 %v7194_v3  ;;  %10351 = vmatpush3.msra.mxu0 %v7202_v9  ;;  %v9412_v3 = vld [vmem:[%s13169_s21 + $0x1] ss:$0 sm:$0xff] }
0x311f   : > { %10361 = vmatprep.subr.bf16.mxu0 %v11318_v48 }
0x312b   : > { %v10879_v62 = vpop.eup %10878 }
0x312c   : > { %v7196_v10 = vsel %vm1876_vm2, %v10879_v62, 0.0 }
0x312d   : > { %7197 = vadd.xlane.f32.xlu1 %v7196_v10 }
0x314b   : > { %v7104_v2 = vpop.f32.mrf.mxu1 }
0x314c   : > { %v7110_v41 = vadd.f32 %v7104_v2, %v6891_v35 }
0x314d   : > { %v10343_v16 = vpop.f32.mrf.mxu1 }
0x314e   : > { %v9430_v16 = vld [vmem:[%s13168_s20 + $0x28] sm:$0xff] }
0x314f   : > { %v7107_v20 = vpop.f32.mrf.mxu1 }
0x3151   : > { %v10344_v49 = vpop.f32.mrf.mxu1 }
0x31b6   : > { %v7198_v37 = vpop.xlane.xlu1 %7197 }
0x31b7   : > { %10880 = vrcp.f32 %v7198_v37 }
0x31c4   : > { %v10881_v21 = vpop.eup %10880 }
0x31c5   : > { %v7200_v22 = vmul.f32 %v10881_v21, %v10879_v62  ;;  %v9413_v62 = vld [vmem:[%s13170_s22 + $0x1] ss:$0 sm:$0xff] }
0x31c7   : > { %10353 = vmatmul.mubr.msk.f32.vlgmr.msra.gmra.mxu0 %vm1876_vm2, %v7200_v22 }
0x31c8   : > { %10365 = vmatprep.mubr.msk.bf16.mxu0 %vm11319_vm5, %v11318_v48  ;;  %10362 = vmatpush3.bf16.msra.mxu0 %v7373_v57 }
0x31c9   : > { %10363 = vmatprep.subr.bf16.mxu0 %v11318_v48 }
0x31cc   : > { %10364 = vmatpush3.bf16.msra.mxu0 %v7372_v18 }
0x31cd   : > { %10377 = vmatprep.subr.bf16.mxu0 %v7495_v1 }
0x3287   : > { %v7273_v13 = vpop.f32.mrf.mxu0 }
0x3288   : > { %v7277_v30 = vpack.c.bf16 %v7273_v13, %v7273_v13 }
0x3289   : > { %v10354_v32 = vpop.f32.mrf.mxu0 }
0x328a   : > { %10358 = vmatmul.mubr.msk.bf16.vlgmr.msra.gmra.mxu1 %vm1876_vm2, %v7277_v30 }
0x328b   : > { %10370 = vmatpush3.bf16.msra.mxu1 %v7431_v26  ;;  %10373 = vmatprep.mubr.msk.bf16.mxu1 %vm1993_vm3, %v12251_v17 }
0x328c   : > { %10371 = vmatprep.subr.bf16.mxu1 %v7430_v31 }
0x328f   : > { %10372 = vmatpush3.bf16.msra.mxu1 %v7430_v31 }
0x3290   : > { %10385 = vmatprep.subr.mxu1 %v11318_v48 }
0x3292   : > { %10374 = vmatmul.mubr.msk.bf16.vlgmr.msra.gmra.mxu1 %vm1993_vm3, %v12263_v42 }
0x3293   : > { %10393 = vmatprep.mubr.msk.f32.mxu1 %vm11319_vm5, %v11318_v48 }
0x334a   : > { %v7319_v35 = vpop.f32.mrf.mxu1 }
0x334b   : > { %v7325_v0 = vadd.f32 %v7319_v35, %v7110_v41  ;;  %v9429_v41 = vld [vmem:[%s13168_s20 + $0x20] sm:$0xff] }
0x334c   : > { %v10359_v6 = vpop.f32.mrf.mxu1  ;;  %v7494_v37 = vpack.c.bf16 %v9430_v16, %v9429_v41 }
0x334d   : > { %v7332_v36 = vadd.f32 %v9409_v34, %v7325_v0 }
0x334e   : > { %v7322_v43 = vpop.f32.mrf.mxu1 }
0x334f   : > { %v7333_v44 = vadd.f32 %v7332_v36, %v12521_v25 }
0x3350   : > { %v10360_v17 = vpop.f32.mrf.mxu1 }
0x3351   : > { %v7338_v60 = vsel %vm1993_vm3, %v7333_v44, 0.0 }
0x3352   : > { %7339 = vadd.xlane.f32.xlu1 %v7338_v60  ;;  %v10375_v45 = vpop.f32.mrf.mxu1 }
0x3353   : > { %v12701_v25 = vadd.f32 %v10375_v45, %v9426_v40 }
0x3354   : > { %v7474_v47 = vpop.f32.mrf.mxu1 }
0x3355   : > { %v12710_v23 = vadd.f32 %v9426_v40, %v7474_v47 }
0x3356   : > { %v10376_v50 = vpop.f32.mrf.mxu1 }
0x3357   : > { %v12694_v42 = vadd.f32 %v10376_v50, %v9426_v40 }
0x3358   : > { %v7477_v14 = vpop.f32.mrf.mxu1 }
0x3359   : > { %7740 = vrot.lane.b32.xlu0 %v12694_v42, %s13159_s11  ;;  %10386 = vmatpush3.xpose.msk.msra.mxu1 %vm1876_vm2, %v12694_v42  ;;  %v12703_v7 = vadd.f32 %v9426_v40, %v7477_v14 }
0x335a   : > { %10387 = vmatprep.subr.mxu1 %v11318_v48 }
0x335d   : > { %10388 = vmatpush3.xpose.msk.msra.mxu1 %vm1876_vm2, %v12701_v25  ;;  %7736 = vrot.lane.b32.xlu0 %v12703_v7, %s13159_s11 }
0x335e   : > { %10389 = vmatprep.subr.mxu1 %v11318_v48 }
0x3361   : > { %10390 = vmatpush3.xpose.msk.msra.mxu1 %vm1876_vm2, %v12703_v7  ;;  %7734 = vrot.lane.b32.xlu0 %v12710_v23, %s13159_s11 }
0x3362   : > { %10391 = vmatprep.subr.mxu1 %v11318_v48 }
0x3365   : > { %10392 = vmatpush3.xpose.msk.msra.mxu1 %vm1876_vm2, %v12710_v23 }
0x3366   : > { %10418 = vmatprep.subr.mxu1 %v11318_v48 }
0x33cb   : > { %v7741_v47 = vpop.permute.xlu0 %7740 }
0x33cf   : > { %v7737_v50 = vpop.permute.xlu0 %7736 }
0x33d3   : > { %v7735_v14 = vpop.permute.xlu0 %7734 }
0x33db   : > { %v7340_v51 = vpop.xlane.xlu1 %7339 }
0x33dc   : > { %v7341_v52 = vmul.f32 0.03125, %v7340_v51 }
0x33de   : > { %v7342_v15 = vsub.f32 %v7333_v44, %v7341_v52  ;;  %v9437_v52 = vld [vmem:[%s13174_s27 + $0x20] sm:$0xff] }
0x33e0   : > { %v7343_v29 = vmul.f32 %v7342_v15, %v7342_v15 }
0x33e2   : > { %v7344_v54 = vsel %vm1993_vm3, %v7343_v29, 0.0 }
0x33e3   : > { %7345 = vadd.xlane.f32.xlu1 %v7344_v54 }
0x346c   : > { %v7346_v56 = vpop.xlane.xlu1 %7345 }
0x346d   : > { %v7347_v4 = vmul.f32 0.03125, %v7346_v56 }
0x346f   : > { %v7348_v11 = vadd.f32 1e-05, %v7347_v4 }
0x3471   : > { %10882 = vrsqrt.f32 %v7348_v11 }
0x347e   : > { %v10883_v59 = vpop.eup %10882 }
0x347f   : > { %v7350_v9 = vmul.f32 %v10883_v59, %v7342_v15  ;;  %v7731_v15 = vpack.c.bf16 %v9437_v52, %v9437_v52 }
0x3481   : > { %v7357_v10 = vmul.f32 %v9412_v3, %v7350_v9  ;;  %v7975_v29 = vsel %vm2672_vm4, %v7731_v15, 0 }
0x3483   : > { %v12730_v2 = vadd.f32 %v9413_v62, %v7357_v10 }
0x3485   : > { %v7365_v20 = vadd.f32 %v12555_v8, %v12730_v2  ;;  %v9419_v8 = vld [vmem:[%s13172_s24 + $0x1] ss:$0 sm:$0xff] }
0x3487   : > { %v7371_v49 = vpack.c.bf16 %v7365_v20, %v7365_v20  ;;  %v9438_v20 = vld [vmem:[%s13174_s27 + $0x28] sm:$0xff] }
0x3489   : > { %10366 = vmatmul.mubr.msk.bf16.vlgmr.msra.gmra.mxu0 %vm1993_vm3, %v7371_v49 }
0x348a   : > { %10378 = vmatpush3.bf16.msra.mxu0 %v7495_v1  ;;  %10381 = vmatprep.mubr.msk.bf16.mxu0 %vm1993_vm3, %v12281_v12 }
0x348b   : > { %10379 = vmatprep.subr.bf16.mxu0 %v7494_v37 }
0x348e   : > { %10380 = vmatpush3.bf16.msra.mxu0 %v7494_v37 }
0x348f   : > { %10396 = vmatprep.subr.mxu0 %v11318_v48 }
0x3491   : > { %10382 = vmatmul.mubr.msk.bf16.vlgmr.msra.gmra.mxu0 %vm1993_vm3, %v12261_v63 }
0x3492   : > { %10404 = vmatprep.mubr.msk.f32.mxu0 %vm11319_vm5, %v11318_v48 }
0x3549   : > { %v7419_v21 = vpop.f32.mrf.mxu0 }
0x354a   : > { %v12745_v22 = vadd.f32 %v9419_v8, %v7419_v21 }
0x354b   : > { %v10367_v24 = vpop.f32.mrf.mxu0 }
0x354c   : > { %7732 = vrot.lane.b32.xlu0 %v12745_v22, %s13159_s11  ;;  %10394 = vmatmul.mubr.msk.f32.vlgmr.msra.gmra.mxu1 %vm1876_vm2, %v12745_v22 }
0x354d   : > { %v7422_v12 = vpop.f32.mrf.mxu0  ;;  %10426 = vmatprep.mubr.msk.f32.mxu1 %vm11319_vm5, %v11318_v48 }
0x354f   : > { %v10368_v46 = vpop.f32.mrf.mxu0 }
0x3551   : > { %v10383_v63 = vpop.f32.mrf.mxu0 }
0x3552   : > { %v12756_v28 = vadd.f32 %v10383_v63, %v9434_v33 }
0x3553   : > { %v7538_v5 = vpop.f32.mrf.mxu0 }
0x3554   : > { %v12764_v30 = vadd.f32 %v9434_v33, %v7538_v5 }
0x3555   : > { %v10384_v61 = vpop.f32.mrf.mxu0 }
0x3556   : > { %v12754_v26 = vadd.f32 %v10384_v61, %v9434_v33 }
0x3557   : > { %v7541_v27 = vpop.f32.mrf.mxu0 }
0x3558   : > { %10397 = vmatpush3.msra.mxu0 %v12754_v26  ;;  %v12760_v13 = vadd.f32 %v9434_v33, %v7541_v27 }
0x3559   : > { %10398 = vmatprep.subr.mxu0 %v11318_v48 }
0x355a   : > { %10399 = vmatpush3.msra.mxu0 %v12756_v28 }
0x355b   : > { %10400 = vmatprep.subr.mxu0 %v11318_v48 }
0x355c   : > { %10401 = vmatpush3.msra.mxu0 %v12760_v13 }
0x355d   : > { %10402 = vmatprep.subr.mxu0 %v11318_v48 }
0x355e   : > { %10403 = vmatpush3.msra.mxu0 %v12764_v30 }
0x355f   : > { %10407 = vmatprep.subr.mxu0 %v11318_v48 }
0x35be   : > { %v7733_v51 = vpop.permute.xlu0 %7732 }
0x360c   : > { %v7641_v31 = vpop.f32.mrf.mxu1 }
0x360d   : > { %v7645_v32 = vmul.f32 0.35355338, %v7641_v31 }
0x360e   : > { %v10395_v34 = vpop.f32.mrf.mxu1 }
0x360f   : > { %v7646_v35 = vsel %vm1993_vm3, %v7645_v32, -inf }
0x3610   : > { %7647 = vmax.xlane.f32.xlu1 %v7646_v35 }
0x3699   : > { %v7648_v0 = vpop.xlane.xlu1 %7647 }
0x369a   : > { %v7649_v6 = vsub.f32 %v7645_v32, %v7648_v0 }
0x369c   : > { %v7650_v36 = vmul.f32 1.442695, %v7649_v6 }
0x369e   : > { %10884 = vpow2.f32 %v7650_v36 }
0x36ab   : > { %v10885_v43 = vpop.eup %10884 }
0x36ac   : > { %v7652_v44 = vsel %vm1993_vm3, %v10885_v43, 0.0 }
0x36ad   : > { %7653 = vadd.xlane.f32.xlu1 %v7652_v44 }
0x36be   : > { %7738 = vrot.lane.b32.xlu1 %v12701_v25, %s13159_s11 }
0x36c2   : > { %7842 = vrot.lane.b32.xlu1 %v12756_v28, %s13159_s11 }
0x3736   : > { %v7654_v17 = vpop.xlane.xlu1 %7653 }
0x3737   : > { %10886 = vrcp.f32 %v7654_v17 }
0x373a   : > { %v7739_v40 = vpop.permute.xlu1 %7738 }
0x373e   : > { %v7843_v4 = vpop.permute.xlu1 %7842 }
0x3744   : > { %v10887_v60 = vpop.eup %10886 }
0x3745   : > { %v7656_v45 = vmul.f32 %v10887_v60, %v10885_v43 }
0x3747   : > { %10405 = vmatmul.mubr.msk.f32.vlgmr.msra.gmra.mxu0 %vm1993_vm3, %v7656_v45 }
0x3748   : > { %10408 = vmatpush3.xpose.msk.msra.mxu0 %vm1876_vm2, %v7741_v47  ;;  %10415 = vmatprep.mubr.msk.f32.mxu0 %vm11319_vm5, %v11318_v48 }
0x3749   : > { %10409 = vmatprep.subr.mxu0 %v11318_v48 }
0x374c   : > { %10410 = vmatpush3.xpose.msk.msra.mxu0 %vm1876_vm2, %v7739_v40 }
0x374d   : > { %10411 = vmatprep.subr.mxu0 %v11318_v48 }
0x3750   : > { %10412 = vmatpush3.xpose.msk.msra.mxu0 %vm1876_vm2, %v7737_v50 }
0x3751   : > { %10413 = vmatprep.subr.mxu0 %v11318_v48 }
0x3754   : > { %10414 = vmatpush3.xpose.msk.msra.mxu0 %vm1876_vm2, %v7735_v14 }
0x3755   : > { %10435 = vmatprep.subr.bf16.mxu0 %v11318_v48 }
0x3757   : > { %10416 = vmatmul.mubr.msk.f32.vlgmr.msra.gmra.mxu0 %vm1876_vm2, %v7733_v51 }
0x3758   : > { %10437 = vmatprep.mubr.msk.bf16.mxu0 %vm11319_vm5, %v11318_v48  ;;  %10436 = vmatpush3.bf16.msra.mxu0 %v7975_v29 }
0x3759   : > { %10452 = vmatprep.subr.mxu0 %v11318_v48 }
0x3807   : > { %v7726_v54 = vpop.f32.mrf.mxu0 }
0x3808   : > { %v7730_v55 = vpack.c.bf16 %v7726_v54, %v7726_v54 }
0x3809   : > { %v10406_v39 = vpop.f32.mrf.mxu0 }
0x380a   : > { %10438 = vmatmul.mubr.msk.bf16.vlgmr.msra.gmra.mxu0 %vm1876_vm2, %v7730_v55 }
0x380b   : > { %10460 = vmatprep.mubr.msk.f32.mxu0 %vm11319_vm5, %v11318_v48 }
0x3817   : > { %v7818_v19 = vpop.f32.mrf.mxu0 }
0x3818   : > { %v7822_v57 = vmul.f32 0.35355338, %v7818_v19 }
0x3819   : > { %v10417_v58 = vpop.f32.mrf.mxu0 }
0x381a   : > { %v7823_v18 = vsel %vm1993_vm3, %v7822_v57, -inf }
0x381b   : > { %7824 = vmax.xlane.f32.xlu0 %v7823_v18  ;;  %v9439_v18 = vld [vmem:[%s13174_s27 + $0x30] sm:$0xff] }
0x3831   : > { %7844 = vrot.lane.b32.xlu0 %v12754_v26, %s13159_s11 }
0x3835   : > { %7840 = vrot.lane.b32.xlu0 %v12760_v13, %s13159_s11 }
0x3839   : > { %8025 = vrot.lane.b32.xlu0 %v12694_v42, %s13161_s4 }
0x383d   : > { %8021 = vrot.lane.b32.xlu0 %v12703_v7, %s13161_s4 }
0x3841   : > { %8017 = vrot.lane.b32.xlu0 %v12745_v22, %s13161_s4 }
0x3845   : > { %8259 = vrot.lane.b32.xlu0 %v12701_v25, %s13163_s12 }
0x3849   : > { %8255 = vrot.lane.b32.xlu0 %v12710_v23, %s13163_s12 }
0x38a4   : > { %v7825_v38 = vpop.xlane.xlu0 %7824 }
0x38a5   : > { %v7826_v53 = vsub.f32 %v7822_v57, %v7825_v38  ;;  %v8205_v38 = vpack.c.bf16 %v9439_v18, %v9439_v18  ;;  %v9484_v18 = vld [vmem:[%s13177_s30 + $0x50] sm:$0xff] }
0x38a7   : > { %v7827_v1 = vmul.f32 1.442695, %v7826_v53 }
0x38a8   : > { %v7845_v56 = vpop.permute.xlu0 %7844 }
0x38a9   : > { %10888 = vpow2.f32 %v7827_v1  ;;  %10419 = vmatpush3.msra.mxu1 %v7845_v56  ;;  %v8210_v1 = vsel %vm2672_vm4, %v8205_v38, 0  ;;  %v9485_v38 = vld [vmem:[%s13177_s30 + $0x58] sm:$0xff] }
0x38aa   : > { %10420 = vmatprep.subr.mxu1 %v11318_v48 }
0x38ab   : > { %10421 = vmatpush3.msra.mxu1 %v7843_v4 }
0x38ac   : > { %v7841_v11 = vpop.permute.xlu0 %7840  ;;  %10422 = vmatprep.subr.mxu1 %v11318_v48 }
0x38ad   : > { %10423 = vmatpush3.msra.mxu1 %v7841_v11 }
0x38ae   : > { %10424 = vmatprep.subr.mxu1 %v11318_v48 }
0x38b6   : > { %v10889_v59 = vpop.eup %10888 }
0x38b7   : > { %v7829_v3 = vsel %vm1993_vm3, %v10889_v59, 0.0 }
0x38b8   : > { %7830 = vadd.xlane.f32.xlu1 %v7829_v3 }
0x38c9   : > { %7838 = vrot.lane.b32.xlu1 %v12764_v30, %s13159_s11  ;;  %s13190_s11 = sld [smem:[#allocation70_spill]] }
0x38ca   : > { %v12817_v9 = vpop.f32.mrf.mxu0 }
0x38cc   : > { %v10439_v62 = vpop.f32.mrf.mxu0 }
0x38cd   : > { %8023 = vrot.lane.b32.xlu1 %v12701_v25, %s13161_s4 }
0x38ce   : > { %v8014_v10 = vpop.f32.mrf.mxu0 }
0x38d0   : > { %v10440_v41 = vpop.f32.mrf.mxu0 }
0x38d1   : > { %8019 = vrot.lane.b32.xlu1 %v12710_v23, %s13161_s4  ;;  %v7924_v23 = vpack.c.bf16 %v9438_v20, %v9438_v20 }
0x38d5   : > { %8261 = vrot.lane.b32.xlu1 %v12694_v42, %s13163_s12  ;;  %v7929_v42 = vsel %vm2672_vm4, %v7924_v23, 0 }
0x38d9   : > { %8257 = vrot.lane.b32.xlu1 %v12703_v7, %s13163_s12 }
0x38dd   : > { %8253 = vrot.lane.b32.xlu1 %v12745_v22, %s13163_s12  ;;  %v8026_v22 = vpop.permute.xlu0 %8025 }
0x38e1   : > { %8123 = vrot.lane.b32.xlu1 %v12756_v28, %s13161_s4  ;;  %v8022_v12 = vpop.permute.xlu0 %8021 }
0x38e5   : > { %v8018_v63 = vpop.permute.xlu0 %8017 }
0x38e9   : > { %v8260_v33 = vpop.permute.xlu0 %8259 }
0x38ed   : > { %v8256_v27 = vpop.permute.xlu0 %8255 }
0x3941   : > { %v7831_v16 = vpop.xlane.xlu1 %7830 }
0x3942   : > { %10890 = vrcp.f32 %v7831_v16 }
0x3945   : > { %v7839_v25 = vpop.permute.xlu1 %7838 }
0x3946   : > { %10425 = vmatpush3.msra.mxu1 %v7839_v25  ;;  %v9440_v25 = vld [vmem:[%s13174_s27 + $0x38] sm:$0xff] }
0x3947   : > { %10429 = vmatprep.subr.bf16.mxu1 %v11318_v48  ;;  %v8441_v20 = vpack.c.bf16 %v9440_v25, %v9440_v25 }
0x3949   : > { %v8024_v24 = vpop.permute.xlu1 %8023  ;;  %v8446_v23 = vsel %vm2672_vm4, %v8441_v20, 0 }
0x394d   : > { %v8020_v46 = vpop.permute.xlu1 %8019 }
0x394f   : > { %v10891_v49 = vpop.eup %10890 }
0x3950   : > { %v7833_v37 = vmul.f32 %v10891_v49, %v10889_v59 }
0x3951   : > { %v8262_v5 = vpop.permute.xlu1 %8261 }
0x3952   : > { %10427 = vmatmul.mubr.msk.f32.vlgmr.msra.gmra.mxu1 %vm1993_vm3, %v7833_v37 }
0x3953   : > { %10430 = vmatpush3.bf16.msra.mxu1 %v7929_v42  ;;  %10431 = vmatprep.mubr.msk.bf16.mxu1 %vm11319_vm5, %v11318_v48 }
0x3954   : > { %10441 = vmatprep.subr.mxu1 %v11318_v48 }
0x3955   : > { %v8258_v61 = vpop.permute.xlu1 %8257 }
0x3959   : > { %v8254_v31 = vpop.permute.xlu1 %8253 }
0x395d   : > { %v8124_v52 = vpop.permute.xlu1 %8123 }
0x3a12   : > { %v7919_v7 = vpop.f32.mrf.mxu1 }
0x3a13   : > { %v7923_v8 = vpack.c.bf16 %v7919_v7, %v7919_v7 }
0x3a14   : > { %v10428_v21 = vpop.f32.mrf.mxu1 }
0x3a15   : > { %10432 = vmatmul.mubr.msk.bf16.vlgmr.msra.gmra.mxu1 %vm1876_vm2, %v7923_v8 }
0x3a16   : > { %10442 = vmatpush3.xpose.msk.msra.mxu1 %vm1876_vm2, %v8026_v22  ;;  %10449 = vmatprep.mubr.msk.f32.mxu1 %vm11319_vm5, %v11318_v48 }
0x3a17   : > { %10443 = vmatprep.subr.mxu1 %v11318_v48 }
0x3a1a   : > { %10444 = vmatpush3.xpose.msk.msra.mxu1 %vm1876_vm2, %v8024_v24 }
0x3a1b   : > { %10445 = vmatprep.subr.mxu1 %v11318_v48 }
0x3a1e   : > { %10446 = vmatpush3.xpose.msk.msra.mxu1 %vm1876_vm2, %v8022_v12 }
0x3a1f   : > { %10447 = vmatprep.subr.mxu1 %v11318_v48 }
0x3a22   : > { %10448 = vmatpush3.xpose.msk.msra.mxu1 %vm1876_vm2, %v8020_v46  ;;  %v9470_v46 = vld [vmem:[%s13175_s28 + $0x1] ss:$0 sm:$0xff] }
0x3a23   : > { %10469 = vmatprep.subr.mxu1 %v11318_v48 }
0x3a25   : > { %10450 = vmatmul.mubr.msk.f32.vlgmr.msra.gmra.mxu1 %vm1876_vm2, %v8018_v63 }
0x3a26   : > { %10470 = vmatpush3.xpose.msk.msra.mxu1 %vm1876_vm2, %v8262_v5  ;;  %10477 = vmatprep.mubr.msk.f32.mxu1 %vm11319_vm5, %v11318_v48 }
0x3a27   : > { %10471 = vmatprep.subr.mxu1 %v11318_v48 }
0x3a2a   : > { %10472 = vmatpush3.xpose.msk.msra.mxu1 %vm1876_vm2, %v8260_v33 }
0x3a2b   : > { %10473 = vmatprep.subr.mxu1 %v11318_v48 }
0x3a2e   : > { %10474 = vmatpush3.xpose.msk.msra.mxu1 %vm1876_vm2, %v8258_v61 }
0x3a2f   : > { %10475 = vmatprep.subr.mxu1 %v11318_v48 }
0x3a32   : > { %10476 = vmatpush3.xpose.msk.msra.mxu1 %vm1876_vm2, %v8256_v27 }
0x3a33   : > { %10505 = vmatprep.subr.bf16.mxu1 %v11318_v48 }
0x3a35   : > { %10478 = vmatmul.mubr.msk.f32.vlgmr.msra.gmra.mxu1 %vm1876_vm2, %v8254_v31 }
0x3a36   : > { %10513 = vmatprep.mubr.msk.bf16.mxu1 %vm11319_vm5, %v11318_v48 }
0x3ad5   : > { %v12863_v32 = vpop.f32.mrf.mxu1 }
0x3ad6   : > { %v8012_v49 = vadd.f32 %v12817_v9, %v12863_v32 }
0x3ad7   : > { %v10433_v34 = vpop.f32.mrf.mxu1 }
0x3ad9   : > { %v7968_v35 = vpop.f32.mrf.mxu1 }
0x3adb   : > { %v10434_v0 = vpop.f32.mrf.mxu1 }
0x3ae5   : > { %v8103_v6 = vpop.f32.mrf.mxu1 }
0x3ae6   : > { %v8107_v36 = vmul.f32 0.35355338, %v8103_v6 }
0x3ae7   : > { %v10451_v43 = vpop.f32.mrf.mxu1 }
0x3ae8   : > { %v8108_v44 = vsel %vm1993_vm3, %v8107_v36, -inf  ;;  %v9477_v43 = vld [vmem:[%s13186_s14 + $0x30] sm:$0xff] }
0x3ae9   : > { %8109 = vmax.xlane.f32.xlu0 %v8108_v44  ;;  %v9478_v44 = vld [vmem:[%s13186_s14 + $0x38] sm:$0xff] }
0x3af5   : > { %v8339_v17 = vpop.f32.mrf.mxu1 }
0x3af6   : > { %v8343_v45 = vmul.f32 0.35355338, %v8339_v17  ;;  %v8535_v17 = vpack.c.bf16 %v9478_v44, %v9477_v43  ;;  %v8702_v44 = vld [vmem:[%s13184_s29 + $0x10] sm:$0xff] }
0x3af7   : > { %v10479_v60 = vpop.f32.mrf.mxu1 }
0x3af8   : > { %v8344_v47 = vsel %vm1993_vm3, %v8343_v45, -inf  ;;  %v9476_v60 = vld [vmem:[%s13186_s14 + $0x28] sm:$0xff] }
0x3aff   : > { %8125 = vrot.lane.b32.xlu0 %v12754_v26, %s13161_s4 }
0x3b03   : > { %8121 = vrot.lane.b32.xlu0 %v12760_v13, %s13161_s4 }
0x3b22   : > { %8345 = vmax.xlane.f32.xlu0 %v8344_v47  ;;  %v9488_v47 = vld [vmem:[%s13177_s30 + $0x70] sm:$0xff] }
0x3b38   : > { %8361 = vrot.lane.b32.xlu0 %v12754_v26, %s13163_s12 }
0x3b3c   : > { %8357 = vrot.lane.b32.xlu0 %v12760_v13, %s13163_s12 }
0x3b72   : > { %v8110_v40 = vpop.xlane.xlu0 %8109 }
0x3b73   : > { %v8111_v50 = vsub.f32 %v8107_v36, %v8110_v40  ;;  %v9489_v40 = vld [vmem:[%s13177_s30 + $0x78] sm:$0xff] }
0x3b75   : > { %v8112_v14 = vmul.f32 1.442695, %v8111_v50  ;;  %v9486_v50 = vld [vmem:[%s13177_s30 + $0x60] sm:$0xff] }
0x3b76   : > { %v8126_v51 = vpop.permute.xlu0 %8125 }
0x3b77   : > { %10892 = vpow2.f32 %v8112_v14  ;;  %10453 = vmatpush3.msra.mxu0 %v8126_v51  ;;  %v8601_v14 = vpack.c.bf16 %v9489_v40, %v9488_v47  ;;  %v9487_v51 = vld [vmem:[%s13177_s30 + $0x68] sm:$0xff] }
0x3b78   : > { %10454 = vmatprep.subr.mxu0 %v11318_v48 }
0x3b79   : > { %10455 = vmatpush3.msra.mxu0 %v8124_v52  ;;  %10506 = vmatpush3.bf16.msra.mxu1 %v8601_v14  ;;  %v8600_v52 = vpack.c.bf16 %v9487_v51, %v9486_v50 }
0x3b7a   : > { %10456 = vmatprep.subr.mxu0 %v11318_v48  ;;  %v8122_v15 = vpop.permute.xlu0 %8121  ;;  %10507 = vmatprep.subr.bf16.mxu1 %v11318_v48 }
0x3b7b   : > { %10457 = vmatpush3.msra.mxu0 %v8122_v15 }
0x3b7c   : > { %10458 = vmatprep.subr.mxu0 %v11318_v48 }
0x3b7d   : > { %10508 = vmatpush3.bf16.msra.mxu1 %v8600_v52 }
0x3b7e   : > { %10509 = vmatprep.subr.bf16.mxu1 %v11318_v48 }
0x3b84   : > { %v10893_v26 = vpop.eup %10892 }
0x3b85   : > { %v8114_v29 = vsel %vm1993_vm3, %v10893_v26, 0.0 }
0x3b86   : > { %8115 = vadd.xlane.f32.xlu1 %v8114_v29 }
0x3b97   : > { %8119 = vrot.lane.b32.xlu1 %v12764_v30, %s13161_s4  ;;  %s13188_s4 = sld [smem:[#allocation62_spill]] }
0x3b9b   : > { %8359 = vrot.lane.b32.xlu1 %v12756_v28, %s13163_s12 }
0x3bab   : > { %v8346_v13 = vpop.xlane.xlu0 %8345 }
0x3bac   : > { %v8347_v54 = vsub.f32 %v8343_v45, %v8346_v13 }
0x3bae   : > { %v8348_v55 = vmul.f32 1.442695, %v8347_v54  ;;  %v9473_v54 = vld [vmem:[%s13178_s9 + $0x1] ss:$0 sm:$0xff] }
0x3baf   : > { %v8362_v11 = vpop.permute.xlu0 %8361 }
0x3bb0   : > { %10894 = vpow2.f32 %v8348_v55 }
0x3bb3   : > { %v8358_v10 = vpop.permute.xlu0 %8357 }
0x3bbd   : > { %v10895_v39 = vpop.eup %10894 }
0x3bbe   : > { %v8350_v19 = vsel %vm1993_vm3, %v10895_v39, 0.0 }
0x3bbf   : > { %8351 = vadd.xlane.f32.xlu1 %v8350_v19 }
0x3bd0   : > { %8355 = vrot.lane.b32.xlu1 %v12764_v30, %s13163_s12  ;;  %s13187_s12 = sld [smem:[#allocation68_spill]] }
0x3c0f   : > { %v8116_v57 = vpop.xlane.xlu1 %8115 }
0x3c10   : > { %10896 = vrcp.f32 %v8116_v57 }
0x3c13   : > { %v8120_v58 = vpop.permute.xlu1 %8119 }
0x3c14   : > { %10459 = vmatpush3.msra.mxu0 %v8120_v58 }
0x3c15   : > { %10463 = vmatprep.subr.bf16.mxu0 %v11318_v48 }
0x3c17   : > { %v8360_v30 = vpop.permute.xlu1 %8359 }
0x3c1d   : > { %v10897_v28 = vpop.eup %10896 }
0x3c1e   : > { %v8118_v53 = vmul.f32 %v10897_v28, %v10893_v26  ;;  %v8599_v28 = vpack.c.bf16 %v9485_v38, %v9484_v18  ;;  %v8819_v38 = vld [vmem:[%s11584_s8 + $0x18] sm:$0xff] }
0x3c20   : > { %10461 = vmatmul.mubr.msk.f32.vlgmr.msra.gmra.mxu0 %vm1993_vm3, %v8118_v53  ;;  %10510 = vmatpush3.bf16.msra.mxu1 %v8599_v28  ;;  %v9482_v53 = vld [vmem:[%s13177_s30 + $0x40] sm:$0xff]  ;;  %v9497_v28 = vld [vmem:[#allocation15] ss:$0 sm:$0xff] }
0x3c21   : > { %10464 = vmatpush3.bf16.msra.mxu0 %v8210_v1  ;;  %10465 = vmatprep.mubr.msk.bf16.mxu0 %vm11319_vm5, %v11318_v48  ;;  %v9483_v1 = vld [vmem:[%s13177_s30 + $0x48] sm:$0xff] }
0x3c22   : > { %10480 = vmatprep.subr.mxu0 %v11318_v48  ;;  %10511 = vmatprep.subr.bf16.mxu1 %v11318_v48 }
0x3c48   : > { %v8352_v56 = vpop.xlane.xlu1 %8351 }
0x3c49   : > { %10898 = vrcp.f32 %v8352_v56  ;;  %v9480_v56 = vld [vmem:[%s13188_s4 + $0x1] ss:$0 sm:$0xff] }
0x3c4c   : > { %v8356_v16 = vpop.permute.xlu1 %8355 }
0x3c56   : > { %v10899_v62 = vpop.eup %10898 }
0x3c57   : > { %v8354_v41 = vmul.f32 %v10899_v62, %v10895_v39  ;;  %v9474_v39 = vld [vmem:[%s13187_s12 + $0x1] ss:$0 sm:$0xff]  ;;  %s9505_s12 = sshll.u32 (%p13192_p2), %s13193_s3, 3 }
0x3c58   : > { %s8910_s4 = scalar_lea.vmem (%p13192_p2), %s13194_s26, %s9505_s12 }
0x3ce0   : > { %v8200_v4 = vpop.f32.mrf.mxu0 }
0x3ce1   : > { %v8204_v59 = vpack.c.bf16 %v8200_v4, %v8200_v4 }
0x3ce2   : > { %v10462_v3 = vpop.f32.mrf.mxu0 }
0x3ce3   : > { %10466 = vmatmul.mubr.msk.bf16.vlgmr.msra.gmra.mxu0 %vm1876_vm2, %v8204_v59 }
0x3ce4   : > { %10481 = vmatpush3.msra.mxu0 %v8362_v11  ;;  %10488 = vmatprep.mubr.msk.f32.mxu0 %vm11319_vm5, %v11318_v48 }
0x3ce5   : > { %10482 = vmatprep.subr.mxu0 %v11318_v48 }
0x3ce6   : > { %10483 = vmatpush3.msra.mxu0 %v8360_v30  ;;  %v8598_v30 = vpack.c.bf16 %v9483_v1, %v9482_v53 }
0x3ce7   : > { %10484 = vmatprep.subr.mxu0 %v11318_v48 }
0x3ce8   : > { %10485 = vmatpush3.msra.mxu0 %v8358_v10  ;;  %10512 = vmatpush3.bf16.msra.mxu1 %v8598_v30 }
0x3ce9   : > { %10486 = vmatprep.subr.mxu0 %v11318_v48  ;;  %10533 = vmatprep.subr.mxu1 %v11318_v48 }
0x3cea   : > { %10487 = vmatpush3.msra.mxu0 %v8356_v16  ;;  %v9491_v16 = vld [vmem:[%s13189_s7 + $0x1] ss:$0 sm:$0xff] }
0x3ceb   : > { %10489 = vmatmul.mubr.msk.f32.vlgmr.msra.gmra.mxu0 %vm1993_vm3, %v8354_v41  ;;  %10491 = vmatprep.subr.bf16.mxu0 %v11318_v48 }
0x3cec   : > { %10493 = vmatprep.mubr.msk.bf16.mxu0 %vm11319_vm5, %v11318_v48  ;;  %10492 = vmatpush3.bf16.msra.mxu0 %v8446_v23 }
0x3ced   : > { %10497 = vmatprep.subr.bf16.mxu0 %v11318_v48 }
0x3da3   : > { %v8246_v37 = vpop.f32.mrf.mxu0 }
0x3da4   : > { %v8252_v42 = vadd.f32 %v8246_v37, %v8012_v49 }
0x3da5   : > { %v10467_v7 = vpop.f32.mrf.mxu0 }
0x3da7   : > { %v8249_v8 = vpop.f32.mrf.mxu0 }
0x3da9   : > { %v10468_v21 = vpop.f32.mrf.mxu0 }
0x3dab   : > { %v8436_v22 = vpop.f32.mrf.mxu0 }
0x3dac   : > { %v8440_v24 = vpack.c.bf16 %v8436_v22, %v8436_v22 }
0x3dad   : > { %v10490_v12 = vpop.f32.mrf.mxu0 }
0x3dae   : > { %10494 = vmatmul.mubr.msk.bf16.vlgmr.msra.gmra.mxu0 %vm1876_vm2, %v8440_v24 }
0x3daf   : > { %10501 = vmatprep.mubr.msk.bf16.mxu0 %vm11319_vm5, %v11318_v48  ;;  %10498 = vmatpush3.bf16.msra.mxu0 %v8535_v17  ;;  %v8703_v17 = vld [vmem:[%s13184_s29 + $0x18] sm:$0xff] }
0x3db0   : > { %10499 = vmatprep.subr.bf16.mxu0 %v11318_v48 }
0x3e6e   : > { %v8482_v63 = vpop.f32.mrf.mxu0 }
0x3e6f   : > { %v8488_v5 = vadd.f32 %v8482_v63, %v8252_v42 }
0x3e70   : > { %v10495_v33 = vpop.f32.mrf.mxu0 }
0x3e71   : > { %v8495_v9 = vadd.f32 %v9470_v46, %v8488_v5 }
0x3e72   : > { %v8485_v61 = vpop.f32.mrf.mxu0 }
0x3e73   : > { %v8496_v27 = vadd.f32 %v8495_v9, %v12730_v2  ;;  %v9475_v2 = vld [vmem:[%s13186_s14 + $0x20] sm:$0xff] }
0x3e74   : > { %v10496_v31 = vpop.f32.mrf.mxu0  ;;  %v8534_v45 = vpack.c.bf16 %v9476_v60, %v9475_v2  ;;  %v9495_v9 = vld [vmem:[%s13182_s0 + $0x1] ss:$0 sm:$0xff]  ;;  %v8706_v2 = vpack.c.bf16 %v8703_v17, %v8702_v44 }
0x3e75   : > { %v8501_v32 = vsel %vm1993_vm3, %v8496_v27, 0.0  ;;  %v8700_v60 = vld [vmem:[%s13184_s29] sm:$0xff] }
0x3e76   : > { %8502 = vadd.xlane.f32.xlu0 %v8501_v32  ;;  %10500 = vmatpush3.bf16.msra.mxu0 %v8534_v45  ;;  %v8701_v45 = vld [vmem:[%s13184_s29 + $0x8] sm:$0xff] }
0x3e77   : > { %10517 = vmatprep.subr.bf16.mxu0 %v11318_v48  ;;  %v8705_v47 = vpack.c.bf16 %v8701_v45, %v8700_v60 }
0x3eff   : > { %v8503_v34 = vpop.xlane.xlu0 %8502 }
0x3f00   : > { %v8504_v35 = vmul.f32 0.03125, %v8503_v34 }
0x3f02   : > { %v8505_v0 = vsub.f32 %v8496_v27, %v8504_v35  ;;  %v9496_v27 = vld [vmem:[%s13190_s11 + $0x1] ss:$0 sm:$0xff] }
0x3f04   : > { %v8506_v6 = vmul.f32 %v8505_v0, %v8505_v0 }
0x3f06   : > { %v8507_v36 = vsel %vm1993_vm3, %v8506_v6, 0.0 }
0x3f07   : > { %8508 = vadd.xlane.f32.xlu1 %v8507_v36 }
0x3f90   : > { %v8509_v15 = vpop.xlane.xlu1 %8508 }
0x3f91   : > { %v8510_v26 = vmul.f32 0.03125, %v8509_v15  ;;  %v10911_v15 = vld [vmem:[#allocation12] ss:$0 sm:$0xff] }
0x3f93   : > { %v8511_v29 = vadd.f32 1e-05, %v8510_v26 }
0x3f95   : > { %10900 = vrsqrt.f32 %v8511_v29  ;;  %v10912_v29 = vld [vmem:[#allocation13] ss:$0 sm:$0xff] }
0x3fa2   : > { %v10901_v13 = vpop.eup %10900 }
0x3fa3   : > { %v8513_v55 = vmul.f32 %v10901_v13, %v8505_v0 }
0x3fa5   : > { %v8520_v19 = vmul.f32 %v9473_v54, %v8513_v55  ;;  %v8760_v55 = vld [vmem:[%s13185_s23 + $0x10] sm:$0xff] }
0x3fa7   : > { %v8527_v57 = vadd.f32 %v9474_v39, %v8520_v19  ;;  %v8761_v39 = vld [vmem:[%s13185_s23 + $0x18] sm:$0xff] }
0x3fa8   : > { %v8764_v19 = vpack.c.bf16 %v8761_v39, %v8760_v55 }
0x3fa9   : > { %v8533_v58 = vpack.c.bf16 %v8527_v57, %v8527_v57 }
0x3fab   : > { %10502 = vmatmul.mubr.msk.bf16.vlgmr.msra.gmra.mxu0 %vm1993_vm3, %v8533_v58  ;;  %v8759_v58 = vld [vmem:[%s13185_s23 + $0x8] sm:$0xff] }
0x3fac   : > { %10521 = vmatprep.mubr.msk.bf16.mxu0 %vm11319_vm5, %v11318_v48  ;;  %10518 = vmatpush3.bf16.msra.mxu0 %v8706_v2 }
0x3fad   : > { %10519 = vmatprep.subr.bf16.mxu0 %v11318_v48 }
0x3fb0   : > { %10520 = vmatpush3.bf16.msra.mxu0 %v8705_v47 }
0x3fb1   : > { %10525 = vmatprep.subr.bf16.mxu0 %v11318_v48 }
0x406b   : > { %v8581_v4 = vpop.f32.mrf.mxu0 }
0x406c   : > { %v8582_v11 = vadd.f32 %v9480_v56, %v8581_v4 }
0x406d   : > { %v10503_v59 = vpop.f32.mrf.mxu0 }
0x406e   : > { %v8587_v3 = vmax.f32 %v8582_v11, 0.0 }
0x406f   : > { %v8584_v62 = vpop.f32.mrf.mxu0 }
0x4070   : > { %v8597_v10 = vpack.c.bf16 %v8587_v3, %v8587_v3  ;;  %v8818_v3 = vld [vmem:[%s11584_s8 + $0x10] sm:$0xff]  ;;  %v8817_v62 = vld [vmem:[%s11584_s8 + $0x8] sm:$0xff] }
0x4071   : > { %v10504_v41 = vpop.f32.mrf.mxu0 }
0x4072   : > { %10514 = vmatmul.mubr.msk.bf16.vlgmr.msra.gmra.mxu1 %vm3645_vm6, %v8597_v10  ;;  %v8816_v10 = vld [vmem:[%s11584_s8] sm:$0xff]  ;;  %v9499_v41 = vld [vmem:[#allocation16] ss:$0 sm:$0xff] }
0x4073   : > { %10541 = vmatprep.mubr.msk.f32.mxu1 %vm11319_vm5, %v11318_v48  ;;  %10534 = vmatpush3.msra.mxu1 %v8819_v38 }
0x4074   : > { %10535 = vmatprep.subr.mxu1 %v11318_v48 }
0x4075   : > { %10536 = vmatpush3.msra.mxu1 %v8818_v3 }
0x4076   : > { %10537 = vmatprep.subr.mxu1 %v11318_v48 }
0x4077   : > { %10538 = vmatpush3.msra.mxu1 %v8817_v62 }
0x4078   : > { %10539 = vmatprep.subr.mxu1 %v11318_v48 }
0x4079   : > { %10540 = vmatpush3.msra.mxu1 %v8816_v10 }
0x4132   : > { %v8647_v25 = vpop.f32.mrf.mxu1 }
0x4133   : > { %v8648_v20 = vadd.f32 %v9491_v16, %v8647_v25 }
0x4134   : > { %v10515_v23 = vpop.f32.mrf.mxu1 }
0x4135   : > { %v8653_v49 = vadd.f32 %v8648_v20, %v8527_v57  ;;  %v8758_v57 = vld [vmem:[%s13185_s23] sm:$0xff] }
0x4136   : > { %v8650_v37 = vpop.f32.mrf.mxu1  ;;  %v8763_v18 = vpack.c.bf16 %v8759_v58, %v8758_v57 }
0x4137   : > { %v8658_v42 = vsel %vm1993_vm3, %v8653_v49, 0.0 }
0x4138   : > { %8659 = vadd.xlane.f32.xlu0 %v8658_v42  ;;  %v10516_v7 = vpop.f32.mrf.mxu1  ;;  %v9501_v42 = vld [vmem:[#allocation18] ss:$0 sm:$0xff] }
0x41c1   : > { %v8660_v8 = vpop.xlane.xlu0 %8659 }
0x41c2   : > { %v8661_v21 = vmul.f32 0.03125, %v8660_v8 }
0x41c4   : > { %v8662_v22 = vsub.f32 %v8653_v49, %v8661_v21 }
0x41c6   : > { %v8663_v24 = vmul.f32 %v8662_v22, %v8662_v22 }
0x41c8   : > { %v8664_v12 = vsel %vm1993_vm3, %v8663_v24, 0.0 }
0x41c9   : > { %8665 = vadd.xlane.f32.xlu0 %v8664_v12 }
0x4252   : > { %v8666_v46 = vpop.xlane.xlu0 %8665 }
0x4253   : > { %v8667_v63 = vmul.f32 0.03125, %v8666_v46 }
0x4255   : > { %v8668_v5 = vadd.f32 1e-05, %v8667_v63 }
0x4257   : > { %10902 = vrsqrt.f32 %v8668_v5 }
0x4264   : > { %v10903_v33 = vpop.eup %10902 }
0x4265   : > { %v8670_v61 = vmul.f32 %v10903_v33, %v8662_v22 }
0x4267   : > { %v8677_v31 = vmul.f32 %v9495_v9, %v8670_v61 }
0x4269   : > { %v8684_v32 = vadd.f32 %v9496_v27, %v8677_v31 }
0x426b   : > { %v8685_v34 = vsel %vm1993_vm3, %v8684_v32, 0.0 }
0x426c   : > { %8686 = vadd.xlane.f32.xlu0 %v8685_v34 }
0x42f5   : > { %v8687_v35 = vpop.xlane.xlu0 %8686 }
0x42f6   : > { %v8688_v0 = vmul.f32 0.03125, %v8687_v35 }
0x42f8   : > { %v8689_v6 = vsub.f32 %v8684_v32, %v8688_v0 }
0x42fa   : > { %v8690_v36 = vmul.f32 %v8689_v6, %v8689_v6 }
0x42fc   : > { %v8691_v43 = vsel %vm1993_vm3, %v8690_v36, 0.0 }
0x42fd   : > { %8692 = vadd.xlane.f32.xlu1 %v8691_v43 }
0x4386   : > { %v8693_v40 = vpop.xlane.xlu1 %8692 }
0x4387   : > { %v8694_v50 = vmul.f32 0.03125, %v8693_v40 }
0x4389   : > { %v8695_v14 = vadd.f32 1e-05, %v8694_v50 }
0x438b   : > { %10904 = vrsqrt.f32 %v8695_v14 }
0x4398   : > { %v10905_v51 = vpop.eup %10904 }
0x4399   : > { %v8697_v52 = vmul.f32 %v10905_v51, %v8689_v6 }
0x439b   : > { %v8698_v26 = vmul.f32 %v10911_v15, %v8697_v52 }
0x439d   : > { %v8699_v13 = vadd.f32 %v10912_v29, %v8698_v26 }
0x439f   : > { %v8704_v54 = vpack.c.bf16 %v8699_v13, %v8699_v13 }
0x43a1   : > { %10522 = vmatmul.mubr.msk.bf16.vlgmr.msra.gmra.mxu0 %vm1993_vm3, %v8704_v54 }
0x43a2   : > { %10529 = vmatprep.mubr.msk.bf16.mxu0 %vm11319_vm5, %v11318_v48  ;;  %10526 = vmatpush3.bf16.msra.mxu0 %v8764_v19 }
0x43a3   : > { %10527 = vmatprep.subr.bf16.mxu0 %v11318_v48  ;;  %v8941_v48 = vld [vmem:[%s12602_s1] sm:$0xff] (%p13192_p2) }
0x43a4   : > { %8942 = vst [vmem:[%s8910_s4] sm:$0xff] (%p13192_p2), %v8941_v48 }
0x43a6   : > { %10528 = vmatpush3.bf16.msra.mxu0 %v8763_v18 }
0x4461   : > { %v8751_v53 = vpop.f32.mrf.mxu0 }
0x4462   : > { %v8752_v1 = vadd.f32 %v9497_v28, %v8751_v53 }
0x4463   : > { %v10523_v30 = vpop.f32.mrf.mxu0 }
0x4464   : > { %v8757_v56 = vmax.f32 %v8752_v1, 0.0 }
0x4465   : > { %v8754_v4 = vpop.f32.mrf.mxu0 }
0x4466   : > { %v8762_v11 = vpack.c.bf16 %v8757_v56, %v8757_v56 }
0x4467   : > { %v10524_v59 = vpop.f32.mrf.mxu0 }
0x4468   : > { %10530 = vmatmul.mubr.msk.bf16.vlgmr.msra.gmra.mxu0 %vm1993_vm3, %v8762_v11 }
0x4528   : > { %v8809_v16 = vpop.f32.mrf.mxu0 }
0x4529   : > { %v8810_v25 = vadd.f32 %v9499_v41, %v8809_v16 }
0x452a   : > { %v10531_v20 = vpop.f32.mrf.mxu0 }
0x452b   : > { %v8815_v23 = vmax.f32 %v8810_v25, 0.0 }
0x452c   : > { %v8812_v49 = vpop.f32.mrf.mxu0 }
0x452d   : > { %10542 = vmatmul.mubr.msk.f32.vlgmr.msra.gmra.mxu1 %vm1993_vm3, %v8815_v23 }
0x452e   : > { %v10532_v37 = vpop.f32.mrf.mxu0 }
0x45ec   : > { %8908 = sbr.rel (!%p13192_p2) target bundleno = 17913 (0x45f9), region = 280 }
0x45ed   : > { %v8896_v7 = vpop.f32.mrf.mxu1 }
0x45ee   : > { %v8897_v8 = vadd.f32 %v9501_v42, %v8896_v7 }
0x45ef   : > { %v10543_v21 = vpop.f32.mrf.mxu1 }
0x45f0   : > { %9503 = vst.msk [vmem:[%s12602_s1 + $0x8] sm:$0xff] %vm6343_vm7, %v8897_v8 }
0x45f7   : > { %v8943_v22 = vld [vmem:[%s12602_s1 + $0x8] sm:$0xff] }
0x45f8   : > { %8944 = vst [vmem:[%s8910_s4 + $0x10] sm:$0xff] %v8943_v22 }
0x45f9 PF: > { %s13195_s11 = sld [smem:[#allocation81_spill]] }
0x45fa   : > { %s13196_s7 = sld [smem:[#allocation79_spill]] }
0x45fb   : > { %s13197_s10 = sld [smem:[#allocation82_spill]] }
0x45ff   : > { %p120_p4 = scmp.ge.s32.totalorder %s13195_s11, 4  }
0x4601   :  { %122 = sbr.rel (!%p120_p4) target bundleno = 128 (0x80), region = 429 }
0x4606   :  { %8960 = vsyncpa [#allocation3], 1 }
0x4607   :  { %8962 = vsyncpa [#allocation3 + $0x1], 1 }
0x4608   :  { %8963 = vsyncpa [#allocation5], 1 }
0x4609   :  { %8964 = vsyncpa [#allocation8], 1 }
0x460a   :  { %8965 = vsyncpa [#allocation11], 1 }
0x460b   :  { %8966 = vsyncpa [#allocation14], 1 }
0x460c   :  { %8967 = vsyncpa [#allocation17], 1 }

</bundles_post_ra>
